<compile_context>
chip_gen: v6e
topology: v6e:2x2x1
jax: 0.10.0
libtpu: 0.0.40
codegen_flags: <defaults>
</compile_context>

<pallas_src>
import functools

import jax
import jax.numpy as jnp
from jax import lax
from jax.experimental import pallas as pl
from jax.experimental.pallas import tpu as pltpu


_DILS = (2, 3, 4, 5)        # W-dilations of the four 3x3 ConvBNAct layers
_DWMAX = max(_DILS)         # shared W-halo width of the padded scratch
_EPS = 1e-5                 # BatchNorm eps (PyTorch default)


def _center_block_kernel(x_ref, w3_ref, w1_ref, shift_ref, mask_ref, o_ref,
                         xflat_ref, patch_ref, *, H, W, C):
    # x_ref    : (1, C, H*W)        bf16  NCHW input block (lane-dense, 256 lanes)
    # w3_ref   : (4, C, 9*C)        bf16  BN-folded 3x3 weights, rows=co, cols=(kh,kw,ci)
    # w1_ref   : (C, C)             bf16  BN-folded 1x1 weight (co, ci)
    # shift_ref: (5, C, 1)          f32   BN-folded per-channel shifts
    # mask_ref : (1, H*Wp)          f32   1.0 on real pixels, 0.0 on the W-pad band
    # o_ref    : (1, C, H*W)        f32   output block (lane-dense)
    # xflat_ref: (C, (H+2)*Wp+2*5)  bf16  zero-padded flat activation scratch
    # patch_ref: (9*C, H*Wp)        bf16  im2col patch matrix scratch
    Wp = W + 2 * _DWMAX                 # padded row width
    S = H * Wp                          # flat spatial extent the matmuls run over
    row1 = _DWMAX + Wp                  # flat offset of padded row 1 (= image row 0)

    # Zero the scratch; halo rows / columns stay zero for every layer.
    xflat_ref[...] = jnp.zeros(xflat_ref.shape, xflat_ref.dtype)

    # Scatter the dense (C, H*W) input into the zero-padded flat layout.
    for h in range(H):
        dst = row1 + h * Wp + _DWMAX
        xflat_ref[:, dst:dst + W] = x_ref[0, :, h * W:(h + 1) * W]

    mask = mask_ref[...]                # (1, S)

    # Four dilated 3x3 ConvBNAct layers: one fat im2col matmul each.
    for layer, dw in enumerate(_DILS):
        for kh in range(3):
            for kw in range(3):
                t = kh * 3 + kw
                src = _DWMAX + kh * Wp + (kw - 1) * dw
                patch_ref[t * C:(t + 1) * C, :] = xflat_ref[:, src:src + S]
        acc = jnp.dot(w3_ref[layer], patch_ref[...],
                      preferred_element_type=jnp.float32)          # (C, S) f32, MXU
        y = jnp.maximum(acc + shift_ref[layer], 0.0)               # folded BN + ReLU
        # Write back for the next layer; the mask re-zeroes the W-halo columns.
        xflat_ref[:, row1:row1 + S] = (y * mask).astype(xflat_ref.dtype)
        # Dropout2d(p=0.25) is identity at inference.

    # Final 1x1 ConvBNAct: pointwise matmul + folded BN + ReLU.
    act = xflat_ref[:, row1:row1 + S]
    y = jnp.maximum(
        jnp.dot(w1_ref[...], act, preferred_element_type=jnp.float32)
        + shift_ref[4], 0.0)                                       # (C, S) f32

    # Gather the valid pixels back into the dense (C, H*W) output block.
    for h in range(H):
        src = h * Wp + _DWMAX
        o_ref[0, :, h * W:(h + 1) * W] = y[:, src:src + W].astype(o_ref.dtype)


def _fold_bn(w_oihw, bias, gamma, beta, mean, var):
    """Fold inference-mode BatchNorm into conv weight + per-channel shift."""
    s = gamma * lax.rsqrt(var + _EPS)
    return w_oihw * s[:, None, None, None], (bias - mean) * s + beta


def center_block_m1(x_nchw, params):
    """Inference forward of CenterBlockM1.

    x_nchw : (N, C, H, W) float32
    params : list of 5 tuples (conv_weight OIHW, conv_bias, bn_gamma, bn_beta,
                               bn_running_mean, bn_running_var)
    """
    N, C, H, W = x_nchw.shape
    Wp = W + 2 * _DWMAX
    S = H * Wp
    FLAT = (H + 2) * Wp + 2 * _DWMAX

    # Fold BN into weights / shifts and pre-arrange weights for the kernel.
    w3_list, shifts = [], []
    for (w, b, g, be, mu, var) in params[:4]:
        wf, sh = _fold_bn(w, b, g, be, mu, var)
        # OIHW -> (co, kh, kw, ci) -> (C, 9*C): matches the patch row order.
        w3_list.append(jnp.transpose(wf, (0, 2, 3, 1)).reshape(C, 9 * C))
        shifts.append(sh)
    wf1, sh1 = _fold_bn(*params[4])
    shifts.append(sh1)

    w3 = jnp.stack(w3_list).astype(jnp.bfloat16)                   # (4, C, 9*C)
    w1 = wf1[:, :, 0, 0].astype(jnp.bfloat16)                      # (C, C)
    shift = jnp.stack(shifts).reshape(5, C, 1).astype(jnp.float32)

    # Validity mask over the flat padded-row spatial axis.
    col = jnp.arange(S, dtype=jnp.int32) % Wp
    mask = ((col >= _DWMAX) & (col < _DWMAX + W)).astype(jnp.float32).reshape(1, S)

    # Native NCHW: (N, C, H*W) is a free view of it -> no transpose, no HBM pad.
    x = x_nchw.reshape(N, C, H * W).astype(jnp.bfloat16)

    kernel = functools.partial(_center_block_kernel, H=H, W=W, C=C)

    out = pl.pallas_call(
        kernel,
        out_shape=jax.ShapeDtypeStruct((N, C, H * W), jnp.float32),
        grid_spec=pltpu.PrefetchScalarGridSpec(
            num_scalar_prefetch=0,
            grid=(N,),
            in_specs=[
                pl.BlockSpec((1, C, H * W), lambda n: (n, 0, 0)),
                pl.BlockSpec((4, C, 9 * C), lambda n: (0, 0, 0)),
                pl.BlockSpec((C, C), lambda n: (0, 0)),
                pl.BlockSpec((5, C, 1), lambda n: (0, 0, 0)),
                pl.BlockSpec((1, S), lambda n: (0, 0)),
            ],
            out_specs=pl.BlockSpec((1, C, H * W), lambda n: (n, 0, 0)),
            scratch_shapes=[
                pltpu.VMEM((C, FLAT), jnp.bfloat16),     # zero-padded activations
                pltpu.VMEM((9 * C, S), jnp.bfloat16),    # im2col patch matrix
            ],
        ),
        compiler_params=pltpu.CompilerParams(
            dimension_semantics=("parallel",),   # 2 batch steps -> both v7x TCs
            vmem_limit_bytes=32 * 1024 * 1024,
        ),
    )(x, w3, w1, shift, mask)

    return out.reshape(N, C, H, W)


def _reference(x_nchw, params):
    """Pure-JAX reference (same bf16 matmul / f32 accumulate numerics)."""
    dils = (2, 3, 4, 5, 1)
    y = x_nchw
    for (w, b, g, be, mu, var), dw in zip(params, dils):
        wf, sh = _fold_bn(w, b, g, be, mu, var)
        ks = w.shape[-1]
        pad_h = (ks - 1) // 2
        pad_w = dw * (ks - 1) // 2
        out = lax.conv_general_dilated(
            y.astype(jnp.bfloat16), wf.astype(jnp.bfloat16),
            window_strides=(1, 1),
            padding=((pad_h, pad_h), (pad_w, pad_w)),
            rhs_dilation=(1, dw),
            dimension_numbers=("NCHW", "OIHW", "NCHW"),
            preferred_element_type=jnp.float32)
        y = jnp.maximum(out + sh.reshape(1, -1, 1, 1), 0.0)
    return y


if __name__ == "__main__":
    key = jax.random.PRNGKey(0)
    N, C, H, W = 2, 32, 16, 16          # num_channels=32 default of CenterBlockM1

    k_x, k_p = jax.random.split(key)
    x = jax.random.normal(k_x, (N, C, H, W), dtype=jnp.float32)

    params = []
    ks_list = (3, 3, 3, 3, 1)
    pkeys = jax.random.split(k_p, len(ks_list) * 6)
    for i, ks in enumerate(ks_list):
        kw_, kb, kg, kbe, kmu, kvar = pkeys[6 * i:6 * i + 6]
        fan_in = C * ks * ks
        bound = 1.0 / (fan_in ** 0.5)
        w = jax.random.uniform(kw_, (C, C, ks, ks), jnp.float32, -bound, bound)
        b = jax.random.uniform(kb, (C,), jnp.float32, -bound, bound)
        gamma = jax.random.uniform(kg, (C,), jnp.float32, 0.5, 1.5)
        beta = 0.1 * jax.random.normal(kbe, (C,), jnp.float32)
        mean = 0.1 * jax.random.normal(kmu, (C,), jnp.float32)
        var = jax.random.uniform(kvar, (C,), jnp.float32, 0.5, 1.5)
        params.append((w, b, gamma, beta, mean, var))

    out = jax.block_until_ready(center_block_m1(x, params))
    ref = jax.block_until_ready(_reference(x, params))

    assert out.shape == (N, C, H, W)
    max_err = float(jnp.max(jnp.abs(out - ref)))
    assert jnp.allclose(out, ref, atol=1e-2, rtol=1e-2), f"max abs err = {max_err}"

    print("KERNEL_OK")
</pallas_src>

<mosaic_0001>
module attributes {stable_mosaic.version = 11 : i64} {
  func.func @_center_block_kernel(%arg0: i32, %arg1: memref<1x32x256xbf16, #tpu.memory_space<vmem>>, %arg2: memref<4x32x288xbf16, #tpu.memory_space<vmem>>, %arg3: memref<32x32xbf16, #tpu.memory_space<vmem>>, %arg4: memref<5x32x1xf32, #tpu.memory_space<vmem>>, %arg5: memref<1x416xf32, #tpu.memory_space<vmem>>, %arg6: memref<1x32x256xf32, #tpu.memory_space<vmem>>, %arg7: memref<32x478xbf16, #tpu.memory_space<vmem>>, %arg8: memref<288x416xbf16, #tpu.memory_space<vmem>>) attributes {dimension_semantics = [#tpu.dimension_semantics<parallel>], iteration_bounds = array<i64: 2>, scalar_prefetch = 0 : i64, scratch_operands = 2 : i64, tpu.core_type = #tpu.core_type<tc>, window_params = [{transform_indices = @transform_0, window_bounds = array<i64: 1, 32, 256>}, {pipeline_mode = #tpu.pipeline_mode<synchronous>, transform_indices = @transform_1, window_bounds = array<i64: 4, 32, 288>}, {pipeline_mode = #tpu.pipeline_mode<synchronous>, transform_indices = @transform_2, window_bounds = array<i64: 32, 32>}, {pipeline_mode = #tpu.pipeline_mode<synchronous>, transform_indices = @transform_3, window_bounds = array<i64: 5, 32, 1>}, {pipeline_mode = #tpu.pipeline_mode<synchronous>, transform_indices = @transform_4, window_bounds = array<i64: 1, 416>}, {transform_indices = @transform_5, window_bounds = array<i64: 1, 32, 256>}]} {
    %cst = arith.constant 0.000000e+00 : bf16
    %0 = vector.broadcast %cst : bf16 to vector<32x478xbf16>
    %c0 = arith.constant 0 : index
    %c0_0 = arith.constant 0 : index
    %1 = vector.load %arg7[%c0, %c0_0] : memref<32x478xbf16, #tpu.memory_space<vmem>>, vector<32x478xbf16>
    tpu.vector_store %arg7[%c0, %c0_0], %0 {strides = array<i32>} : memref<32x478xbf16, #tpu.memory_space<vmem>>, vector<32x478xbf16>,
    %c0_1 = arith.constant 0 : index
    %c0_2 = arith.constant 0 : index
    %c0_3 = arith.constant 0 : index
    %2 = vector.load %arg1[%c0_1, %c0_2, %c0_3] : memref<1x32x256xbf16, #tpu.memory_space<vmem>>, vector<1x32x16xbf16>
    %3 = vector.shape_cast %2 : vector<1x32x16xbf16> to vector<32x16xbf16>
    %c0_4 = arith.constant 0 : index
    %c36 = arith.constant 36 : index
    %4 = vector.load %arg7[%c0_4, %c36] : memref<32x478xbf16, #tpu.memory_space<vmem>>, vector<32x16xbf16>
    tpu.vector_store %arg7[%c0_4, %c36], %3 {strides = array<i32>} : memref<32x478xbf16, #tpu.memory_space<vmem>>, vector<32x16xbf16>,
    %c0_5 = arith.constant 0 : index
    %c0_6 = arith.constant 0 : index
    %c16 = arith.constant 16 : index
    %5 = vector.load %arg1[%c0_5, %c0_6, %c16] : memref<1x32x256xbf16, #tpu.memory_space<vmem>>, vector<1x32x16xbf16>
    %6 = vector.shape_cast %5 : vector<1x32x16xbf16> to vector<32x16xbf16>
    %c0_7 = arith.constant 0 : index
    %c62 = arith.constant 62 : index
    %7 = vector.load %arg7[%c0_7, %c62] : memref<32x478xbf16, #tpu.memory_space<vmem>>, vector<32x16xbf16>
    tpu.vector_store %arg7[%c0_7, %c62], %6 {strides = array<i32>} : memref<32x478xbf16, #tpu.memory_space<vmem>>, vector<32x16xbf16>,
    %c0_8 = arith.constant 0 : index
    %c0_9 = arith.constant 0 : index
    %c32 = arith.constant 32 : index
    %8 = vector.load %arg1[%c0_8, %c0_9, %c32] : memref<1x32x256xbf16, #tpu.memory_space<vmem>>, vector<1x32x16xbf16>
    %9 = vector.shape_cast %8 : vector<1x32x16xbf16> to vector<32x16xbf16>
    %c0_10 = arith.constant 0 : index
    %c88 = arith.constant 88 : index
    %10 = vector.load %arg7[%c0_10, %c88] : memref<32x478xbf16, #tpu.memory_space<vmem>>, vector<32x16xbf16>
    tpu.vector_store %arg7[%c0_10, %c88], %9 {strides = array<i32>} : memref<32x478xbf16, #tpu.memory_space<vmem>>, vector<32x16xbf16>,
    %c0_11 = arith.constant 0 : index
    %c0_12 = arith.constant 0 : index
    %c48 = arith.constant 48 : index
    %11 = vector.load %arg1[%c0_11, %c0_12, %c48] : memref<1x32x256xbf16, #tpu.memory_space<vmem>>, vector<1x32x16xbf16>
    %12 = vector.shape_cast %11 : vector<1x32x16xbf16> to vector<32x16xbf16>
    %c0_13 = arith.constant 0 : index
    %c114 = arith.constant 114 : index
    %13 = vector.load %arg7[%c0_13, %c114] : memref<32x478xbf16, #tpu.memory_space<vmem>>, vector<32x16xbf16>
    tpu.vector_store %arg7[%c0_13, %c114], %12 {strides = array<i32>} : memref<32x478xbf16, #tpu.memory_space<vmem>>, vector<32x16xbf16>,
    %c0_14 = arith.constant 0 : index
    %c0_15 = arith.constant 0 : index
    %c64 = arith.constant 64 : index
    %14 = vector.load %arg1[%c0_14, %c0_15, %c64] : memref<1x32x256xbf16, #tpu.memory_space<vmem>>, vector<1x32x16xbf16>
    %15 = vector.shape_cast %14 : vector<1x32x16xbf16> to vector<32x16xbf16>
    %c0_16 = arith.constant 0 : index
    %c140 = arith.constant 140 : index
    %16 = vector.load %arg7[%c0_16, %c140] : memref<32x478xbf16, #tpu.memory_space<vmem>>, vector<32x16xbf16>
    tpu.vector_store %arg7[%c0_16, %c140], %15 {strides = array<i32>} : memref<32x478xbf16, #tpu.memory_space<vmem>>, vector<32x16xbf16>,
    %c0_17 = arith.constant 0 : index
    %c0_18 = arith.constant 0 : index
    %c80 = arith.constant 80 : index
    %17 = vector.load %arg1[%c0_17, %c0_18, %c80] : memref<1x32x256xbf16, #tpu.memory_space<vmem>>, vector<1x32x16xbf16>
    %18 = vector.shape_cast %17 : vector<1x32x16xbf16> to vector<32x16xbf16>
    %c0_19 = arith.constant 0 : index
    %c166 = arith.constant 166 : index
    %19 = vector.load %arg7[%c0_19, %c166] : memref<32x478xbf16, #tpu.memory_space<vmem>>, vector<32x16xbf16>
    tpu.vector_store %arg7[%c0_19, %c166], %18 {strides = array<i32>} : memref<32x478xbf16, #tpu.memory_space<vmem>>, vector<32x16xbf16>,
    %c0_20 = arith.constant 0 : index
    %c0_21 = arith.constant 0 : index
    %c96 = arith.constant 96 : index
    %20 = vector.load %arg1[%c0_20, %c0_21, %c96] : memref<1x32x256xbf16, #tpu.memory_space<vmem>>, vector<1x32x16xbf16>
    %21 = vector.shape_cast %20 : vector<1x32x16xbf16> to vector<32x16xbf16>
    %c0_22 = arith.constant 0 : index
    %c192 = arith.constant 192 : index
    %22 = vector.load %arg7[%c0_22, %c192] : memref<32x478xbf16, #tpu.memory_space<vmem>>, vector<32x16xbf16>
    tpu.vector_store %arg7[%c0_22, %c192], %21 {strides = array<i32>} : memref<32x478xbf16, #tpu.memory_space<vmem>>, vector<32x16xbf16>,
    %c0_23 = arith.constant 0 : index
    %c0_24 = arith.constant 0 : index
    %c112 = arith.constant 112 : index
    %23 = vector.load %arg1[%c0_23, %c0_24, %c112] : memref<1x32x256xbf16, #tpu.memory_space<vmem>>, vector<1x32x16xbf16>
    %24 = vector.shape_cast %23 : vector<1x32x16xbf16> to vector<32x16xbf16>
    %c0_25 = arith.constant 0 : index
    %c218 = arith.constant 218 : index
    %25 = vector.load %arg7[%c0_25, %c218] : memref<32x478xbf16, #tpu.memory_space<vmem>>, vector<32x16xbf16>
    tpu.vector_store %arg7[%c0_25, %c218], %24 {strides = array<i32>} : memref<32x478xbf16, #tpu.memory_space<vmem>>, vector<32x16xbf16>,
    %c0_26 = arith.constant 0 : index
    %c0_27 = arith.constant 0 : index
    %c128 = arith.constant 128 : index
    %26 = vector.load %arg1[%c0_26, %c0_27, %c128] : memref<1x32x256xbf16, #tpu.memory_space<vmem>>, vector<1x32x16xbf16>
    %27 = vector.shape_cast %26 : vector<1x32x16xbf16> to vector<32x16xbf16>
    %c0_28 = arith.constant 0 : index
    %c244 = arith.constant 244 : index
    %28 = vector.load %arg7[%c0_28, %c244] : memref<32x478xbf16, #tpu.memory_space<vmem>>, vector<32x16xbf16>
    tpu.vector_store %arg7[%c0_28, %c244], %27 {strides = array<i32>} : memref<32x478xbf16, #tpu.memory_space<vmem>>, vector<32x16xbf16>,
    %c0_29 = arith.constant 0 : index
    %c0_30 = arith.constant 0 : index
    %c144 = arith.constant 144 : index
    %29 = vector.load %arg1[%c0_29, %c0_30, %c144] : memref<1x32x256xbf16, #tpu.memory_space<vmem>>, vector<1x32x16xbf16>
    %30 = vector.shape_cast %29 : vector<1x32x16xbf16> to vector<32x16xbf16>
    %c0_31 = arith.constant 0 : index
    %c270 = arith.constant 270 : index
    %31 = vector.load %arg7[%c0_31, %c270] : memref<32x478xbf16, #tpu.memory_space<vmem>>, vector<32x16xbf16>
    tpu.vector_store %arg7[%c0_31, %c270], %30 {strides = array<i32>} : memref<32x478xbf16, #tpu.memory_space<vmem>>, vector<32x16xbf16>,
    %c0_32 = arith.constant 0 : index
    %c0_33 = arith.constant 0 : index
    %c160 = arith.constant 160 : index
    %32 = vector.load %arg1[%c0_32, %c0_33, %c160] : memref<1x32x256xbf16, #tpu.memory_space<vmem>>, vector<1x32x16xbf16>
    %33 = vector.shape_cast %32 : vector<1x32x16xbf16> to vector<32x16xbf16>
    %c0_34 = arith.constant 0 : index
    %c296 = arith.constant 296 : index
    %34 = vector.load %arg7[%c0_34, %c296] : memref<32x478xbf16, #tpu.memory_space<vmem>>, vector<32x16xbf16>
    tpu.vector_store %arg7[%c0_34, %c296], %33 {strides = array<i32>} : memref<32x478xbf16, #tpu.memory_space<vmem>>, vector<32x16xbf16>,
    %c0_35 = arith.constant 0 : index
    %c0_36 = arith.constant 0 : index
    %c176 = arith.constant 176 : index
    %35 = vector.load %arg1[%c0_35, %c0_36, %c176] : memref<1x32x256xbf16, #tpu.memory_space<vmem>>, vector<1x32x16xbf16>
    %36 = vector.shape_cast %35 : vector<1x32x16xbf16> to vector<32x16xbf16>
    %c0_37 = arith.constant 0 : index
    %c322 = arith.constant 322 : index
    %37 = vector.load %arg7[%c0_37, %c322] : memref<32x478xbf16, #tpu.memory_space<vmem>>, vector<32x16xbf16>
    tpu.vector_store %arg7[%c0_37, %c322], %36 {strides = array<i32>} : memref<32x478xbf16, #tpu.memory_space<vmem>>, vector<32x16xbf16>,
    %c0_38 = arith.constant 0 : index
    %c0_39 = arith.constant 0 : index
    %c192_40 = arith.constant 192 : index
    %38 = vector.load %arg1[%c0_38, %c0_39, %c192_40] : memref<1x32x256xbf16, #tpu.memory_space<vmem>>, vector<1x32x16xbf16>
    %39 = vector.shape_cast %38 : vector<1x32x16xbf16> to vector<32x16xbf16>
    %c0_41 = arith.constant 0 : index
    %c348 = arith.constant 348 : index
    %40 = vector.load %arg7[%c0_41, %c348] : memref<32x478xbf16, #tpu.memory_space<vmem>>, vector<32x16xbf16>
    tpu.vector_store %arg7[%c0_41, %c348], %39 {strides = array<i32>} : memref<32x478xbf16, #tpu.memory_space<vmem>>, vector<32x16xbf16>,
    %c0_42 = arith.constant 0 : index
    %c0_43 = arith.constant 0 : index
    %c208 = arith.constant 208 : index
    %41 = vector.load %arg1[%c0_42, %c0_43, %c208] : memref<1x32x256xbf16, #tpu.memory_space<vmem>>, vector<1x32x16xbf16>
    %42 = vector.shape_cast %41 : vector<1x32x16xbf16> to vector<32x16xbf16>
    %c0_44 = arith.constant 0 : index
    %c374 = arith.constant 374 : index
    %43 = vector.load %arg7[%c0_44, %c374] : memref<32x478xbf16, #tpu.memory_space<vmem>>, vector<32x16xbf16>
    tpu.vector_store %arg7[%c0_44, %c374], %42 {strides = array<i32>} : memref<32x478xbf16, #tpu.memory_space<vmem>>, vector<32x16xbf16>,
    %c0_45 = arith.constant 0 : index
    %c0_46 = arith.constant 0 : index
    %c224 = arith.constant 224 : index
    %44 = vector.load %arg1[%c0_45, %c0_46, %c224] : memref<1x32x256xbf16, #tpu.memory_space<vmem>>, vector<1x32x16xbf16>
    %45 = vector.shape_cast %44 : vector<1x32x16xbf16> to vector<32x16xbf16>
    %c0_47 = arith.constant 0 : index
    %c400 = arith.constant 400 : index
    %46 = vector.load %arg7[%c0_47, %c400] : memref<32x478xbf16, #tpu.memory_space<vmem>>, vector<32x16xbf16>
    tpu.vector_store %arg7[%c0_47, %c400], %45 {strides = array<i32>} : memref<32x478xbf16, #tpu.memory_space<vmem>>, vector<32x16xbf16>,
    %c0_48 = arith.constant 0 : index
    %c0_49 = arith.constant 0 : index
    %c240 = arith.constant 240 : index
    %47 = vector.load %arg1[%c0_48, %c0_49, %c240] : memref<1x32x256xbf16, #tpu.memory_space<vmem>>, vector<1x32x16xbf16>
    %48 = vector.shape_cast %47 : vector<1x32x16xbf16> to vector<32x16xbf16>
    %c0_50 = arith.constant 0 : index
    %c426 = arith.constant 426 : index
    %49 = vector.load %arg7[%c0_50, %c426] : memref<32x478xbf16, #tpu.memory_space<vmem>>, vector<32x16xbf16>
    tpu.vector_store %arg7[%c0_50, %c426], %48 {strides = array<i32>} : memref<32x478xbf16, #tpu.memory_space<vmem>>, vector<32x16xbf16>,
    %c0_51 = arith.constant 0 : index
    %c0_52 = arith.constant 0 : index
    %50 = vector.load %arg5[%c0_51, %c0_52] : memref<1x416xf32, #tpu.memory_space<vmem>>, vector<1x416xf32>
    %c0_53 = arith.constant 0 : index
    %c3 = arith.constant 3 : index
    %51 = vector.load %arg7[%c0_53, %c3] : memref<32x478xbf16, #tpu.memory_space<vmem>>, vector<32x416xbf16>
    %c0_54 = arith.constant 0 : index
    %c0_55 = arith.constant 0 : index
    %52 = vector.load %arg8[%c0_54, %c0_55] : memref<288x416xbf16, #tpu.memory_space<vmem>>, vector<32x416xbf16>
    tpu.vector_store %arg8[%c0_54, %c0_55], %51 {strides = array<i32>} : memref<288x416xbf16, #tpu.memory_space<vmem>>, vector<32x416xbf16>,
    %c0_56 = arith.constant 0 : index
    %c5 = arith.constant 5 : index
    %53 = vector.load %arg7[%c0_56, %c5] : memref<32x478xbf16, #tpu.memory_space<vmem>>, vector<32x416xbf16>
    %c32_57 = arith.constant 32 : index
    %c0_58 = arith.constant 0 : index
    %54 = vector.load %arg8[%c32_57, %c0_58] : memref<288x416xbf16, #tpu.memory_space<vmem>>, vector<32x416xbf16>
    tpu.vector_store %arg8[%c32_57, %c0_58], %53 {strides = array<i32>} : memref<288x416xbf16, #tpu.memory_space<vmem>>, vector<32x416xbf16>,
    %c0_59 = arith.constant 0 : index
    %c7 = arith.constant 7 : index
    %55 = vector.load %arg7[%c0_59, %c7] : memref<32x478xbf16, #tpu.memory_space<vmem>>, vector<32x416xbf16>
    %c64_60 = arith.constant 64 : index
    %c0_61 = arith.constant 0 : index
    %56 = vector.load %arg8[%c64_60, %c0_61] : memref<288x416xbf16, #tpu.memory_space<vmem>>, vector<32x416xbf16>
    tpu.vector_store %arg8[%c64_60, %c0_61], %55 {strides = array<i32>} : memref<288x416xbf16, #tpu.memory_space<vmem>>, vector<32x416xbf16>,
    %c0_62 = arith.constant 0 : index
    %c29 = arith.constant 29 : index
    %57 = vector.load %arg7[%c0_62, %c29] : memref<32x478xbf16, #tpu.memory_space<vmem>>, vector<32x416xbf16>
    %c96_63 = arith.constant 96 : index
    %c0_64 = arith.constant 0 : index
    %58 = vector.load %arg8[%c96_63, %c0_64] : memref<288x416xbf16, #tpu.memory_space<vmem>>, vector<32x416xbf16>
    tpu.vector_store %arg8[%c96_63, %c0_64], %57 {strides = array<i32>} : memref<288x416xbf16, #tpu.memory_space<vmem>>, vector<32x416xbf16>,
    %c0_65 = arith.constant 0 : index
    %c31 = arith.constant 31 : index
    %59 = vector.load %arg7[%c0_65, %c31] : memref<32x478xbf16, #tpu.memory_space<vmem>>, vector<32x416xbf16>
    %c128_66 = arith.constant 128 : index
    %c0_67 = arith.constant 0 : index
    %60 = vector.load %arg8[%c128_66, %c0_67] : memref<288x416xbf16, #tpu.memory_space<vmem>>, vector<32x416xbf16>
    tpu.vector_store %arg8[%c128_66, %c0_67], %59 {strides = array<i32>} : memref<288x416xbf16, #tpu.memory_space<vmem>>, vector<32x416xbf16>,
    %c0_68 = arith.constant 0 : index
    %c33 = arith.constant 33 : index
    %61 = vector.load %arg7[%c0_68, %c33] : memref<32x478xbf16, #tpu.memory_space<vmem>>, vector<32x416xbf16>
    %c160_69 = arith.constant 160 : index
    %c0_70 = arith.constant 0 : index
    %62 = vector.load %arg8[%c160_69, %c0_70] : memref<288x416xbf16, #tpu.memory_space<vmem>>, vector<32x416xbf16>
    tpu.vector_store %arg8[%c160_69, %c0_70], %61 {strides = array<i32>} : memref<288x416xbf16, #tpu.memory_space<vmem>>, vector<32x416xbf16>,
    %c0_71 = arith.constant 0 : index
    %c55 = arith.constant 55 : index
    %63 = vector.load %arg7[%c0_71, %c55] : memref<32x478xbf16, #tpu.memory_space<vmem>>, vector<32x416xbf16>
    %c192_72 = arith.constant 192 : index
    %c0_73 = arith.constant 0 : index
    %64 = vector.load %arg8[%c192_72, %c0_73] : memref<288x416xbf16, #tpu.memory_space<vmem>>, vector<32x416xbf16>
    tpu.vector_store %arg8[%c192_72, %c0_73], %63 {strides = array<i32>} : memref<288x416xbf16, #tpu.memory_space<vmem>>, vector<32x416xbf16>,
    %c0_74 = arith.constant 0 : index
    %c57 = arith.constant 57 : index
    %65 = vector.load %arg7[%c0_74, %c57] : memref<32x478xbf16, #tpu.memory_space<vmem>>, vector<32x416xbf16>
    %c224_75 = arith.constant 224 : index
    %c0_76 = arith.constant 0 : index
    %66 = vector.load %arg8[%c224_75, %c0_76] : memref<288x416xbf16, #tpu.memory_space<vmem>>, vector<32x416xbf16>
    tpu.vector_store %arg8[%c224_75, %c0_76], %65 {strides = array<i32>} : memref<288x416xbf16, #tpu.memory_space<vmem>>, vector<32x416xbf16>,
    %c0_77 = arith.constant 0 : index
    %c59 = arith.constant 59 : index
    %67 = vector.load %arg7[%c0_77, %c59] : memref<32x478xbf16, #tpu.memory_space<vmem>>, vector<32x416xbf16>
    %c256 = arith.constant 256 : index
    %c0_78 = arith.constant 0 : index
    %68 = vector.load %arg8[%c256, %c0_78] : memref<288x416xbf16, #tpu.memory_space<vmem>>, vector<32x416xbf16>
    tpu.vector_store %arg8[%c256, %c0_78], %67 {strides = array<i32>} : memref<288x416xbf16, #tpu.memory_space<vmem>>, vector<32x416xbf16>,
    %c0_79 = arith.constant 0 : index
    %c0_80 = arith.constant 0 : index
    %c0_81 = arith.constant 0 : index
    %69 = vector.load %arg2[%c0_79, %c0_80, %c0_81] : memref<4x32x288xbf16, #tpu.memory_space<vmem>>, vector<1x32x288xbf16>
    %70 = vector.shape_cast %69 : vector<1x32x288xbf16> to vector<32x288xbf16>
    %c0_82 = arith.constant 0 : index
    %c0_83 = arith.constant 0 : index
    %71 = vector.load %arg8[%c0_82, %c0_83] : memref<288x416xbf16, #tpu.memory_space<vmem>>, vector<288x416xbf16>
    %cst_84 = arith.constant dense<0.000000e+00> : vector<32x416xf32>
    %72 = tpu.matmul %70, %71, %cst_84 {dimension_numbers = #tpu.dot_dimension_numbers<[1], [0], [0], [1], [0, 0, 1, 1], [], []>} : vector<32x288xbf16>, vector<288x416xbf16>, vector<32x416xf32> -> vector<32x416xf32>
    %c0_85 = arith.constant 0 : index
    %c0_86 = arith.constant 0 : index
    %c0_87 = arith.constant 0 : index
    %73 = vector.load %arg4[%c0_85, %c0_86, %c0_87] : memref<5x32x1xf32, #tpu.memory_space<vmem>>, vector<1x32x1xf32>
    %74 = vector.shape_cast %73 : vector<1x32x1xf32> to vector<32x1xf32>
    %75 = vector.broadcast %74 : vector<32x1xf32> to vector<32x416xf32>
    %76 = arith.addf %72, %75 : vector<32x416xf32>
    %cst_88 = arith.constant 0.000000e+00 : f32
    %77 = vector.broadcast %cst_88 : f32 to vector<32x416xf32>
    %78 = arith.maximumf %76, %77 : vector<32x416xf32>
    %79 = vector.broadcast %50 : vector<1x416xf32> to vector<32x416xf32>
    %80 = arith.mulf %78, %79 : vector<32x416xf32>
    %81 = arith.truncf %80 : vector<32x416xf32> to vector<32x416xbf16>
    %c0_89 = arith.constant 0 : index
    %c31_90 = arith.constant 31 : index
    %82 = vector.load %arg7[%c0_89, %c31_90] : memref<32x478xbf16, #tpu.memory_space<vmem>>, vector<32x416xbf16>
    tpu.vector_store %arg7[%c0_89, %c31_90], %81 {strides = array<i32>} : memref<32x478xbf16, #tpu.memory_space<vmem>>, vector<32x416xbf16>,
    %c0_91 = arith.constant 0 : index
    %c2 = arith.constant 2 : index
    %83 = vector.load %arg7[%c0_91, %c2] : memref<32x478xbf16, #tpu.memory_space<vmem>>, vector<32x416xbf16>
    %c0_92 = arith.constant 0 : index
    %c0_93 = arith.constant 0 : index
    %84 = vector.load %arg8[%c0_92, %c0_93] : memref<288x416xbf16, #tpu.memory_space<vmem>>, vector<32x416xbf16>
    tpu.vector_store %arg8[%c0_92, %c0_93], %83 {strides = array<i32>} : memref<288x416xbf16, #tpu.memory_space<vmem>>, vector<32x416xbf16>,
    %c0_94 = arith.constant 0 : index
    %c5_95 = arith.constant 5 : index
    %85 = vector.load %arg7[%c0_94, %c5_95] : memref<32x478xbf16, #tpu.memory_space<vmem>>, vector<32x416xbf16>
    %c32_96 = arith.constant 32 : index
    %c0_97 = arith.constant 0 : index
    %86 = vector.load %arg8[%c32_96, %c0_97] : memref<288x416xbf16, #tpu.memory_space<vmem>>, vector<32x416xbf16>
    tpu.vector_store %arg8[%c32_96, %c0_97], %85 {strides = array<i32>} : memref<288x416xbf16, #tpu.memory_space<vmem>>, vector<32x416xbf16>,
    %c0_98 = arith.constant 0 : index
    %c8 = arith.constant 8 : index
    %87 = vector.load %arg7[%c0_98, %c8] : memref<32x478xbf16, #tpu.memory_space<vmem>>, vector<32x416xbf16>
    %c64_99 = arith.constant 64 : index
    %c0_100 = arith.constant 0 : index
    %88 = vector.load %arg8[%c64_99, %c0_100] : memref<288x416xbf16, #tpu.memory_space<vmem>>, vector<32x416xbf16>
    tpu.vector_store %arg8[%c64_99, %c0_100], %87 {strides = array<i32>} : memref<288x416xbf16, #tpu.memory_space<vmem>>, vector<32x416xbf16>,
    %c0_101 = arith.constant 0 : index
    %c28 = arith.constant 28 : index
    %89 = vector.load %arg7[%c0_101, %c28] : memref<32x478xbf16, #tpu.memory_space<vmem>>, vector<32x416xbf16>
    %c96_102 = arith.constant 96 : index
    %c0_103 = arith.constant 0 : index
    %90 = vector.load %arg8[%c96_102, %c0_103] : memref<288x416xbf16, #tpu.memory_space<vmem>>, vector<32x416xbf16>
    tpu.vector_store %arg8[%c96_102, %c0_103], %89 {strides = array<i32>} : memref<288x416xbf16, #tpu.memory_space<vmem>>, vector<32x416xbf16>,
    %c0_104 = arith.constant 0 : index
    %c31_105 = arith.constant 31 : index
    %91 = vector.load %arg7[%c0_104, %c31_105] : memref<32x478xbf16, #tpu.memory_space<vmem>>, vector<32x416xbf16>
    %c128_106 = arith.constant 128 : index
    %c0_107 = arith.constant 0 : index
    %92 = vector.load %arg8[%c128_106, %c0_107] : memref<288x416xbf16, #tpu.memory_space<vmem>>, vector<32x416xbf16>
    tpu.vector_store %arg8[%c128_106, %c0_107], %91 {strides = array<i32>} : memref<288x416xbf16, #tpu.memory_space<vmem>>, vector<32x416xbf16>,
    %c0_108 = arith.constant 0 : index
    %c34 = arith.constant 34 : index
    %93 = vector.load %arg7[%c0_108, %c34] : memref<32x478xbf16, #tpu.memory_space<vmem>>, vector<32x416xbf16>
    %c160_109 = arith.constant 160 : index
    %c0_110 = arith.constant 0 : index
    %94 = vector.load %arg8[%c160_109, %c0_110] : memref<288x416xbf16, #tpu.memory_space<vmem>>, vector<32x416xbf16>
    tpu.vector_store %arg8[%c160_109, %c0_110], %93 {strides = array<i32>} : memref<288x416xbf16, #tpu.memory_space<vmem>>, vector<32x416xbf16>,
    %c0_111 = arith.constant 0 : index
    %c54 = arith.constant 54 : index
    %95 = vector.load %arg7[%c0_111, %c54] : memref<32x478xbf16, #tpu.memory_space<vmem>>, vector<32x416xbf16>
    %c192_112 = arith.constant 192 : index
    %c0_113 = arith.constant 0 : index
    %96 = vector.load %arg8[%c192_112, %c0_113] : memref<288x416xbf16, #tpu.memory_space<vmem>>, vector<32x416xbf16>
    tpu.vector_store %arg8[%c192_112, %c0_113], %95 {strides = array<i32>} : memref<288x416xbf16, #tpu.memory_space<vmem>>, vector<32x416xbf16>,
    %c0_114 = arith.constant 0 : index
    %c57_115 = arith.constant 57 : index
    %97 = vector.load %arg7[%c0_114, %c57_115] : memref<32x478xbf16, #tpu.memory_space<vmem>>, vector<32x416xbf16>
    %c224_116 = arith.constant 224 : index
    %c0_117 = arith.constant 0 : index
    %98 = vector.load %arg8[%c224_116, %c0_117] : memref<288x416xbf16, #tpu.memory_space<vmem>>, vector<32x416xbf16>
    tpu.vector_store %arg8[%c224_116, %c0_117], %97 {strides = array<i32>} : memref<288x416xbf16, #tpu.memory_space<vmem>>, vector<32x416xbf16>,
    %c0_118 = arith.constant 0 : index
    %c60 = arith.constant 60 : index
    %99 = vector.load %arg7[%c0_118, %c60] : memref<32x478xbf16, #tpu.memory_space<vmem>>, vector<32x416xbf16>
    %c256_119 = arith.constant 256 : index
    %c0_120 = arith.constant 0 : index
    %100 = vector.load %arg8[%c256_119, %c0_120] : memref<288x416xbf16, #tpu.memory_space<vmem>>, vector<32x416xbf16>
    tpu.vector_store %arg8[%c256_119, %c0_120], %99 {strides = array<i32>} : memref<288x416xbf16, #tpu.memory_space<vmem>>, vector<32x416xbf16>,
    %c1 = arith.constant 1 : index
    %c0_121 = arith.constant 0 : index
    %c0_122 = arith.constant 0 : index
    %101 = vector.load %arg2[%c1, %c0_121, %c0_122] : memref<4x32x288xbf16, #tpu.memory_space<vmem>>, vector<1x32x288xbf16>
    %102 = vector.shape_cast %101 : vector<1x32x288xbf16> to vector<32x288xbf16>
    %c0_123 = arith.constant 0 : index
    %c0_124 = arith.constant 0 : index
    %103 = vector.load %arg8[%c0_123, %c0_124] : memref<288x416xbf16, #tpu.memory_space<vmem>>, vector<288x416xbf16>
    %cst_125 = arith.constant dense<0.000000e+00> : vector<32x416xf32>
    %104 = tpu.matmul %102, %103, %cst_125 {dimension_numbers = #tpu.dot_dimension_numbers<[1], [0], [0], [1], [0, 0, 1, 1], [], []>} : vector<32x288xbf16>, vector<288x416xbf16>, vector<32x416xf32> -> vector<32x416xf32>
    %c1_126 = arith.constant 1 : index
    %c0_127 = arith.constant 0 : index
    %c0_128 = arith.constant 0 : index
    %105 = vector.load %arg4[%c1_126, %c0_127, %c0_128] : memref<5x32x1xf32, #tpu.memory_space<vmem>>, vector<1x32x1xf32>
    %106 = vector.shape_cast %105 : vector<1x32x1xf32> to vector<32x1xf32>
    %107 = vector.broadcast %106 : vector<32x1xf32> to vector<32x416xf32>
    %108 = arith.addf %104, %107 : vector<32x416xf32>
    %cst_129 = arith.constant 0.000000e+00 : f32
    %109 = vector.broadcast %cst_129 : f32 to vector<32x416xf32>
    %110 = arith.maximumf %108, %109 : vector<32x416xf32>
    %111 = vector.broadcast %50 : vector<1x416xf32> to vector<32x416xf32>
    %112 = arith.mulf %110, %111 : vector<32x416xf32>
    %113 = arith.truncf %112 : vector<32x416xf32> to vector<32x416xbf16>
    %c0_130 = arith.constant 0 : index
    %c31_131 = arith.constant 31 : index
    %114 = vector.load %arg7[%c0_130, %c31_131] : memref<32x478xbf16, #tpu.memory_space<vmem>>, vector<32x416xbf16>
    tpu.vector_store %arg7[%c0_130, %c31_131], %113 {strides = array<i32>} : memref<32x478xbf16, #tpu.memory_space<vmem>>, vector<32x416xbf16>,
    %c0_132 = arith.constant 0 : index
    %c1_133 = arith.constant 1 : index
    %115 = vector.load %arg7[%c0_132, %c1_133] : memref<32x478xbf16, #tpu.memory_space<vmem>>, vector<32x416xbf16>
    %c0_134 = arith.constant 0 : index
    %c0_135 = arith.constant 0 : index
    %116 = vector.load %arg8[%c0_134, %c0_135] : memref<288x416xbf16, #tpu.memory_space<vmem>>, vector<32x416xbf16>
    tpu.vector_store %arg8[%c0_134, %c0_135], %115 {strides = array<i32>} : memref<288x416xbf16, #tpu.memory_space<vmem>>, vector<32x416xbf16>,
    %c0_136 = arith.constant 0 : index
    %c5_137 = arith.constant 5 : index
    %117 = vector.load %arg7[%c0_136, %c5_137] : memref<32x478xbf16, #tpu.memory_space<vmem>>, vector<32x416xbf16>
    %c32_138 = arith.constant 32 : index
    %c0_139 = arith.constant 0 : index
    %118 = vector.load %arg8[%c32_138, %c0_139] : memref<288x416xbf16, #tpu.memory_space<vmem>>, vector<32x416xbf16>
    tpu.vector_store %arg8[%c32_138, %c0_139], %117 {strides = array<i32>} : memref<288x416xbf16, #tpu.memory_space<vmem>>, vector<32x416xbf16>,
    %c0_140 = arith.constant 0 : index
    %c9 = arith.constant 9 : index
    %119 = vector.load %arg7[%c0_140, %c9] : memref<32x478xbf16, #tpu.memory_space<vmem>>, vector<32x416xbf16>
    %c64_141 = arith.constant 64 : index
    %c0_142 = arith.constant 0 : index
    %120 = vector.load %arg8[%c64_141, %c0_142] : memref<288x416xbf16, #tpu.memory_space<vmem>>, vector<32x416xbf16>
    tpu.vector_store %arg8[%c64_141, %c0_142], %119 {strides = array<i32>} : memref<288x416xbf16, #tpu.memory_space<vmem>>, vector<32x416xbf16>,
    %c0_143 = arith.constant 0 : index
    %c27 = arith.constant 27 : index
    %121 = vector.load %arg7[%c0_143, %c27] : memref<32x478xbf16, #tpu.memory_space<vmem>>, vector<32x416xbf16>
    %c96_144 = arith.constant 96 : index
    %c0_145 = arith.constant 0 : index
    %122 = vector.load %arg8[%c96_144, %c0_145] : memref<288x416xbf16, #tpu.memory_space<vmem>>, vector<32x416xbf16>
    tpu.vector_store %arg8[%c96_144, %c0_145], %121 {strides = array<i32>} : memref<288x416xbf16, #tpu.memory_space<vmem>>, vector<32x416xbf16>,
    %c0_146 = arith.constant 0 : index
    %c31_147 = arith.constant 31 : index
    %123 = vector.load %arg7[%c0_146, %c31_147] : memref<32x478xbf16, #tpu.memory_space<vmem>>, vector<32x416xbf16>
    %c128_148 = arith.constant 128 : index
    %c0_149 = arith.constant 0 : index
    %124 = vector.load %arg8[%c128_148, %c0_149] : memref<288x416xbf16, #tpu.memory_space<vmem>>, vector<32x416xbf16>
    tpu.vector_store %arg8[%c128_148, %c0_149], %123 {strides = array<i32>} : memref<288x416xbf16, #tpu.memory_space<vmem>>, vector<32x416xbf16>,
    %c0_150 = arith.constant 0 : index
    %c35 = arith.constant 35 : index
    %125 = vector.load %arg7[%c0_150, %c35] : memref<32x478xbf16, #tpu.memory_space<vmem>>, vector<32x416xbf16>
    %c160_151 = arith.constant 160 : index
    %c0_152 = arith.constant 0 : index
    %126 = vector.load %arg8[%c160_151, %c0_152] : memref<288x416xbf16, #tpu.memory_space<vmem>>, vector<32x416xbf16>
    tpu.vector_store %arg8[%c160_151, %c0_152], %125 {strides = array<i32>} : memref<288x416xbf16, #tpu.memory_space<vmem>>, vector<32x416xbf16>,
    %c0_153 = arith.constant 0 : index
    %c53 = arith.constant 53 : index
    %127 = vector.load %arg7[%c0_153, %c53] : memref<32x478xbf16, #tpu.memory_space<vmem>>, vector<32x416xbf16>
    %c192_154 = arith.constant 192 : index
    %c0_155 = arith.constant 0 : index
    %128 = vector.load %arg8[%c192_154, %c0_155] : memref<288x416xbf16, #tpu.memory_space<vmem>>, vector<32x416xbf16>
    tpu.vector_store %arg8[%c192_154, %c0_155], %127 {strides = array<i32>} : memref<288x416xbf16, #tpu.memory_space<vmem>>, vector<32x416xbf16>,
    %c0_156 = arith.constant 0 : index
    %c57_157 = arith.constant 57 : index
    %129 = vector.load %arg7[%c0_156, %c57_157] : memref<32x478xbf16, #tpu.memory_space<vmem>>, vector<32x416xbf16>
    %c224_158 = arith.constant 224 : index
    %c0_159 = arith.constant 0 : index
    %130 = vector.load %arg8[%c224_158, %c0_159] : memref<288x416xbf16, #tpu.memory_space<vmem>>, vector<32x416xbf16>
    tpu.vector_store %arg8[%c224_158, %c0_159], %129 {strides = array<i32>} : memref<288x416xbf16, #tpu.memory_space<vmem>>, vector<32x416xbf16>,
    %c0_160 = arith.constant 0 : index
    %c61 = arith.constant 61 : index
    %131 = vector.load %arg7[%c0_160, %c61] : memref<32x478xbf16, #tpu.memory_space<vmem>>, vector<32x416xbf16>
    %c256_161 = arith.constant 256 : index
    %c0_162 = arith.constant 0 : index
    %132 = vector.load %arg8[%c256_161, %c0_162] : memref<288x416xbf16, #tpu.memory_space<vmem>>, vector<32x416xbf16>
    tpu.vector_store %arg8[%c256_161, %c0_162], %131 {strides = array<i32>} : memref<288x416xbf16, #tpu.memory_space<vmem>>, vector<32x416xbf16>,
    %c2_163 = arith.constant 2 : index
    %c0_164 = arith.constant 0 : index
    %c0_165 = arith.constant 0 : index
    %133 = vector.load %arg2[%c2_163, %c0_164, %c0_165] : memref<4x32x288xbf16, #tpu.memory_space<vmem>>, vector<1x32x288xbf16>
    %134 = vector.shape_cast %133 : vector<1x32x288xbf16> to vector<32x288xbf16>
    %c0_166 = arith.constant 0 : index
    %c0_167 = arith.constant 0 : index
    %135 = vector.load %arg8[%c0_166, %c0_167] : memref<288x416xbf16, #tpu.memory_space<vmem>>, vector<288x416xbf16>
    %cst_168 = arith.constant dense<0.000000e+00> : vector<32x416xf32>
    %136 = tpu.matmul %134, %135, %cst_168 {dimension_numbers = #tpu.dot_dimension_numbers<[1], [0], [0], [1], [0, 0, 1, 1], [], []>} : vector<32x288xbf16>, vector<288x416xbf16>, vector<32x416xf32> -> vector<32x416xf32>
    %c2_169 = arith.constant 2 : index
    %c0_170 = arith.constant 0 : index
    %c0_171 = arith.constant 0 : index
    %137 = vector.load %arg4[%c2_169, %c0_170, %c0_171] : memref<5x32x1xf32, #tpu.memory_space<vmem>>, vector<1x32x1xf32>
    %138 = vector.shape_cast %137 : vector<1x32x1xf32> to vector<32x1xf32>
    %139 = vector.broadcast %138 : vector<32x1xf32> to vector<32x416xf32>
    %140 = arith.addf %136, %139 : vector<32x416xf32>
    %cst_172 = arith.constant 0.000000e+00 : f32
    %141 = vector.broadcast %cst_172 : f32 to vector<32x416xf32>
    %142 = arith.maximumf %140, %141 : vector<32x416xf32>
    %143 = vector.broadcast %50 : vector<1x416xf32> to vector<32x416xf32>
    %144 = arith.mulf %142, %143 : vector<32x416xf32>
    %145 = arith.truncf %144 : vector<32x416xf32> to vector<32x416xbf16>
    %c0_173 = arith.constant 0 : index
    %c31_174 = arith.constant 31 : index
    %146 = vector.load %arg7[%c0_173, %c31_174] : memref<32x478xbf16, #tpu.memory_space<vmem>>, vector<32x416xbf16>
    tpu.vector_store %arg7[%c0_173, %c31_174], %145 {strides = array<i32>} : memref<32x478xbf16, #tpu.memory_space<vmem>>, vector<32x416xbf16>,
    %c0_175 = arith.constant 0 : index
    %c0_176 = arith.constant 0 : index
    %147 = vector.load %arg7[%c0_175, %c0_176] : memref<32x478xbf16, #tpu.memory_space<vmem>>, vector<32x416xbf16>
    %c0_177 = arith.constant 0 : index
    %c0_178 = arith.constant 0 : index
    %148 = vector.load %arg8[%c0_177, %c0_178] : memref<288x416xbf16, #tpu.memory_space<vmem>>, vector<32x416xbf16>
    tpu.vector_store %arg8[%c0_177, %c0_178], %147 {strides = array<i32>} : memref<288x416xbf16, #tpu.memory_space<vmem>>, vector<32x416xbf16>,
    %c0_179 = arith.constant 0 : index
    %c5_180 = arith.constant 5 : index
    %149 = vector.load %arg7[%c0_179, %c5_180] : memref<32x478xbf16, #tpu.memory_space<vmem>>, vector<32x416xbf16>
    %c32_181 = arith.constant 32 : index
    %c0_182 = arith.constant 0 : index
    %150 = vector.load %arg8[%c32_181, %c0_182] : memref<288x416xbf16, #tpu.memory_space<vmem>>, vector<32x416xbf16>
    tpu.vector_store %arg8[%c32_181, %c0_182], %149 {strides = array<i32>} : memref<288x416xbf16, #tpu.memory_space<vmem>>, vector<32x416xbf16>,
    %c0_183 = arith.constant 0 : index
    %c10 = arith.constant 10 : index
    %151 = vector.load %arg7[%c0_183, %c10] : memref<32x478xbf16, #tpu.memory_space<vmem>>, vector<32x416xbf16>
    %c64_184 = arith.constant 64 : index
    %c0_185 = arith.constant 0 : index
    %152 = vector.load %arg8[%c64_184, %c0_185] : memref<288x416xbf16, #tpu.memory_space<vmem>>, vector<32x416xbf16>
    tpu.vector_store %arg8[%c64_184, %c0_185], %151 {strides = array<i32>} : memref<288x416xbf16, #tpu.memory_space<vmem>>, vector<32x416xbf16>,
    %c0_186 = arith.constant 0 : index
    %c26 = arith.constant 26 : index
    %153 = vector.load %arg7[%c0_186, %c26] : memref<32x478xbf16, #tpu.memory_space<vmem>>, vector<32x416xbf16>
    %c96_187 = arith.constant 96 : index
    %c0_188 = arith.constant 0 : index
    %154 = vector.load %arg8[%c96_187, %c0_188] : memref<288x416xbf16, #tpu.memory_space<vmem>>, vector<32x416xbf16>
    tpu.vector_store %arg8[%c96_187, %c0_188], %153 {strides = array<i32>} : memref<288x416xbf16, #tpu.memory_space<vmem>>, vector<32x416xbf16>,
    %c0_189 = arith.constant 0 : index
    %c31_190 = arith.constant 31 : index
    %155 = vector.load %arg7[%c0_189, %c31_190] : memref<32x478xbf16, #tpu.memory_space<vmem>>, vector<32x416xbf16>
    %c128_191 = arith.constant 128 : index
    %c0_192 = arith.constant 0 : index
    %156 = vector.load %arg8[%c128_191, %c0_192] : memref<288x416xbf16, #tpu.memory_space<vmem>>, vector<32x416xbf16>
    tpu.vector_store %arg8[%c128_191, %c0_192], %155 {strides = array<i32>} : memref<288x416xbf16, #tpu.memory_space<vmem>>, vector<32x416xbf16>,
    %c0_193 = arith.constant 0 : index
    %c36_194 = arith.constant 36 : index
    %157 = vector.load %arg7[%c0_193, %c36_194] : memref<32x478xbf16, #tpu.memory_space<vmem>>, vector<32x416xbf16>
    %c160_195 = arith.constant 160 : index
    %c0_196 = arith.constant 0 : index
    %158 = vector.load %arg8[%c160_195, %c0_196] : memref<288x416xbf16, #tpu.memory_space<vmem>>, vector<32x416xbf16>
    tpu.vector_store %arg8[%c160_195, %c0_196], %157 {strides = array<i32>} : memref<288x416xbf16, #tpu.memory_space<vmem>>, vector<32x416xbf16>,
    %c0_197 = arith.constant 0 : index
    %c52 = arith.constant 52 : index
    %159 = vector.load %arg7[%c0_197, %c52] : memref<32x478xbf16, #tpu.memory_space<vmem>>, vector<32x416xbf16>
    %c192_198 = arith.constant 192 : index
    %c0_199 = arith.constant 0 : index
    %160 = vector.load %arg8[%c192_198, %c0_199] : memref<288x416xbf16, #tpu.memory_space<vmem>>, vector<32x416xbf16>
    tpu.vector_store %arg8[%c192_198, %c0_199], %159 {strides = array<i32>} : memref<288x416xbf16, #tpu.memory_space<vmem>>, vector<32x416xbf16>,
    %c0_200 = arith.constant 0 : index
    %c57_201 = arith.constant 57 : index
    %161 = vector.load %arg7[%c0_200, %c57_201] : memref<32x478xbf16, #tpu.memory_space<vmem>>, vector<32x416xbf16>
    %c224_202 = arith.constant 224 : index
    %c0_203 = arith.constant 0 : index
    %162 = vector.load %arg8[%c224_202, %c0_203] : memref<288x416xbf16, #tpu.memory_space<vmem>>, vector<32x416xbf16>
    tpu.vector_store %arg8[%c224_202, %c0_203], %161 {strides = array<i32>} : memref<288x416xbf16, #tpu.memory_space<vmem>>, vector<32x416xbf16>,
    %c0_204 = arith.constant 0 : index
    %c62_205 = arith.constant 62 : index
    %163 = vector.load %arg7[%c0_204, %c62_205] : memref<32x478xbf16, #tpu.memory_space<vmem>>, vector<32x416xbf16>
    %c256_206 = arith.constant 256 : index
    %c0_207 = arith.constant 0 : index
    %164 = vector.load %arg8[%c256_206, %c0_207] : memref<288x416xbf16, #tpu.memory_space<vmem>>, vector<32x416xbf16>
    tpu.vector_store %arg8[%c256_206, %c0_207], %163 {strides = array<i32>} : memref<288x416xbf16, #tpu.memory_space<vmem>>, vector<32x416xbf16>,
    %c3_208 = arith.constant 3 : index
    %c0_209 = arith.constant 0 : index
    %c0_210 = arith.constant 0 : index
    %165 = vector.load %arg2[%c3_208, %c0_209, %c0_210] : memref<4x32x288xbf16, #tpu.memory_space<vmem>>, vector<1x32x288xbf16>
    %166 = vector.shape_cast %165 : vector<1x32x288xbf16> to vector<32x288xbf16>
    %c0_211 = arith.constant 0 : index
    %c0_212 = arith.constant 0 : index
    %167 = vector.load %arg8[%c0_211, %c0_212] : memref<288x416xbf16, #tpu.memory_space<vmem>>, vector<288x416xbf16>
    %cst_213 = arith.constant dense<0.000000e+00> : vector<32x416xf32>
    %168 = tpu.matmul %166, %167, %cst_213 {dimension_numbers = #tpu.dot_dimension_numbers<[1], [0], [0], [1], [0, 0, 1, 1], [], []>} : vector<32x288xbf16>, vector<288x416xbf16>, vector<32x416xf32> -> vector<32x416xf32>
    %c3_214 = arith.constant 3 : index
    %c0_215 = arith.constant 0 : index
    %c0_216 = arith.constant 0 : index
    %169 = vector.load %arg4[%c3_214, %c0_215, %c0_216] : memref<5x32x1xf32, #tpu.memory_space<vmem>>, vector<1x32x1xf32>
    %170 = vector.shape_cast %169 : vector<1x32x1xf32> to vector<32x1xf32>
    %171 = vector.broadcast %170 : vector<32x1xf32> to vector<32x416xf32>
    %172 = arith.addf %168, %171 : vector<32x416xf32>
    %cst_217 = arith.constant 0.000000e+00 : f32
    %173 = vector.broadcast %cst_217 : f32 to vector<32x416xf32>
    %174 = arith.maximumf %172, %173 : vector<32x416xf32>
    %175 = vector.broadcast %50 : vector<1x416xf32> to vector<32x416xf32>
    %176 = arith.mulf %174, %175 : vector<32x416xf32>
    %177 = arith.truncf %176 : vector<32x416xf32> to vector<32x416xbf16>
    %c0_218 = arith.constant 0 : index
    %c31_219 = arith.constant 31 : index
    %178 = vector.load %arg7[%c0_218, %c31_219] : memref<32x478xbf16, #tpu.memory_space<vmem>>, vector<32x416xbf16>
    tpu.vector_store %arg7[%c0_218, %c31_219], %177 {strides = array<i32>} : memref<32x478xbf16, #tpu.memory_space<vmem>>, vector<32x416xbf16>,
    %c0_220 = arith.constant 0 : index
    %c31_221 = arith.constant 31 : index
    %179 = vector.load %arg7[%c0_220, %c31_221] : memref<32x478xbf16, #tpu.memory_space<vmem>>, vector<32x416xbf16>
    %c0_222 = arith.constant 0 : index
    %c0_223 = arith.constant 0 : index
    %180 = vector.load %arg3[%c0_222, %c0_223] : memref<32x32xbf16, #tpu.memory_space<vmem>>, vector<32x32xbf16>
    %cst_224 = arith.constant dense<0.000000e+00> : vector<32x416xf32>
    %181 = tpu.matmul %180, %179, %cst_224 {dimension_numbers = #tpu.dot_dimension_numbers<[1], [0], [0], [1], [0, 0, 1, 1], [], []>} : vector<32x32xbf16>, vector<32x416xbf16>, vector<32x416xf32> -> vector<32x416xf32>
    %c4 = arith.constant 4 : index
    %c0_225 = arith.constant 0 : index
    %c0_226 = arith.constant 0 : index
    %182 = vector.load %arg4[%c4, %c0_225, %c0_226] : memref<5x32x1xf32, #tpu.memory_space<vmem>>, vector<1x32x1xf32>
    %183 = vector.shape_cast %182 : vector<1x32x1xf32> to vector<32x1xf32>
    %184 = vector.broadcast %183 : vector<32x1xf32> to vector<32x416xf32>
    %185 = arith.addf %181, %184 : vector<32x416xf32>
    %cst_227 = arith.constant 0.000000e+00 : f32
    %186 = vector.broadcast %cst_227 : f32 to vector<32x416xf32>
    %187 = arith.maximumf %185, %186 : vector<32x416xf32>
    %188 = vector.extract_strided_slice %187 {offsets = [0, 5], sizes = [32, 16], strides = [1, 1]} : vector<32x416xf32> to vector<32x16xf32>
    %c0_228 = arith.constant 0 : index
    %c0_229 = arith.constant 0 : index
    %c0_230 = arith.constant 0 : index
    %189 = vector.load %arg6[%c0_228, %c0_229, %c0_230] : memref<1x32x256xf32, #tpu.memory_space<vmem>>, vector<1x32x16xf32>
    %190 = vector.shape_cast %189 : vector<1x32x16xf32> to vector<32x16xf32>
    %191 = vector.shape_cast %188 : vector<32x16xf32> to vector<1x32x16xf32>
    tpu.vector_store %arg6[%c0_228, %c0_229, %c0_230], %191 {strides = array<i32>} : memref<1x32x256xf32, #tpu.memory_space<vmem>>, vector<1x32x16xf32>,
    %192 = vector.extract_strided_slice %187 {offsets = [0, 31], sizes = [32, 16], strides = [1, 1]} : vector<32x416xf32> to vector<32x16xf32>
    %c0_231 = arith.constant 0 : index
    %c0_232 = arith.constant 0 : index
    %c16_233 = arith.constant 16 : index
    %193 = vector.load %arg6[%c0_231, %c0_232, %c16_233] : memref<1x32x256xf32, #tpu.memory_space<vmem>>, vector<1x32x16xf32>
    %194 = vector.shape_cast %193 : vector<1x32x16xf32> to vector<32x16xf32>
    %195 = vector.shape_cast %192 : vector<32x16xf32> to vector<1x32x16xf32>
    tpu.vector_store %arg6[%c0_231, %c0_232, %c16_233], %195 {strides = array<i32>} : memref<1x32x256xf32, #tpu.memory_space<vmem>>, vector<1x32x16xf32>,
    %196 = vector.extract_strided_slice %187 {offsets = [0, 57], sizes = [32, 16], strides = [1, 1]} : vector<32x416xf32> to vector<32x16xf32>
    %c0_234 = arith.constant 0 : index
    %c0_235 = arith.constant 0 : index
    %c32_236 = arith.constant 32 : index
    %197 = vector.load %arg6[%c0_234, %c0_235, %c32_236] : memref<1x32x256xf32, #tpu.memory_space<vmem>>, vector<1x32x16xf32>
    %198 = vector.shape_cast %197 : vector<1x32x16xf32> to vector<32x16xf32>
    %199 = vector.shape_cast %196 : vector<32x16xf32> to vector<1x32x16xf32>
    tpu.vector_store %arg6[%c0_234, %c0_235, %c32_236], %199 {strides = array<i32>} : memref<1x32x256xf32, #tpu.memory_space<vmem>>, vector<1x32x16xf32>,
    %200 = vector.extract_strided_slice %187 {offsets = [0, 83], sizes = [32, 16], strides = [1, 1]} : vector<32x416xf32> to vector<32x16xf32>
    %c0_237 = arith.constant 0 : index
    %c0_238 = arith.constant 0 : index
    %c48_239 = arith.constant 48 : index
    %201 = vector.load %arg6[%c0_237, %c0_238, %c48_239] : memref<1x32x256xf32, #tpu.memory_space<vmem>>, vector<1x32x16xf32>
    %202 = vector.shape_cast %201 : vector<1x32x16xf32> to vector<32x16xf32>
    %203 = vector.shape_cast %200 : vector<32x16xf32> to vector<1x32x16xf32>
    tpu.vector_store %arg6[%c0_237, %c0_238, %c48_239], %203 {strides = array<i32>} : memref<1x32x256xf32, #tpu.memory_space<vmem>>, vector<1x32x16xf32>,
    %204 = vector.extract_strided_slice %187 {offsets = [0, 109], sizes = [32, 16], strides = [1, 1]} : vector<32x416xf32> to vector<32x16xf32>
    %c0_240 = arith.constant 0 : index
    %c0_241 = arith.constant 0 : index
    %c64_242 = arith.constant 64 : index
    %205 = vector.load %arg6[%c0_240, %c0_241, %c64_242] : memref<1x32x256xf32, #tpu.memory_space<vmem>>, vector<1x32x16xf32>
    %206 = vector.shape_cast %205 : vector<1x32x16xf32> to vector<32x16xf32>
    %207 = vector.shape_cast %204 : vector<32x16xf32> to vector<1x32x16xf32>
    tpu.vector_store %arg6[%c0_240, %c0_241, %c64_242], %207 {strides = array<i32>} : memref<1x32x256xf32, #tpu.memory_space<vmem>>, vector<1x32x16xf32>,
    %208 = vector.extract_strided_slice %187 {offsets = [0, 135], sizes = [32, 16], strides = [1, 1]} : vector<32x416xf32> to vector<32x16xf32>
    %c0_243 = arith.constant 0 : index
    %c0_244 = arith.constant 0 : index
    %c80_245 = arith.constant 80 : index
    %209 = vector.load %arg6[%c0_243, %c0_244, %c80_245] : memref<1x32x256xf32, #tpu.memory_space<vmem>>, vector<1x32x16xf32>
    %210 = vector.shape_cast %209 : vector<1x32x16xf32> to vector<32x16xf32>
    %211 = vector.shape_cast %208 : vector<32x16xf32> to vector<1x32x16xf32>
    tpu.vector_store %arg6[%c0_243, %c0_244, %c80_245], %211 {strides = array<i32>} : memref<1x32x256xf32, #tpu.memory_space<vmem>>, vector<1x32x16xf32>,
    %212 = vector.extract_strided_slice %187 {offsets = [0, 161], sizes = [32, 16], strides = [1, 1]} : vector<32x416xf32> to vector<32x16xf32>
    %c0_246 = arith.constant 0 : index
    %c0_247 = arith.constant 0 : index
    %c96_248 = arith.constant 96 : index
    %213 = vector.load %arg6[%c0_246, %c0_247, %c96_248] : memref<1x32x256xf32, #tpu.memory_space<vmem>>, vector<1x32x16xf32>
    %214 = vector.shape_cast %213 : vector<1x32x16xf32> to vector<32x16xf32>
    %215 = vector.shape_cast %212 : vector<32x16xf32> to vector<1x32x16xf32>
    tpu.vector_store %arg6[%c0_246, %c0_247, %c96_248], %215 {strides = array<i32>} : memref<1x32x256xf32, #tpu.memory_space<vmem>>, vector<1x32x16xf32>,
    %216 = vector.extract_strided_slice %187 {offsets = [0, 187], sizes = [32, 16], strides = [1, 1]} : vector<32x416xf32> to vector<32x16xf32>
    %c0_249 = arith.constant 0 : index
    %c0_250 = arith.constant 0 : index
    %c112_251 = arith.constant 112 : index
    %217 = vector.load %arg6[%c0_249, %c0_250, %c112_251] : memref<1x32x256xf32, #tpu.memory_space<vmem>>, vector<1x32x16xf32>
    %218 = vector.shape_cast %217 : vector<1x32x16xf32> to vector<32x16xf32>
    %219 = vector.shape_cast %216 : vector<32x16xf32> to vector<1x32x16xf32>
    tpu.vector_store %arg6[%c0_249, %c0_250, %c112_251], %219 {strides = array<i32>} : memref<1x32x256xf32, #tpu.memory_space<vmem>>, vector<1x32x16xf32>,
    %220 = vector.extract_strided_slice %187 {offsets = [0, 213], sizes = [32, 16], strides = [1, 1]} : vector<32x416xf32> to vector<32x16xf32>
    %c0_252 = arith.constant 0 : index
    %c0_253 = arith.constant 0 : index
    %c128_254 = arith.constant 128 : index
    %221 = vector.load %arg6[%c0_252, %c0_253, %c128_254] : memref<1x32x256xf32, #tpu.memory_space<vmem>>, vector<1x32x16xf32>
    %222 = vector.shape_cast %221 : vector<1x32x16xf32> to vector<32x16xf32>
    %223 = vector.shape_cast %220 : vector<32x16xf32> to vector<1x32x16xf32>
    tpu.vector_store %arg6[%c0_252, %c0_253, %c128_254], %223 {strides = array<i32>} : memref<1x32x256xf32, #tpu.memory_space<vmem>>, vector<1x32x16xf32>,
    %224 = vector.extract_strided_slice %187 {offsets = [0, 239], sizes = [32, 16], strides = [1, 1]} : vector<32x416xf32> to vector<32x16xf32>
    %c0_255 = arith.constant 0 : index
    %c0_256 = arith.constant 0 : index
    %c144_257 = arith.constant 144 : index
    %225 = vector.load %arg6[%c0_255, %c0_256, %c144_257] : memref<1x32x256xf32, #tpu.memory_space<vmem>>, vector<1x32x16xf32>
    %226 = vector.shape_cast %225 : vector<1x32x16xf32> to vector<32x16xf32>
    %227 = vector.shape_cast %224 : vector<32x16xf32> to vector<1x32x16xf32>
    tpu.vector_store %arg6[%c0_255, %c0_256, %c144_257], %227 {strides = array<i32>} : memref<1x32x256xf32, #tpu.memory_space<vmem>>, vector<1x32x16xf32>,
    %228 = vector.extract_strided_slice %187 {offsets = [0, 265], sizes = [32, 16], strides = [1, 1]} : vector<32x416xf32> to vector<32x16xf32>
    %c0_258 = arith.constant 0 : index
    %c0_259 = arith.constant 0 : index
    %c160_260 = arith.constant 160 : index
    %229 = vector.load %arg6[%c0_258, %c0_259, %c160_260] : memref<1x32x256xf32, #tpu.memory_space<vmem>>, vector<1x32x16xf32>
    %230 = vector.shape_cast %229 : vector<1x32x16xf32> to vector<32x16xf32>
    %231 = vector.shape_cast %228 : vector<32x16xf32> to vector<1x32x16xf32>
    tpu.vector_store %arg6[%c0_258, %c0_259, %c160_260], %231 {strides = array<i32>} : memref<1x32x256xf32, #tpu.memory_space<vmem>>, vector<1x32x16xf32>,
    %232 = vector.extract_strided_slice %187 {offsets = [0, 291], sizes = [32, 16], strides = [1, 1]} : vector<32x416xf32> to vector<32x16xf32>
    %c0_261 = arith.constant 0 : index
    %c0_262 = arith.constant 0 : index
    %c176_263 = arith.constant 176 : index
    %233 = vector.load %arg6[%c0_261, %c0_262, %c176_263] : memref<1x32x256xf32, #tpu.memory_space<vmem>>, vector<1x32x16xf32>
    %234 = vector.shape_cast %233 : vector<1x32x16xf32> to vector<32x16xf32>
    %235 = vector.shape_cast %232 : vector<32x16xf32> to vector<1x32x16xf32>
    tpu.vector_store %arg6[%c0_261, %c0_262, %c176_263], %235 {strides = array<i32>} : memref<1x32x256xf32, #tpu.memory_space<vmem>>, vector<1x32x16xf32>,
    %236 = vector.extract_strided_slice %187 {offsets = [0, 317], sizes = [32, 16], strides = [1, 1]} : vector<32x416xf32> to vector<32x16xf32>
    %c0_264 = arith.constant 0 : index
    %c0_265 = arith.constant 0 : index
    %c192_266 = arith.constant 192 : index
    %237 = vector.load %arg6[%c0_264, %c0_265, %c192_266] : memref<1x32x256xf32, #tpu.memory_space<vmem>>, vector<1x32x16xf32>
    %238 = vector.shape_cast %237 : vector<1x32x16xf32> to vector<32x16xf32>
    %239 = vector.shape_cast %236 : vector<32x16xf32> to vector<1x32x16xf32>
    tpu.vector_store %arg6[%c0_264, %c0_265, %c192_266], %239 {strides = array<i32>} : memref<1x32x256xf32, #tpu.memory_space<vmem>>, vector<1x32x16xf32>,
    %240 = vector.extract_strided_slice %187 {offsets = [0, 343], sizes = [32, 16], strides = [1, 1]} : vector<32x416xf32> to vector<32x16xf32>
    %c0_267 = arith.constant 0 : index
    %c0_268 = arith.constant 0 : index
    %c208_269 = arith.constant 208 : index
    %241 = vector.load %arg6[%c0_267, %c0_268, %c208_269] : memref<1x32x256xf32, #tpu.memory_space<vmem>>, vector<1x32x16xf32>
    %242 = vector.shape_cast %241 : vector<1x32x16xf32> to vector<32x16xf32>
    %243 = vector.shape_cast %240 : vector<32x16xf32> to vector<1x32x16xf32>
    tpu.vector_store %arg6[%c0_267, %c0_268, %c208_269], %243 {strides = array<i32>} : memref<1x32x256xf32, #tpu.memory_space<vmem>>, vector<1x32x16xf32>,
    %244 = vector.extract_strided_slice %187 {offsets = [0, 369], sizes = [32, 16], strides = [1, 1]} : vector<32x416xf32> to vector<32x16xf32>
    %c0_270 = arith.constant 0 : index
    %c0_271 = arith.constant 0 : index
    %c224_272 = arith.constant 224 : index
    %245 = vector.load %arg6[%c0_270, %c0_271, %c224_272] : memref<1x32x256xf32, #tpu.memory_space<vmem>>, vector<1x32x16xf32>
    %246 = vector.shape_cast %245 : vector<1x32x16xf32> to vector<32x16xf32>
    %247 = vector.shape_cast %244 : vector<32x16xf32> to vector<1x32x16xf32>
    tpu.vector_store %arg6[%c0_270, %c0_271, %c224_272], %247 {strides = array<i32>} : memref<1x32x256xf32, #tpu.memory_space<vmem>>, vector<1x32x16xf32>,
    %248 = vector.extract_strided_slice %187 {offsets = [0, 395], sizes = [32, 16], strides = [1, 1]} : vector<32x416xf32> to vector<32x16xf32>
    %c0_273 = arith.constant 0 : index
    %c0_274 = arith.constant 0 : index
    %c240_275 = arith.constant 240 : index
    %249 = vector.load %arg6[%c0_273, %c0_274, %c240_275] : memref<1x32x256xf32, #tpu.memory_space<vmem>>, vector<1x32x16xf32>
    %250 = vector.shape_cast %249 : vector<1x32x16xf32> to vector<32x16xf32>
    %251 = vector.shape_cast %248 : vector<32x16xf32> to vector<1x32x16xf32>
    tpu.vector_store %arg6[%c0_273, %c0_274, %c240_275], %251 {strides = array<i32>} : memref<1x32x256xf32, #tpu.memory_space<vmem>>, vector<1x32x16xf32>,
    return
  }
  func.func @transform_0(%arg0: i32) -> (i32, i32, i32) {
    %c0_i32 = arith.constant 0 : i32
    %c0_i32_0 = arith.constant 0 : i32
    %c0_i32_1 = arith.constant 0 : i32
    return %arg0, %c0_i32, %c0_i32_0 : i32, i32, i32
  }
  func.func @transform_1(%arg0: i32) -> (i32, i32, i32) {
    %c0_i32 = arith.constant 0 : i32
    %c0_i32_0 = arith.constant 0 : i32
    %c0_i32_1 = arith.constant 0 : i32
    %c0_i32_2 = arith.constant 0 : i32
    return %c0_i32, %c0_i32_0, %c0_i32_1 : i32, i32, i32
  }
  func.func @transform_2(%arg0: i32) -> (i32, i32) {
    %c0_i32 = arith.constant 0 : i32
    %c0_i32_0 = arith.constant 0 : i32
    %c0_i32_1 = arith.constant 0 : i32
    return %c0_i32, %c0_i32_0 : i32, i32
  }
  func.func @transform_3(%arg0: i32) -> (i32, i32, i32) {
    %c0_i32 = arith.constant 0 : i32
    %c0_i32_0 = arith.constant 0 : i32
    %c0_i32_1 = arith.constant 0 : i32
    %c0_i32_2 = arith.constant 0 : i32
    return %c0_i32, %c0_i32_0, %c0_i32_1 : i32, i32, i32
  }
  func.func @transform_4(%arg0: i32) -> (i32, i32) {
    %c0_i32 = arith.constant 0 : i32
    %c0_i32_0 = arith.constant 0 : i32
    %c0_i32_1 = arith.constant 0 : i32
    return %c0_i32, %c0_i32_0 : i32, i32
  }
  func.func @transform_5(%arg0: i32) -> (i32, i32, i32) {
    %c0_i32 = arith.constant 0 : i32
    %c0_i32_0 = arith.constant 0 : i32
    %c0_i32_1 = arith.constant 0 : i32
    return %arg0, %c0_i32, %c0_i32_0 : i32, i32, i32
  }
}

</mosaic_0001>

<bundles_post_ra>
// kernel: tpu_custom_call.1
= control target key start
LH: loop header
LB: loop body
LE: loop exit
PB: predicated region body
PF: predicated region fallthrough
CT: control target
= control target key end

     0   :  { %10 = vsyncpa [#allocation5], 0  ;;  %s11200_s0 = inlined_call_operand.vmem [shape: bf16[2,32,256], index: 0, kind: input, shape index: {}]   ;;  %s11201_s1 = inlined_call_operand.hbm [shape: bf16[4,32,288], index: 1, kind: input, shape index: {}]   ;;  %s11202_s2 = inlined_call_operand.vmem [shape: bf16[32,32], index: 2, kind: input, shape index: {}]   ;;  %s11203_s3 = inlined_call_operand.vmem [shape: f32[5,32,1], index: 3, kind: input, shape index: {}]   ;;  %s11204_s4 = inlined_call_operand.vmem [shape: f32[1,416], index: 4, kind: input, shape index: {}]   ;;  %s11205_s5 = inlined_call_operand.hbm [shape: f32[2,32,256], index: 5, kind: output, shape index: {}]  }
   0x1   :  { %11 = vsyncpa [#allocation6], 0 }
   0x2   :  { %13 = vsyncpa [#allocation6 + $0x1], 0  ;;  %s8073_s18 = smov 0   ;;  %s8075_s19 = smov 0  }
   0x3   :  { %s8077_s20 = smov 0   ;;  %s8079_s21 = smov 0  }
   0x4 LB: > { %s8094_s22 = sadd.s32 4294967295, %s7983_s21   ;;  %s7104_s23 = sadd.s32 4294967294, %s7983_s21   ;;  %s7983_s21 = sphi %s8079_s21, %s11318_s21   ;;  %s7979_s20 = sphi %s8077_s20, %s11317_s20   ;;  %s7975_s19 = sphi %s8075_s19, %s11316_s19   ;;  %s7971_s18 = sphi %s8073_s18, %s11315_s18  }
   0x5   : > { %s8098_s24 = sadd.s32 1, %s7983_s21   ;;  %s136_s25 = sadd.s32 1, %s7979_s20 }
   0x6   : > { %s133_s26 = ssub.s32 %s7983_s21, %s8098_s24  ;;  %p146_p0 = scmp.ne.s32.totalorder %s7979_s20, %s7975_s19 }
   0x7   : > { %p134_p1 = scmp.eq.s32.totalorder %s133_s26, 0  ;;  %p147_p2 = scmp.eq.s32.totalorder %s8094_s22, 1 }
   0x8   : > { %p152_p3 = scmp.ne.s32.totalorder %s7975_s19, %s7971_s18  ;;  %p153_p4 = scmp.eq.s32.totalorder %s7104_s23, 1 }
   0x9   : > { %s8109_s27 = scalar_select %p134_p1, %s7979_s20, %s136_s25  }
   0xa   : > { %p8111_p5 = por %p147_p2, %p146_p0  ;;  %p8115_p6 = por %p153_p4, %p152_p3 }
   0xb   : > { %p7105_p7 = scmp.ge.s32.totalorder %s7983_s21, 1  ;;  %p160_p8 = scmp.lt.s32.totalorder %s7983_s21, 3 }
   0xc   : > { %s11252_s29 = scalar_select %p8115_p6, 1, 0 }
   0xd   : > { %p7556_p9 = scmp.eq.s32.totalorder %s8094_s22, 0  ;;  %p8122_p10 = pnand %p7105_p7, %p160_p8 }
   0xe   : > { %s7985_s6 = smov [#allocation4]  }
   0xf   : > { %s172_s7 = sshll.u32 %s7985_s6, 4  ;;  %p7548_p11 = pneg %p8122_p10  ;;  %s173_s7 = int_to_ptr.vmem [resolvable:$true] %s172_s7 }
  0x10   : > { %s7904_s8 = scalar_lea.vmem %s173_s7, 3072  ;;  %p7912_p3 = scmp.lt.s32.totalorder %s173_s7, %s173_s7 }
  0x11   : > { %p7549_p12 = pnand %p7556_p9, %p7548_p11  ;;  %p7905_p0 = scmp.ne.s32.totalorder %s173_s7, %s7904_s8 }
  0x12   : > { %p7913_p4 = scmp.lt.s32.totalorder %s7904_s8, %s7904_s8 }
  0x13   : > { %p7895_p13 = pneg %p7549_p12 }
  0x14   : > { %p7914_p6 = por %p7913_p4, %p7912_p3 }
  0x15   : > { %p7907_p1 = pnand %p7905_p0, %p7895_p13 }
  0x17   : > { %p7908_p2 = pneg %p7907_p1 }
  0x19   : > { %p7915_p7 = pnand %p7914_p6, %p7908_p2 }
  0x1b   : > { %7918 = shalt.err (!%p7915_p7)
}
  0x1c   : > { %s7986_s9 = smov 192   ;;  %s7987_s10 = smov 12  }
  0x1d   : > { %7551 = dma.hbm_to_vmem [thread:$0]  (!%p7549_p12), %s11201_s1, 3072, %s173_s7, [#allocation5], %s7986_s9, %s7986_s9, %s7987_s10  }
  0x1e   : > { %205 = sbr.rel (%p8122_p10) target bundleno = 3317 (0xcf5), region = 40 }
  0x23   : > { %7962 = dma.done.wait (%p7556_p9), [#allocation5], 3072  }
  0x24   : > { %7964 = vsyncadd (%p7556_p9), [#allocation5], 4294964224  ;;  %p233_p8 = scmp.lt.s32.totalorder %s8094_s22, 1  ;;  %v11210_v0 = vmov 0   ;;  %s7989_s23 = smov 66   ;;  %vm240_vm0 = vcmask 1043456  }
  0x25   : > { %246 = vst [vmem:[#allocation2 + $0x20] sm:$0xff] %v11210_v0  ;;  %239 = vst [vmem:[#allocation2] sm:$0xff] %v11210_v0  ;;  %1894 = vmatprep.mubr.bf16.mxu1 %v11210_v0  ;;  %7649 = vset.pattern.permute.xlu1 %v11210_v0  ;;  %s7990_s25 = smov 36   ;;  %s7991_s26 = smov 46   ;;  %vm241_vm1 = vcmask 769028   ;;  %vm270_vm3 = vcmask 421152  }
  0x26   : > { %244 = vst [vmem:[#allocation2 + $0x10] sm:$0xff] %v11210_v0  ;;  %248 = vst [vmem:[#allocation2 + $0x30] sm:$0xff] %v11210_v0  ;;  %s234_s13 = scalar_select %p233_p8, %s8094_s22, 1  ;;  %7648 = vset.pattern.permute.xlu0 %v11210_v0  ;;  %vm295_vm4 = vcmask 634352   ;;  %vm354_vm5 = vcmask 1044368   ;;  %vm355_vm6 = vcmask 15364  }
  0x27   : > { %s7992_s30 = smov 56   ;;  %s7993_s6 = smov 76   ;;  %vm242_vm2 = vmor %vm241_vm1, %vm240_vm0  ;;  %vm345_vm7 = vcmask 539648   ;;  %vm320_vm8 = vcmask 847552   ;;  %vm381_vm10 = vcmask 224352   ;;  %vm406_vm11 = vcmask 437552  }
  0x28   : > { %s7508_s14 = sshll.u32 %s234_s13, 5  ;;  %s7994_s7 = smov 86   ;;  %249 = vst.msk [vmem:[#allocation2 + $0x38] sm:$0xff] %vm242_vm2, %v11210_v0  ;;  %243 = vst.msk [vmem:[#allocation2 + $0x8] sm:$0xff] %vm242_vm2, %v11210_v0  ;;  %vm431_vm12 = vcmask 650752   ;;  %vm490_vm13 = vcmask 1044384  }
  0x29   : > { %s8151_s17 = scalar_lea.vmem %s11200_s0, %s7508_s14  ;;  %245 = vst.msk [vmem:[#allocation2 + $0x18] sm:$0xff] %vm242_vm2, %v11210_v0  ;;  %247 = vst.msk [vmem:[#allocation2 + $0x28] sm:$0xff] %vm242_vm2, %v11210_v0  ;;  %s7995_s8 = smov 116   ;;  %vm491_vm14 = vcmask 31748   ;;  %vm481_vm15 = vcmask 949248   ;;  %vm456_vm1 = vcmask 863952  }
  0x2a   : > { %v327_v1 = vld [vmem:[%s8151_s17 + $0x10] sm:$0xf]  ;;  %v328_v3 = vld [vmem:[%s8151_s17 + $0x18] sm:$0xf]  ;;  %v251_v9 = vld [vmem:[%s8151_s17 + $0x8] sm:$0xf] }
  0x2b   : > { %v252_v2 = vld [vmem:[%s8151_s17 + $0x10] sm:$0xf]  ;;  %337 = vrot.lane.b32.xlu1 %v327_v1, %s7989_s23  ;;  %v253_v4 = vld [vmem:[%s8151_s17 + $0x18] sm:$0xf]  ;;  %v250_v10 = vld [vmem:[%s8151_s17] sm:$0xf] }
  0x2c   : > { %262 = vrot.lane.b32.xlu0 %v252_v2, %s7990_s25  ;;  %v278_v5 = vld [vmem:[%s8151_s17 + $0x18] sm:$0xf]  ;;  %v277_v6 = vld [vmem:[%s8151_s17 + $0x10] sm:$0xf]  ;;  %v326_v11 = vld [vmem:[%s8151_s17 + $0x8] sm:$0xf] }
  0x2d   : > { %v303_v7 = vld [vmem:[%s8151_s17 + $0x18] sm:$0xf]  ;;  %v302_v8 = vld [vmem:[%s8151_s17 + $0x10] sm:$0xf]  ;;  %v325_v12 = vld [vmem:[%s8151_s17] sm:$0xf] }
  0x2e   : > { %v364_v13 = vld [vmem:[%s8151_s17 + $0x18] sm:$0xf]  ;;  %v363_v14 = vld [vmem:[%s8151_s17 + $0x10] sm:$0xf]  ;;  %v276_v15 = vld [vmem:[%s8151_s17 + $0x8] sm:$0xf] }
  0x2f   : > { %339 = vrot.lane.b32.xlu1 %v328_v3, %s7989_s23  ;;  %v275_v16 = vld [vmem:[%s8151_s17] sm:$0xf]  ;;  %v389_v17 = vld [vmem:[%s8151_s17 + $0x18] sm:$0xf]  ;;  %v388_v18 = vld [vmem:[%s8151_s17 + $0x10] sm:$0xf] }
  0x30   : > { %264 = vrot.lane.b32.xlu0 %v253_v4, %s7990_s25  ;;  %v464_v19 = vld [vmem:[%s8151_s17 + $0x1c] sm:$0xf]  ;;  %v463_v20 = vld [vmem:[%s8151_s17 + $0x14] sm:$0xf]  ;;  %v301_v21 = vld [vmem:[%s8151_s17 + $0x8] sm:$0xf] }
  0x31   : > { %v300_v22 = vld [vmem:[%s8151_s17] sm:$0xf]  ;;  %v414_v23 = vld [vmem:[%s8151_s17 + $0x18] sm:$0xf]  ;;  %v413_v24 = vld [vmem:[%s8151_s17 + $0x10] sm:$0xf] }
  0x32   : > { %s7996_s9 = smov 96   ;;  %v439_v25 = vld [vmem:[%s8151_s17 + $0x18] sm:$0xf]  ;;  %v438_v26 = vld [vmem:[%s8151_s17 + $0x10] sm:$0xf]  ;;  %s7997_s10 = smov 106   ;;  %vm8258_vm9 = vmor %vm355_vm6, %vm354_vm5 }
  0x33   : > { %289 = vrot.lane.b32.xlu1 %v278_v5, %s7991_s26  ;;  %v362_v27 = vld [vmem:[%s8151_s17 + $0x8] sm:$0xf]  ;;  %v361_v28 = vld [vmem:[%s8151_s17] sm:$0xf]  ;;  %v462_v31 = vld [vmem:[%s8151_s17 + $0xc] sm:$0xf] }
  0x34   : > { %287 = vrot.lane.b32.xlu0 %v277_v6, %s7991_s26  ;;  %v387_v29 = vld [vmem:[%s8151_s17 + $0x8] sm:$0xf]  ;;  %v386_v30 = vld [vmem:[%s8151_s17] sm:$0xf]  ;;  %v461_v32 = vld [vmem:[%s8151_s17 + $0x4] sm:$0xf] }
  0x35   : > { %v500_v33 = vld [vmem:[%s8151_s17 + $0x1c] sm:$0xf]  ;;  %v499_v34 = vld [vmem:[%s8151_s17 + $0x14] sm:$0xf]  ;;  %s7998_s11 = smov 126   ;;  %s7999_s12 = smov 8   ;;  %vm8288_vm2 = vmor %vm491_vm14, %vm490_vm13 }
  0x36   : > { %v412_v35 = vld [vmem:[%s8151_s17 + $0x8] sm:$0xf]  ;;  %v411_v36 = vld [vmem:[%s8151_s17] sm:$0xf]  ;;  %v525_v37 = vld [vmem:[%s8151_s17 + $0x1c] sm:$0xf] }
  0x37   : > { %314 = vrot.lane.b32.xlu1 %v303_v7, %s7992_s30  ;;  %v524_v38 = vld [vmem:[%s8151_s17 + $0x14] sm:$0xf]  ;;  %v600_v39 = vld [vmem:[%s8151_s17 + $0x1c] sm:$0xf]  ;;  %s8000_s13 = smov 38   ;;  %s8001_s14 = smov 18  }
  0x38   : > { %312 = vrot.lane.b32.xlu0 %v302_v8, %s7992_s30  ;;  %v599_v40 = vld [vmem:[%s8151_s17 + $0x14] sm:$0xf]  ;;  %v437_v41 = vld [vmem:[%s8151_s17 + $0x8] sm:$0xf]  ;;  %v436_v42 = vld [vmem:[%s8151_s17] sm:$0xf] }
  0x39   : > { %v550_v43 = vld [vmem:[%s8151_s17 + $0x1c] sm:$0xf]  ;;  %v549_v44 = vld [vmem:[%s8151_s17 + $0x14] sm:$0xf]  ;;  %s8002_s15 = smov 28   ;;  %s8003_s16 = smov 48  }
  0x3a   : > { %v575_v45 = vld [vmem:[%s8151_s17 + $0x1c] sm:$0xf]  ;;  %v574_v46 = vld [vmem:[%s8151_s17 + $0x14] sm:$0xf]  ;;  %v498_v47 = vld [vmem:[%s8151_s17 + $0xc] sm:$0xf] }
  0x3b   : > { %260 = vrot.lane.b32.xlu1 %v251_v9, %s7990_s25  ;;  %v497_v48 = vld [vmem:[%s8151_s17 + $0x4] sm:$0xf]  ;;  %v523_v49 = vld [vmem:[%s8151_s17 + $0xc] sm:$0xf]  ;;  %v636_v53 = vld [vmem:[%s8151_s17 + $0x1c] sm:$0xf] }
  0x3c   : > { %258 = vrot.lane.b32.xlu0 %v250_v10, %s7990_s25  ;;  %v522_v50 = vld [vmem:[%s8151_s17 + $0x4] sm:$0xf]  ;;  %v598_v51 = vld [vmem:[%s8151_s17 + $0xc] sm:$0xf]  ;;  %v635_v54 = vld [vmem:[%s8151_s17 + $0x14] sm:$0xf] }
  0x3d   : > { %v597_v52 = vld [vmem:[%s8151_s17 + $0x4] sm:$0xf]  ;;  %v548_v55 = vld [vmem:[%s8151_s17 + $0xc] sm:$0xf]  ;;  %v661_v57 = vld [vmem:[%s8151_s17 + $0x1c] sm:$0xf] }
  0x3e   : > { %v547_v56 = vld [vmem:[%s8151_s17 + $0x4] sm:$0xf]  ;;  %v660_v58 = vld [vmem:[%s8151_s17 + $0x14] sm:$0xf]  ;;  %s8004_s25 = smov 58   ;;  %vm567_vm5 = vcmask 667152  }
  0x3f   : > { %335 = vrot.lane.b32.xlu1 %v326_v11, %s7989_s23  ;;  %v573_v59 = vld [vmem:[%s8151_s17 + $0xc] sm:$0xf]  ;;  %v572_v60 = vld [vmem:[%s8151_s17 + $0x4] sm:$0xf]  ;;  %vm626_vm6 = vcmask 1044400   ;;  %vm678_vm13 = vcmask 470352  }
  0x40   : > { %333 = vrot.lane.b32.xlu0 %v325_v12, %s7989_s23  ;;  %v634_v63 = vld [vmem:[%s8151_s17 + $0xc] sm:$0xf]  ;;  %v633_v1 = vld [vmem:[%s8151_s17 + $0x4] sm:$0xf]  ;;  %vm747_vm14 = vcmask 261124  }
  0x41   : > { %v659_v4 = vld [vmem:[%s8151_s17 + $0xc] sm:$0xf]  ;;  %v658_v5 = vld [vmem:[%s8151_s17 + $0x4] sm:$0xf]  ;;  %s8005_s17 = smov 99  }
  0x43   : > { %375 = vrot.lane.b32.xlu1 %v364_v13, %s7993_s6 }
  0x44   : > { %373 = vrot.lane.b32.xlu0 %v363_v14, %s7993_s6 }
  0x47   : > { %285 = vrot.lane.b32.xlu1 %v276_v15, %s7991_s26 }
  0x48   : > { %283 = vrot.lane.b32.xlu0 %v275_v16, %s7991_s26  ;;  %s8006_s26 = smov 69  }
  0x4b   : > { %400 = vrot.lane.b32.xlu1 %v389_v17, %s7994_s7 }
  0x4c   : > { %398 = vrot.lane.b32.xlu0 %v388_v18, %s7994_s7 }
  0x4f   : > { %475 = vrot.lane.b32.xlu1 %v464_v19, %s7995_s8 }
  0x50   : > { %473 = vrot.lane.b32.xlu0 %v463_v20, %s7995_s8 }
  0x53   : > { %310 = vrot.lane.b32.xlu1 %v301_v21, %s7992_s30 }
  0x54   : > { %308 = vrot.lane.b32.xlu0 %v300_v22, %s7992_s30  ;;  %s8007_s30 = smov 121  }
  0x57   : > { %425 = vrot.lane.b32.xlu1 %v414_v23, %s7996_s9 }
  0x58   : > { %423 = vrot.lane.b32.xlu0 %v413_v24, %s7996_s9 }
  0x5b   : > { %450 = vrot.lane.b32.xlu1 %v439_v25, %s7997_s10 }
  0x5c   : > { %448 = vrot.lane.b32.xlu0 %v438_v26, %s7997_s10 }
  0x5f   : > { %371 = vrot.lane.b32.xlu1 %v362_v27, %s7993_s6 }
  0x60   : > { %369 = vrot.lane.b32.xlu0 %v361_v28, %s7993_s6 }
  0x63   : > { %396 = vrot.lane.b32.xlu1 %v387_v29, %s7994_s7 }
  0x64   : > { %394 = vrot.lane.b32.xlu0 %v386_v30, %s7994_s7  ;;  %s8008_s7 = smov 123  }
  0x67   : > { %471 = vrot.lane.b32.xlu1 %v462_v31, %s7995_s8 }
  0x68   : > { %469 = vrot.lane.b32.xlu0 %v461_v32, %s7995_s8  ;;  %s8009_s8 = smov 125  }
  0x6b   : > { %511 = vrot.lane.b32.xlu1 %v500_v33, %s7998_s11 }
  0x6c   : > { %509 = vrot.lane.b32.xlu0 %v499_v34, %s7998_s11 }
  0x6f   : > { %421 = vrot.lane.b32.xlu1 %v412_v35, %s7996_s9 }
  0x70   : > { %419 = vrot.lane.b32.xlu0 %v411_v36, %s7996_s9  ;;  %s8010_s9 = smov 71  }
  0x73   : > { %536 = vrot.lane.b32.xlu1 %v525_v37, %s7999_s12 }
  0x74   : > { %534 = vrot.lane.b32.xlu0 %v524_v38, %s7999_s12 }
  0x77   : > { %611 = vrot.lane.b32.xlu1 %v600_v39, %s8000_s13 }
  0x78   : > { %609 = vrot.lane.b32.xlu0 %v599_v40, %s8000_s13 }
  0x7b   : > { %446 = vrot.lane.b32.xlu1 %v437_v41, %s7997_s10 }
  0x7c   : > { %444 = vrot.lane.b32.xlu0 %v436_v42, %s7997_s10  ;;  %s8011_s10 = smov 73  }
  0x7f   : > { %561 = vrot.lane.b32.xlu1 %v550_v43, %s8001_s14 }
  0x80   : > { %559 = vrot.lane.b32.xlu0 %v549_v44, %s8001_s14 }
  0x83   : > { %586 = vrot.lane.b32.xlu1 %v575_v45, %s8002_s15 }
  0x84   : > { %584 = vrot.lane.b32.xlu0 %v574_v46, %s8002_s15 }
  0x87   : > { %507 = vrot.lane.b32.xlu1 %v498_v47, %s7998_s11 }
  0x88   : > { %505 = vrot.lane.b32.xlu0 %v497_v48, %s7998_s11 }
  0x8b   : > { %532 = vrot.lane.b32.xlu1 %v523_v49, %s7999_s12 }
  0x8c   : > { %530 = vrot.lane.b32.xlu0 %v522_v50, %s7999_s12  ;;  %s8012_s12 = smov 95  }
  0x8f   : > { %607 = vrot.lane.b32.xlu1 %v598_v51, %s8000_s13 }
  0x90   : > { %605 = vrot.lane.b32.xlu0 %v597_v52, %s8000_s13  ;;  %s8013_s13 = smov 97  }
  0x93   : > { %647 = vrot.lane.b32.xlu1 %v636_v53, %s8003_s16 }
  0x94   : > { %645 = vrot.lane.b32.xlu0 %v635_v54, %s8003_s16 }
  0x97   : > { %557 = vrot.lane.b32.xlu1 %v548_v55, %s8001_s14 }
  0x98   : > { %555 = vrot.lane.b32.xlu0 %v547_v56, %s8001_s14  ;;  %s8021_s14 = smov 67  }
  0x9b   : > { %672 = vrot.lane.b32.xlu1 %v661_v57, %s8004_s25 }
  0x9c   : > { %670 = vrot.lane.b32.xlu0 %v660_v58, %s8004_s25 }
  0x9d   : > { %v338_v61 = vpop.permute.xlu1 %337 }
  0x9e   : > { %v263_v62 = vpop.permute.xlu0 %262  ;;  %v343_v8 = vrot.slane %v338_v61, 4 }
  0x9f   : > { %273 = vst.msk [vmem:[#allocation2 + $0x20] sm:$0xf] %vm270_vm3, %v263_v62  ;;  %582 = vrot.lane.b32.xlu1 %v573_v59, %s8002_s15 }
  0xa0   : > { %580 = vrot.lane.b32.xlu0 %v572_v60, %s8002_s15  ;;  %v348_v13 = vsel %vm345_vm7, %v343_v8, %v338_v61  ;;  %s8022_s15 = smov 119  }
  0xa1   : > { %v340_v2 = vpop.permute.xlu1 %339 }
  0xa2   : > { %v265_v3 = vpop.permute.xlu0 %264  ;;  %v344_v9 = vrot.slane %v340_v2, 4 }
  0xa3   : > { %274 = vst.msk [vmem:[#allocation2 + $0x30] sm:$0xf] %vm270_vm3, %v265_v3  ;;  %643 = vrot.lane.b32.xlu1 %v634_v63, %s8003_s16 }
  0xa4   : > { %641 = vrot.lane.b32.xlu0 %v633_v1, %s8003_s16  ;;  %v349_v14 = vsel %vm345_vm7, %v344_v9, %v340_v2  ;;  %s8014_s16 = smov 31  }
  0xa5   : > { %v290_v6 = vpop.permute.xlu1 %289 }
  0xa6   : > { %v288_v7 = vpop.permute.xlu0 %287  ;;  %299 = vst.msk [vmem:[#allocation2 + $0x30] sm:$0xf] %vm295_vm4, %v290_v6 }
  0xa7   : > { %298 = vst.msk [vmem:[#allocation2 + $0x20] sm:$0xf] %vm295_vm4, %v288_v7  ;;  %668 = vrot.lane.b32.xlu1 %v659_v4, %s8004_s25 }
  0xa8   : > { %666 = vrot.lane.b32.xlu0 %v658_v5, %s8004_s25  ;;  %s8015_s25 = smov 100  }
  0xa9   : > { %v315_v11 = vpop.permute.xlu1 %314 }
  0xaa   : > { %v313_v12 = vpop.permute.xlu0 %312  ;;  %324 = vst.msk [vmem:[#allocation2 + $0x30] sm:$0xf] %vm320_vm8, %v315_v11 }
  0xab   : > { %323 = vst.msk [vmem:[#allocation2 + $0x20] sm:$0xf] %vm320_vm8, %v313_v12 }
  0xac   : > { %360 = vst.msk [vmem:[#allocation2 + $0x30] sm:$0xff] %vm8258_vm9, %v349_v14  ;;  %359 = vst.msk [vmem:[#allocation2 + $0x20] sm:$0xff] %vm8258_vm9, %v348_v13 }
  0xad   : > { %v261_v15 = vpop.permute.xlu1 %260 }
  0xae   : > { %v259_v16 = vpop.permute.xlu0 %258  ;;  %272 = vst.msk [vmem:[#allocation2 + $0x10] sm:$0xf] %vm270_vm3, %v261_v15 }
  0xaf   : > { %271 = vst.msk [vmem:[#allocation2] sm:$0xf] %vm270_vm3, %v259_v16  ;;  %vm517_vm3 = vcmask 240752  }
  0xb1   : > { %v336_v17 = vpop.permute.xlu1 %335 }
  0xb2   : > { %v334_v18 = vpop.permute.xlu0 %333  ;;  %v342_v27 = vrot.slane %v336_v17, 4 }
  0xb3   : > { %v341_v28 = vrot.slane %v334_v18, 4 }
  0xb4   : > { %v347_v31 = vsel %vm345_vm7, %v342_v27, %v336_v17 }
  0xb5   : > { %v376_v19 = vpop.permute.xlu1 %375  ;;  %v346_v32 = vsel %vm345_vm7, %v341_v28, %v334_v18 }
  0xb6   : > { %v374_v20 = vpop.permute.xlu0 %373  ;;  %385 = vst.msk [vmem:[#allocation2 + $0x34] sm:$0xf] %vm381_vm10, %v376_v19 }
  0xb7   : > { %384 = vst.msk [vmem:[#allocation2 + $0x24] sm:$0xf] %vm381_vm10, %v374_v20 }
  0xb9   : > { %v286_v21 = vpop.permute.xlu1 %285 }
  0xba   : > { %v284_v22 = vpop.permute.xlu0 %283  ;;  %297 = vst.msk [vmem:[#allocation2 + $0x10] sm:$0xf] %vm295_vm4, %v286_v21 }
  0xbb   : > { %296 = vst.msk [vmem:[#allocation2] sm:$0xf] %vm295_vm4, %v284_v22  ;;  %vm542_vm4 = vcmask 453952  }
  0xbd   : > { %v401_v23 = vpop.permute.xlu1 %400 }
  0xbe   : > { %v399_v24 = vpop.permute.xlu0 %398  ;;  %410 = vst.msk [vmem:[#allocation2 + $0x34] sm:$0xf] %vm406_vm11, %v401_v23 }
  0xbf   : > { %409 = vst.msk [vmem:[#allocation2 + $0x24] sm:$0xf] %vm406_vm11, %v399_v24 }
  0xc1   : > { %v476_v25 = vpop.permute.xlu1 %475 }
  0xc2   : > { %v474_v26 = vpop.permute.xlu0 %473  ;;  %v480_v35 = vrot.slane %v476_v25, 4 }
  0xc3   : > { %v479_v36 = vrot.slane %v474_v26, 4 }
  0xc4   : > { %v485_v40 = vsel %vm481_vm15, %v480_v35, %v476_v25 }
  0xc5   : > { %v311_v29 = vpop.permute.xlu1 %310  ;;  %v484_v41 = vsel %vm481_vm15, %v479_v36, %v474_v26 }
  0xc6   : > { %v309_v30 = vpop.permute.xlu0 %308  ;;  %322 = vst.msk [vmem:[#allocation2 + $0x10] sm:$0xf] %vm320_vm8, %v311_v29 }
  0xc7   : > { %321 = vst.msk [vmem:[#allocation2] sm:$0xf] %vm320_vm8, %v309_v30  ;;  %vm627_vm8 = vcmask 48132  }
  0xc8   : > { %358 = vst.msk [vmem:[#allocation2 + $0x10] sm:$0xff] %vm8258_vm9, %v347_v31  ;;  %357 = vst.msk [vmem:[#allocation2] sm:$0xff] %vm8258_vm9, %v346_v32  ;;  %vm617_vm9 = vcmask 310272  }
  0xc9   : > { %v426_v33 = vpop.permute.xlu1 %425 }
  0xca   : > { %v424_v34 = vpop.permute.xlu0 %423  ;;  %435 = vst.msk [vmem:[#allocation2 + $0x34] sm:$0xf] %vm431_vm12, %v426_v33 }
  0xcb   : > { %434 = vst.msk [vmem:[#allocation2 + $0x24] sm:$0xf] %vm431_vm12, %v424_v34 }
  0xcd   : > { %v451_v38 = vpop.permute.xlu1 %450 }
  0xce   : > { %v449_v39 = vpop.permute.xlu0 %448  ;;  %460 = vst.msk [vmem:[#allocation2 + $0x34] sm:$0xf] %vm456_vm1, %v451_v38 }
  0xcf   : > { %459 = vst.msk [vmem:[#allocation2 + $0x24] sm:$0xf] %vm456_vm1, %v449_v39 }
  0xd0   : > { %496 = vst.msk [vmem:[#allocation2 + $0x34] sm:$0xff] %vm8288_vm2, %v485_v40  ;;  %495 = vst.msk [vmem:[#allocation2 + $0x24] sm:$0xff] %vm8288_vm2, %v484_v41 }
  0xd1   : > { %v372_v42 = vpop.permute.xlu1 %371 }
  0xd2   : > { %v370_v43 = vpop.permute.xlu0 %369  ;;  %383 = vst.msk [vmem:[#allocation2 + $0x14] sm:$0xf] %vm381_vm10, %v372_v42 }
  0xd3   : > { %382 = vst.msk [vmem:[#allocation2 + $0x4] sm:$0xf] %vm381_vm10, %v370_v43  ;;  %vm592_vm10 = vcmask 880352  }
  0xd5   : > { %v397_v44 = vpop.permute.xlu1 %396 }
  0xd6   : > { %v395_v45 = vpop.permute.xlu0 %394  ;;  %408 = vst.msk [vmem:[#allocation2 + $0x14] sm:$0xf] %vm406_vm11, %v397_v44 }
  0xd7   : > { %407 = vst.msk [vmem:[#allocation2 + $0x4] sm:$0xf] %vm406_vm11, %v395_v45  ;;  %v8304_v46 = vld [vmem:[#allocation2 + $0x20] sm:$0xff]  ;;  %v8308_v49 = vld [vmem:[#allocation2 + $0x30] sm:$0xff]  ;;  %vm8328_vm11 = vmor %vm627_vm8, %vm626_vm6  ;;  %vm726_vm6 = vcmask 1022976   ;;  %vm1211_vm8 = vcmask 580608  }
  0xd8   : > { %918 = vrot.lane.b32.xlu0 %v8304_v46, %s8005_s17 }
  0xd9   : > { %v472_v47 = vpop.permute.xlu1 %471 }
  0xda   : > { %v470_v48 = vpop.permute.xlu0 %469  ;;  %v478_v58 = vrot.slane %v472_v47, 4 }
  0xdb   : > { %v477_v59 = vrot.slane %v470_v48, 4 }
  0xdc   : > { %922 = vrot.lane.b32.xlu0 %v8308_v49, %s8005_s17  ;;  %v483_v62 = vsel %vm481_vm15, %v478_v58, %v472_v47 }
  0xdd   : > { %v512_v50 = vpop.permute.xlu1 %511  ;;  %v482_v63 = vsel %vm481_vm15, %v477_v59, %v470_v48  ;;  %vm935_vm15 = vcmask 809984  }
  0xde   : > { %v510_v51 = vpop.permute.xlu0 %509  ;;  %521 = vst.msk [vmem:[#allocation2 + $0x38] sm:$0xf] %vm517_vm3, %v512_v50 }
  0xdf   : > { %520 = vst.msk [vmem:[#allocation2 + $0x28] sm:$0xf] %vm517_vm3, %v510_v51 }
  0xe1   : > { %v422_v52 = vpop.permute.xlu1 %421 }
  0xe2   : > { %v420_v53 = vpop.permute.xlu0 %419  ;;  %433 = vst.msk [vmem:[#allocation2 + $0x14] sm:$0xf] %vm431_vm12, %v422_v52 }
  0xe3   : > { %432 = vst.msk [vmem:[#allocation2 + $0x4] sm:$0xf] %vm431_vm12, %v420_v53  ;;  %vm653_vm12 = vcmask 257152  }
  0xe5   : > { %v537_v54 = vpop.permute.xlu1 %536 }
  0xe6   : > { %v535_v55 = vpop.permute.xlu0 %534  ;;  %546 = vst.msk [vmem:[#allocation2 + $0x38] sm:$0xf] %vm542_vm4, %v537_v54 }
  0xe7   : > { %545 = vst.msk [vmem:[#allocation2 + $0x28] sm:$0xf] %vm542_vm4, %v535_v55 }
  0xe9   : > { %v612_v56 = vpop.permute.xlu1 %611 }
  0xea   : > { %v610_v57 = vpop.permute.xlu0 %609  ;;  %v616_v3 = vrot.slane %v612_v56, 4 }
  0xeb   : > { %v615_v4 = vrot.slane %v610_v57, 4 }
  0xec   : > { %v621_v8 = vsel %vm617_vm9, %v616_v3, %v612_v56 }
  0xed   : > { %v447_v60 = vpop.permute.xlu1 %446  ;;  %v620_v9 = vsel %vm617_vm9, %v615_v4, %v610_v57 }
  0xee   : > { %v445_v61 = vpop.permute.xlu0 %444  ;;  %458 = vst.msk [vmem:[#allocation2 + $0x14] sm:$0xf] %vm456_vm1, %v447_v60 }
  0xef   : > { %457 = vst.msk [vmem:[#allocation2 + $0x4] sm:$0xf] %vm456_vm1, %v445_v61  ;;  %vm8515_vm1 = vmor %vm747_vm14, %vm240_vm0  ;;  %vm2138_vm14 = vcmask 252928  }
  0xf0   : > { %494 = vst.msk [vmem:[#allocation2 + $0x14] sm:$0xff] %vm8288_vm2, %v483_v62  ;;  %493 = vst.msk [vmem:[#allocation2 + $0x4] sm:$0xff] %vm8288_vm2, %v482_v63  ;;  %vm1280_vm2 = vcmask 564224  }
  0xf1   : > { %v562_v1 = vpop.permute.xlu1 %561 }
  0xf2   : > { %v560_v2 = vpop.permute.xlu0 %559  ;;  %571 = vst.msk [vmem:[#allocation2 + $0x38] sm:$0xf] %vm567_vm5, %v562_v1 }
  0xf3   : > { %570 = vst.msk [vmem:[#allocation2 + $0x28] sm:$0xf] %vm567_vm5, %v560_v2 }
  0xf5   : > { %v587_v6 = vpop.permute.xlu1 %586 }
  0xf6   : > { %v585_v7 = vpop.permute.xlu0 %584  ;;  %596 = vst.msk [vmem:[#allocation2 + $0x38] sm:$0xf] %vm592_vm10, %v587_v6 }
  0xf7   : > { %595 = vst.msk [vmem:[#allocation2 + $0x28] sm:$0xf] %vm592_vm10, %v585_v7  ;;  %v8336_v10 = vld [vmem:[#allocation2] sm:$0xff]  ;;  %v8346_v13 = vld [vmem:[#allocation2 + $0x10] sm:$0xff] }
  0xf8   : > { %632 = vst.msk [vmem:[#allocation2 + $0x38] sm:$0xff] %vm8328_vm11, %v621_v8  ;;  %631 = vst.msk [vmem:[#allocation2 + $0x28] sm:$0xff] %vm8328_vm11, %v620_v9  ;;  %910 = vrot.lane.b32.xlu0 %v8336_v10, %s8005_s17 }
  0xf9   : > { %v508_v11 = vpop.permute.xlu1 %507 }
  0xfa   : > { %v506_v12 = vpop.permute.xlu0 %505  ;;  %519 = vst.msk [vmem:[#allocation2 + $0x18] sm:$0xf] %vm517_vm3, %v508_v11 }
  0xfb   : > { %518 = vst.msk [vmem:[#allocation2 + $0x8] sm:$0xf] %vm517_vm3, %v506_v12  ;;  %vm866_vm3 = vcmask 990208  }
  0xfc   : > { %914 = vrot.lane.b32.xlu0 %v8346_v13, %s8005_s17 }
  0xfd   : > { %v533_v14 = vpop.permute.xlu1 %532 }
  0xfe   : > { %v531_v15 = vpop.permute.xlu0 %530  ;;  %544 = vst.msk [vmem:[#allocation2 + $0x18] sm:$0xf] %vm542_vm4, %v533_v14 }
  0xff   : > { %543 = vst.msk [vmem:[#allocation2 + $0x8] sm:$0xf] %vm542_vm4, %v531_v15  ;;  %vm1802_vm4 = vcmask 261120  }
 0x100   : > { %1263 = vrot.lane.b32.xlu0 %v8304_v46, %s8006_s26 }
 0x101   : > { %v608_v16 = vpop.permute.xlu1 %607 }
 0x102   : > { %v606_v17 = vpop.permute.xlu0 %605  ;;  %v614_v24 = vrot.slane %v608_v16, 4 }
 0x103   : > { %v613_v25 = vrot.slane %v606_v17, 4 }
 0x104   : > { %1267 = vrot.lane.b32.xlu0 %v8308_v49, %s8006_s26  ;;  %v619_v28 = vsel %vm617_vm9, %v614_v24, %v608_v16 }
 0x105   : > { %v648_v18 = vpop.permute.xlu1 %647  ;;  %v618_v29 = vsel %vm617_vm9, %v613_v25, %v606_v17  ;;  %v8571_v25 = vld [vmem:[#allocation4 + $0x4] ss:$12 sps:$4 sm:$0xff]   ;;  %vm1142_vm9 = vcmask 596992  }
 0x106   : > { %v646_v19 = vpop.permute.xlu0 %645  ;;  %657 = vst.msk [vmem:[#allocation2 + $0x3c] sm:$0xf] %vm653_vm12, %v648_v18  ;;  %1841 = vmatprep.mubr.bf16.mxu0 %v8571_v25 }
 0x107   : > { %656 = vst.msk [vmem:[#allocation2 + $0x2c] sm:$0xf] %vm653_vm12, %v646_v19 }
 0x108   : > { %849 = vrot.lane.b32.xlu0 %v8304_v46, %s8007_s30 }
 0x109   : > { %v558_v20 = vpop.permute.xlu1 %557 }
 0x10a   : > { %v556_v21 = vpop.permute.xlu0 %555  ;;  %569 = vst.msk [vmem:[#allocation2 + $0x18] sm:$0xf] %vm567_vm5, %v558_v20 }
 0x10b   : > { %568 = vst.msk [vmem:[#allocation2 + $0x8] sm:$0xf] %vm567_vm5, %v556_v21  ;;  %vm797_vm5 = vcmask 1006592  }
 0x10c   : > { %853 = vrot.lane.b32.xlu0 %v8308_v49, %s8007_s30 }
 0x10d   : > { %v673_v22 = vpop.permute.xlu1 %672 }
 0x10e   : > { %v671_v23 = vpop.permute.xlu0 %670  ;;  %682 = vst.msk [vmem:[#allocation2 + $0x3c] sm:$0xf] %vm678_vm13, %v673_v22 }
 0x10f   : > { %681 = vst.msk [vmem:[#allocation2 + $0x2c] sm:$0xf] %vm678_vm13, %v671_v23 }
 0x110   : > { %1255 = vrot.lane.b32.xlu0 %v8336_v10, %s8006_s26 }
 0x111   : > { %v583_v26 = vpop.permute.xlu1 %582 }
 0x112   : > { %v581_v27 = vpop.permute.xlu0 %580  ;;  %594 = vst.msk [vmem:[#allocation2 + $0x18] sm:$0xf] %vm592_vm10, %v583_v26 }
 0x113   : > { %593 = vst.msk [vmem:[#allocation2 + $0x8] sm:$0xf] %vm592_vm10, %v581_v27  ;;  %vm1073_vm10 = vcmask 777216  }
 0x114   : > { %630 = vst.msk [vmem:[#allocation2 + $0x18] sm:$0xff] %vm8328_vm11, %v619_v28  ;;  %629 = vst.msk [vmem:[#allocation2 + $0x8] sm:$0xff] %vm8328_vm11, %v618_v29  ;;  %1259 = vrot.lane.b32.xlu0 %v8346_v13, %s8006_s26  ;;  %vm1004_vm11 = vcmask 793600  }
 0x115   : > { %v644_v30 = vpop.permute.xlu1 %643  ;;  %v8386_v35 = vld [vmem:[#allocation2 + $0x38] sm:$0xff] }
 0x116   : > { %v642_v31 = vpop.permute.xlu0 %641  ;;  %v8378_v32 = vld [vmem:[#allocation2 + $0x28] sm:$0xff]  ;;  %655 = vst.msk [vmem:[#allocation2 + $0x1c] sm:$0xf] %vm653_vm12, %v644_v30 }
 0x117   : > { %654 = vst.msk [vmem:[#allocation2 + $0xc] sm:$0xf] %vm653_vm12, %v642_v31  ;;  %920 = vrot.lane.b32.xlu1 %v8378_v32, %s8005_s17  ;;  %vm2159_vm12 = vcmask 1043704  }
 0x118   : > { %841 = vrot.lane.b32.xlu0 %v8336_v10, %s8007_s30 }
 0x119   : > { %v669_v33 = vpop.permute.xlu1 %668 }
 0x11a   : > { %v667_v34 = vpop.permute.xlu0 %666  ;;  %680 = vst.msk [vmem:[#allocation2 + $0x1c] sm:$0xf] %vm678_vm13, %v669_v33 }
 0x11b   : > { %679 = vst.msk [vmem:[#allocation2 + $0xc] sm:$0xf] %vm678_vm13, %v667_v34  ;;  %924 = vrot.lane.b32.xlu1 %v8386_v35, %s8005_s17  ;;  %vm2160_vm13 = vcmask 1047556  }
 0x11c   : > { %845 = vrot.lane.b32.xlu0 %v8346_v13, %s8007_s30 }
 0x120   : > { %780 = vrot.lane.b32.xlu0 %v8304_v46, %s8008_s7 }
 0x121   : > { %v8402_v37 = vld [vmem:[#allocation2 + $0x18] sm:$0xff] }
 0x122   : > { %v8396_v36 = vld [vmem:[#allocation2 + $0x8] sm:$0xff] }
 0x123   : > { %912 = vrot.lane.b32.xlu1 %v8396_v36, %s8005_s17 }
 0x124   : > { %784 = vrot.lane.b32.xlu0 %v8308_v49, %s8008_s7 }
 0x127   : > { %916 = vrot.lane.b32.xlu1 %v8402_v37, %s8005_s17  ;;  %s8016_s17 = smov 68  }
 0x128   : > { %772 = vrot.lane.b32.xlu0 %v8336_v10, %s8008_s7 }
 0x12b   : > { %1265 = vrot.lane.b32.xlu1 %v8378_v32, %s8006_s26 }
 0x12c   : > { %776 = vrot.lane.b32.xlu0 %v8346_v13, %s8008_s7 }
 0x12f   : > { %1269 = vrot.lane.b32.xlu1 %v8386_v35, %s8006_s26 }
 0x130   : > { %708 = vrot.lane.b32.xlu0 %v8304_v46, %s8009_s8 }
 0x133   : > { %851 = vrot.lane.b32.xlu1 %v8378_v32, %s8007_s30 }
 0x134   : > { %712 = vrot.lane.b32.xlu0 %v8308_v49, %s8009_s8 }
 0x137   : > { %855 = vrot.lane.b32.xlu1 %v8386_v35, %s8007_s30 }
 0x138   : > { %700 = vrot.lane.b32.xlu0 %v8336_v10, %s8009_s8 }
 0x13b   : > { %1257 = vrot.lane.b32.xlu1 %v8396_v36, %s8006_s26 }
 0x13c   : > { %704 = vrot.lane.b32.xlu0 %v8346_v13, %s8009_s8 }
 0x13f   : > { %1261 = vrot.lane.b32.xlu1 %v8402_v37, %s8006_s26  ;;  %s8017_s26 = smov 120  }
 0x140   : > { %1194 = vrot.lane.b32.xlu0 %v8304_v46, %s8010_s9 }
 0x143   : > { %843 = vrot.lane.b32.xlu1 %v8396_v36, %s8007_s30 }
 0x144   : > { %1198 = vrot.lane.b32.xlu0 %v8308_v49, %s8010_s9 }
 0x147   : > { %847 = vrot.lane.b32.xlu1 %v8402_v37, %s8007_s30 }
 0x148   : > { %1186 = vrot.lane.b32.xlu0 %v8336_v10, %s8010_s9 }
 0x14a   : > { %v919_v38 = vpop.permute.xlu0 %918 }
 0x14b   : > { %782 = vrot.lane.b32.xlu1 %v8378_v32, %s8008_s7  ;;  %v930_v52 = vrot.slane %v919_v38, 4 }
 0x14c   : > { %1190 = vrot.lane.b32.xlu0 %v8346_v13, %s8010_s9 }
 0x14e   : > { %v923_v39 = vpop.permute.xlu0 %922 }
 0x14f   : > { %786 = vrot.lane.b32.xlu1 %v8386_v35, %s8008_s7  ;;  %v932_v55 = vrot.slane %v923_v39, 4 }
 0x150   : > { %1125 = vrot.lane.b32.xlu0 %v8304_v46, %s8011_s10 }
 0x153   : > { %774 = vrot.lane.b32.xlu1 %v8396_v36, %s8008_s7 }
 0x154   : > { %1129 = vrot.lane.b32.xlu0 %v8308_v49, %s8011_s10 }
 0x157   : > { %778 = vrot.lane.b32.xlu1 %v8402_v37, %s8008_s7 }
 0x158   : > { %1117 = vrot.lane.b32.xlu0 %v8336_v10, %s8011_s10 }
 0x15b   : > { %710 = vrot.lane.b32.xlu1 %v8378_v32, %s8009_s8 }
 0x15c   : > { %1121 = vrot.lane.b32.xlu0 %v8346_v13, %s8011_s10 }
 0x15f   : > { %714 = vrot.lane.b32.xlu1 %v8386_v35, %s8009_s8 }
 0x160   : > { %1056 = vrot.lane.b32.xlu0 %v8304_v46, %s8012_s12 }
 0x163   : > { %702 = vrot.lane.b32.xlu1 %v8396_v36, %s8009_s8 }
 0x164   : > { %1060 = vrot.lane.b32.xlu0 %v8308_v49, %s8012_s12 }
 0x167   : > { %706 = vrot.lane.b32.xlu1 %v8402_v37, %s8009_s8  ;;  %s8018_s8 = smov 74  }
 0x168   : > { %1048 = vrot.lane.b32.xlu0 %v8336_v10, %s8012_s12 }
 0x16a   : > { %v8472_v40 = vpop.permute.xlu0 %910 }
 0x16b   : > { %1196 = vrot.lane.b32.xlu1 %v8378_v32, %s8010_s9  ;;  %v926_v6 = vrot.slane %v8472_v40, 4 }
 0x16c   : > { %1052 = vrot.lane.b32.xlu0 %v8346_v13, %s8012_s12 }
 0x16e   : > { %v8478_v41 = vpop.permute.xlu0 %914 }
 0x16f   : > { %1200 = vrot.lane.b32.xlu1 %v8386_v35, %s8010_s9  ;;  %v928_v9 = vrot.slane %v8478_v41, 4 }
 0x170   : > { %987 = vrot.lane.b32.xlu0 %v8304_v46, %s8013_s13 }
 0x172   : > { %v8484_v42 = vpop.permute.xlu0 %1263 }
 0x173   : > { %1188 = vrot.lane.b32.xlu1 %v8396_v36, %s8010_s9  ;;  %v1275_v22 = vrot.slane %v8484_v42, 4 }
 0x174   : > { %991 = vrot.lane.b32.xlu0 %v8308_v49, %s8013_s13 }
 0x176   : > { %v8490_v43 = vpop.permute.xlu0 %1267 }
 0x177   : > { %1192 = vrot.lane.b32.xlu1 %v8402_v37, %s8010_s9  ;;  %v1277_v26 = vrot.slane %v8490_v43, 4 }
 0x178   : > { %979 = vrot.lane.b32.xlu0 %v8336_v10, %s8013_s13 }
 0x17a   : > { %v8496_v44 = vpop.permute.xlu0 %849 }
 0x17b   : > { %1127 = vrot.lane.b32.xlu1 %v8378_v32, %s8011_s10 }
 0x17c   : > { %983 = vrot.lane.b32.xlu0 %v8346_v13, %s8013_s13 }
 0x17e   : > { %v8502_v45 = vpop.permute.xlu0 %853 }
 0x17f   : > { %1131 = vrot.lane.b32.xlu1 %v8386_v35, %s8011_s10 }
 0x182   : > { %v8506_v46 = vpop.permute.xlu0 %1255 }
 0x183   : > { %1119 = vrot.lane.b32.xlu1 %v8396_v36, %s8011_s10 }
 0x186   : > { %v8510_v47 = vpop.permute.xlu0 %1259 }
 0x187   : > { %1123 = vrot.lane.b32.xlu1 %v8402_v37, %s8011_s10 }
 0x189   : > { %v921_v48 = vpop.permute.xlu1 %920 }
 0x18a   : > { %v931_v50 = vrot.slane %v921_v48, 4  ;;  %v8519_v51 = vpop.permute.xlu0 %841 }
 0x18b   : > { %1058 = vrot.lane.b32.xlu1 %v8378_v32, %s8012_s12 }
 0x18c   : > { %v943_v53 = vsel %vm935_vm15, %v921_v48, %v931_v50  ;;  %v941_v56 = vsel %vm240_vm0, %v930_v52, %v931_v50 }
 0x18d   : > { %960 = vst.msk [vmem:[#allocation3 + $0xe8] sm:$0xff] %vm8515_vm1, %v943_v53  ;;  %v925_v54 = vpop.permute.xlu1 %924  ;;  %v942_v61 = vsel %vm935_vm15, %v919_v38, %v941_v56 }
 0x18e   : > { %v933_v57 = vrot.slane %v925_v54, 4  ;;  %v8527_v58 = vpop.permute.xlu0 %845 }
 0x18f   : > { %1062 = vrot.lane.b32.xlu1 %v8386_v35, %s8012_s12 }
 0x190   : > { %v944_v59 = vsel %vm240_vm0, %v932_v55, %v933_v57  ;;  %v946_v60 = vsel %vm935_vm15, %v925_v54, %v933_v57 }
 0x191   : > { %v945_v62 = vsel %vm935_vm15, %v923_v39, %v944_v59  ;;  %962 = vst.msk [vmem:[#allocation3 + $0xf8] sm:$0xff] %vm8515_vm1, %v946_v60  ;;  %v861_v39 = vrot.slane %v8496_v44, 4  ;;  %v1271_v60 = vrot.slane %v8506_v46, 4 }
 0x192   : > { %v8537_v63 = vpop.permute.xlu0 %780  ;;  %v7148_v1 = vcombine.high %v942_v61, %v945_v62  ;;  %v7147_v2 = vcombine.low %v942_v61, %v945_v62 }
 0x193   : > { %1050 = vrot.lane.b32.xlu1 %v8396_v36, %s8012_s12 }
 0x194   : > { %1809 = vmatprep.subr.bf16.mxu0 %v7148_v1 }
 0x195   : > { %v913_v3 = vpop.permute.xlu1 %912  ;;  %1810 = vmatpush1.bf16.msra.mxu0 %v7147_v2 }
 0x196   : > { %v927_v4 = vrot.slane %v913_v3, 4  ;;  %v8541_v5 = vpop.permute.xlu0 %784 }
 0x197   : > { %1054 = vrot.lane.b32.xlu1 %v8402_v37, %s8012_s12  ;;  %s8019_s12 = smov 94  }
 0x198   : > { %v937_v7 = vsel %vm935_vm15, %v913_v3, %v927_v4  ;;  %v934_v10 = vsel %vm240_vm0, %v926_v6, %v927_v4 }
 0x199   : > { %956 = vst.msk [vmem:[#allocation3 + $0xc8] sm:$0xff] %vm8515_vm1, %v937_v7  ;;  %v917_v8 = vpop.permute.xlu1 %916  ;;  %v936_v15 = vsel %vm935_vm15, %v8472_v40, %v934_v10 }
 0x19a   : > { %v929_v11 = vrot.slane %v917_v8, 4  ;;  %v8551_v12 = vpop.permute.xlu0 %772 }
 0x19b   : > { %989 = vrot.lane.b32.xlu1 %v8378_v32, %s8013_s13 }
 0x19c   : > { %v938_v13 = vsel %vm240_vm0, %v928_v9, %v929_v11  ;;  %v940_v14 = vsel %vm935_vm15, %v917_v8, %v929_v11 }
 0x19d   : > { %v939_v16 = vsel %vm935_vm15, %v8478_v41, %v938_v13  ;;  %958 = vst.msk [vmem:[#allocation3 + $0xd8] sm:$0xff] %vm8515_vm1, %v940_v14  ;;  %v1266_v17 = vpop.permute.xlu1 %1265  ;;  %v857_v14 = vrot.slane %v8519_v51, 4  ;;  %vm8904_vm15 = vmor %vm2160_vm13, %vm2159_vm12  ;;  %vm2213_vm12 = vcmask 1031168   ;;  %vm2625_vm13 = vcmask 605184  }
 0x19e   : > { %v1276_v18 = vrot.slane %v1266_v17, 4  ;;  %v7144_v19 = vcombine.high %v936_v15, %v939_v16  ;;  %v7143_v20 = vcombine.low %v936_v15, %v939_v16  ;;  %v8563_v21 = vpop.permute.xlu0 %776  ;;  %v7650_v16 = vld [vmem:[#allocation3 + $0xec] ss:$16 sps:$4 sm:$0xff]  }
 0x19f   : > { %993 = vrot.lane.b32.xlu1 %v8386_v35, %s8013_s13 }
 0x1a0   : > { %v1288_v23 = vsel %vm1280_vm2, %v1266_v17, %v1276_v18  ;;  %1811 = vmatprep.subr.bf16.mxu0 %v7144_v19  ;;  %v1286_v27 = vsel %vm240_vm0, %v1275_v22, %v1276_v18  ;;  %v8626_v17 = vld [vmem:[#allocation4 + $0x8] ss:$12 sps:$4 sm:$0xff]  }
 0x1a1   : > { %1305 = vst.msk [vmem:[#allocation3 + $0x228] sm:$0xff] %vm8515_vm1, %v1288_v23  ;;  %v1270_v24 = vpop.permute.xlu1 %1269  ;;  %1812 = vmatpush1.bf16.msra.mxu0 %v7143_v20  ;;  %v1287_v31 = vsel %vm1280_vm2, %v8484_v42, %v1286_v27  ;;  %v863_v42 = vrot.slane %v8502_v45, 4  ;;  %v7653_v20 = vld [vmem:[#allocation3 + $0xe8] ss:$16 sps:$4 sm:$0xff]  }
 0x1a2   : > { %v1278_v28 = vrot.slane %v1270_v24, 4  ;;  %v8586_v33 = vpop.permute.xlu0 %708 }
 0x1a3   : > { %981 = vrot.lane.b32.xlu1 %v8396_v36, %s8013_s13 }
 0x1a4   : > { %v1289_v29 = vsel %vm240_vm0, %v1277_v26, %v1278_v28  ;;  %v1291_v30 = vsel %vm1280_vm2, %v1270_v24, %v1278_v28  ;;  %v7654_v24 = vld [vmem:[#allocation3 + $0xcc] ss:$16 sps:$4 sm:$0xff]  }
 0x1a5   : > { %v1290_v32 = vsel %vm1280_vm2, %v8490_v43, %v1289_v29  ;;  %1307 = vst.msk [vmem:[#allocation3 + $0x238] sm:$0xff] %vm8515_vm1, %v1291_v30  ;;  %v852_v34 = vpop.permute.xlu1 %851  ;;  %v1391_v30 = vld [vmem:[%s11203_s3 + $0x18] sm:$0xff] }
 0x1a6   : > { %v862_v35 = vrot.slane %v852_v34, 4  ;;  %v7188_v36 = vcombine.high %v1287_v31, %v1290_v32  ;;  %v7187_v38 = vcombine.low %v1287_v31, %v1290_v32  ;;  %v8596_v50 = vpop.permute.xlu0 %712  ;;  %v1390_v31 = vld [vmem:[%s11203_s3 + $0x10] sm:$0xff] }
 0x1a7   : > { %985 = vrot.lane.b32.xlu1 %v8402_v37, %s8013_s13  ;;  %1404 = vperm.xlu0 %7648, %v1390_v31  }
 0x1a8   : > { %v874_v40 = vsel %vm866_vm3, %v852_v34, %v862_v35  ;;  %1874 = vmatprep.subr.bf16.mxu1 %v7188_v36  ;;  %v872_v43 = vsel %vm240_vm0, %v861_v39, %v862_v35  ;;  %v7656_v34 = vld [vmem:[#allocation3 + $0xc8] ss:$16 sps:$4 sm:$0xff]   ;;  %v8651_v35 = vld [vmem:[#allocation4 + $0x20] ss:$12 sps:$4 sm:$0xff]  }
 0x1a9   : > { %891 = vst.msk [vmem:[#allocation3 + $0xa8] sm:$0xff] %vm8515_vm1, %v874_v40  ;;  %v856_v41 = vpop.permute.xlu1 %855  ;;  %1875 = vmatpush1.bf16.msra.mxu1 %v7187_v38  ;;  %v873_v53 = vsel %vm866_vm3, %v8496_v44, %v872_v43  ;;  %v1388_v36 = vld [vmem:[%s11203_s3] sm:$0xff]  ;;  %v792_v38 = vrot.slane %v8537_v63, 4  ;;  %v794_v43 = vrot.slane %v8541_v5, 4 }
 0x1aa   : > { %v864_v48 = vrot.slane %v856_v41, 4  ;;  %v8608_v62 = vpop.permute.xlu0 %700 }
 0x1ab   : > { %1409 = vperm.xlu1 %7649, %v1391_v30  }
 0x1ac   : > { %v875_v52 = vsel %vm240_vm0, %v863_v42, %v864_v48  ;;  %v877_v37 = vsel %vm866_vm3, %v856_v41, %v864_v48  ;;  %v1389_v41 = vld [vmem:[%s11203_s3 + $0x8] sm:$0xff] }
 0x1ad   : > { %v876_v54 = vsel %vm866_vm3, %v8502_v45, %v875_v52  ;;  %893 = vst.msk [vmem:[#allocation3 + $0xb8] sm:$0xff] %vm8515_vm1, %v877_v37  ;;  %v1258_v55 = vpop.permute.xlu1 %1257  ;;  %v1273_v45 = vrot.slane %v8510_v47, 4  ;;  %1399 = vperm.xlu0 %7648, %v1389_v41  }
 0x1ae   : > { %v1272_v56 = vrot.slane %v1258_v55, 4  ;;  %v7140_v57 = vcombine.high %v873_v53, %v876_v54  ;;  %v7139_v59 = vcombine.low %v873_v53, %v876_v54  ;;  %v8622_v13 = vpop.permute.xlu0 %704 }
 0x1af   : > { %1394 = vperm.xlu1 %7649, %v1388_v36  }
 0x1b0   : > { %v1282_v61 = vsel %vm1280_vm2, %v1258_v55, %v1272_v56  ;;  %1813 = vmatprep.subr.bf16.mxu0 %v7140_v57  ;;  %v1279_v1 = vsel %vm240_vm0, %v1271_v60, %v1272_v56 }
 0x1b1   : > { %1301 = vst.msk [vmem:[#allocation3 + $0x208] sm:$0xff] %vm8515_vm1, %v1282_v61  ;;  %v1262_v44 = vpop.permute.xlu1 %1261  ;;  %1814 = vmatpush1.bf16.msra.mxu0 %v7139_v59  ;;  %v1281_v6 = vsel %vm1280_vm2, %v8506_v46, %v1279_v1 }
 0x1b2   : > { %v1274_v2 = vrot.slane %v1262_v44, 4  ;;  %v8636_v26 = vpop.permute.xlu0 %1194 }
 0x1b4   : > { %v1283_v3 = vsel %vm240_vm0, %v1273_v45, %v1274_v2  ;;  %v1285_v4 = vsel %vm1280_vm2, %v1262_v44, %v1274_v2  ;;  %v7657_v40 = vld [vmem:[#allocation3 + $0xac] ss:$16 sps:$4 sm:$0xff]   ;;  %v7659_v53 = vld [vmem:[#allocation3 + $0xa8] ss:$16 sps:$4 sm:$0xff]   ;;  %v788_v2 = vrot.slane %v8551_v12, 4 }
 0x1b5   : > { %v1284_v7 = vsel %vm1280_vm2, %v8510_v47, %v1283_v3  ;;  %1303 = vst.msk [vmem:[#allocation3 + $0x218] sm:$0xff] %vm8515_vm1, %v1285_v4  ;;  %v844_v8 = vpop.permute.xlu1 %843  ;;  %v859_v47 = vrot.slane %v8527_v58, 4  ;;  %vm2163_vm2 = vcmask 515076  }
 0x1b6   : > { %v858_v9 = vrot.slane %v844_v8, 4  ;;  %v7184_v10 = vcombine.high %v1281_v6, %v1284_v7  ;;  %v7183_v11 = vcombine.low %v1281_v6, %v1284_v7  ;;  %v8665_v37 = vpop.permute.xlu0 %1198 }
 0x1b8   : > { %v868_v15 = vsel %vm866_vm3, %v844_v8, %v858_v9  ;;  %1876 = vmatprep.subr.bf16.mxu1 %v7184_v10  ;;  %v865_v18 = vsel %vm240_vm0, %v857_v14, %v858_v9 }
 0x1b9   : > { %887 = vst.msk [vmem:[#allocation3 + $0x88] sm:$0xff] %vm8515_vm1, %v868_v15  ;;  %v848_v46 = vpop.permute.xlu1 %847  ;;  %1877 = vmatpush1.bf16.msra.mxu1 %v7183_v11  ;;  %v867_v27 = vsel %vm866_vm3, %v8519_v51, %v865_v18 }
 0x1ba   : > { %v860_v19 = vrot.slane %v848_v46, 4  ;;  %1915 = vmatprep.subr.bf16.mxu1 %v7650_v16 }
 0x1bc   : > { %v869_v22 = vsel %vm240_vm0, %v859_v47, %v860_v19  ;;  %v871_v23 = vsel %vm866_vm3, %v848_v46, %v860_v19  ;;  %7191 = vmatmul.mubr.msk.bf16.vlgmr.msra.gmra.mxu1 %vm1802_vm4, %v8626_v17  ;;  %v720_v19 = vrot.slane %v8586_v33, 4 }
 0x1bd   : > { %v870_v28 = vsel %vm866_vm3, %v8527_v58, %v869_v22  ;;  %889 = vst.msk [vmem:[#allocation3 + $0x98] sm:$0xff] %vm8515_vm1, %v871_v23  ;;  %v783_v29 = vpop.permute.xlu1 %782  ;;  %1916 = vmatpush1.bf16.msra.mxu1 %v7653_v20  ;;  %1904 = vmatprep.mubr.bf16.mxu1 %v11210_v0  ;;  %vm8927_vm3 = vmor %vm2163_vm2, %vm240_vm0  ;;  %vm2556_vm2 = vcmask 769024  }
 0x1be   : > { %v793_v51 = vrot.slane %v783_v29, 4  ;;  %1917 = vmatprep.subr.bf16.mxu1 %v7654_v24  ;;  %v7136_v32 = vcombine.high %v867_v27, %v870_v28  ;;  %v7135_v58 = vcombine.low %v867_v27, %v870_v28 }
 0x1c0   : > { %v805_v39 = vsel %vm797_vm5, %v783_v29, %v793_v51  ;;  %1815 = vmatprep.subr.bf16.mxu0 %v7136_v32  ;;  %v803_v48 = vsel %vm240_vm0, %v792_v38, %v793_v51  ;;  %v716_v38 = vrot.slane %v8608_v62, 4 }
 0x1c1   : > { %822 = vst.msk [vmem:[#allocation3 + $0x68] sm:$0xff] %vm8515_vm1, %v805_v39  ;;  %v787_v42 = vpop.permute.xlu1 %786  ;;  %1816 = vmatpush1.bf16.msra.mxu0 %v7135_v58  ;;  %1918 = vmatpush1.bf16.msra.mxu1 %v7656_v34  ;;  %v804_v57 = vsel %vm797_vm5, %v8537_v63, %v803_v48  ;;  %v8680_v63 = vpop.permute.xlu0 %1186 }
 0x1c2   : > { %v795_v52 = vrot.slane %v787_v42, 4  ;;  %1919 = vmatprep.subr.bf16.mxu1 %v7657_v40 }
 0x1c4   : > { %v806_v54 = vsel %vm240_vm0, %v794_v43, %v795_v52  ;;  %v808_v55 = vsel %vm797_vm5, %v787_v42, %v795_v52  ;;  %v7660_v56 = vld [vmem:[#allocation3 + $0x8c] ss:$16 sps:$4 sm:$0xff]   ;;  %7192 = vmatmul.mubr.msk.bf16.gmra.mxu1 %vm1802_vm4, %v8651_v35  ;;  %v7662_v1 = vld [vmem:[#allocation3 + $0x88] ss:$16 sps:$4 sm:$0xff]  }
 0x1c5   : > { %v807_v59 = vsel %vm797_vm5, %v8541_v5, %v806_v54  ;;  %824 = vst.msk [vmem:[#allocation3 + $0x78] sm:$0xff] %vm8515_vm1, %v808_v55  ;;  %v775_v60 = vpop.permute.xlu1 %774  ;;  %1920 = vmatpush1.bf16.msra.mxu1 %v7659_v53  ;;  %1947 = vmatprep.mubr.bf16.mxu1 %v8571_v25  ;;  %v790_v25 = vrot.slane %v8563_v21, 4  ;;  %v8694_v18 = vpop.permute.xlu0 %1190 }
 0x1c6   : > { %v789_v61 = vrot.slane %v775_v60, 4  ;;  %1921 = vmatprep.subr.bf16.mxu1 %v7660_v56  ;;  %v7132_v44 = vcombine.high %v804_v57, %v807_v59  ;;  %v7131_v45 = vcombine.low %v804_v57, %v807_v59 }
 0x1c8   : > { %v799_v3 = vsel %vm797_vm5, %v775_v60, %v789_v61  ;;  %1817 = vmatprep.subr.bf16.mxu0 %v7132_v44  ;;  %v796_v4 = vsel %vm240_vm0, %v788_v2, %v789_v61  ;;  %v1206_v61 = vrot.slane %v8636_v26, 4 }
 0x1c9   : > { %818 = vst.msk [vmem:[#allocation3 + $0x48] sm:$0xff] %vm8515_vm1, %v799_v3  ;;  %v779_v5 = vpop.permute.xlu1 %778  ;;  %1818 = vmatpush1.bf16.msra.mxu0 %v7131_v45  ;;  %1922 = vmatpush1.bf16.msra.mxu1 %v7662_v1  ;;  %v798_v11 = vsel %vm797_vm5, %v8551_v12, %v796_v4  ;;  %v8704_v30 = vpop.permute.xlu0 %1125 }
 0x1ca   : > { %v791_v6 = vrot.slane %v779_v5, 4 }
 0x1cc   : > { %v800_v7 = vsel %vm240_vm0, %v790_v25, %v791_v6  ;;  %v802_v8 = vsel %vm797_vm5, %v779_v5, %v791_v6  ;;  %v7663_v9 = vld [vmem:[#allocation3 + $0x6c] ss:$16 sps:$4 sm:$0xff]   ;;  %v7665_v10 = vld [vmem:[#allocation3 + $0x68] ss:$16 sps:$4 sm:$0xff]  }
 0x1cd   : > { %v801_v14 = vsel %vm797_vm5, %v8563_v21, %v800_v7  ;;  %820 = vst.msk [vmem:[#allocation3 + $0x58] sm:$0xff] %vm8515_vm1, %v802_v8  ;;  %v711_v15 = vpop.permute.xlu1 %710  ;;  %1923 = vmatprep.subr.bf16.mxu1 %v7663_v9  ;;  %v722_v21 = vrot.slane %v8596_v50, 4  ;;  %v8718_v42 = vpop.permute.xlu0 %1129 }
 0x1ce   : > { %v721_v16 = vrot.slane %v711_v15, 4  ;;  %v7128_v46 = vcombine.high %v798_v11, %v801_v14  ;;  %v7127_v47 = vcombine.low %v798_v11, %v801_v14  ;;  %1924 = vmatpush1.bf16.msra.mxu1 %v7665_v10 }
 0x1d0   : > { %v734_v20 = vsel %vm726_vm6, %v711_v15, %v721_v16  ;;  %1819 = vmatprep.subr.bf16.mxu0 %v7128_v46  ;;  %v732_v22 = vsel %vm240_vm0, %v720_v19, %v721_v16  ;;  %v1202_v15 = vrot.slane %v8680_v63, 4 }
 0x1d1   : > { %753 = vst.msk [vmem:[#allocation3 + $0x28] sm:$0xff] %vm8515_vm1, %v734_v20  ;;  %v715_v12 = vpop.permute.xlu1 %714  ;;  %1820 = vmatpush1.bf16.msra.mxu0 %v7127_v47  ;;  %v733_v31 = vsel %vm726_vm6, %v8586_v33, %v732_v22  ;;  %v8730_v45 = vpop.permute.xlu0 %1117 }
 0x1d2   : > { %v723_v23 = vrot.slane %v715_v12, 4 }
 0x1d4   : > { %v735_v24 = vsel %vm240_vm0, %v722_v21, %v723_v23  ;;  %v737_v27 = vsel %vm726_vm6, %v715_v12, %v723_v23  ;;  %v7666_v28 = vld [vmem:[#allocation3 + $0x4c] ss:$16 sps:$4 sm:$0xff]   ;;  %v7668_v29 = vld [vmem:[#allocation3 + $0x48] ss:$16 sps:$4 sm:$0xff]  }
 0x1d5   : > { %v736_v51 = vsel %vm726_vm6, %v8596_v50, %v735_v24  ;;  %755 = vst.msk [vmem:[#allocation3 + $0x38] sm:$0xff] %vm8515_vm1, %v737_v27  ;;  %v703_v32 = vpop.permute.xlu1 %702  ;;  %1925 = vmatprep.subr.bf16.mxu1 %v7666_v28  ;;  %v718_v50 = vrot.slane %v8622_v13, 4  ;;  %v8744_v14 = vpop.permute.xlu0 %1121 }
 0x1d6   : > { %v717_v58 = vrot.slane %v703_v32, 4  ;;  %v7124_v34 = vcombine.high %v733_v31, %v736_v51  ;;  %v7123_v36 = vcombine.low %v733_v31, %v736_v51  ;;  %1926 = vmatpush1.bf16.msra.mxu1 %v7668_v29  ;;  %v1137_v51 = vrot.slane %v8704_v30, 4 }
 0x1d8   : > { %v728_v39 = vsel %vm726_vm6, %v703_v32, %v717_v58  ;;  %1821 = vmatprep.subr.bf16.mxu0 %v7124_v34  ;;  %v725_v40 = vsel %vm240_vm0, %v716_v38, %v717_v58 }
 0x1d9   : > { %749 = vst.msk [vmem:[#allocation3 + $0x8] sm:$0xff] %vm8515_vm1, %v728_v39  ;;  %v707_v33 = vpop.permute.xlu1 %706  ;;  %1822 = vmatpush1.bf16.msra.mxu0 %v7123_v36  ;;  %v727_v54 = vsel %vm726_vm6, %v8608_v62, %v725_v40  ;;  %v8754_v22 = vpop.permute.xlu0 %1056 }
 0x1da   : > { %v719_v41 = vrot.slane %v707_v33, 4 }
 0x1dc   : > { %v729_v43 = vsel %vm240_vm0, %v718_v50, %v719_v41  ;;  %v731_v48 = vsel %vm726_vm6, %v707_v33, %v719_v41  ;;  %v7669_v52 = vld [vmem:[#allocation3 + $0x2c] ss:$16 sps:$4 sm:$0xff]   ;;  %v7671_v53 = vld [vmem:[#allocation3 + $0x28] ss:$16 sps:$4 sm:$0xff]  }
 0x1dd   : > { %v730_v55 = vsel %vm726_vm6, %v8622_v13, %v729_v43  ;;  %751 = vst.msk [vmem:[#allocation3 + $0x18] sm:$0xff] %vm8515_vm1, %v731_v48  ;;  %v1197_v56 = vpop.permute.xlu1 %1196  ;;  %1927 = vmatprep.subr.bf16.mxu1 %v7669_v52  ;;  %v1208_v13 = vrot.slane %v8665_v37, 4  ;;  %v1061_v36 = vpop.permute.xlu0 %1060  ;;  %vm2419_vm6 = vcmask 818176  }
 0x1de   : > { %v1207_v57 = vrot.slane %v1197_v56, 4  ;;  %v7120_v59 = vcombine.high %v727_v54, %v730_v55  ;;  %v7119_v60 = vcombine.low %v727_v54, %v730_v55  ;;  %1928 = vmatpush1.bf16.msra.mxu1 %v7671_v53  ;;  %v1133_v54 = vrot.slane %v8730_v45, 4 }
 0x1e0   : > { %v1219_v44 = vsel %vm1211_vm8, %v1197_v56, %v1207_v57  ;;  %1823 = vmatprep.subr.bf16.mxu0 %v7120_v59  ;;  %v1217_v1 = vsel %vm240_vm0, %v1206_v61, %v1207_v57 }
 0x1e1   : > { %1236 = vst.msk [vmem:[#allocation3 + $0x1e8] sm:$0xff] %vm8515_vm1, %v1219_v44  ;;  %v1201_v62 = vpop.permute.xlu1 %1200  ;;  %1824 = vmatpush1.bf16.msra.mxu0 %v7119_v60  ;;  %v1218_v6 = vsel %vm1211_vm8, %v8636_v26, %v1217_v1  ;;  %v1049_v56 = vpop.permute.xlu0 %1048 }
 0x1e2   : > { %v1209_v2 = vrot.slane %v1201_v62, 4 }
 0x1e4   : > { %v1220_v3 = vsel %vm240_vm0, %v1208_v13, %v1209_v2  ;;  %v1222_v5 = vsel %vm1211_vm8, %v1201_v62, %v1209_v2  ;;  %v7672_v25 = vld [vmem:[#allocation3 + $0xc] ss:$16 sps:$4 sm:$0xff]   ;;  %v7674_v4 = vld [vmem:[#allocation3 + $0x8] ss:$16 sps:$4 sm:$0xff]  }
 0x1e5   : > { %v1221_v7 = vsel %vm1211_vm8, %v8665_v37, %v1220_v3  ;;  %1238 = vst.msk [vmem:[#allocation3 + $0x1f8] sm:$0xff] %vm8515_vm1, %v1222_v5  ;;  %v1189_v8 = vpop.permute.xlu1 %1188  ;;  %1929 = vmatprep.subr.bf16.mxu1 %v7672_v25  ;;  %v1204_v37 = vrot.slane %v8694_v18, 4 }
 0x1e6   : > { %v1203_v9 = vrot.slane %v1189_v8, 4  ;;  %v7180_v10 = vcombine.high %v1218_v6, %v1221_v7  ;;  %v7179_v11 = vcombine.low %v1218_v6, %v1221_v7  ;;  %1930 = vmatpush1.bf16.msra.mxu1 %v7674_v4  ;;  %v1053_v4 = vpop.permute.xlu0 %1052  ;;  %v1068_v6 = vrot.slane %v8754_v22, 4 }
 0x1e8   : > { %v1213_v16 = vsel %vm1211_vm8, %v1189_v8, %v1203_v9  ;;  %1825 = vmatprep.subr.bf16.mxu0 %v7180_v10  ;;  %v1210_v46 = vsel %vm240_vm0, %v1202_v15, %v1203_v9  ;;  %v1070_v8 = vrot.slane %v1061_v36, 4 }
 0x1e9   : > { %1232 = vst.msk [vmem:[#allocation3 + $0x1c8] sm:$0xff] %vm8515_vm1, %v1213_v16  ;;  %v1193_v26 = vpop.permute.xlu1 %1192  ;;  %1826 = vmatpush2.bf16.msra.mxu0 %v7179_v11  ;;  %v1212_v23 = vsel %vm1211_vm8, %v8680_v63, %v1210_v46 }
 0x1ea   : > { %v1205_v47 = vrot.slane %v1193_v26, 4 }
 0x1ec   : > { %v1214_v19 = vsel %vm240_vm0, %v1204_v37, %v1205_v47  ;;  %v1216_v20 = vsel %vm1211_vm8, %v1193_v26, %v1205_v47  ;;  %v7675_v12 = vld [vmem:[#allocation3 + $0x1ec] ss:$16 sps:$4 sm:$0xff]   ;;  %v7677_v21 = vld [vmem:[#allocation3 + $0x1e8] ss:$16 sps:$4 sm:$0xff]   ;;  %v988_v26 = vpop.permute.xlu0 %987 }
 0x1ed   : > { %v1215_v24 = vsel %vm1211_vm8, %v8694_v18, %v1214_v19  ;;  %1234 = vst.msk [vmem:[#allocation3 + $0x1d8] sm:$0xff] %vm8515_vm1, %v1216_v20  ;;  %v1128_v27 = vpop.permute.xlu1 %1127  ;;  %1931 = vmatprep.subr.bf16.mxu1 %v7675_v12  ;;  %v1139_v18 = vrot.slane %v8718_v42, 4 }
 0x1ee   : > { %v1138_v28 = vrot.slane %v1128_v27, 4  ;;  %v7176_v29 = vcombine.high %v1212_v23, %v1215_v24  ;;  %v7175_v31 = vcombine.low %v1212_v23, %v1215_v24  ;;  %1932 = vmatpush2.bf16.msra.mxu1 %v7677_v21  ;;  %v1064_v21 = vrot.slane %v1049_v56, 4 }
 0x1f0   : > { %v1150_v32 = vsel %vm1142_vm9, %v1128_v27, %v1138_v28  ;;  %1827 = vmatprep.subr.bf16.mxu0 %v7176_v29  ;;  %v1148_v58 = vsel %vm240_vm0, %v1137_v51, %v1138_v28  ;;  %v992_v29 = vpop.permute.xlu0 %991 }
 0x1f1   : > { %1167 = vst.msk [vmem:[#allocation3 + $0x1a8] sm:$0xff] %vm8515_vm1, %v1150_v32  ;;  %v1132_v63 = vpop.permute.xlu1 %1131  ;;  %1828 = vmatpush2.bf16.msra.mxu0 %v7175_v31  ;;  %v1149_v40 = vsel %vm1142_vm9, %v8704_v30, %v1148_v58 }
 0x1f2   : > { %v1140_v34 = vrot.slane %v1132_v63, 4 }
 0x1f4   : > { %v1151_v38 = vsel %vm240_vm0, %v1139_v18, %v1140_v34  ;;  %v1153_v39 = vsel %vm1142_vm9, %v1132_v63, %v1140_v34  ;;  %v7678_v33 = vld [vmem:[#allocation3 + $0x1cc] ss:$16 sps:$4 sm:$0xff]   ;;  %v7680_v50 = vld [vmem:[#allocation3 + $0x1c8] ss:$16 sps:$4 sm:$0xff]  }
 0x1f5   : > { %v1152_v41 = vsel %vm1142_vm9, %v8718_v42, %v1151_v38  ;;  %1169 = vst.msk [vmem:[#allocation3 + $0x1b8] sm:$0xff] %vm8515_vm1, %v1153_v39  ;;  %v1120_v43 = vpop.permute.xlu1 %1119  ;;  %1933 = vmatprep.subr.bf16.mxu1 %v7678_v33  ;;  %v1135_v42 = vrot.slane %v8744_v14, 4  ;;  %v999_v33 = vrot.slane %v988_v26, 4 }
 0x1f6   : > { %v1134_v48 = vrot.slane %v1120_v43, 4  ;;  %v7172_v52 = vcombine.high %v1149_v40, %v1152_v41  ;;  %v7171_v53 = vcombine.low %v1149_v40, %v1152_v41  ;;  %1934 = vmatpush2.bf16.msra.mxu1 %v7680_v50  ;;  %v980_v40 = vpop.permute.xlu0 %979 }
 0x1f8   : > { %v1144_v55 = vsel %vm1142_vm9, %v1120_v43, %v1134_v48  ;;  %1829 = vmatprep.subr.bf16.mxu0 %v7172_v52  ;;  %v1141_v57 = vsel %vm240_vm0, %v1133_v54, %v1134_v48  ;;  %v1001_v43 = vrot.slane %v992_v29, 4 }
 0x1f9   : > { %1163 = vst.msk [vmem:[#allocation3 + $0x188] sm:$0xff] %vm8515_vm1, %v1144_v55  ;;  %v1124_v30 = vpop.permute.xlu1 %1123  ;;  %1830 = vmatpush2.bf16.msra.mxu0 %v7171_v53  ;;  %v1143_v13 = vsel %vm1142_vm9, %v8730_v45, %v1141_v57 }
 0x1fa   : > { %v1136_v59 = vrot.slane %v1124_v30, 4 }
 0x1fc   : > { %v1145_v60 = vsel %vm240_vm0, %v1135_v42, %v1136_v59  ;;  %v1147_v61 = vsel %vm1142_vm9, %v1124_v30, %v1136_v59  ;;  %v7681_v44 = vld [vmem:[#allocation3 + $0x1ac] ss:$16 sps:$4 sm:$0xff]   ;;  %v7683_v62 = vld [vmem:[#allocation3 + $0x1a8] ss:$16 sps:$4 sm:$0xff]  }
 0x1fd   : > { %v1146_v1 = vsel %vm1142_vm9, %v8744_v14, %v1145_v60  ;;  %1165 = vst.msk [vmem:[#allocation3 + $0x198] sm:$0xff] %vm8515_vm1, %v1147_v61  ;;  %v1059_v2 = vpop.permute.xlu1 %1058  ;;  %1935 = vmatprep.subr.bf16.mxu1 %v7681_v44  ;;  %v984_v44 = vpop.permute.xlu0 %983  ;;  %vm2762_vm9 = vcmask 556032  }
 0x1fe   : > { %v1069_v3 = vrot.slane %v1059_v2, 4  ;;  %v7168_v5 = vcombine.high %v1143_v13, %v1146_v1  ;;  %v7167_v25 = vcombine.low %v1143_v13, %v1146_v1  ;;  %1936 = vmatpush2.bf16.msra.mxu1 %v7683_v62  ;;  %v995_v62 = vrot.slane %v980_v40, 4 }
 0x200   : > { %v1081_v7 = vsel %vm1073_vm10, %v1059_v2, %v1069_v3  ;;  %1831 = vmatprep.subr.bf16.mxu0 %v7168_v5  ;;  %v1079_v9 = vsel %vm240_vm0, %v1068_v6, %v1069_v3  ;;  %v997_v2 = vrot.slane %v984_v44, 4 }
 0x201   : > { %1098 = vst.msk [vmem:[#allocation3 + $0x168] sm:$0xff] %vm8515_vm1, %v1081_v7  ;;  %v1063_v45 = vpop.permute.xlu1 %1062  ;;  %1832 = vmatpush2.bf16.msra.mxu0 %v7167_v25  ;;  %v1080_v37 = vsel %vm1073_vm10, %v8754_v22, %v1079_v9  ;;  %v1066_v22 = vrot.slane %v1053_v4, 4 }
 0x202   : > { %v1071_v10 = vrot.slane %v1063_v45, 4 }
 0x204   : > { %v1082_v11 = vsel %vm240_vm0, %v1070_v8, %v1071_v10  ;;  %v1084_v14 = vsel %vm1073_vm10, %v1063_v45, %v1071_v10  ;;  %v7684_v15 = vld [vmem:[#allocation3 + $0x18c] ss:$16 sps:$4 sm:$0xff]   ;;  %v7686_v16 = vld [vmem:[#allocation3 + $0x188] ss:$16 sps:$4 sm:$0xff]  }
 0x205   : > { %v1083_v46 = vsel %vm1073_vm10, %v1061_v36, %v1082_v11  ;;  %1100 = vst.msk [vmem:[#allocation3 + $0x178] sm:$0xff] %vm8515_vm1, %v1084_v14  ;;  %v1051_v47 = vpop.permute.xlu1 %1050  ;;  %1937 = vmatprep.subr.bf16.mxu1 %v7684_v15  ;;  %v7700_v11 = vld [vmem:[#allocation4] ss:$12 sps:$4 sm:$0xff]   ;;  %v7709_v15 = vld [vmem:[#allocation4 + $0x1c] ss:$12 sps:$4 sm:$0xff]  }
 0x206   : > { %v1065_v19 = vrot.slane %v1051_v47, 4  ;;  %v7164_v20 = vcombine.high %v1080_v37, %v1083_v46  ;;  %v7163_v12 = vcombine.low %v1080_v37, %v1083_v46  ;;  %1938 = vmatpush2.bf16.msra.mxu1 %v7686_v16  ;;  %v7703_v14 = vld [vmem:[#allocation3 + $0x22c] ss:$16 sps:$4 sm:$0xff]   ;;  %v7705_v16 = vld [vmem:[#allocation3 + $0x228] ss:$16 sps:$4 sm:$0xff]  }
 0x208   : > { %v1075_v23 = vsel %vm1073_vm10, %v1051_v47, %v1065_v19  ;;  %1833 = vmatprep.subr.bf16.mxu0 %v7164_v20  ;;  %v1072_v27 = vsel %vm240_vm0, %v1064_v21, %v1065_v19  ;;  %v7708_v47 = vld [vmem:[#allocation3 + $0x208] ss:$16 sps:$4 sm:$0xff]  }
 0x209   : > { %1094 = vst.msk [vmem:[#allocation3 + $0x148] sm:$0xff] %vm8515_vm1, %v1075_v23  ;;  %v1055_v24 = vpop.permute.xlu1 %1054  ;;  %1834 = vmatpush2.bf16.msra.mxu0 %v7163_v12  ;;  %v1074_v18 = vsel %vm1073_vm10, %v1049_v56, %v1072_v27  ;;  %v7711_v19 = vld [vmem:[#allocation4 + $0x18] ss:$12 sps:$4 sm:$0xff]   ;;  %v2038_v27 = vlaneseq }
 0x20a   : > { %v1067_v28 = vrot.slane %v1055_v24, 4 }
 0x20c   : > { %v1076_v31 = vsel %vm240_vm0, %v1066_v22, %v1067_v28  ;;  %v1078_v51 = vsel %vm1073_vm10, %v1055_v24, %v1067_v28  ;;  %v7687_v32 = vld [vmem:[#allocation3 + $0x16c] ss:$16 sps:$4 sm:$0xff]   ;;  %v7689_v63 = vld [vmem:[#allocation3 + $0x168] ss:$16 sps:$4 sm:$0xff]  }
 0x20d   : > { %v1077_v58 = vsel %vm1073_vm10, %v1053_v4, %v1076_v31  ;;  %1096 = vst.msk [vmem:[#allocation3 + $0x158] sm:$0xff] %vm8515_vm1, %v1078_v51  ;;  %v990_v34 = vpop.permute.xlu1 %989  ;;  %1939 = vmatprep.subr.bf16.mxu1 %v7687_v32  ;;  %v8843_v31 = vshrl.u32 %v2038_v27, 7  ;;  %vm2350_vm10 = vcmask 982016  }
 0x20e   : > { %v1000_v36 = vrot.slane %v990_v34, 4  ;;  %v7160_v38 = vcombine.high %v1074_v18, %v1077_v58  ;;  %v7159_v39 = vcombine.low %v1074_v18, %v1077_v58  ;;  %1940 = vmatpush2.bf16.msra.mxu1 %v7689_v63  ;;  %v8849_v18 = vld [vmem:[%s11204_s4] sm:$0xf] }
 0x20f   : > { %v2044_v58 = vsub.s32 1, %v8843_v31 }
 0x210   : > { %v1012_v50 = vsel %vm1004_vm11, %v990_v34, %v1000_v36  ;;  %1835 = vmatprep.subr.bf16.mxu0 %v7160_v38  ;;  %v1010_v48 = vsel %vm240_vm0, %v999_v33, %v1000_v36 }
 0x211   : > { %1029 = vst.msk [vmem:[#allocation3 + $0x128] sm:$0xff] %vm8515_vm1, %v1012_v50  ;;  %v994_v41 = vpop.permute.xlu1 %993  ;;  %1836 = vmatpush2.bf16.msra.mxu0 %v7159_v39  ;;  %v1011_v30 = vsel %vm1004_vm11, %v988_v26, %v1010_v48  ;;  %v7706_v26 = vld [vmem:[#allocation3 + $0x20c] ss:$16 sps:$4 sm:$0xff]   ;;  %v8858_v48 = vrot.slane %v8849_v18, %v2044_v58 }
 0x212   : > { %v1002_v52 = vrot.slane %v994_v41, 4 }
 0x213   : > { %11262 = vst [vmem:[#allocation10_spill] sm:$0xff] %v8858_v48 }
 0x214   : > { %v1013_v53 = vsel %vm240_vm0, %v1001_v43, %v1002_v52  ;;  %v1015_v54 = vsel %vm1004_vm11, %v994_v41, %v1002_v52  ;;  %v7690_v55 = vld [vmem:[#allocation3 + $0x14c] ss:$16 sps:$4 sm:$0xff]   ;;  %v7692_v56 = vld [vmem:[#allocation3 + $0x148] ss:$16 sps:$4 sm:$0xff]  }
 0x215   : > { %v1014_v42 = vsel %vm1004_vm11, %v992_v29, %v1013_v53  ;;  %1031 = vst.msk [vmem:[#allocation3 + $0x138] sm:$0xff] %vm8515_vm1, %v1015_v54  ;;  %v982_v57 = vpop.permute.xlu1 %981  ;;  %1941 = vmatprep.subr.bf16.mxu1 %v7690_v55 }
 0x216   : > { %v996_v59 = vrot.slane %v982_v57, 4  ;;  %v7156_v60 = vcombine.high %v1011_v30, %v1014_v42  ;;  %v7155_v61 = vcombine.low %v1011_v30, %v1014_v42  ;;  %1942 = vmatpush2.bf16.msra.mxu1 %v7692_v56 }
 0x218   : > { %v1006_v13 = vsel %vm1004_vm11, %v982_v57, %v996_v59  ;;  %1837 = vmatprep.subr.bf16.mxu0 %v7156_v60  ;;  %v1003_v3 = vsel %vm240_vm0, %v995_v62, %v996_v59 }
 0x219   : > { %1025 = vst.msk [vmem:[#allocation3 + $0x108] sm:$0xff] %vm8515_vm1, %v1006_v13  ;;  %v986_v1 = vpop.permute.xlu1 %985  ;;  %1838 = vmatpush2.bf16.msra.mxu0 %v7155_v61  ;;  %v1005_v45 = vsel %vm1004_vm11, %v980_v40, %v1003_v3 }
 0x21a   : > { %v998_v5 = vrot.slane %v986_v1, 4 }
 0x21c   : > { %v1007_v25 = vsel %vm240_vm0, %v997_v2, %v998_v5  ;;  %v1009_v4 = vsel %vm1004_vm11, %v986_v1, %v998_v5  ;;  %v7693_v6 = vld [vmem:[#allocation3 + $0x12c] ss:$16 sps:$4 sm:$0xff]   ;;  %v7695_v7 = vld [vmem:[#allocation3 + $0x128] ss:$16 sps:$4 sm:$0xff]  }
 0x21d   : > { %v1008_v8 = vsel %vm1004_vm11, %v984_v44, %v1007_v25  ;;  %1027 = vst.msk [vmem:[#allocation3 + $0x118] sm:$0xff] %vm8515_vm1, %v1009_v4  ;;  %1943 = vmatprep.subr.bf16.mxu1 %v7693_v6 }
 0x21e   : > { %v7152_v9 = vcombine.high %v1005_v45, %v1008_v8  ;;  %v7151_v10 = vcombine.low %v1005_v45, %v1008_v8  ;;  %1944 = vmatpush2.bf16.msra.mxu1 %v7695_v7 }
 0x220   : > { %1839 = vmatprep.subr.bf16.mxu0 %v7152_v9 }
 0x221   : > { %1840 = vmatpush2.bf16.msra.mxu0 %v7151_v10 }
 0x222   : > { %1980 = vmatprep.subr.bf16.mxu0 %v7703_v14  ;;  %v8841_v29 = vpop.permute.xlu0 %1404 }
 0x224   : > { %v7697_v37 = vld [vmem:[#allocation3 + $0x10c] ss:$16 sps:$4 sm:$0xff]   ;;  %v7699_v46 = vld [vmem:[#allocation3 + $0x108] ss:$16 sps:$4 sm:$0xff]   ;;  %1842 = vmatmul.mubr.bf16.vlgmr.msra.gmra.mxu0 %v7700_v11 }
 0x225   : > { %1981 = vmatpush1.bf16.msra.mxu0 %v7705_v16  ;;  %1851 = vmatprep.mubr.bf16.mxu0 %v7709_v15 }
 0x226   : > { %1945 = vmatprep.subr.bf16.mxu1 %v7697_v37  ;;  %1982 = vmatprep.subr.bf16.mxu0 %v7706_v26  ;;  %v8839_v22 = vpop.permute.xlu1 %1409 }
 0x227   : > { %1946 = vmatpush2.bf16.msra.mxu1 %v7699_v46 }
 0x228   : > { %v8852_v34 = vpop.permute.xlu0 %1399 }
 0x229   : > { %1983 = vmatpush1.bf16.msra.mxu0 %v7708_v47 }
 0x22a   : > { %1948 = vmatmul.mubr.bf16.vlgmr.msra.gmra.mxu1 %v7700_v11  ;;  %v1395_v51 = vpop.permute.xlu1 %1394 }
 0x22b   : > { %1957 = vmatprep.mubr.bf16.mxu1 %v7709_v15  ;;  %v2048_v15 = vsub.s32 2, %v8843_v31 }
 0x22c   : > { %1852 = vmatmul.mubr.bf16.gmra.mxu0 %v7711_v19 }
 0x22d   : > { %2000 = vmatprep.mubr.bf16.mxu0 %v11210_v0 }
 0x232   : > { %1958 = vmatmul.mubr.bf16.gmra.mxu1 %v7711_v19 }
 0x234   : > { %7193 = vmatmul.mubr.msk.bf16.vlgmr.msra.gmra.mxu0 %vm1802_vm4, %v8626_v17 }
 0x235   : > { %2010 = vmatprep.mubr.bf16.mxu0 %v11210_v0 }
 0x23c   : > { %7194 = vmatmul.mubr.msk.bf16.gmra.mxu0 %vm1802_vm4, %v8651_v35  ;;  %v2040_v35 = vsub.s32 0, %v8843_v31 }
 0x23d   : > { %3377 = vmatprep.mubr.bf16.mxu0 %v11210_v0 }
 0x23e   : > { %v8855_v50 = vrot.slane %v8849_v18, %v2040_v35 }
 0x27c   : > { %v1896_v20 = vpop.f32.mrf.mxu1 }
 0x27e   : > { %v1898_v12 = vpop.f32.mrf.mxu1 }
 0x280   : > { %v1900_v21 = vpop.f32.mrf.mxu1 }
 0x282   : > { %v1902_v23 = vpop.f32.mrf.mxu1 }
 0x284   : > { %v1906_v24 = vpop.f32.mrf.mxu1 }
 0x286   : > { %v1908_v28 = vpop.f32.mrf.mxu1 }
 0x288   : > { %v1910_v17 = vpop.f32.mrf.mxu1 }
 0x28a   : > { %v1912_v36 = vpop.f32.mrf.mxu1 }
 0x2e4   : > { %v1843_v32 = vpop.f32.mrf.mxu0 }
 0x2e5   : > { %v1844_v63 = vadd.f32 %v1843_v32, %v1395_v51 }
 0x2e6   : > { %v1845_v38 = vpop.f32.mrf.mxu0 }
 0x2e7   : > { %v1897_v39 = vadd.f32 %v1896_v20, %v1844_v63  ;;  %v1846_v33 = vadd.f32 %v1845_v38, %v1395_v51  ;;  %v2052_v20 = vsub.s32 3, %v8843_v31 }
 0x2e8   : > { %v1847_v40 = vpop.f32.mrf.mxu0 }
 0x2e9   : > { %v1899_v41 = vadd.f32 %v1898_v12, %v1846_v33  ;;  %v2021_v43 = vmax.f32 %v1897_v39, 0.0  ;;  %v1848_v52 = vadd.f32 %v1847_v40, %v8852_v34  ;;  %v8881_v33 = vrot.slane %v8849_v18, %v2052_v20 }
 0x2ea   : > { %v1949_v53 = vpop.f32.mrf.mxu1  ;;  %v1849_v54 = vpop.f32.mrf.mxu0 }
 0x2eb   : > { %v2022_v55 = vmax.f32 %v1899_v41, 0.0  ;;  %v1901_v56 = vadd.f32 %v1900_v21, %v1848_v52  ;;  %v1850_v30 = vadd.f32 %v1849_v54, %v8852_v34  ;;  %v2058_v59 = vmul.f32 %v8855_v50, %v2021_v43  ;;  %11264 = vst [vmem:[#allocation12_spill] sm:$0xff] %v8881_v33 }
 0x2ec   : > { %v1951_v42 = vpop.f32.mrf.mxu1  ;;  %v1853_v57 = vpop.f32.mrf.mxu0  ;;  %v1950_v46 = vadd.f32 %v1949_v53, %v1395_v51 }
 0x2ed   : > { %v2059_v60 = vmul.f32 %v8858_v48, %v2022_v55  ;;  %v2025_v61 = vmax.f32 %v1901_v56, 0.0  ;;  %v1903_v44 = vadd.f32 %v1902_v23, %v1850_v30  ;;  %v1854_v13 = vadd.f32 %v1853_v57, %v8841_v29 }
 0x2ee   : > { %v1953_v62 = vpop.f32.mrf.mxu1  ;;  %v1855_v1 = vpop.f32.mrf.mxu0  ;;  %v1952_v27 = vadd.f32 %v1951_v42, %v1395_v51 }
 0x2ef   : > { %v7509_v2 = vpack.c.bf16 %v2059_v60, %v2058_v59  ;;  %v2026_v3 = vmax.f32 %v1903_v44, 0.0  ;;  %v1856_v5 = vadd.f32 %v1855_v1, %v8841_v29  ;;  %v1907_v4 = vadd.f32 %v1906_v24, %v1854_v13 }
 0x2f0   : > { %v1955_v25 = vpop.f32.mrf.mxu1  ;;  %v1857_v6 = vpop.f32.mrf.mxu0  ;;  %v2062_v7 = vmul.f32 %v8855_v50, %v2025_v61  ;;  %v1954_v58 = vadd.f32 %v1953_v62, %v8852_v34 }
 0x2f1   : > { %v2063_v45 = vmul.f32 %v8858_v48, %v2026_v3  ;;  %v1909_v8 = vadd.f32 %v1908_v28, %v1856_v5  ;;  %v1858_v9 = vadd.f32 %v1857_v6, %v8839_v22  ;;  %2114 = vrot.lane.b32.xlu1 %v7509_v2, %s8014_s16  ;;  %v2029_v11 = vmax.f32 %v1907_v4, 0.0 }
 0x2f2   : > { %v1959_v10 = vpop.f32.mrf.mxu1  ;;  %v1859_v14 = vpop.f32.mrf.mxu0  ;;  %v1956_v41 = vadd.f32 %v1955_v25, %v8852_v34 }
 0x2f3   : > { %v7511_v16 = vpack.c.bf16 %v2063_v45, %v2062_v7  ;;  %v2030_v26 = vmax.f32 %v1909_v8, 0.0  ;;  %v1911_v37 = vadd.f32 %v1910_v17, %v1858_v9  ;;  %v1860_v47 = vadd.f32 %v1859_v14, %v8839_v22 }
 0x2f4   : > { %v2002_v19 = vpop.f32.mrf.mxu0  ;;  %v2066_v12 = vmul.f32 %v8855_v50, %v2029_v11  ;;  %v1961_v21 = vpop.f32.mrf.mxu1  ;;  %v8877_v17 = vrot.slane %v8849_v18, %v2048_v15  ;;  %v1960_v51 = vadd.f32 %v1959_v10, %v8841_v29 }
 0x2f5   : > { %v2067_v23 = vmul.f32 %v8858_v48, %v2030_v26  ;;  %v2003_v24 = vadd.f32 %v2002_v19, %v1950_v46  ;;  %2118 = vrot.lane.b32.xlu1 %v7511_v16, %s8014_s16  ;;  %v2033_v28 = vmax.f32 %v1911_v37, 0.0  ;;  %v1913_v32 = vadd.f32 %v1912_v36, %v1860_v47 }
 0x2f6   : > { %v2004_v35 = vpop.f32.mrf.mxu0  ;;  %11263 = vst [vmem:[#allocation11_spill] sm:$0xff] %v8877_v17  ;;  %v1963_v43 = vpop.f32.mrf.mxu1  ;;  %v1962_v56 = vadd.f32 %v1961_v21, %v8841_v29  ;;  %v11265_v19 = vmov 0 }
 0x2f7   : > { %v7513_v63 = vpack.c.bf16 %v2067_v23, %v2066_v12  ;;  %v2034_v38 = vmax.f32 %v1913_v32, 0.0  ;;  %v2023_v31 = vmax.f32 %v2003_v24, 0.0  ;;  %v2005_v39 = vadd.f32 %v2004_v35, %v1952_v27 }
 0x2f8   : > { %v2006_v40 = vpop.f32.mrf.mxu0  ;;  %v2070_v52 = vmul.f32 %v8855_v50, %v2033_v28  ;;  %v1965_v60 = vpop.f32.mrf.mxu1  ;;  %v1964_v62 = vadd.f32 %v1963_v43, %v8839_v22  ;;  %v11266_v19 = vsel %vm8904_vm15, 4294967295, %v11265_v19 }
 0x2f9   : > { %v2007_v36 = vadd.f32 %v2006_v40, %v1954_v58  ;;  %2122 = vrot.lane.b32.xlu1 %v7513_v63, %s8014_s16  ;;  %v2071_v53 = vmul.f32 %v8858_v48, %v2034_v38  ;;  %v2024_v54 = vmax.f32 %v2005_v39, 0.0  ;;  %v2060_v57 = vmul.f32 %v8877_v17, %v2023_v31  ;;  %11267 = vst [vmem:[#allocation13_spill] sm:$0xff] %v11266_v19 }
 0x2fa   : > { %v2008_v55 = vpop.f32.mrf.mxu0  ;;  %v1966_v25 = vadd.f32 %v1965_v60, %v8839_v22  ;;  %v11268_v39 = vmov 0 }
 0x2fb   : > { %v2027_v30 = vmax.f32 %v2007_v36, 0.0  ;;  %v2009_v18 = vadd.f32 %v2008_v55, %v1956_v41  ;;  %v7515_v42 = vpack.c.bf16 %v2071_v53, %v2070_v52  ;;  %v2061_v34 = vmul.f32 %v8881_v33, %v2024_v54 }
 0x2fc   : > { %v2012_v59 = vpop.f32.mrf.mxu0  ;;  %v11269_v39 = vsel %vm8927_vm3, 4294967295, %v11268_v39 }
 0x2fd   : > { %v2028_v61 = vmax.f32 %v2009_v18, 0.0  ;;  %v2013_v44 = vadd.f32 %v2012_v59, %v1960_v51  ;;  %v7510_v13 = vpack.c.bf16 %v2061_v34, %v2060_v57  ;;  %2126 = vrot.lane.b32.xlu1 %v7515_v42, %s8014_s16  ;;  %v2064_v2 = vmul.f32 %v8877_v17, %v2027_v30  ;;  %11270 = vst [vmem:[#allocation14_spill] sm:$0xff] %v11269_v39 }
 0x2fe   : > { %v2014_v1 = vpop.f32.mrf.mxu0 }
 0x2ff   : > { %v2065_v29 = vmul.f32 %v8881_v33, %v2028_v61  ;;  %v2031_v3 = vmax.f32 %v2013_v44, 0.0  ;;  %v2015_v5 = vadd.f32 %v2014_v1, %v1962_v56  ;;  %2116 = vrot.lane.b32.xlu0 %v7510_v13, %s8014_s16 }
 0x300   : > { %v2016_v4 = vpop.f32.mrf.mxu0 }
 0x301   : > { %v7512_v6 = vpack.c.bf16 %v2065_v29, %v2064_v2  ;;  %v2068_v7 = vmul.f32 %v8877_v17, %v2031_v3  ;;  %v2032_v45 = vmax.f32 %v2015_v5, 0.0  ;;  %v2017_v8 = vadd.f32 %v2016_v4, %v1964_v62 }
 0x302   : > { %v2018_v9 = vpop.f32.mrf.mxu0 }
 0x303   : > { %v2069_v10 = vmul.f32 %v8881_v33, %v2032_v45  ;;  %v2035_v11 = vmax.f32 %v2017_v8, 0.0  ;;  %v2019_v14 = vadd.f32 %v2018_v9, %v1966_v25  ;;  %2120 = vrot.lane.b32.xlu0 %v7512_v6, %s8014_s16 }
 0x305   : > { %v7514_v15 = vpack.c.bf16 %v2069_v10, %v2068_v7  ;;  %v2036_v16 = vmax.f32 %v2019_v14, 0.0  ;;  %v2072_v26 = vmul.f32 %v8877_v17, %v2035_v11 }
 0x307   : > { %v2073_v22 = vmul.f32 %v8881_v33, %v2036_v16  ;;  %2124 = vrot.lane.b32.xlu0 %v7514_v15, %s8014_s16  ;;  %v7205_v16 = vld [vmem:[%s11203_s3 + $0x30] sm:$0xff] }
 0x309   : > { %v7516_v37 = vpack.c.bf16 %v2073_v22, %v2072_v26 }
 0x30b   : > { %2128 = vrot.lane.b32.xlu0 %v7516_v37, %s8014_s16 }
 0x363   : > { %v2115_v46 = vpop.permute.xlu1 %2114 }
 0x364   : > { %v2130_v47 = vrot.slane %v2115_v46, 4 }
 0x366   : > { %v2139_v20 = vsel %vm2138_vm14, %v2130_v47, %v2115_v46 }
 0x367   : > { %v2119_v12 = vpop.permute.xlu1 %2118  ;;  %2162 = vst.msk [vmem:[#allocation2] sm:$0xff] %vm8904_vm15, %v2139_v20 }
 0x368   : > { %v2132_v21 = vrot.slane %v2119_v12, 4 }
 0x36a   : > { %v2142_v23 = vsel %vm2138_vm14, %v2132_v21, %v2119_v12 }
 0x36b   : > { %v2123_v24 = vpop.permute.xlu1 %2122  ;;  %2166 = vst.msk [vmem:[#allocation2 + $0x10] sm:$0xff] %vm8904_vm15, %v2142_v23 }
 0x36c   : > { %v2134_v27 = vrot.slane %v2123_v24, 4 }
 0x36e   : > { %v2145_v28 = vsel %vm2138_vm14, %v2134_v27, %v2123_v24  ;;  %v8915_v32 = vld [vmem:[#allocation2] sm:$0xff] }
 0x36f   : > { %2394 = vrot.lane.b32.xlu1 %v8915_v32, %s8015_s25  ;;  %2168 = vst.msk [vmem:[#allocation2 + $0x20] sm:$0xff] %vm8904_vm15, %v2145_v28  ;;  %v2127_v35 = vpop.permute.xlu1 %2126  ;;  %v9135_v28 = vld [vmem:[#allocation4 + $0x34] ss:$12 sps:$4 sm:$0xff]  }
 0x370   : > { %v2136_v63 = vrot.slane %v2127_v35, 4  ;;  %3324 = vmatprep.mubr.bf16.mxu1 %v9135_v28 }
 0x371   : > { %v2117_v58 = vpop.permute.xlu0 %2116 }
 0x372   : > { %v2148_v38 = vsel %vm2138_vm14, %v2136_v63, %v2127_v35  ;;  %v2131_v31 = vrot.slane %v2117_v58, 4  ;;  %v8965_v59 = vld [vmem:[#allocation2 + $0x10] sm:$0xff] }
 0x373   : > { %2737 = vrot.lane.b32.xlu1 %v8915_v32, %s8016_s17  ;;  %2170 = vst.msk [vmem:[#allocation2 + $0x30] sm:$0xff] %vm8904_vm15, %v2148_v38 }
 0x374   : > { %v2140_v40 = vsel %vm240_vm0, %v2130_v47, %v2131_v31  ;;  %v7203_v47 = vld [vmem:[%s11203_s3 + $0x20] sm:$0xff] }
 0x375   : > { %v2141_v41 = vsel %vm2138_vm14, %v2140_v40, %v2117_v58  ;;  %v2121_v51 = vpop.permute.xlu0 %2120  ;;  %v7206_v40 = vld [vmem:[%s11203_s3 + $0x38] sm:$0xff] }
 0x376   : > { %v2133_v43 = vrot.slane %v2121_v51, 4  ;;  %2165 = vst.msk [vmem:[#allocation2 + $0x8] sm:$0xff] %vm8927_vm3, %v2141_v41  ;;  %v2382_v61 = vld [vmem:[#allocation2 + $0x20] sm:$0xff] }
 0x377   : > { %2325 = vrot.lane.b32.xlu1 %v8915_v32, %s8017_s26 }
 0x378   : > { %v2143_v36 = vsel %vm240_vm0, %v2132_v21, %v2133_v43 }
 0x379   : > { %v2144_v52 = vsel %vm2138_vm14, %v2143_v36, %v2121_v51  ;;  %v2125_v53 = vpop.permute.xlu0 %2124 }
 0x37a   : > { %v2135_v54 = vrot.slane %v2125_v53, 4  ;;  %2167 = vst.msk [vmem:[#allocation2 + $0x18] sm:$0xff] %vm8927_vm3, %v2144_v52  ;;  %v2384_v62 = vld [vmem:[#allocation2 + $0x30] sm:$0xff]  ;;  %v7204_v52 = vld [vmem:[%s11203_s3 + $0x28] sm:$0xff] }
 0x37b   : > { %2257 = vrot.lane.b32.xlu1 %v8915_v32, %s8008_s7 }
 0x37c   : > { %v2146_v55 = vsel %vm240_vm0, %v2134_v27, %v2135_v54 }
 0x37d   : > { %v2147_v56 = vsel %vm2138_vm14, %v2146_v55, %v2125_v53  ;;  %v2129_v30 = vpop.permute.xlu0 %2128  ;;  %v8945_v18 = vld [vmem:[#allocation2 + $0x8] sm:$0xff] }
 0x37e   : > { %v2137_v42 = vrot.slane %v2129_v30, 4  ;;  %2396 = vrot.lane.b32.xlu0 %v8945_v18, %s8015_s25  ;;  %2169 = vst.msk [vmem:[#allocation2 + $0x28] sm:$0xff] %vm8927_vm3, %v2147_v56 }
 0x37f   : > { %2188 = vrot.lane.b32.xlu1 %v8915_v32, %s7998_s11 }
 0x380   : > { %v2149_v57 = vsel %vm240_vm0, %v2136_v63, %v2137_v42 }
 0x381   : > { %v2150_v34 = vsel %vm2138_vm14, %v2149_v57, %v2129_v30  ;;  %v8983_v60 = vld [vmem:[#allocation2 + $0x18] sm:$0xff] }
 0x382   : > { %2171 = vst.msk [vmem:[#allocation2 + $0x38] sm:$0xff] %vm8927_vm3, %v2150_v34  ;;  %2739 = vrot.lane.b32.xlu0 %v8945_v18, %s8016_s17 }
 0x383   : > { %2669 = vrot.lane.b32.xlu1 %v8915_v32, %s8010_s9 }
 0x385   : > { %v2383_v44 = vld [vmem:[#allocation2 + $0x28] sm:$0xff] }
 0x386   : > { %2327 = vrot.lane.b32.xlu0 %v8945_v18, %s8017_s26 }
 0x387   : > { %2600 = vrot.lane.b32.xlu1 %v8915_v32, %s8018_s8 }
 0x389   : > { %v9020_v13 = vld [vmem:[#allocation2 + $0x38] sm:$0xff] }
 0x38a   : > { %2259 = vrot.lane.b32.xlu0 %v8945_v18, %s8008_s7 }
 0x38b   : > { %2398 = vrot.lane.b32.xlu1 %v8965_v59, %s8015_s25 }
 0x38e   : > { %2190 = vrot.lane.b32.xlu0 %v8945_v18, %s7998_s11 }
 0x38f   : > { %2741 = vrot.lane.b32.xlu1 %v8965_v59, %s8016_s17 }
 0x392   : > { %2671 = vrot.lane.b32.xlu0 %v8945_v18, %s8010_s9 }
 0x393   : > { %2329 = vrot.lane.b32.xlu1 %v8965_v59, %s8017_s26 }
 0x396   : > { %2602 = vrot.lane.b32.xlu0 %v8945_v18, %s8018_s8 }
 0x397   : > { %2261 = vrot.lane.b32.xlu1 %v8965_v59, %s8008_s7 }
 0x39a   : > { %2400 = vrot.lane.b32.xlu0 %v8983_v60, %s8015_s25 }
 0x39b   : > { %2192 = vrot.lane.b32.xlu1 %v8965_v59, %s7998_s11 }
 0x39e   : > { %2743 = vrot.lane.b32.xlu0 %v8983_v60, %s8016_s17 }
 0x39f   : > { %2673 = vrot.lane.b32.xlu1 %v8965_v59, %s8010_s9 }
 0x3a2   : > { %2331 = vrot.lane.b32.xlu0 %v8983_v60, %s8017_s26 }
 0x3a3   : > { %2402 = vrot.lane.b32.xlu1 %v2382_v61, %s8015_s25 }
 0x3a6   : > { %2263 = vrot.lane.b32.xlu0 %v8983_v60, %s8008_s7 }
 0x3a7   : > { %2745 = vrot.lane.b32.xlu1 %v2382_v61, %s8016_s17 }
 0x3aa   : > { %2194 = vrot.lane.b32.xlu0 %v8983_v60, %s7998_s11 }
 0x3ab   : > { %2333 = vrot.lane.b32.xlu1 %v2382_v61, %s8017_s26 }
 0x3ae   : > { %2675 = vrot.lane.b32.xlu0 %v8983_v60, %s8010_s9 }
 0x3af   : > { %2265 = vrot.lane.b32.xlu1 %v2382_v61, %s8008_s7 }
 0x3b2   : > { %2404 = vrot.lane.b32.xlu0 %v2383_v44, %s8015_s25 }
 0x3b3   : > { %2196 = vrot.lane.b32.xlu1 %v2382_v61, %s7998_s11 }
 0x3b6   : > { %2747 = vrot.lane.b32.xlu0 %v2383_v44, %s8016_s17 }
 0x3b7   : > { %2677 = vrot.lane.b32.xlu1 %v2382_v61, %s8010_s9 }
 0x3ba   : > { %2335 = vrot.lane.b32.xlu0 %v2383_v44, %s8017_s26 }
 0x3bb   : > { %2608 = vrot.lane.b32.xlu1 %v2382_v61, %s8018_s8 }
 0x3be   : > { %2267 = vrot.lane.b32.xlu0 %v2383_v44, %s8008_s7 }
 0x3bf   : > { %2406 = vrot.lane.b32.xlu1 %v2384_v62, %s8015_s25 }
 0x3c2   : > { %2198 = vrot.lane.b32.xlu0 %v2383_v44, %s7998_s11 }
 0x3c3   : > { %2749 = vrot.lane.b32.xlu1 %v2384_v62, %s8016_s17 }
 0x3c6   : > { %2679 = vrot.lane.b32.xlu0 %v2383_v44, %s8010_s9 }
 0x3c7   : > { %2337 = vrot.lane.b32.xlu1 %v2384_v62, %s8017_s26 }
 0x3ca   : > { %2610 = vrot.lane.b32.xlu0 %v2383_v44, %s8018_s8 }
 0x3cb   : > { %2604 = vrot.lane.b32.xlu1 %v8965_v59, %s8018_s8 }
 0x3ce   : > { %2408 = vrot.lane.b32.xlu0 %v9020_v13, %s8015_s25  ;;  %s8023_s25 = smov 127  }
 0x3cf   : > { %2269 = vrot.lane.b32.xlu1 %v2384_v62, %s8008_s7 }
 0x3d2   : > { %2751 = vrot.lane.b32.xlu0 %v9020_v13, %s8016_s17  ;;  %s8024_s17 = smov 75  }
 0x3d3   : > { %2200 = vrot.lane.b32.xlu1 %v2384_v62, %s7998_s11 }
 0x3d6   : > { %2339 = vrot.lane.b32.xlu0 %v9020_v13, %s8017_s26  ;;  %s8025_s26 = smov 93  }
 0x3d7   : > { %2681 = vrot.lane.b32.xlu1 %v2384_v62, %s8010_s9 }
 0x3da   : > { %2606 = vrot.lane.b32.xlu0 %v8983_v60, %s8018_s8 }
 0x3db   : > { %2612 = vrot.lane.b32.xlu1 %v2384_v62, %s8018_s8 }
 0x3de   : > { %2271 = vrot.lane.b32.xlu0 %v9020_v13, %s8008_s7 }
 0x3df   : > { %2539 = vrot.lane.b32.xlu1 %v2382_v61, %s8019_s12 }
 0x3e1   : > { %v9037_v1 = vpop.permute.xlu1 %2394 }
 0x3e2   : > { %2541 = vrot.lane.b32.xlu0 %v2383_v44, %s8019_s12 }
 0x3e3   : > { %2543 = vrot.lane.b32.xlu1 %v2384_v62, %s8019_s12 }
 0x3e5   : > { %v9041_v2 = vpop.permute.xlu1 %2737 }
 0x3e6   : > { %2202 = vrot.lane.b32.xlu0 %v9020_v13, %s7998_s11  ;;  %s8020_s11 = smov 101  }
 0x3e7   : > { %2531 = vrot.lane.b32.xlu1 %v8915_v32, %s8019_s12 }
 0x3e9   : > { %v9047_v29 = vpop.permute.xlu1 %2325 }
 0x3ea   : > { %2533 = vrot.lane.b32.xlu0 %v8945_v18, %s8019_s12 }
 0x3eb   : > { %2535 = vrot.lane.b32.xlu1 %v8965_v59, %s8019_s12 }
 0x3ed   : > { %v9053_v3 = vpop.permute.xlu1 %2257 }
 0x3ee   : > { %2683 = vrot.lane.b32.xlu0 %v9020_v13, %s8010_s9 }
 0x3ef   : > { %2471 = vrot.lane.b32.xlu1 %v2382_v61, %s8013_s13 }
 0x3f0   : > { %v9058_v5 = vpop.permute.xlu0 %2396 }
 0x3f1   : > { %v9060_v25 = vpop.permute.xlu1 %2188  ;;  %v2411_v4 = vrot.slane %v9058_v5, 4 }
 0x3f2   : > { %2537 = vrot.lane.b32.xlu0 %v8983_v60, %s8019_s12 }
 0x3f3   : > { %2475 = vrot.lane.b32.xlu1 %v2384_v62, %s8013_s13  ;;  %v2421_v6 = vsel %vm2419_vm6, %v9058_v5, %v2411_v4 }
 0x3f4   : > { %2440 = vst.msk [vmem:[#allocation3 + $0xc8] sm:$0xff] %vm8515_vm1, %v2421_v6  ;;  %v9072_v7 = vpop.permute.xlu0 %2739 }
 0x3f5   : > { %v9074_v45 = vpop.permute.xlu1 %2669  ;;  %v11219_v8 = vrot.slane %v9072_v7, 4 }
 0x3f6   : > { %2614 = vrot.lane.b32.xlu0 %v9020_v13, %s8018_s8  ;;  %v2685_v6 = vrot.slane %v9074_v45, 4  ;;  %s8033_s8 = smov 113  }
 0x3f7   : > { %2463 = vrot.lane.b32.xlu1 %v8915_v32, %s8013_s13  ;;  %v2764_v9 = vsel %vm2762_vm9, %v9072_v7, %v11219_v8 }
 0x3f8   : > { %2783 = vst.msk [vmem:[#allocation3 + $0x208] sm:$0xff] %vm8515_vm1, %v2764_v9  ;;  %v9087_v10 = vpop.permute.xlu0 %2327 }
 0x3f9   : > { %v9089_v11 = vpop.permute.xlu1 %2600  ;;  %v11216_v14 = vrot.slane %v9087_v10, 4 }
 0x3fa   : > { %2473 = vrot.lane.b32.xlu0 %v2383_v44, %s8013_s13 }
 0x3fb   : > { %2467 = vrot.lane.b32.xlu1 %v8965_v59, %s8013_s13  ;;  %v2352_v15 = vsel %vm2350_vm10, %v9087_v10, %v11216_v14  ;;  %v2410_v14 = vrot.slane %v9037_v1, 4 }
 0x3fc   : > { %2371 = vst.msk [vmem:[#allocation3 + $0x88] sm:$0xff] %vm8515_vm1, %v2352_v15  ;;  %v9104_v26 = vpop.permute.xlu0 %2259 }
 0x3fd   : > { %v9106_v22 = vpop.permute.xlu1 %2398  ;;  %v11212_v37 = vrot.slane %v9104_v26, 4 }
 0x3fe   : > { %2545 = vrot.lane.b32.xlu0 %v9020_v13, %s8019_s12  ;;  %v2412_v0 = vrot.slane %v9106_v22, 4  ;;  %s8035_s12 = smov 83  }
 0x3ff   : > { %2888 = vperm.xlu1 %7649, %v7205_v16   ;;  %v2283_v46 = vsel %vm797_vm5, %v9104_v26, %v11212_v37 }
 0x400   : > { %2302 = vst.msk [vmem:[#allocation3 + $0x48] sm:$0xff] %vm8515_vm1, %v2283_v46  ;;  %v9120_v20 = vpop.permute.xlu0 %2190 }
 0x401   : > { %v9122_v12 = vpop.permute.xlu1 %2741  ;;  %v11207_v21 = vrot.slane %v9120_v20, 4 }
 0x402   : > { %2465 = vrot.lane.b32.xlu0 %v8945_v18, %s8013_s13 }
 0x403   : > { %2878 = vperm.xlu1 %7649, %v7203_v47   ;;  %v2215_v23 = vsel %vm2213_vm12, %v9120_v20, %v11207_v21 }
 0x404   : > { %2234 = vst.msk [vmem:[#allocation3 + $0x8] sm:$0xff] %vm8515_vm1, %v2215_v23  ;;  %v2672_v24 = vpop.permute.xlu0 %2671 }
 0x405   : > { %v9133_v27 = vpop.permute.xlu1 %2329  ;;  %v2686_v32 = vrot.slane %v2672_v24, 4 }
 0x406   : > { %2477 = vrot.lane.b32.xlu0 %v9020_v13, %s8013_s13 }
 0x407   : > { %v2695_v35 = vsel %vm1211_vm8, %v2672_v24, %v2686_v32  ;;  %v2693_v46 = vsel %vm240_vm0, %v2685_v6, %v2686_v32 }
 0x408   : > { %2714 = vst.msk [vmem:[#allocation3 + $0x1c8] sm:$0xff] %vm8515_vm1, %v2695_v35  ;;  %v9143_v63 = vpop.permute.xlu0 %2602 }
 0x409   : > { %v9145_v58 = vpop.permute.xlu1 %2261  ;;  %v11206_v38 = vrot.slane %v9143_v63, 4 }
 0x40a   : > { %2469 = vrot.lane.b32.xlu0 %v8983_v60, %s8013_s13 }
 0x40b   : > { %v2627_v31 = vsel %vm2625_vm13, %v9143_v63, %v11206_v38 }
 0x40c   : > { %2646 = vst.msk [vmem:[#allocation3 + $0x188] sm:$0xff] %vm8515_vm1, %v2627_v31  ;;  %v9159_v41 = vpop.permute.xlu0 %2400  ;;  %v9223_v31 = vsel %vm1211_vm8, %v9074_v45, %v2693_v46 }
 0x40d   : > { %v9161_v51 = vpop.permute.xlu1 %2192  ;;  %v2413_v43 = vrot.slane %v9159_v41, 4 }
 0x40e   : > { %2893 = vperm.xlu0 %7648, %v7206_v40  }
 0x40f   : > { %v2424_v36 = vsel %vm2419_vm6, %v9159_v41, %v2413_v43  ;;  %v2755_v41 = vrot.slane %v9122_v12, 4 }
 0x410   : > { %2442 = vst.msk [vmem:[#allocation3 + $0xd8] sm:$0xff] %vm8515_vm1, %v2424_v36  ;;  %v9173_v53 = vpop.permute.xlu0 %2743 }
 0x411   : > { %v2674_v54 = vpop.permute.xlu1 %2673  ;;  %v11220_v55 = vrot.slane %v9173_v53, 4 }
 0x412   : > { %2883 = vperm.xlu0 %7648, %v7204_v52   ;;  %v2687_v47 = vrot.slane %v2674_v54, 4 }
 0x413   : > { %v2767_v56 = vsel %vm2762_vm9, %v9173_v53, %v11220_v55  ;;  %v2753_v55 = vrot.slane %v9041_v2, 4 }
 0x414   : > { %2785 = vst.msk [vmem:[#allocation3 + $0x218] sm:$0xff] %vm8515_vm1, %v2767_v56  ;;  %v9182_v30 = vpop.permute.xlu0 %2331 }
 0x415   : > { %v9184_v18 = vpop.permute.xlu1 %2402  ;;  %v11218_v42 = vrot.slane %v9182_v30, 4 }
 0x416   : > { %v2414_v37 = vrot.slane %v9184_v18, 4 }
 0x417   : > { %v2355_v57 = vsel %vm2350_vm10, %v9182_v30, %v11218_v42 }
 0x418   : > { %2373 = vst.msk [vmem:[#allocation3 + $0x98] sm:$0xff] %vm8515_vm1, %v2355_v57  ;;  %v9193_v34 = vpop.permute.xlu0 %2263 }
 0x419   : > { %v9195_v59 = vpop.permute.xlu1 %2745  ;;  %v11215_v60 = vrot.slane %v9193_v34, 4 }
 0x41b   : > { %v2286_v61 = vsel %vm797_vm5, %v9193_v34, %v11215_v60 }
 0x41c   : > { %2304 = vst.msk [vmem:[#allocation3 + $0x58] sm:$0xff] %vm8515_vm1, %v2286_v61  ;;  %v9204_v44 = vpop.permute.xlu0 %2194 }
 0x41d   : > { %v9206_v62 = vpop.permute.xlu1 %2333  ;;  %v11208_v13 = vrot.slane %v9204_v44, 4 }
 0x41f   : > { %v2218_v9 = vsel %vm2213_vm12, %v9204_v44, %v11208_v13 }
 0x420   : > { %2236 = vst.msk [vmem:[#allocation3 + $0x18] sm:$0xff] %vm8515_vm1, %v2218_v9  ;;  %v2676_v15 = vpop.permute.xlu0 %2675 }
 0x421   : > { %v9216_v16 = vpop.permute.xlu1 %2265  ;;  %v2688_v23 = vrot.slane %v2676_v15, 4 }
 0x423   : > { %v2696_v24 = vsel %vm240_vm0, %v2687_v47, %v2688_v23  ;;  %v2698_v35 = vsel %vm1211_vm8, %v2676_v15, %v2688_v23 }
 0x424   : > { %v9226_v40 = vsel %vm1211_vm8, %v2674_v54, %v2696_v24  ;;  %2716 = vst.msk [vmem:[#allocation3 + $0x1d8] sm:$0xff] %vm8515_vm1, %v2698_v35  ;;  %v2405_v36 = vpop.permute.xlu0 %2404 }
 0x425   : > { %v9230_v52 = vpop.permute.xlu1 %2196  ;;  %v2415_v32 = vrot.slane %v2405_v36, 4 }
 0x427   : > { %v2427_v61 = vsel %vm2419_vm6, %v2405_v36, %v2415_v32 }
 0x428   : > { %2444 = vst.msk [vmem:[#allocation3 + $0xe8] sm:$0xff] %vm8515_vm1, %v2427_v61  ;;  %v2748_v45 = vpop.permute.xlu0 %2747 }
 0x429   : > { %v9239_v54 = vpop.permute.xlu1 %2677  ;;  %v2758_v6 = vrot.slane %v2748_v45, 4 }
 0x42b   : > { %v2770_v9 = vsel %vm2762_vm9, %v2748_v45, %v2758_v6 }
 0x42c   : > { %2787 = vst.msk [vmem:[#allocation3 + $0x228] sm:$0xff] %vm8515_vm1, %v2770_v9  ;;  %v9244_v15 = vpop.permute.xlu0 %2335 }
 0x42d   : > { %v9246_v46 = vpop.permute.xlu1 %2608  ;;  %v11217_v47 = vrot.slane %v9244_v15, 4 }
 0x42f   : > { %v2358_v23 = vsel %vm2350_vm10, %v9244_v15, %v11217_v47  ;;  %v2425_v47 = vsel %vm240_vm0, %v2414_v37, %v2415_v32  ;;  %v11271_v32 = vrot.slane %v9173_v53, 4 }
 0x430   : > { %2375 = vst.msk [vmem:[#allocation3 + $0xa8] sm:$0xff] %vm8515_vm1, %v2358_v23  ;;  %v9255_v24 = vpop.permute.xlu0 %2267  ;;  %v2426_v33 = vsel %vm2419_vm6, %v9184_v18, %v2425_v47 }
 0x431   : > { %v2407_v35 = vpop.permute.xlu1 %2406  ;;  %v11213_v36 = vrot.slane %v9255_v24, 4  ;;  %v2765_v19 = vsel %vm240_vm0, %v2755_v41, %v11271_v32 }
 0x432   : > { %v2416_v42 = vrot.slane %v2407_v35, 4  ;;  %v2766_v47 = vsel %vm2762_vm9, %v9122_v12, %v2765_v19 }
 0x433   : > { %v2289_v61 = vsel %vm797_vm5, %v9255_v24, %v11213_v36 }
 0x434   : > { %2306 = vst.msk [vmem:[#allocation3 + $0x68] sm:$0xff] %vm8515_vm1, %v2289_v61  ;;  %v9264_v45 = vpop.permute.xlu0 %2198 }
 0x435   : > { %v2750_v9 = vpop.permute.xlu1 %2749  ;;  %v11209_v57 = vrot.slane %v9264_v45, 4 }
 0x437   : > { %v2221_v23 = vsel %vm2213_vm12, %v9264_v45, %v11209_v57 }
 0x438   : > { %2238 = vst.msk [vmem:[#allocation3 + $0x28] sm:$0xff] %vm8515_vm1, %v2221_v23  ;;  %v9273_v38 = vpop.permute.xlu0 %2679 }
 0x439   : > { %v9275_v56 = vpop.permute.xlu1 %2337  ;;  %v11214_v21 = vrot.slane %v9273_v38, 4 }
 0x43b   : > { %v2701_v61 = vsel %vm1211_vm8, %v9273_v38, %v11214_v21  ;;  %v2422_v21 = vsel %vm240_vm0, %v2412_v0, %v2413_v43  ;;  %v2757_v0 = vrot.slane %v9195_v59, 4  ;;  %v2418_v43 = vsel %vm240_vm0, %v2410_v14, %v2411_v4 }
 0x43c   : > { %2718 = vst.msk [vmem:[#allocation3 + $0x1e8] sm:$0xff] %vm8515_vm1, %v2701_v61  ;;  %v9284_v13 = vpop.permute.xlu0 %2610  ;;  %v2420_v53 = vsel %vm2419_vm6, %v9037_v1, %v2418_v43 }
 0x43d   : > { %v9286_v57 = vpop.permute.xlu1 %2604  ;;  %v11221_v23 = vrot.slane %v9284_v13, 4  ;;  %v2768_v17 = vsel %vm240_vm0, %v2757_v0, %v2758_v6  ;;  %v2343_v6 = vrot.slane %v9133_v27, 4  ;;  %v11273_v0 = vrot.slane %v9182_v30, 4 }
 0x43e   : > { %v2347_v30 = vrot.slane %v9275_v56, 4 }
 0x43f   : > { %v2633_v36 = vsel %vm2625_vm13, %v9284_v13, %v11221_v23  ;;  %v2341_v23 = vrot.slane %v9047_v29, 4  ;;  %v2353_v1 = vsel %vm240_vm0, %v2343_v6, %v11273_v0  ;;  %v9373_v6 = vld [vmem:[#allocation4 + $0x38] ss:$12 sps:$4 sm:$0xff]  }
 0x440   : > { %2650 = vst.msk [vmem:[#allocation3 + $0x1a8] sm:$0xff] %vm8515_vm1, %v2633_v36  ;;  %v2409_v61 = vpop.permute.xlu0 %2408  ;;  %v2423_v36 = vsel %vm2419_vm6, %v9106_v22, %v2422_v21  ;;  %v2759_v22 = vrot.slane %v2750_v9, 4 }
 0x441   : > { %v9300_v60 = vpop.permute.xlu1 %2269  ;;  %v2417_v8 = vrot.slane %v2409_v61, 4 }
 0x443   : > { %v2428_v39 = vsel %vm240_vm0, %v2416_v42, %v2417_v8  ;;  %v2430_v37 = vsel %vm2419_vm6, %v2409_v61, %v2417_v8  ;;  %v11272_v61 = vrot.slane %v9072_v7, 4  ;;  %v2769_v7 = vsel %vm2762_vm9, %v9195_v59, %v2768_v17 }
 0x444   : > { %v2429_v5 = vsel %vm2419_vm6, %v2407_v35, %v2428_v39  ;;  %2446 = vst.msk [vmem:[#allocation3 + $0xf8] sm:$0xff] %vm8515_vm1, %v2430_v37  ;;  %v2752_v4 = vpop.permute.xlu0 %2751  ;;  %v2345_v39 = vrot.slane %v9206_v62, 4  ;;  %v7237_v59 = vcombine.low %v2420_v53, %v2423_v36  ;;  %vm3875_vm6 = vcmask 826368  }
 0x445   : > { %v9324_v14 = vpop.permute.xlu1 %2200  ;;  %v2760_v21 = vrot.slane %v2752_v4, 4  ;;  %v7242_v8 = vcombine.high %v2426_v33, %v2429_v5  ;;  %v7241_v42 = vcombine.low %v2426_v33, %v2429_v5  ;;  %v2761_v18 = vsel %vm240_vm0, %v2753_v55, %v11272_v61 }
 0x446   : > { %v7238_v33 = vcombine.high %v2420_v53, %v2423_v36  ;;  %v11274_v55 = vrot.slane %v9244_v15, 4  ;;  %v2763_v17 = vsel %vm2762_vm9, %v9041_v2, %v2761_v18  ;;  %v11275_v15 = vrot.slane %v9087_v10, 4 }
 0x447   : > { %v2771_v35 = vsel %vm240_vm0, %v2759_v22, %v2760_v21  ;;  %v2773_v41 = vsel %vm2762_vm9, %v2752_v4, %v2760_v21  ;;  %3292 = vmatprep.subr.bf16.mxu1 %v7242_v8  ;;  %v7278_v8 = vcombine.high %v2763_v17, %v2766_v47  ;;  %v7277_v18 = vcombine.low %v2763_v17, %v2766_v47 }
 0x448   : > { %v2356_v43 = vsel %vm240_vm0, %v2345_v39, %v11274_v55  ;;  %v2772_v37 = vsel %vm2762_vm9, %v2750_v9, %v2771_v35  ;;  %2789 = vst.msk [vmem:[#allocation3 + $0x238] sm:$0xff] %vm8515_vm1, %v2773_v41  ;;  %v2340_v19 = vpop.permute.xlu0 %2339  ;;  %3293 = vmatpush1.bf16.msra.mxu1 %v7241_v42  ;;  %v2349_v9 = vsel %vm240_vm0, %v2341_v23, %v11275_v15  ;;  %v2277_v39 = vrot.slane %v9216_v16, 4 }
 0x449   : > { %v9348_v12 = vpop.permute.xlu1 %2681  ;;  %v2348_v32 = vrot.slane %v2340_v19, 4  ;;  %3294 = vmatprep.subr.bf16.mxu1 %v7238_v33  ;;  %v7282_v5 = vcombine.high %v2769_v7, %v2772_v37  ;;  %v7281_v4 = vcombine.low %v2769_v7, %v2772_v37  ;;  %v2354_v42 = vsel %vm2350_vm10, %v9133_v27, %v2353_v1 }
 0x44a   : > { %v2357_v61 = vsel %vm2350_vm10, %v9206_v62, %v2356_v43  ;;  %v2351_v62 = vsel %vm2350_vm10, %v9047_v29, %v2349_v9  ;;  %v2273_v1 = vrot.slane %v9053_v3, 4  ;;  %v11276_v7 = vrot.slane %v9193_v34, 4  ;;  %v7715_v9 = vld [vmem:[#allocation3 + $0xcc] ss:$16 sps:$4 sm:$0xff]  }
 0x44b   : > { %v2359_v22 = vsel %vm240_vm0, %v2347_v30, %v2348_v32  ;;  %v2361_v21 = vsel %vm2350_vm10, %v2340_v19, %v2348_v32  ;;  %3357 = vmatprep.subr.bf16.mxu0 %v7282_v5  ;;  %v7230_v41 = vcombine.high %v2351_v62, %v2354_v42  ;;  %v2830_v33 = vld [vmem:[#allocation3 + $0xf8] sm:$0xff]  ;;  %v11277_v43 = vrot.slane %v9255_v24, 4  ;;  %v2828_v32 = vld [vmem:[#allocation3 + $0xe8] sm:$0xff] }
 0x44c   : > { %v2360_v2 = vsel %vm2350_vm10, %v9275_v56, %v2359_v22  ;;  %2377 = vst.msk [vmem:[#allocation3 + $0xb8] sm:$0xff] %vm8515_vm1, %v2361_v21  ;;  %v9366_v10 = vpop.permute.xlu0 %2606  ;;  %3295 = vmatpush1.bf16.msra.mxu1 %v7237_v59  ;;  %3358 = vmatpush1.bf16.msra.mxu0 %v7281_v4  ;;  %v2275_v56 = vrot.slane %v9145_v58, 4  ;;  %v7712_v0 = vld [vmem:[#allocation3 + $0xec] ss:$16 sps:$4 sm:$0xff]   ;;  %v2279_v19 = vrot.slane %v9300_v60, 4  ;;  %v7229_v5 = vcombine.low %v2351_v62, %v2354_v42 }
 0x44d   : > { %v9368_v23 = vpop.permute.xlu1 %2612  ;;  %v2619_v36 = vrot.slane %v9366_v10, 4  ;;  %3359 = vmatprep.subr.bf16.mxu0 %v7278_v8  ;;  %v7234_v53 = vcombine.high %v2357_v61, %v2360_v2  ;;  %v7233_v27 = vcombine.low %v2357_v61, %v2360_v2  ;;  %v2287_v37 = vsel %vm240_vm0, %v2277_v39, %v11277_v43  ;;  %v2826_v24 = vld [vmem:[#allocation3 + $0xd8] sm:$0xff]  ;;  %v2824_v2 = vld [vmem:[#allocation3 + $0xc8] sm:$0xff] }
 0x44e   : > { %v2284_v55 = vsel %vm240_vm0, %v2275_v56, %v11276_v7  ;;  %v7243_v4 = vcombine.low %v2828_v32, %v2830_v33  ;;  %v11278_v17 = vrot.slane %v9104_v26, 4  ;;  %v2288_v21 = vsel %vm797_vm5, %v9216_v16, %v2287_v37  ;;  %v9416_v62 = vld [vmem:[#allocation4 + $0x50] ss:$12 sps:$4 sm:$0xff]  }
 0x44f   : > { %v2630_v35 = vsel %vm2625_vm13, %v9366_v10, %v2619_v36  ;;  %3296 = vmatprep.subr.bf16.mxu1 %v7234_v53  ;;  %v2285_v22 = vsel %vm797_vm5, %v9145_v58, %v2284_v55  ;;  %v11279_v16 = vmov 0   ;;  %v2208_v56 = vrot.slane %v9230_v52, 4 }
 0x450   : > { %2648 = vst.msk [vmem:[#allocation3 + $0x198] sm:$0xff] %vm8515_vm1, %v2630_v35  ;;  %v2272_v29 = vpop.permute.xlu0 %2271  ;;  %3297 = vmatpush1.bf16.msra.mxu1 %v7233_v27  ;;  %3360 = vmatpush1.bf16.msra.mxu0 %v7277_v18  ;;  %v2281_v59 = vsel %vm240_vm0, %v2273_v1, %v11278_v17  ;;  %v7239_v27 = vcombine.low %v2824_v2, %v2826_v24  ;;  %v2206_v18 = vrot.slane %v9161_v51, 4  ;;  %v11280_v1 = vrot.slane %v9204_v44, 4 }
 0x451   : > { %v9384_v47 = vpop.permute.xlu1 %2539  ;;  %v2280_v30 = vrot.slane %v2272_v29, 4  ;;  %3298 = vmatprep.subr.bf16.mxu1 %v7230_v41  ;;  %3398 = vmatprep.subr.bf16.mxu0 %v7712_v0  ;;  %v2204_v0 = vrot.slane %v9060_v25, 4  ;;  %v11281_v7 = vrot.slane %v9264_v45, 4  ;;  %v2210_v43 = vrot.slane %v9324_v14, 4  ;;  %v2818_v45 = vld [vmem:[#allocation3 + $0x98] sm:$0xff] }
 0x452   : > { %vm4218_vm9 = vcmask 547840   ;;  %vm3806_vm10 = vcmask 973824  }
 0x453   : > { %v2290_v34 = vsel %vm240_vm0, %v2279_v19, %v2280_v30  ;;  %v2292_v15 = vsel %vm797_vm5, %v2272_v29, %v2280_v30  ;;  %7285 = vmatmul.mubr.msk.bf16.vlgmr.msra.gmra.mxu0 %vm1802_vm4, %v9373_v6  ;;  %v2822_v41 = vld [vmem:[#allocation3 + $0xb8] sm:$0xff]  ;;  %v2216_v29 = vsel %vm240_vm0, %v2206_v18, %v11280_v1  ;;  %v2219_v55 = vsel %vm240_vm0, %v2208_v56, %v11281_v7  ;;  %v2820_v19 = vld [vmem:[#allocation3 + $0xa8] sm:$0xff] }
 0x454   : > { %v2291_v26 = vsel %vm797_vm5, %v9300_v60, %v2290_v34  ;;  %2308 = vst.msk [vmem:[#allocation3 + $0x78] sm:$0xff] %vm8515_vm1, %v2292_v15  ;;  %v9408_v8 = vpop.permute.xlu0 %2541  ;;  %3299 = vmatpush1.bf16.msra.mxu1 %v7229_v5  ;;  %3399 = vmatpush1.bf16.msra.mxu0 %v7243_v4  ;;  %v2282_v60 = vsel %vm797_vm5, %v9053_v3, %v2281_v59  ;;  %v7717_v33 = vld [vmem:[#allocation3 + $0xac] ss:$16 sps:$4 sm:$0xff]   ;;  %v11282_v5 = vrot.slane %v9120_v20, 4  ;;  %v2691_v56 = vrot.slane %v9348_v12, 4 }
 0x455   : > { %v2552_v42 = vrot.slane %v9408_v8, 4  ;;  %v9411_v61 = vpop.permute.xlu1 %2543  ;;  %3400 = vmatprep.subr.bf16.mxu0 %v7715_v9  ;;  %v7226_v58 = vcombine.high %v2288_v21, %v2291_v26  ;;  %v7225_v53 = vcombine.low %v2288_v21, %v2291_v26  ;;  %3387 = vmatprep.mubr.bf16.mxu0 %v11279_v16  ;;  %v7222_v35 = vcombine.high %v2282_v60, %v2285_v22  ;;  %v7719_v34 = vld [vmem:[#allocation3 + $0x8c] ss:$16 sps:$4 sm:$0xff]  }
 0x456   : > { %v7221_v30 = vcombine.low %v2282_v60, %v2285_v22  ;;  %v7235_v32 = vcombine.low %v2820_v19, %v2822_v41  ;;  %v2212_v4 = vsel %vm240_vm0, %v2204_v0, %v11282_v5  ;;  %v2217_v15 = vsel %vm2213_vm12, %v9161_v51, %v2216_v29  ;;  %v2816_v21 = vld [vmem:[#allocation3 + $0x88] sm:$0xff]  ;;  %v2810_v29 = vld [vmem:[#allocation3 + $0x58] sm:$0xff] }
 0x457   : > { %v2564_v39 = vsel %vm2556_vm2, %v9408_v8, %v2552_v42  ;;  %3300 = vmatprep.subr.bf16.mxu1 %v7226_v58  ;;  %v2220_v24 = vsel %vm2213_vm12, %v9230_v52, %v2219_v55  ;;  %v2214_v51 = vsel %vm2213_vm12, %v9060_v25, %v2212_v4  ;;  %v7231_v52 = vcombine.low %v2816_v21, %v2818_v45  ;;  %v2812_v41 = vld [vmem:[#allocation3 + $0x68] sm:$0xff] }
 0x458   : > { %2581 = vst.msk [vmem:[#allocation3 + $0x168] sm:$0xff] %vm8515_vm1, %v2564_v39  ;;  %v2203_v3 = vpop.permute.xlu0 %2202  ;;  %3301 = vmatpush1.bf16.msra.mxu1 %v7225_v53  ;;  %3401 = vmatpush1.bf16.msra.mxu0 %v7239_v27  ;;  %v7214_v53 = vcombine.high %v2214_v51, %v2217_v15  ;;  %v11283_v25 = vrot.slane %v9273_v38, 4  ;;  %v7723_v7 = vld [vmem:[#allocation3 + $0x4c] ss:$16 sps:$4 sm:$0xff]   ;;  %v2620_v4 = vrot.slane %v9246_v46, 4 }
 0x459   : > { %v2211_v37 = vrot.slane %v2203_v3, 4  ;;  %3302 = vmatprep.subr.bf16.mxu1 %v7222_v35  ;;  %3402 = vmatprep.subr.bf16.mxu0 %v7717_v33  ;;  %v9439_v59 = vpop.permute.xlu1 %2531  ;;  %v7213_v33 = vcombine.low %v2214_v51, %v2217_v15  ;;  %v2808_v19 = vld [vmem:[#allocation3 + $0x48] sm:$0xff]  ;;  %v11285_v51 = vcombine.high %v9223_v31, %v9226_v40 }
 0x45a   : > { %v7223_v5 = vcombine.low %v2808_v19, %v2810_v29 }
 0x45b   : > { %v2222_v44 = vsel %vm240_vm0, %v2210_v43, %v2211_v37  ;;  %v2224_v17 = vsel %vm2213_vm12, %v2203_v3, %v2211_v37  ;;  %7286 = vmatmul.mubr.msk.bf16.gmra.mxu0 %vm1802_vm4, %v9416_v62  ;;  %v2814_v60 = vld [vmem:[#allocation3 + $0x78] sm:$0xff] }
 0x45c   : > { %v2223_v20 = vsel %vm2213_vm12, %v9324_v14, %v2222_v44  ;;  %2240 = vst.msk [vmem:[#allocation3 + $0x38] sm:$0xff] %vm8515_vm1, %v2224_v17  ;;  %v9451_v9 = vpop.permute.xlu0 %2533  ;;  %3303 = vmatpush1.bf16.msra.mxu1 %v7221_v30  ;;  %3403 = vmatpush1.bf16.msra.mxu0 %v7235_v32  ;;  %v2689_v14 = vrot.slane %v9239_v54, 4  ;;  %v7721_v27 = vld [vmem:[#allocation3 + $0x6c] ss:$16 sps:$4 sm:$0xff]   ;;  %v7227_v0 = vcombine.low %v2812_v41, %v2814_v60  ;;  %vm3669_vm12 = vcmask 1039360  }
 0x45d   : > { %v2548_v22 = vrot.slane %v9451_v9, 4  ;;  %3404 = vmatprep.subr.bf16.mxu0 %v7719_v34  ;;  %v7218_v26 = vcombine.high %v2220_v24, %v2223_v20  ;;  %v7217_v2 = vcombine.low %v2220_v24, %v2223_v20  ;;  %3430 = vmatprep.mubr.bf16.mxu0 %v9135_v28  ;;  %v9468_v39 = vpop.permute.xlu1 %2535  ;;  %v2616_v34 = vrot.slane %v9089_v11, 4  ;;  %v2802_v60 = vld [vmem:[#allocation3 + $0x18] sm:$0xff]  ;;  %v2800_v41 = vld [vmem:[#allocation3 + $0x8] sm:$0xff] }
 0x45e   : > { %v2699_v28 = vsel %vm240_vm0, %v2689_v14, %v11283_v25  ;;  %v11284_v24 = vrot.slane %v9284_v13, 4 }
 0x45f   : > { %v2558_v58 = vsel %vm2556_vm2, %v9451_v9, %v2548_v22  ;;  %3304 = vmatprep.subr.bf16.mxu1 %v7218_v26  ;;  %v2700_v38 = vsel %vm1211_vm8, %v9239_v54, %v2699_v28  ;;  %v2618_v54 = vrot.slane %v9286_v57, 4  ;;  %v2622_v26 = vrot.slane %v9368_v23, 4 }
 0x460   : > { %2577 = vst.msk [vmem:[#allocation3 + $0x148] sm:$0xff] %vm8515_vm1, %v2558_v58  ;;  %v2684_v18 = vpop.permute.xlu0 %2683  ;;  %3305 = vmatpush1.bf16.msra.mxu1 %v7217_v2  ;;  %3405 = vmatpush1.bf16.msra.mxu0 %v7231_v52  ;;  %v2631_v20 = vsel %vm240_vm0, %v2620_v4, %v11284_v24  ;;  %v2804_v52 = vld [vmem:[#allocation3 + $0x28] sm:$0xff]  ;;  %v11286_v58 = vrot.slane %v9143_v63, 4  ;;  %v11287_v28 = vcombine.low %v9223_v31, %v9226_v40 }
 0x461   : > { %v2692_v35 = vrot.slane %v2684_v18, 4  ;;  %3306 = vmatprep.subr.bf16.mxu1 %v7214_v53  ;;  %3406 = vmatprep.subr.bf16.mxu0 %v7721_v27  ;;  %v9483_v44 = vpop.permute.xlu1 %2471  ;;  %v2628_v21 = vsel %vm240_vm0, %v2618_v54, %v2619_v36  ;;  %v7727_v36 = vld [vmem:[#allocation3 + $0xc] ss:$16 sps:$4 sm:$0xff]   ;;  %v2632_v27 = vsel %vm2625_vm13, %v9246_v46, %v2631_v20 }
 0x462   : > { %v2624_v13 = vsel %vm240_vm0, %v2616_v34, %v11286_v58  ;;  %v2483_v20 = vrot.slane %v9483_v44, 4 }
 0x463   : > { %v2702_v3 = vsel %vm240_vm0, %v2691_v56, %v2692_v35  ;;  %v2704_v1 = vsel %vm1211_vm8, %v2684_v18, %v2692_v35  ;;  %v2806_v17 = vld [vmem:[#allocation3 + $0x38] sm:$0xff]  ;;  %v2629_v18 = vsel %vm2625_vm13, %v9286_v57, %v2628_v21  ;;  %v2626_v57 = vsel %vm2625_vm13, %v9089_v11, %v2624_v13 }
 0x464   : > { %v2703_v55 = vsel %vm1211_vm8, %v9348_v12, %v2702_v3  ;;  %2720 = vst.msk [vmem:[#allocation3 + $0x1f8] sm:$0xff] %vm8515_vm1, %v2704_v1  ;;  %v9478_v43 = vpop.permute.xlu0 %2537  ;;  %3307 = vmatpush1.bf16.msra.mxu1 %v7213_v33  ;;  %3407 = vmatpush1.bf16.msra.mxu0 %v7227_v0  ;;  %v7725_v45 = vld [vmem:[#allocation3 + $0x2c] ss:$16 sps:$4 sm:$0xff]   ;;  %v7219_v14 = vcombine.low %v2804_v52, %v2806_v17  ;;  %v2551_v0 = vrot.slane %v9384_v47, 4  ;;  %v2549_v3 = vrot.slane %v9468_v39, 4 }
 0x465   : > { %v2550_v37 = vrot.slane %v9478_v43, 4  ;;  %3408 = vmatprep.subr.bf16.mxu0 %v7723_v7  ;;  %v7274_v30 = vcombine.high %v2700_v38, %v2703_v55  ;;  %v7273_v32 = vcombine.low %v2700_v38, %v2703_v55  ;;  %v9516_v56 = vpop.permute.xlu1 %2475  ;;  %v7262_v31 = vcombine.high %v2626_v57, %v2629_v18 }
 0x466   : > { %v2553_v7 = vrot.slane %v9411_v61, 4  ;;  %v2562_v11 = vsel %vm240_vm0, %v2551_v0, %v2552_v42  ;;  %v2547_v55 = vrot.slane %v9439_v59, 4  ;;  %v7731_v42 = vld [vmem:[#allocation3 + $0x1cc] ss:$16 sps:$4 sm:$0xff]  }
 0x467   : > { %v2561_v12 = vsel %vm2556_vm2, %v9478_v43, %v2550_v37  ;;  %3308 = vmatprep.subr.bf16.mxu1 %v7274_v30  ;;  %v2559_v43 = vsel %vm240_vm0, %v2549_v3, %v2550_v37  ;;  %v2860_v30 = vld [vmem:[#allocation3 + $0x1e8] sm:$0xff]  ;;  %v2563_v17 = vsel %vm2556_vm2, %v9384_v47, %v2562_v11 }
 0x468   : > { %2579 = vst.msk [vmem:[#allocation3 + $0x158] sm:$0xff] %vm8515_vm1, %v2561_v12  ;;  %v2615_v15 = vpop.permute.xlu0 %2614  ;;  %3309 = vmatpush2.bf16.msra.mxu1 %v7273_v32  ;;  %3409 = vmatpush1.bf16.msra.mxu0 %v7223_v5  ;;  %v7261_v32 = vcombine.low %v2626_v57, %v2629_v18  ;;  %v2555_v4 = vsel %vm240_vm0, %v2547_v55, %v2548_v22  ;;  %v7733_v47 = vld [vmem:[#allocation3 + $0x1c8] ss:$16 sps:$4 sm:$0xff]  }
 0x469   : > { %v2623_v2 = vrot.slane %v2615_v15, 4  ;;  %3310 = vmatprep.subr.bf16.mxu1 %v11285_v51  ;;  %3410 = vmatprep.subr.bf16.mxu0 %v7725_v45  ;;  %v2464_v54 = vpop.permute.xlu1 %2463  ;;  %v2560_v37 = vsel %vm2556_vm2, %v9468_v39, %v2559_v43  ;;  %v2557_v24 = vsel %vm2556_vm2, %v9439_v59, %v2555_v4  ;;  %v7761_v11 = vld [vmem:[#allocation4 + $0x4c] ss:$12 sps:$4 sm:$0xff]  }
 0x46a   : > { %v2479_v13 = vrot.slane %v2464_v54, 4  ;;  %v7755_v43 = vld [vmem:[#allocation3 + $0x20c] ss:$16 sps:$4 sm:$0xff]  }
 0x46b   : > { %v2634_v53 = vsel %vm240_vm0, %v2622_v26, %v2623_v2  ;;  %v2636_v10 = vsel %vm2625_vm13, %v2615_v15, %v2623_v2  ;;  %v2862_v40 = vld [vmem:[#allocation3 + $0x1f8] sm:$0xff]  ;;  %v2485_v2 = vrot.slane %v9516_v56, 4 }
 0x46c   : > { %v2635_v25 = vsel %vm2625_vm13, %v9368_v23, %v2634_v53  ;;  %2652 = vst.msk [vmem:[#allocation3 + $0x1b8] sm:$0xff] %vm8515_vm1, %v2636_v10  ;;  %v2474_v63 = vpop.permute.xlu0 %2473  ;;  %3311 = vmatpush2.bf16.msra.mxu1 %v11287_v28  ;;  %3411 = vmatpush1.bf16.msra.mxu0 %v7219_v14  ;;  %v7215_v23 = vcombine.low %v2800_v41, %v2802_v60  ;;  %v7729_v29 = vld [vmem:[#allocation3 + $0x1ec] ss:$16 sps:$4 sm:$0xff]   ;;  %vm4081_vm13 = vcmask 613376  }
 0x46d   : > { %v2484_v35 = vrot.slane %v2474_v63, 4  ;;  %3412 = vmatprep.subr.bf16.mxu0 %v7727_v36  ;;  %v7266_v46 = vcombine.high %v2632_v27, %v2635_v25  ;;  %v7265_v33 = vcombine.low %v2632_v27, %v2635_v25  ;;  %v7275_v5 = vcombine.low %v2860_v30, %v2862_v40  ;;  %v2468_v52 = vpop.permute.xlu1 %2467  ;;  %v7737_v60 = vld [vmem:[#allocation3 + $0x18c] ss:$16 sps:$4 sm:$0xff]   ;;  %v7758_v30 = vld [vmem:[#allocation3 + $0x208] ss:$16 sps:$4 sm:$0xff]  }
 0x46e   : > { %v7253_v14 = vcombine.low %v2557_v24, %v2560_v37  ;;  %v2481_v27 = vrot.slane %v2468_v52, 4 }
 0x46f   : > { %v2495_v1 = vsel %vm1004_vm11, %v2474_v63, %v2484_v35  ;;  %3312 = vmatprep.subr.bf16.mxu1 %v7266_v46  ;;  %v2493_v51 = vsel %vm240_vm0, %v2483_v20, %v2484_v35  ;;  %v7739_v46 = vld [vmem:[#allocation3 + $0x188] ss:$16 sps:$4 sm:$0xff]   ;;  %v7743_v40 = vld [vmem:[#allocation3 + $0x14c] ss:$16 sps:$4 sm:$0xff]  }
 0x470   : > { %2512 = vst.msk [vmem:[#allocation3 + $0x128] sm:$0xff] %vm8515_vm1, %v2495_v1  ;;  %v2546_v38 = vpop.permute.xlu0 %2545  ;;  %3313 = vmatpush2.bf16.msra.mxu1 %v7265_v33  ;;  %3413 = vmatpush1.bf16.msra.mxu0 %v7215_v23  ;;  %v2494_v36 = vsel %vm1004_vm11, %v9483_v44, %v2493_v51 }
 0x471   : > { %v2554_v19 = vrot.slane %v2546_v38, 4  ;;  %3314 = vmatprep.subr.bf16.mxu1 %v7262_v31  ;;  %3414 = vmatprep.subr.bf16.mxu0 %v7729_v29  ;;  %v7747_v31 = vld [vmem:[#allocation4 + $0x30] ss:$12 sps:$4 sm:$0xff]  }
 0x472   : > { %v7745_v29 = vld [vmem:[#allocation3 + $0x22c] ss:$16 sps:$4 sm:$0xff]  }
 0x473   : > { %v2565_v12 = vsel %vm240_vm0, %v2553_v7, %v2554_v19  ;;  %v2567_v8 = vsel %vm2556_vm2, %v2546_v38, %v2554_v19  ;;  %v7734_v21 = vld [vmem:[#allocation3 + $0x1ac] ss:$16 sps:$4 sm:$0xff]   ;;  %v7736_v58 = vld [vmem:[#allocation3 + $0x1a8] ss:$16 sps:$4 sm:$0xff]  }
 0x474   : > { %v2566_v45 = vsel %vm2556_vm2, %v9411_v61, %v2565_v12  ;;  %2583 = vst.msk [vmem:[#allocation3 + $0x178] sm:$0xff] %vm8515_vm1, %v2567_v8  ;;  %v2466_v9 = vpop.permute.xlu0 %2465  ;;  %3315 = vmatpush2.bf16.msra.mxu1 %v7261_v32  ;;  %3415 = vmatpush2.bf16.msra.mxu0 %v7275_v5  ;;  %v7254_v61 = vcombine.high %v2557_v24, %v2560_v37  ;;  %v7751_v7 = vld [vmem:[#allocation3 + $0x148] ss:$16 sps:$4 sm:$0xff]   ;;  %vm4012_vm2 = vcmask 760832  }
 0x475   : > { %v2480_v22 = vrot.slane %v2466_v9, 4  ;;  %3416 = vmatprep.subr.bf16.mxu0 %v7731_v42  ;;  %v7258_v34 = vcombine.high %v2563_v17, %v2566_v45  ;;  %v7257_v15 = vcombine.low %v2563_v17, %v2566_v45  ;;  %v7752_v38 = vld [vmem:[#allocation3 + $0x228] ss:$16 sps:$4 sm:$0xff]  }
 0x476   : > { %v7763_v5 = vld [vmem:[#allocation4 + $0x48] ss:$12 sps:$4 sm:$0xff]  }
 0x477   : > { %v2489_v39 = vsel %vm1004_vm11, %v2466_v9, %v2480_v22  ;;  %3316 = vmatprep.subr.bf16.mxu1 %v7258_v34  ;;  %v2487_v63 = vsel %vm240_vm0, %v2479_v13, %v2480_v22 }
 0x478   : > { %2508 = vst.msk [vmem:[#allocation3 + $0x108] sm:$0xff] %vm8515_vm1, %v2489_v39  ;;  %v2478_v26 = vpop.permute.xlu0 %2477  ;;  %3317 = vmatpush2.bf16.msra.mxu1 %v7257_v15  ;;  %3417 = vmatpush2.bf16.msra.mxu0 %v7733_v47 }
 0x479   : > { %v2486_v59 = vrot.slane %v2478_v26, 4  ;;  %3318 = vmatprep.subr.bf16.mxu1 %v7254_v61  ;;  %3418 = vmatprep.subr.bf16.mxu0 %v7734_v21 }
 0x47a   : > { %v9574_v42 = vpop.permute.xlu1 %2888 }
 0x47b   : > { %v2496_v53 = vsel %vm240_vm0, %v2485_v2, %v2486_v59  ;;  %v2498_v10 = vsel %vm1004_vm11, %v2478_v26, %v2486_v59  ;;  %v7740_v57 = vld [vmem:[#allocation3 + $0x16c] ss:$16 sps:$4 sm:$0xff]   ;;  %v7742_v1 = vld [vmem:[#allocation3 + $0x168] ss:$16 sps:$4 sm:$0xff]  }
 0x47c   : > { %v2497_v18 = vsel %vm1004_vm11, %v9516_v56, %v2496_v53  ;;  %2514 = vst.msk [vmem:[#allocation3 + $0x138] sm:$0xff] %vm8515_vm1, %v2498_v10  ;;  %v2470_v25 = vpop.permute.xlu0 %2469  ;;  %3319 = vmatpush2.bf16.msra.mxu1 %v7253_v14  ;;  %3419 = vmatpush2.bf16.msra.mxu0 %v7736_v58  ;;  %v2488_v56 = vsel %vm1004_vm11, %v2464_v54, %v2487_v63 }
 0x47d   : > { %v2482_v28 = vrot.slane %v2470_v25, 4  ;;  %3420 = vmatprep.subr.bf16.mxu0 %v7737_v60  ;;  %v7250_v35 = vcombine.high %v2494_v36, %v2497_v18  ;;  %v7249_v41 = vcombine.low %v2494_v36, %v2497_v18 }
 0x47e   : > { %v2879_v9 = vpop.permute.xlu1 %2878 }
 0x47f   : > { %v2490_v33 = vsel %vm240_vm0, %v2481_v27, %v2482_v28  ;;  %v2492_v44 = vsel %vm1004_vm11, %v2470_v25, %v2482_v28  ;;  %3320 = vmatprep.subr.bf16.mxu1 %v7250_v35 }
 0x480   : > { %v2491_v23 = vsel %vm1004_vm11, %v2468_v52, %v2490_v33  ;;  %2510 = vst.msk [vmem:[#allocation3 + $0x118] sm:$0xff] %vm8515_vm1, %v2492_v44  ;;  %3321 = vmatpush2.bf16.msra.mxu1 %v7249_v41  ;;  %3421 = vmatpush2.bf16.msra.mxu0 %v7739_v46 }
 0x481   : > { %3422 = vmatprep.subr.bf16.mxu0 %v7740_v57  ;;  %v7246_v0 = vcombine.high %v2488_v56, %v2491_v23  ;;  %v7245_v3 = vcombine.low %v2488_v56, %v2491_v23 }
 0x483   : > { %3322 = vmatprep.subr.bf16.mxu1 %v7246_v0  ;;  %v7753_v55 = vld [vmem:[#allocation3 + $0x12c] ss:$16 sps:$4 sm:$0xff]   ;;  %v7757_v19 = vld [vmem:[#allocation3 + $0x128] ss:$16 sps:$4 sm:$0xff]  }
 0x484   : > { %3323 = vmatpush2.bf16.msra.mxu1 %v7245_v3  ;;  %3423 = vmatpush2.bf16.msra.mxu0 %v7742_v1 }
 0x485   : > { %3424 = vmatprep.subr.bf16.mxu0 %v7743_v40  ;;  %3463 = vmatprep.subr.bf16.mxu1 %v7745_v29 }
 0x487   : > { %3325 = vmatmul.mubr.bf16.vlgmr.msra.gmra.mxu1 %v7747_v31  ;;  %v7759_v32 = vld [vmem:[#allocation3 + $0x10c] ss:$16 sps:$4 sm:$0xff]   ;;  %v7764_v4 = vld [vmem:[#allocation3 + $0x108] ss:$16 sps:$4 sm:$0xff]  }
 0x488   : > { %3425 = vmatpush2.bf16.msra.mxu0 %v7751_v7  ;;  %3464 = vmatpush1.bf16.msra.mxu1 %v7752_v38 }
 0x489   : > { %3426 = vmatprep.subr.bf16.mxu0 %v7753_v55  ;;  %3465 = vmatprep.subr.bf16.mxu1 %v7755_v43  ;;  %v9576_v37 = vpop.permute.xlu0 %2893 }
 0x48a   : > { %3334 = vmatprep.mubr.bf16.mxu1 %v7761_v11 }
 0x48c   : > { %3427 = vmatpush2.bf16.msra.mxu0 %v7757_v19  ;;  %3466 = vmatpush1.bf16.msra.mxu1 %v7758_v30 }
 0x48d   : > { %3428 = vmatprep.subr.bf16.mxu0 %v7759_v32  ;;  %v2884_v20 = vpop.permute.xlu0 %2883 }
 0x48f   : > { %3335 = vmatmul.mubr.bf16.gmra.mxu1 %v7763_v5 }
 0x490   : > { %3429 = vmatpush2.bf16.msra.mxu0 %v7764_v4  ;;  %3483 = vmatprep.mubr.bf16.mxu1 %v11279_v16 }
 0x493   : > { %3431 = vmatmul.mubr.bf16.vlgmr.msra.gmra.mxu0 %v7747_v31 }
 0x494   : > { %3440 = vmatprep.mubr.bf16.mxu0 %v7761_v11 }
 0x497   : > { %7287 = vmatmul.mubr.msk.bf16.vlgmr.msra.gmra.mxu1 %vm1802_vm4, %v9373_v6 }
 0x498   : > { %3493 = vmatprep.mubr.bf16.mxu1 %v11279_v16 }
 0x49b   : > { %3441 = vmatmul.mubr.bf16.gmra.mxu0 %v7763_v5 }
 0x49c   : > { %4833 = vmatprep.mubr.bf16.mxu0 %v11279_v16 }
 0x49f   : > { %7288 = vmatmul.mubr.msk.bf16.gmra.mxu1 %vm1802_vm4, %v9416_v62 }
 0x513   : > { %v3379_v54 = vpop.f32.mrf.mxu0 }
 0x515   : > { %v3381_v12 = vpop.f32.mrf.mxu0 }
 0x517   : > { %v3383_v8 = vpop.f32.mrf.mxu0 }
 0x519   : > { %v3385_v17 = vpop.f32.mrf.mxu0 }
 0x51b   : > { %v3389_v45 = vpop.f32.mrf.mxu0 }
 0x51d   : > { %v3391_v15 = vpop.f32.mrf.mxu0 }
 0x51f   : > { %v3393_v26 = vpop.f32.mrf.mxu0 }
 0x521   : > { %v3395_v36 = vpop.f32.mrf.mxu0 }
 0x547   : > { %v3326_v22 = vpop.f32.mrf.mxu1 }
 0x548   : > { %v3327_v6 = vadd.f32 %v3326_v22, %v2879_v9 }
 0x549   : > { %v3328_v34 = vpop.f32.mrf.mxu1 }
 0x54a   : > { %v3380_v24 = vadd.f32 %v3379_v54, %v3327_v6  ;;  %v3329_v47 = vadd.f32 %v3328_v34, %v2879_v9 }
 0x54b   : > { %v3330_v39 = vpop.f32.mrf.mxu1 }
 0x54c   : > { %v3504_v61 = vmax.f32 %v3380_v24, 0.0  ;;  %v3382_v62 = vadd.f32 %v3381_v12, %v3329_v47  ;;  %v3331_v21 = vadd.f32 %v3330_v39, %v2884_v20 }
 0x54d   : > { %v3332_v2 = vpop.f32.mrf.mxu1 }
 0x54e   : > { %v3505_v51 = vmax.f32 %v3382_v62, 0.0  ;;  %v3384_v52 = vadd.f32 %v3383_v8, %v3331_v21  ;;  %v3333_v59 = vadd.f32 %v3332_v2, %v2884_v20  ;;  %v3520_v14 = vmul.f32 %v3504_v61, %v8855_v50 }
 0x54f   : > { %v3336_v58 = vpop.f32.mrf.mxu1 }
 0x550   : > { %v3521_v13 = vmul.f32 %v3505_v51, %v8858_v48  ;;  %v3508_v53 = vmax.f32 %v3384_v52, 0.0  ;;  %v3386_v10 = vadd.f32 %v3385_v17, %v3333_v59  ;;  %v3337_v60 = vadd.f32 %v3336_v58, %v9574_v42  ;;  %v11288_v51 = vld [vmem:[#allocation11_spill] sm:$0xff]  ;;  %v11289_v59 = vld [vmem:[#allocation12_spill] sm:$0xff] }
 0x551   : > { %v3338_v27 = vpop.f32.mrf.mxu1 }
 0x552   : > { %v7517_v18 = vpack.c.bf16 %v3521_v13, %v3520_v14  ;;  %v3509_v25 = vmax.f32 %v3386_v10, 0.0  ;;  %v3390_v63 = vadd.f32 %v3389_v45, %v3337_v60  ;;  %v3339_v28 = vadd.f32 %v3338_v27, %v9574_v42 }
 0x553   : > { %v3340_v35 = vpop.f32.mrf.mxu1  ;;  %v3432_v41 = vpop.f32.mrf.mxu0  ;;  %v3524_v46 = vmul.f32 %v3508_v53, %v8855_v50 }
 0x554   : > { %v3525_v33 = vmul.f32 %v3509_v25, %v8858_v48  ;;  %v3341_v44 = vadd.f32 %v3340_v35, %v9576_v37  ;;  %3576 = vrot.lane.b32.xlu1 %v7517_v18, %s8014_s16  ;;  %v3512_v57 = vmax.f32 %v3390_v63, 0.0  ;;  %v3392_v56 = vadd.f32 %v3391_v15, %v3339_v28 }
 0x555   : > { %v3342_v23 = vpop.f32.mrf.mxu1  ;;  %v3434_v0 = vpop.f32.mrf.mxu0  ;;  %v3433_v31 = vadd.f32 %v3432_v41, %v2879_v9 }
 0x556   : > { %v7519_v3 = vpack.c.bf16 %v3525_v33, %v3524_v46  ;;  %v3394_v1 = vadd.f32 %v3393_v26, %v3341_v44  ;;  %v3343_v40 = vadd.f32 %v3342_v23, %v9576_v37  ;;  %v3513_v29 = vmax.f32 %v3392_v56, 0.0 }
 0x557   : > { %v3436_v7 = vpop.f32.mrf.mxu0  ;;  %v3485_v38 = vpop.f32.mrf.mxu1  ;;  %v3528_v19 = vmul.f32 %v3512_v57, %v8855_v50  ;;  %v3435_v32 = vadd.f32 %v3434_v0, %v2879_v9 }
 0x558   : > { %v3516_v11 = vmax.f32 %v3394_v1, 0.0  ;;  %v3396_v55 = vadd.f32 %v3395_v36, %v3343_v40  ;;  %v3486_v43 = vadd.f32 %v3485_v38, %v3433_v31  ;;  %3580 = vrot.lane.b32.xlu1 %v7519_v3, %s8014_s16  ;;  %v3529_v30 = vmul.f32 %v3513_v29, %v8858_v48 }
 0x559   : > { %v3438_v5 = vpop.f32.mrf.mxu0  ;;  %v3487_v4 = vpop.f32.mrf.mxu1  ;;  %v3437_v12 = vadd.f32 %v3436_v7, %v2884_v20 }
 0x55a   : > { %v3517_v54 = vmax.f32 %v3396_v55, 0.0  ;;  %v7521_v8 = vpack.c.bf16 %v3529_v30, %v3528_v19  ;;  %v3506_v17 = vmax.f32 %v3486_v43, 0.0  ;;  %v3488_v45 = vadd.f32 %v3487_v4, %v3435_v32 }
 0x55b   : > { %v3442_v22 = vpop.f32.mrf.mxu0  ;;  %v3489_v6 = vpop.f32.mrf.mxu1  ;;  %v3532_v34 = vmul.f32 %v3516_v11, %v8855_v50  ;;  %v3439_v24 = vadd.f32 %v3438_v5, %v2884_v20 }
 0x55c   : > { %v3533_v15 = vmul.f32 %v3517_v54, %v8858_v48  ;;  %v3490_v47 = vadd.f32 %v3489_v6, %v3437_v12  ;;  %v3507_v39 = vmax.f32 %v3488_v45, 0.0  ;;  %3584 = vrot.lane.b32.xlu1 %v7521_v8, %s8014_s16  ;;  %v3443_v21 = vadd.f32 %v3442_v22, %v9574_v42 }
 0x55d   : > { %v3444_v61 = vpop.f32.mrf.mxu0  ;;  %v3491_v9 = vpop.f32.mrf.mxu1  ;;  %v3522_v52 = vmul.f32 %v3506_v17, %v11288_v51 }
 0x55e   : > { %v7523_v62 = vpack.c.bf16 %v3533_v15, %v3532_v34  ;;  %v3510_v26 = vmax.f32 %v3490_v47, 0.0  ;;  %v3492_v2 = vadd.f32 %v3491_v9, %v3439_v24  ;;  %v3523_v14 = vmul.f32 %v3507_v39, %v11289_v59 }
 0x55f   : > { %v3446_v58 = vpop.f32.mrf.mxu0  ;;  %v3495_v13 = vpop.f32.mrf.mxu1  ;;  %v3445_v53 = vadd.f32 %v3444_v61, %v9574_v42 }
 0x560   : > { %v3511_v20 = vmax.f32 %v3492_v2, 0.0  ;;  %v3496_v10 = vadd.f32 %v3495_v13, %v3443_v21  ;;  %v7518_v60 = vpack.c.bf16 %v3523_v14, %v3522_v52  ;;  %v3526_v36 = vmul.f32 %v3510_v26, %v11288_v51  ;;  %3588 = vrot.lane.b32.xlu1 %v7523_v62, %s8014_s16 }
 0x561   : > { %v3448_v27 = vpop.f32.mrf.mxu0  ;;  %v3497_v18 = vpop.f32.mrf.mxu1  ;;  %v3447_v63 = vadd.f32 %v3446_v58, %v9576_v37 }
 0x562   : > { %v3527_v25 = vmul.f32 %v3511_v20, %v11289_v59  ;;  %v3514_v28 = vmax.f32 %v3496_v10, 0.0  ;;  %v3498_v35 = vadd.f32 %v3497_v18, %v3445_v53  ;;  %3578 = vrot.lane.b32.xlu0 %v7518_v60, %s8014_s16  ;;  %v3449_v42 = vadd.f32 %v3448_v27, %v9576_v37 }
 0x563   : > { %v3499_v41 = vpop.f32.mrf.mxu1 }
 0x564   : > { %v7520_v46 = vpack.c.bf16 %v3527_v25, %v3526_v36  ;;  %v3515_v33 = vmax.f32 %v3498_v35, 0.0  ;;  %v3500_v44 = vadd.f32 %v3499_v41, %v3447_v63  ;;  %v3530_v56 = vmul.f32 %v3514_v28, %v11288_v51 }
 0x565   : > { %v3501_v57 = vpop.f32.mrf.mxu1 }
 0x566   : > { %v3531_v23 = vmul.f32 %v3515_v33, %v11289_v59  ;;  %v3518_v0 = vmax.f32 %v3500_v44, 0.0  ;;  %v3502_v3 = vadd.f32 %v3501_v57, %v3449_v42  ;;  %3582 = vrot.lane.b32.xlu0 %v7520_v46, %s8014_s16 }
 0x568   : > { %v7522_v1 = vpack.c.bf16 %v3531_v23, %v3530_v56  ;;  %v3519_v31 = vmax.f32 %v3502_v3, 0.0  ;;  %v3534_v40 = vmul.f32 %v3518_v0, %v11288_v51 }
 0x56a   : > { %v3535_v29 = vmul.f32 %v3519_v31, %v11289_v59  ;;  %3586 = vrot.lane.b32.xlu0 %v7522_v1, %s8014_s16  ;;  %v7299_v31 = vld [vmem:[%s11203_s3 + $0x50] sm:$0xff] }
 0x56c   : > { %v7524_v37 = vpack.c.bf16 %v3535_v29, %v3534_v40 }
 0x56e   : > { %3590 = vrot.lane.b32.xlu0 %v7524_v37, %s8014_s16 }
 0x5c6   : > { %v3577_v7 = vpop.permute.xlu1 %3576 }
 0x5c7   : > { %v3592_v38 = vrot.slane %v3577_v7, 4 }
 0x5c9   : > { %v3600_v11 = vsel %vm2138_vm14, %v3592_v38, %v3577_v7 }
 0x5ca   : > { %3620 = vst.msk [vmem:[#allocation2] sm:$0xff] %vm8904_vm15, %v3600_v11  ;;  %v3581_v43 = vpop.permute.xlu1 %3580 }
 0x5cb   : > { %v3594_v19 = vrot.slane %v3581_v43, 4 }
 0x5cd   : > { %v3603_v30 = vsel %vm2138_vm14, %v3594_v19, %v3581_v43 }
 0x5ce   : > { %3622 = vst.msk [vmem:[#allocation2 + $0x10] sm:$0xff] %vm8904_vm15, %v3603_v30  ;;  %v3585_v32 = vpop.permute.xlu1 %3584 }
 0x5cf   : > { %v3596_v5 = vrot.slane %v3585_v32, 4 }
 0x5d1   : > { %v9616_v4 = vld [vmem:[#allocation2] sm:$0xff]  ;;  %v3606_v54 = vsel %vm2138_vm14, %v3596_v5, %v3585_v32 }
 0x5d2   : > { %3850 = vrot.lane.b32.xlu1 %v9616_v4, %s8020_s11  ;;  %3624 = vst.msk [vmem:[#allocation2 + $0x20] sm:$0xff] %vm8904_vm15, %v3606_v54  ;;  %v3589_v12 = vpop.permute.xlu1 %3588 }
 0x5d3   : > { %v3598_v8 = vrot.slane %v3589_v12, 4 }
 0x5d4   : > { %v3579_v17 = vpop.permute.xlu0 %3578 }
 0x5d5   : > { %v3609_v45 = vsel %vm2138_vm14, %v3598_v8, %v3589_v12  ;;  %v3593_v22 = vrot.slane %v3579_v17, 4  ;;  %v9662_v53 = vld [vmem:[#allocation2 + $0x10] sm:$0xff] }
 0x5d6   : > { %4193 = vrot.lane.b32.xlu1 %v9616_v4, %s8021_s14  ;;  %3626 = vst.msk [vmem:[#allocation2 + $0x30] sm:$0xff] %vm8904_vm15, %v3609_v45 }
 0x5d7   : > { %v3601_v6 = vsel %vm240_vm0, %v3592_v38, %v3593_v22  ;;  %v7297_v38 = vld [vmem:[%s11203_s3 + $0x40] sm:$0xff] }
 0x5d8   : > { %v3602_v34 = vsel %vm2138_vm14, %v3601_v6, %v3579_v17  ;;  %v3583_v15 = vpop.permute.xlu0 %3582  ;;  %v7300_v6 = vld [vmem:[%s11203_s3 + $0x58] sm:$0xff] }
 0x5d9   : > { %3621 = vst.msk [vmem:[#allocation2 + $0x8] sm:$0xff] %vm8927_vm3, %v3602_v34  ;;  %v3595_v47 = vrot.slane %v3583_v15, 4  ;;  %v3838_v10 = vld [vmem:[#allocation2 + $0x20] sm:$0xff] }
 0x5da   : > { %3781 = vrot.lane.b32.xlu1 %v9616_v4, %s8022_s15 }
 0x5db   : > { %v3604_v39 = vsel %vm240_vm0, %v3594_v19, %v3595_v47 }
 0x5dc   : > { %v3605_v61 = vsel %vm2138_vm14, %v3604_v39, %v3583_v15  ;;  %v3587_v9 = vpop.permute.xlu0 %3586 }
 0x5dd   : > { %3623 = vst.msk [vmem:[#allocation2 + $0x18] sm:$0xff] %vm8927_vm3, %v3605_v61  ;;  %v3597_v62 = vrot.slane %v3587_v9, 4  ;;  %v3840_v36 = vld [vmem:[#allocation2 + $0x30] sm:$0xff]  ;;  %v7298_v61 = vld [vmem:[%s11203_s3 + $0x48] sm:$0xff] }
 0x5de   : > { %3713 = vrot.lane.b32.xlu1 %v9616_v4, %s8008_s7 }
 0x5df   : > { %v3607_v21 = vsel %vm240_vm0, %v3596_v5, %v3597_v62 }
 0x5e0   : > { %v3608_v26 = vsel %vm2138_vm14, %v3607_v21, %v3587_v9  ;;  %v3591_v2 = vpop.permute.xlu0 %3590  ;;  %v9642_v52 = vld [vmem:[#allocation2 + $0x8] sm:$0xff] }
 0x5e1   : > { %3625 = vst.msk [vmem:[#allocation2 + $0x28] sm:$0xff] %vm8927_vm3, %v3608_v26  ;;  %v3599_v14 = vrot.slane %v3591_v2, 4  ;;  %3852 = vrot.lane.b32.xlu0 %v9642_v52, %s8020_s11 }
 0x5e2   : > { %3644 = vrot.lane.b32.xlu1 %v9616_v4, %s8023_s25 }
 0x5e3   : > { %v3610_v58 = vsel %vm240_vm0, %v3598_v8, %v3599_v14 }
 0x5e4   : > { %v3611_v13 = vsel %vm2138_vm14, %v3610_v58, %v3591_v2  ;;  %v9680_v20 = vld [vmem:[#allocation2 + $0x18] sm:$0xff] }
 0x5e5   : > { %3627 = vst.msk [vmem:[#allocation2 + $0x38] sm:$0xff] %vm8927_vm3, %v3611_v13  ;;  %4195 = vrot.lane.b32.xlu0 %v9642_v52, %s8021_s14 }
 0x5e6   : > { %4125 = vrot.lane.b32.xlu1 %v9616_v4, %s8010_s9 }
 0x5e8   : > { %v3839_v60 = vld [vmem:[#allocation2 + $0x28] sm:$0xff] }
 0x5e9   : > { %3783 = vrot.lane.b32.xlu0 %v9642_v52, %s8022_s15 }
 0x5ea   : > { %4056 = vrot.lane.b32.xlu1 %v9616_v4, %s8024_s17 }
 0x5ec   : > { %v9717_v27 = vld [vmem:[#allocation2 + $0x38] sm:$0xff] }
 0x5ed   : > { %3715 = vrot.lane.b32.xlu0 %v9642_v52, %s8008_s7 }
 0x5ee   : > { %3854 = vrot.lane.b32.xlu1 %v9662_v53, %s8020_s11 }
 0x5f1   : > { %3646 = vrot.lane.b32.xlu0 %v9642_v52, %s8023_s25 }
 0x5f2   : > { %4197 = vrot.lane.b32.xlu1 %v9662_v53, %s8021_s14 }
 0x5f5   : > { %4127 = vrot.lane.b32.xlu0 %v9642_v52, %s8010_s9 }
 0x5f6   : > { %3785 = vrot.lane.b32.xlu1 %v9662_v53, %s8022_s15 }
 0x5f9   : > { %4058 = vrot.lane.b32.xlu0 %v9642_v52, %s8024_s17 }
 0x5fa   : > { %3717 = vrot.lane.b32.xlu1 %v9662_v53, %s8008_s7 }
 0x5fd   : > { %3856 = vrot.lane.b32.xlu0 %v9680_v20, %s8020_s11 }
 0x5fe   : > { %3648 = vrot.lane.b32.xlu1 %v9662_v53, %s8023_s25 }
 0x601   : > { %4199 = vrot.lane.b32.xlu0 %v9680_v20, %s8021_s14 }
 0x602   : > { %4129 = vrot.lane.b32.xlu1 %v9662_v53, %s8010_s9 }
 0x605   : > { %3787 = vrot.lane.b32.xlu0 %v9680_v20, %s8022_s15 }
 0x606   : > { %3858 = vrot.lane.b32.xlu1 %v3838_v10, %s8020_s11 }
 0x609   : > { %3719 = vrot.lane.b32.xlu0 %v9680_v20, %s8008_s7 }
 0x60a   : > { %4201 = vrot.lane.b32.xlu1 %v3838_v10, %s8021_s14 }
 0x60d   : > { %3650 = vrot.lane.b32.xlu0 %v9680_v20, %s8023_s25 }
 0x60e   : > { %3789 = vrot.lane.b32.xlu1 %v3838_v10, %s8022_s15 }
 0x611   : > { %4131 = vrot.lane.b32.xlu0 %v9680_v20, %s8010_s9 }
 0x612   : > { %3721 = vrot.lane.b32.xlu1 %v3838_v10, %s8008_s7 }
 0x615   : > { %3860 = vrot.lane.b32.xlu0 %v3839_v60, %s8020_s11 }
 0x616   : > { %3652 = vrot.lane.b32.xlu1 %v3838_v10, %s8023_s25 }
 0x619   : > { %4203 = vrot.lane.b32.xlu0 %v3839_v60, %s8021_s14 }
 0x61a   : > { %4133 = vrot.lane.b32.xlu1 %v3838_v10, %s8010_s9 }
 0x61d   : > { %3791 = vrot.lane.b32.xlu0 %v3839_v60, %s8022_s15 }
 0x61e   : > { %4064 = vrot.lane.b32.xlu1 %v3838_v10, %s8024_s17 }
 0x621   : > { %3723 = vrot.lane.b32.xlu0 %v3839_v60, %s8008_s7 }
 0x622   : > { %3862 = vrot.lane.b32.xlu1 %v3840_v36, %s8020_s11 }
 0x625   : > { %3654 = vrot.lane.b32.xlu0 %v3839_v60, %s8023_s25 }
 0x626   : > { %4205 = vrot.lane.b32.xlu1 %v3840_v36, %s8021_s14 }
 0x629   : > { %4135 = vrot.lane.b32.xlu0 %v3839_v60, %s8010_s9 }
 0x62a   : > { %3793 = vrot.lane.b32.xlu1 %v3840_v36, %s8022_s15 }
 0x62d   : > { %4066 = vrot.lane.b32.xlu0 %v3839_v60, %s8024_s17 }
 0x62e   : > { %4060 = vrot.lane.b32.xlu1 %v9662_v53, %s8024_s17 }
 0x631   : > { %3864 = vrot.lane.b32.xlu0 %v9717_v27, %s8020_s11 }
 0x632   : > { %3725 = vrot.lane.b32.xlu1 %v3840_v36, %s8008_s7 }
 0x635   : > { %4207 = vrot.lane.b32.xlu0 %v9717_v27, %s8021_s14  ;;  %s8026_s14 = smov 102  }
 0x636   : > { %3656 = vrot.lane.b32.xlu1 %v3840_v36, %s8023_s25 }
 0x639   : > { %3795 = vrot.lane.b32.xlu0 %v9717_v27, %s8022_s15  ;;  %s8027_s15 = smov 118  }
 0x63a   : > { %4137 = vrot.lane.b32.xlu1 %v3840_v36, %s8010_s9 }
 0x63d   : > { %4062 = vrot.lane.b32.xlu0 %v9680_v20, %s8024_s17 }
 0x63e   : > { %4068 = vrot.lane.b32.xlu1 %v3840_v36, %s8024_s17 }
 0x641   : > { %3727 = vrot.lane.b32.xlu0 %v9717_v27, %s8008_s7 }
 0x642   : > { %3995 = vrot.lane.b32.xlu1 %v3838_v10, %s8025_s26 }
 0x644   : > { %v9734_v18 = vpop.permute.xlu1 %3850 }
 0x645   : > { %3997 = vrot.lane.b32.xlu0 %v3839_v60, %s8025_s26 }
 0x646   : > { %3999 = vrot.lane.b32.xlu1 %v3840_v36, %s8025_s26 }
 0x648   : > { %v9738_v25 = vpop.permute.xlu1 %4193 }
 0x649   : > { %3658 = vrot.lane.b32.xlu0 %v9717_v27, %s8023_s25  ;;  %s8028_s25 = smov 92  }
 0x64a   : > { %3987 = vrot.lane.b32.xlu1 %v9616_v4, %s8025_s26 }
 0x64c   : > { %v9744_v63 = vpop.permute.xlu1 %3781 }
 0x64d   : > { %3989 = vrot.lane.b32.xlu0 %v9642_v52, %s8025_s26 }
 0x64e   : > { %3991 = vrot.lane.b32.xlu1 %v9662_v53, %s8025_s26 }
 0x650   : > { %v9750_v28 = vpop.permute.xlu1 %3713 }
 0x651   : > { %4139 = vrot.lane.b32.xlu0 %v9717_v27, %s8010_s9 }
 0x652   : > { %3927 = vrot.lane.b32.xlu1 %v3838_v10, %s8013_s13 }
 0x653   : > { %v9755_v35 = vpop.permute.xlu0 %3852 }
 0x654   : > { %v9757_v41 = vpop.permute.xlu1 %3644  ;;  %v11243_v46 = vrot.slane %v9755_v35, 4 }
 0x655   : > { %3993 = vrot.lane.b32.xlu0 %v9680_v20, %s8025_s26 }
 0x656   : > { %3931 = vrot.lane.b32.xlu1 %v3840_v36, %s8013_s13  ;;  %v3877_v42 = vsel %vm3875_vm6, %v9755_v35, %v11243_v46  ;;  %v4209_v46 = vrot.slane %v9738_v25, 4 }
 0x657   : > { %3896 = vst.msk [vmem:[#allocation3 + $0xc8] sm:$0xff] %vm8515_vm1, %v3877_v42  ;;  %v9769_v33 = vpop.permute.xlu0 %4195 }
 0x658   : > { %v9771_v44 = vpop.permute.xlu1 %4125  ;;  %v11241_v57 = vrot.slane %v9769_v33, 4 }
 0x659   : > { %4070 = vrot.lane.b32.xlu0 %v9717_v27, %s8024_s17  ;;  %v4141_v42 = vrot.slane %v9771_v44, 4  ;;  %s8032_s17 = smov 3  }
 0x65a   : > { %3919 = vrot.lane.b32.xlu1 %v9616_v4, %s8013_s13  ;;  %v4220_v56 = vsel %vm4218_vm9, %v9769_v33, %v11241_v57  ;;  %v9832_v4 = vld [vmem:[#allocation4 + $0x64] ss:$12 sps:$4 sm:$0xff]  }
 0x65b   : > { %4239 = vst.msk [vmem:[#allocation3 + $0x208] sm:$0xff] %vm8515_vm1, %v4220_v56  ;;  %v9784_v23 = vpop.permute.xlu0 %3783  ;;  %4780 = vmatprep.mubr.bf16.mxu1 %v9832_v4 }
 0x65c   : > { %v9786_v0 = vpop.permute.xlu1 %4056  ;;  %v11238_v3 = vrot.slane %v9784_v23, 4 }
 0x65d   : > { %3929 = vrot.lane.b32.xlu0 %v3839_v60, %s8013_s13 }
 0x65e   : > { %3923 = vrot.lane.b32.xlu1 %v9662_v53, %s8013_s13  ;;  %v3808_v1 = vsel %vm3806_vm10, %v9784_v23, %v11238_v3 }
 0x65f   : > { %3827 = vst.msk [vmem:[#allocation3 + $0x88] sm:$0xff] %vm8515_vm1, %v3808_v1  ;;  %v9801_v40 = vpop.permute.xlu0 %3715 }
 0x660   : > { %v9803_v29 = vpop.permute.xlu1 %3854  ;;  %v11234_v37 = vrot.slane %v9801_v40, 4 }
 0x661   : > { %4001 = vrot.lane.b32.xlu0 %v9717_v27, %s8025_s26 }
 0x662   : > { %4344 = vperm.xlu1 %7649, %v7299_v31   ;;  %v3739_v7 = vsel %vm797_vm5, %v9801_v40, %v11234_v37  ;;  %v3868_v37 = vrot.slane %v9803_v29, 4 }
 0x663   : > { %3758 = vst.msk [vmem:[#allocation3 + $0x48] sm:$0xff] %vm8515_vm1, %v3739_v7  ;;  %v9817_v11 = vpop.permute.xlu0 %3646 }
 0x664   : > { %v9819_v43 = vpop.permute.xlu1 %4197  ;;  %v11231_v19 = vrot.slane %v9817_v11, 4 }
 0x665   : > { %3921 = vrot.lane.b32.xlu0 %v9642_v52, %s8013_s13 }
 0x666   : > { %4334 = vperm.xlu1 %7649, %v7297_v38   ;;  %v3671_v30 = vsel %vm3669_vm12, %v9817_v11, %v11231_v19 }
 0x667   : > { %3690 = vst.msk [vmem:[#allocation3 + $0x8] sm:$0xff] %vm8515_vm1, %v3671_v30  ;;  %v4128_v32 = vpop.permute.xlu0 %4127 }
 0x668   : > { %v9830_v5 = vpop.permute.xlu1 %3785  ;;  %v4142_v54 = vrot.slane %v4128_v32, 4 }
 0x669   : > { %3933 = vrot.lane.b32.xlu0 %v9717_v27, %s8013_s13 }
 0x66a   : > { %v4151_v12 = vsel %vm1211_vm8, %v4128_v32, %v4142_v54  ;;  %v4149_v7 = vsel %vm240_vm0, %v4141_v42, %v4142_v54 }
 0x66b   : > { %4170 = vst.msk [vmem:[#allocation3 + $0x1c8] sm:$0xff] %vm8515_vm1, %v4151_v12  ;;  %v9840_v8 = vpop.permute.xlu0 %4058 }
 0x66c   : > { %v9842_v17 = vpop.permute.xlu1 %3717  ;;  %v11230_v45 = vrot.slane %v9840_v8, 4 }
 0x66d   : > { %3925 = vrot.lane.b32.xlu0 %v9680_v20, %s8013_s13 }
 0x66e   : > { %v4083_v22 = vsel %vm4081_vm13, %v9840_v8, %v11230_v45 }
 0x66f   : > { %4102 = vst.msk [vmem:[#allocation3 + $0x188] sm:$0xff] %vm8515_vm1, %v4083_v22  ;;  %v9856_v34 = vpop.permute.xlu0 %3856  ;;  %v9920_v22 = vsel %vm1211_vm8, %v9771_v44, %v4149_v7 }
 0x670   : > { %v9858_v15 = vpop.permute.xlu1 %3648  ;;  %v3869_v47 = vrot.slane %v9856_v34, 4 }
 0x671   : > { %4349 = vperm.xlu0 %7648, %v7300_v6  }
 0x672   : > { %v3880_v39 = vsel %vm3875_vm6, %v9856_v34, %v3869_v47  ;;  %v4211_v34 = vrot.slane %v9819_v43, 4 }
 0x673   : > { %3898 = vst.msk [vmem:[#allocation3 + $0xd8] sm:$0xff] %vm8515_vm1, %v3880_v39  ;;  %v9870_v9 = vpop.permute.xlu0 %4199 }
 0x674   : > { %v4130_v62 = vpop.permute.xlu1 %4129  ;;  %v11242_v21 = vrot.slane %v9870_v9, 4 }
 0x675   : > { %4339 = vperm.xlu0 %7648, %v7298_v61   ;;  %v4143_v38 = vrot.slane %v4130_v62, 4 }
 0x676   : > { %v4223_v26 = vsel %vm4218_vm9, %v9870_v9, %v11242_v21 }
 0x677   : > { %4241 = vst.msk [vmem:[#allocation3 + $0x218] sm:$0xff] %vm8515_vm1, %v4223_v26  ;;  %v9879_v2 = vpop.permute.xlu0 %3787 }
 0x678   : > { %v9881_v52 = vpop.permute.xlu1 %3858  ;;  %v11240_v14 = vrot.slane %v9879_v2, 4 }
 0x67a   : > { %v3811_v58 = vsel %vm3806_vm10, %v9879_v2, %v11240_v14 }
 0x67b   : > { %3829 = vst.msk [vmem:[#allocation3 + $0x98] sm:$0xff] %vm8515_vm1, %v3811_v58  ;;  %v9890_v13 = vpop.permute.xlu0 %3719 }
 0x67c   : > { %v9892_v53 = vpop.permute.xlu1 %4201  ;;  %v11236_v20 = vrot.slane %v9890_v13, 4 }
 0x67e   : > { %v3742_v10 = vsel %vm797_vm5, %v9890_v13, %v11236_v20 }
 0x67f   : > { %3760 = vst.msk [vmem:[#allocation3 + $0x58] sm:$0xff] %vm8515_vm1, %v3742_v10  ;;  %v9901_v60 = vpop.permute.xlu0 %3650 }
 0x680   : > { %v9903_v36 = vpop.permute.xlu1 %3789  ;;  %v11232_v27 = vrot.slane %v9901_v60, 4 }
 0x682   : > { %v3674_v56 = vsel %vm3669_vm12, %v9901_v60, %v11232_v27 }
 0x683   : > { %3692 = vst.msk [vmem:[#allocation3 + $0x18] sm:$0xff] %vm8515_vm1, %v3674_v56  ;;  %v4132_v1 = vpop.permute.xlu0 %4131 }
 0x684   : > { %v9913_v31 = vpop.permute.xlu1 %3721  ;;  %v4144_v30 = vrot.slane %v4132_v1, 4 }
 0x686   : > { %v4152_v32 = vsel %vm240_vm0, %v4143_v38, %v4144_v30  ;;  %v4154_v12 = vsel %vm1211_vm8, %v4132_v1, %v4144_v30 }
 0x687   : > { %v9923_v6 = vsel %vm1211_vm8, %v4130_v62, %v4152_v32  ;;  %4172 = vst.msk [vmem:[#allocation3 + $0x1d8] sm:$0xff] %vm8515_vm1, %v4154_v12  ;;  %v3861_v39 = vpop.permute.xlu0 %3860 }
 0x688   : > { %v9927_v61 = vpop.permute.xlu1 %3652  ;;  %v3871_v54 = vrot.slane %v3861_v39, 4 }
 0x68a   : > { %v3883_v10 = vsel %vm3875_vm6, %v3861_v39, %v3871_v54 }
 0x68b   : > { %3900 = vst.msk [vmem:[#allocation3 + $0xe8] sm:$0xff] %vm8515_vm1, %v3883_v10  ;;  %v4204_v44 = vpop.permute.xlu0 %4203 }
 0x68c   : > { %v9936_v62 = vpop.permute.xlu1 %4133  ;;  %v4214_v42 = vrot.slane %v4204_v44, 4 }
 0x68e   : > { %v4226_v56 = vsel %vm4218_vm9, %v4204_v44, %v4214_v42 }
 0x68f   : > { %4243 = vst.msk [vmem:[#allocation3 + $0x228] sm:$0xff] %vm8515_vm1, %v4226_v56  ;;  %v9941_v1 = vpop.permute.xlu0 %3791 }
 0x690   : > { %v9943_v7 = vpop.permute.xlu1 %4064  ;;  %v11239_v38 = vrot.slane %v9941_v1, 4 }
 0x692   : > { %v3814_v30 = vsel %vm3806_vm10, %v9941_v1, %v11239_v38  ;;  %v3866_v38 = vrot.slane %v9734_v18, 4 }
 0x693   : > { %3831 = vst.msk [vmem:[#allocation3 + $0xa8] sm:$0xff] %vm8515_vm1, %v3814_v30  ;;  %v9952_v32 = vpop.permute.xlu0 %3723 }
 0x694   : > { %v3863_v12 = vpop.permute.xlu1 %3862  ;;  %v11235_v39 = vrot.slane %v9952_v32, 4 }
 0x695   : > { %v3872_v57 = vrot.slane %v3863_v12, 4 }
 0x696   : > { %v3745_v10 = vsel %vm797_vm5, %v9952_v32, %v11235_v39  ;;  %v3870_v39 = vrot.slane %v9881_v52, 4 }
 0x697   : > { %3762 = vst.msk [vmem:[#allocation3 + $0x68] sm:$0xff] %vm8515_vm1, %v3745_v10  ;;  %v9961_v44 = vpop.permute.xlu0 %3654 }
 0x698   : > { %v4206_v56 = vpop.permute.xlu1 %4205  ;;  %v11233_v58 = vrot.slane %v9961_v44, 4  ;;  %v3881_v14 = vsel %vm240_vm0, %v3870_v39, %v3871_v54  ;;  %v11293_v39 = vrot.slane %v9870_v9, 4 }
 0x699   : > { %v3882_v51 = vsel %vm3875_vm6, %v9881_v52, %v3881_v14  ;;  %v3799_v14 = vrot.slane %v9830_v5, 4 }
 0x69a   : > { %v3677_v30 = vsel %vm3669_vm12, %v9961_v44, %v11233_v58  ;;  %v4221_v59 = vsel %vm240_vm0, %v4211_v34, %v11293_v39  ;;  %v11294_v34 = vrot.slane %v9769_v33, 4  ;;  %v11296_v33 = vrot.slane %v9941_v1, 4 }
 0x69b   : > { %3694 = vst.msk [vmem:[#allocation3 + $0x28] sm:$0xff] %vm8515_vm1, %v3677_v30  ;;  %v9970_v45 = vpop.permute.xlu0 %4135  ;;  %v11297_v1 = vrot.slane %v9784_v23, 4 }
 0x69c   : > { %v9972_v26 = vpop.permute.xlu1 %3793  ;;  %v11237_v19 = vrot.slane %v9970_v45, 4  ;;  %v4217_v52 = vsel %vm240_vm0, %v4209_v46, %v11294_v34 }
 0x69e   : > { %v4157_v10 = vsel %vm1211_vm8, %v9970_v45, %v11237_v19  ;;  %v3878_v19 = vsel %vm240_vm0, %v3868_v37, %v3869_v47  ;;  %v4213_v37 = vrot.slane %v9892_v53, 4  ;;  %v11292_v47 = vrot.slane %v9755_v35, 4 }
 0x69f   : > { %4174 = vst.msk [vmem:[#allocation3 + $0x1e8] sm:$0xff] %vm8515_vm1, %v4157_v10  ;;  %v9981_v27 = vpop.permute.xlu0 %4066  ;;  %v3879_v24 = vsel %vm3875_vm6, %v9803_v29, %v3878_v19 }
 0x6a0   : > { %v9983_v58 = vpop.permute.xlu1 %4060  ;;  %v11244_v30 = vrot.slane %v9981_v27, 4  ;;  %v4224_v48 = vsel %vm240_vm0, %v4213_v37, %v4214_v42  ;;  %v4222_v42 = vsel %vm4218_vm9, %v9819_v43, %v4221_v59 }
 0x6a1   : > { %v4225_v46 = vsel %vm4218_vm9, %v9892_v53, %v4224_v48  ;;  %v4219_v48 = vsel %vm4218_vm9, %v9738_v25, %v4217_v52 }
 0x6a2   : > { %v4089_v20 = vsel %vm4081_vm13, %v9981_v27, %v11244_v30  ;;  %v3797_v30 = vrot.slane %v9744_v63, 4  ;;  %v7371_v52 = vcombine.low %v4219_v48, %v4222_v42 }
 0x6a3   : > { %4106 = vst.msk [vmem:[#allocation3 + $0x1a8] sm:$0xff] %vm8515_vm1, %v4089_v20  ;;  %v3865_v10 = vpop.permute.xlu0 %3864  ;;  %v3874_v20 = vsel %vm240_vm0, %v3866_v38, %v11292_v47  ;;  %v11295_v47 = vrot.slane %v9879_v2, 4  ;;  %v3803_v2 = vrot.slane %v9972_v26, 4 }
 0x6a4   : > { %v9997_v3 = vpop.permute.xlu1 %3725  ;;  %v3873_v21 = vrot.slane %v3865_v10, 4  ;;  %v3876_v9 = vsel %vm3875_vm6, %v9734_v18, %v3874_v20 }
 0x6a5   : > { %v3809_v18 = vsel %vm240_vm0, %v3799_v14, %v11295_v47  ;;  %v7331_v53 = vcombine.low %v3876_v9, %v3879_v24  ;;  %v10070_v14 = vld [vmem:[#allocation4 + $0x68] ss:$12 sps:$4 sm:$0xff]  }
 0x6a6   : > { %v3884_v55 = vsel %vm240_vm0, %v3872_v57, %v3873_v21  ;;  %v3886_v54 = vsel %vm3875_vm6, %v3865_v10, %v3873_v21  ;;  %v4215_v57 = vrot.slane %v4206_v56, 4 }
 0x6a7   : > { %v3885_v35 = vsel %vm3875_vm6, %v3863_v12, %v3884_v55  ;;  %3902 = vst.msk [vmem:[#allocation3 + $0xf8] sm:$0xff] %vm8515_vm1, %v3886_v54  ;;  %v4208_v38 = vpop.permute.xlu0 %4207  ;;  %v3801_v55 = vrot.slane %v9903_v36, 4  ;;  %vm5278_vm6 = vcmask 834560  }
 0x6a8   : > { %v10021_v29 = vpop.permute.xlu1 %3656  ;;  %v4216_v19 = vrot.slane %v4208_v38, 4  ;;  %v7336_v21 = vcombine.high %v3882_v51, %v3885_v35  ;;  %v7335_v10 = vcombine.low %v3882_v51, %v3885_v35  ;;  %v7332_v51 = vcombine.high %v3876_v9, %v3879_v24 }
 0x6a9   : > { %v3812_v20 = vsel %vm240_vm0, %v3801_v55, %v11296_v33  ;;  %v3733_v55 = vrot.slane %v9913_v31, 4 }
 0x6aa   : > { %v4227_v12 = vsel %vm240_vm0, %v4215_v57, %v4216_v19  ;;  %v4229_v37 = vsel %vm4218_vm9, %v4208_v38, %v4216_v19  ;;  %4748 = vmatprep.subr.bf16.mxu1 %v7336_v21  ;;  %v7372_v21 = vcombine.high %v4219_v48, %v4222_v42  ;;  %v3813_v34 = vsel %vm3806_vm10, %v9903_v36, %v3812_v20 }
 0x6ab   : > { %v4228_v54 = vsel %vm4218_vm9, %v4206_v56, %v4227_v12  ;;  %4245 = vst.msk [vmem:[#allocation3 + $0x238] sm:$0xff] %vm8515_vm1, %v4229_v37  ;;  %v3796_v59 = vpop.permute.xlu0 %3795  ;;  %4749 = vmatpush1.bf16.msra.mxu1 %v7335_v10  ;;  %v3805_v56 = vsel %vm240_vm0, %v3797_v30, %v11297_v1  ;;  %v3810_v10 = vsel %vm3806_vm10, %v9830_v5, %v3809_v18  ;;  %v3729_v18 = vrot.slane %v9750_v28, 4 }
 0x6ac   : > { %v10045_v43 = vpop.permute.xlu1 %4137  ;;  %v3804_v39 = vrot.slane %v3796_v59, 4  ;;  %4750 = vmatprep.subr.bf16.mxu1 %v7332_v51  ;;  %v7376_v35 = vcombine.high %v4225_v46, %v4228_v54  ;;  %v7375_v38 = vcombine.low %v4225_v46, %v4228_v54  ;;  %v3807_v36 = vsel %vm3806_vm10, %v9744_v63, %v3805_v56  ;;  %v7768_v56 = vld [vmem:[#allocation3 + $0xcc] ss:$16 sps:$4 sm:$0xff]  }
 0x6ad   : > { %v7324_v37 = vcombine.high %v3807_v36, %v3810_v10  ;;  %v11298_v46 = vrot.slane %v9890_v13, 4  ;;  %v11299_v20 = vrot.slane %v9952_v32, 4  ;;  %v11300_v48 = vrot.slane %v9801_v40, 4  ;;  %v4282_v32 = vld [vmem:[#allocation3 + $0xd8] sm:$0xff] }
 0x6ae   : > { %v3815_v57 = vsel %vm240_vm0, %v3803_v2, %v3804_v39  ;;  %v3817_v19 = vsel %vm3806_vm10, %v3796_v59, %v3804_v39  ;;  %4813 = vmatprep.subr.bf16.mxu0 %v7376_v35  ;;  %v4286_v51 = vld [vmem:[#allocation3 + $0xf8] sm:$0xff]  ;;  %v3735_v59 = vrot.slane %v9997_v3, 4  ;;  %v4284_v39 = vld [vmem:[#allocation3 + $0xe8] sm:$0xff]  ;;  %v7323_v35 = vcombine.low %v3807_v36, %v3810_v10 }
 0x6af   : > { %v3816_v25 = vsel %vm3806_vm10, %v9972_v26, %v3815_v57  ;;  %3833 = vst.msk [vmem:[#allocation3 + $0xb8] sm:$0xff] %vm8515_vm1, %v3817_v19  ;;  %v10063_v24 = vpop.permute.xlu0 %4062  ;;  %4751 = vmatpush1.bf16.msra.mxu1 %v7331_v53  ;;  %4814 = vmatpush1.bf16.msra.mxu0 %v7375_v38  ;;  %v3731_v26 = vrot.slane %v9842_v17, 4  ;;  %v7765_v47 = vld [vmem:[#allocation3 + $0xec] ss:$16 sps:$4 sm:$0xff]   ;;  %v3743_v54 = vsel %vm240_vm0, %v3733_v55, %v11299_v20  ;;  %v3662_v36 = vrot.slane %v9858_v15, 4 }
 0x6b0   : > { %v10065_v23 = vpop.permute.xlu1 %4068  ;;  %v4075_v30 = vrot.slane %v10063_v24, 4  ;;  %4815 = vmatprep.subr.bf16.mxu0 %v7372_v21  ;;  %v7328_v9 = vcombine.high %v3813_v34, %v3816_v25  ;;  %v7327_v5 = vcombine.low %v3813_v34, %v3816_v25  ;;  %v7337_v38 = vcombine.low %v4284_v39, %v4286_v51  ;;  %v4280_v25 = vld [vmem:[#allocation3 + $0xc8] sm:$0xff] }
 0x6b1   : > { %v3740_v33 = vsel %vm240_vm0, %v3731_v26, %v11298_v46  ;;  %v3737_v53 = vsel %vm240_vm0, %v3729_v18, %v11300_v48  ;;  %v3744_v19 = vsel %vm797_vm5, %v9913_v31, %v3743_v54  ;;  %v7333_v31 = vcombine.low %v4280_v25, %v4282_v32  ;;  %v4276_v54 = vld [vmem:[#allocation3 + $0xa8] sm:$0xff] }
 0x6b2   : > { %v4086_v12 = vsel %vm4081_vm13, %v10063_v24, %v4075_v30  ;;  %4752 = vmatprep.subr.bf16.mxu1 %v7328_v9  ;;  %v3741_v57 = vsel %vm797_vm5, %v9842_v17, %v3740_v33  ;;  %v3660_v51 = vrot.slane %v9757_v41, 4  ;;  %v3666_v33 = vrot.slane %v10021_v29, 4 }
 0x6b3   : > { %4104 = vst.msk [vmem:[#allocation3 + $0x198] sm:$0xff] %vm8515_vm1, %v4086_v12  ;;  %v3728_v63 = vpop.permute.xlu0 %3727  ;;  %4753 = vmatpush1.bf16.msra.mxu1 %v7327_v5  ;;  %4816 = vmatpush1.bf16.msra.mxu0 %v7371_v52  ;;  %v10113_v5 = vld [vmem:[#allocation4 + $0x80] ss:$12 sps:$4 sm:$0xff]   ;;  %v3664_v52 = vrot.slane %v9927_v61, 4  ;;  %v11303_v39 = vrot.slane %v9817_v11, 4  ;;  %vm5209_vm9 = vcmask 965632  }
 0x6b4   : > { %v10081_v42 = vpop.permute.xlu1 %3995  ;;  %v3736_v2 = vrot.slane %v3728_v63, 4  ;;  %4754 = vmatprep.subr.bf16.mxu1 %v7324_v37  ;;  %4854 = vmatprep.subr.bf16.mxu0 %v7765_v47  ;;  %v11301_v47 = vrot.slane %v9901_v60, 4  ;;  %vm5484_vm10 = vcmask 621568  }
 0x6b6   : > { %v3746_v13 = vsel %vm240_vm0, %v3735_v59, %v3736_v2  ;;  %v3748_v1 = vsel %vm797_vm5, %v3728_v63, %v3736_v2  ;;  %7379 = vmatmul.mubr.msk.bf16.vlgmr.msra.gmra.mxu0 %vm1802_vm4, %v10070_v14  ;;  %v4278_v12 = vld [vmem:[#allocation3 + $0xb8] sm:$0xff]  ;;  %v3672_v18 = vsel %vm240_vm0, %v3662_v36, %v11301_v47  ;;  %v11302_v63 = vrot.slane %v9961_v44, 4 }
 0x6b7   : > { %v3747_v40 = vsel %vm797_vm5, %v9997_v3, %v3746_v13  ;;  %3764 = vst.msk [vmem:[#allocation3 + $0x78] sm:$0xff] %vm8515_vm1, %v3748_v1  ;;  %v10105_v21 = vpop.permute.xlu0 %3997  ;;  %4755 = vmatpush1.bf16.msra.mxu1 %v7323_v35  ;;  %4855 = vmatpush1.bf16.msra.mxu0 %v7337_v38  ;;  %v3738_v3 = vsel %vm797_vm5, %v9750_v28, %v3737_v53  ;;  %v7770_v37 = vld [vmem:[#allocation3 + $0xac] ss:$16 sps:$4 sm:$0xff]   ;;  %v4147_v36 = vrot.slane %v10045_v43, 4 }
 0x6b8   : > { %v4008_v10 = vrot.slane %v10105_v21, 4  ;;  %v10108_v34 = vpop.permute.xlu1 %3999  ;;  %4856 = vmatprep.subr.bf16.mxu0 %v7768_v56  ;;  %v7320_v17 = vcombine.high %v3744_v19, %v3747_v40  ;;  %v7319_v9 = vcombine.low %v3744_v19, %v3747_v40  ;;  %4843 = vmatprep.mubr.bf16.mxu0 %v11279_v16  ;;  %v7316_v55 = vcombine.high %v3738_v3, %v3741_v57  ;;  %v4274_v44 = vld [vmem:[#allocation3 + $0x98] sm:$0xff] }
 0x6b9   : > { %v3675_v46 = vsel %vm240_vm0, %v3664_v52, %v11302_v63  ;;  %v7315_v59 = vcombine.low %v3738_v3, %v3741_v57  ;;  %v7329_v2 = vcombine.low %v4276_v54, %v4278_v12  ;;  %v3668_v35 = vsel %vm240_vm0, %v3660_v51, %v11303_v39  ;;  %v7772_v53 = vld [vmem:[#allocation3 + $0x8c] ss:$16 sps:$4 sm:$0xff]  }
 0x6ba   : > { %v4020_v26 = vsel %vm4012_vm2, %v10105_v21, %v4008_v10  ;;  %4756 = vmatprep.subr.bf16.mxu1 %v7320_v17  ;;  %v3673_v13 = vsel %vm3669_vm12, %v9858_v15, %v3672_v18  ;;  %v3676_v1 = vsel %vm3669_vm12, %v9927_v61, %v3675_v46  ;;  %v4272_v57 = vld [vmem:[#allocation3 + $0x88] sm:$0xff]  ;;  %v3670_v15 = vsel %vm3669_vm12, %v9757_v41, %v3668_v35  ;;  %v4266_v47 = vld [vmem:[#allocation3 + $0x58] sm:$0xff] }
 0x6bb   : > { %4037 = vst.msk [vmem:[#allocation3 + $0x168] sm:$0xff] %vm8515_vm1, %v4020_v26  ;;  %v3659_v28 = vpop.permute.xlu0 %3658  ;;  %4757 = vmatpush1.bf16.msra.mxu1 %v7319_v9  ;;  %4857 = vmatpush1.bf16.msra.mxu0 %v7333_v31  ;;  %v7325_v61 = vcombine.low %v4272_v57, %v4274_v44  ;;  %v7308_v17 = vcombine.high %v3670_v15, %v3673_v13  ;;  %v11304_v41 = vrot.slane %v9970_v45, 4  ;;  %v7776_v18 = vld [vmem:[#allocation3 + $0x4c] ss:$16 sps:$4 sm:$0xff]   ;;  %v4076_v39 = vrot.slane %v9943_v7, 4 }
 0x6bc   : > { %v3667_v20 = vrot.slane %v3659_v28, 4  ;;  %4758 = vmatprep.subr.bf16.mxu1 %v7316_v55  ;;  %4858 = vmatprep.subr.bf16.mxu0 %v7770_v37  ;;  %v10136_v48 = vpop.permute.xlu1 %3987  ;;  %v4268_v55 = vld [vmem:[#allocation3 + $0x68] sm:$0xff]  ;;  %v7307_v12 = vcombine.low %v3670_v15, %v3673_v13  ;;  %v4072_v44 = vrot.slane %v9786_v0, 4  ;;  %v11305_v13 = vrot.slane %v9981_v27, 4 }
 0x6bd   : > { %v4078_v57 = vrot.slane %v10065_v23, 4  ;;  %v4260_v15 = vld [vmem:[#allocation3 + $0x28] sm:$0xff] }
 0x6be   : > { %v3678_v60 = vsel %vm240_vm0, %v3666_v33, %v3667_v20  ;;  %v3680_v38 = vsel %vm3669_vm12, %v3659_v28, %v3667_v20  ;;  %7380 = vmatmul.mubr.msk.bf16.gmra.mxu0 %vm1802_vm4, %v10113_v5  ;;  %v4270_v9 = vld [vmem:[#allocation3 + $0x78] sm:$0xff]  ;;  %v4264_v20 = vld [vmem:[#allocation3 + $0x48] sm:$0xff] }
 0x6bf   : > { %v3679_v11 = vsel %vm3669_vm12, %v10021_v29, %v3678_v60  ;;  %3696 = vst.msk [vmem:[#allocation3 + $0x38] sm:$0xff] %vm8515_vm1, %v3680_v38  ;;  %v10148_v32 = vpop.permute.xlu0 %3989  ;;  %4759 = vmatpush1.bf16.msra.mxu1 %v7315_v59  ;;  %4859 = vmatpush1.bf16.msra.mxu0 %v7329_v2  ;;  %v4145_v29 = vrot.slane %v9936_v62, 4  ;;  %v7774_v3 = vld [vmem:[#allocation3 + $0x6c] ss:$16 sps:$4 sm:$0xff]   ;;  %v7321_v37 = vcombine.low %v4268_v55, %v4270_v9 }
 0x6c0   : > { %v4004_v56 = vrot.slane %v10148_v32, 4  ;;  %4860 = vmatprep.subr.bf16.mxu0 %v7772_v53  ;;  %v7312_v19 = vcombine.high %v3676_v1, %v3679_v11  ;;  %v7311_v40 = vcombine.low %v3676_v1, %v3679_v11  ;;  %4886 = vmatprep.mubr.bf16.mxu0 %v9832_v4  ;;  %v10165_v52 = vpop.permute.xlu1 %3991  ;;  %v7317_v2 = vcombine.low %v4264_v20, %v4266_v47  ;;  %v4316_v20 = vld [vmem:[#allocation3 + $0x1e8] sm:$0xff] }
 0x6c1   : > { %v4155_v4 = vsel %vm240_vm0, %v4145_v29, %v11304_v41  ;;  %v4087_v1 = vsel %vm240_vm0, %v4076_v39, %v11305_v13  ;;  %v11307_v29 = vrot.slane %v9840_v8, 4  ;;  %v11308_v41 = vcombine.low %v9920_v22, %v9923_v6 }
 0x6c2   : > { %v4014_v25 = vsel %vm4012_vm2, %v10148_v32, %v4004_v56  ;;  %4760 = vmatprep.subr.bf16.mxu1 %v7312_v19  ;;  %v4156_v45 = vsel %vm1211_vm8, %v9936_v62, %v4155_v4  ;;  %v4074_v62 = vrot.slane %v9983_v58, 4  ;;  %v4088_v9 = vsel %vm4081_vm13, %v9943_v7, %v4087_v1 }
 0x6c3   : > { %4033 = vst.msk [vmem:[#allocation3 + $0x148] sm:$0xff] %vm8515_vm1, %v4014_v25  ;;  %v4140_v31 = vpop.permute.xlu0 %4139  ;;  %4761 = vmatpush1.bf16.msra.mxu1 %v7311_v40  ;;  %4861 = vmatpush1.bf16.msra.mxu0 %v7325_v61  ;;  %v11306_v40 = vcombine.high %v9920_v22, %v9923_v6  ;;  %v4080_v27 = vsel %vm240_vm0, %v4072_v44, %v11307_v29  ;;  %v4009_v47 = vrot.slane %v10108_v34, 4 }
 0x6c4   : > { %v4148_v26 = vrot.slane %v4140_v31, 4  ;;  %4762 = vmatprep.subr.bf16.mxu1 %v7308_v17  ;;  %4862 = vmatprep.subr.bf16.mxu0 %v7774_v3  ;;  %v10180_v35 = vpop.permute.xlu1 %3927  ;;  %v4084_v11 = vsel %vm240_vm0, %v4074_v62, %v4075_v30  ;;  %v4258_v17 = vld [vmem:[#allocation3 + $0x18] sm:$0xff] }
 0x6c5   : > { %v7780_v30 = vld [vmem:[#allocation3 + $0xc] ss:$16 sps:$4 sm:$0xff]   ;;  %v4085_v3 = vsel %vm4081_vm13, %v9983_v58, %v4084_v11  ;;  %v4082_v58 = vsel %vm4081_vm13, %v9786_v0, %v4080_v27  ;;  %v3939_v13 = vrot.slane %v10180_v35, 4 }
 0x6c6   : > { %v4158_v51 = vsel %vm240_vm0, %v4147_v36, %v4148_v26  ;;  %v4160_v28 = vsel %vm1211_vm8, %v4140_v31, %v4148_v26  ;;  %v4262_v60 = vld [vmem:[#allocation3 + $0x38] sm:$0xff]  ;;  %v4256_v26 = vld [vmem:[#allocation3 + $0x8] sm:$0xff]  ;;  %v7356_v22 = vcombine.high %v4082_v58, %v4085_v3 }
 0x6c7   : > { %v4159_v63 = vsel %vm1211_vm8, %v10045_v43, %v4158_v51  ;;  %4176 = vst.msk [vmem:[#allocation3 + $0x1f8] sm:$0xff] %vm8515_vm1, %v4160_v28  ;;  %v10175_v46 = vpop.permute.xlu0 %3993  ;;  %4763 = vmatpush1.bf16.msra.mxu1 %v7307_v12  ;;  %4863 = vmatpush1.bf16.msra.mxu0 %v7321_v37  ;;  %v7778_v38 = vld [vmem:[#allocation3 + $0x2c] ss:$16 sps:$4 sm:$0xff]   ;;  %v7313_v61 = vcombine.low %v4260_v15, %v4262_v60  ;;  %v4007_v12 = vrot.slane %v10081_v42, 4  ;;  %v4005_v37 = vrot.slane %v10165_v52, 4 }
 0x6c8   : > { %v4006_v33 = vrot.slane %v10175_v46, 4  ;;  %4864 = vmatprep.subr.bf16.mxu0 %v7776_v18  ;;  %v7368_v54 = vcombine.high %v4156_v45, %v4159_v63  ;;  %v7367_v59 = vcombine.low %v4156_v45, %v4159_v63  ;;  %v10213_v4 = vpop.permute.xlu1 %3931  ;;  %v4003_v45 = vrot.slane %v10136_v48, 4 }
 0x6c9   : > { %v4018_v0 = vsel %vm240_vm0, %v4007_v12, %v4008_v10  ;;  %v7784_v10 = vld [vmem:[#allocation3 + $0x1cc] ss:$16 sps:$4 sm:$0xff]  }
 0x6ca   : > { %v4017_v43 = vsel %vm4012_vm2, %v10175_v46, %v4006_v33  ;;  %4764 = vmatprep.subr.bf16.mxu1 %v7368_v54  ;;  %v4015_v63 = vsel %vm240_vm0, %v4005_v37, %v4006_v33  ;;  %v7355_v54 = vcombine.low %v4082_v58, %v4085_v3 }
 0x6cb   : > { %4035 = vst.msk [vmem:[#allocation3 + $0x158] sm:$0xff] %vm8515_vm1, %v4017_v43  ;;  %v4071_v53 = vpop.permute.xlu0 %4070  ;;  %4765 = vmatpush2.bf16.msra.mxu1 %v7367_v59  ;;  %4865 = vmatpush1.bf16.msra.mxu0 %v7317_v2  ;;  %v4011_v2 = vsel %vm240_vm0, %v4003_v45, %v4004_v56  ;;  %v4019_v43 = vsel %vm4012_vm2, %v10081_v42, %v4018_v0  ;;  %v7786_v42 = vld [vmem:[#allocation3 + $0x1c8] ss:$16 sps:$4 sm:$0xff]   ;;  %v7808_v45 = vld [vmem:[#allocation3 + $0x20c] ss:$16 sps:$4 sm:$0xff]  }
 0x6cc   : > { %v4079_v19 = vrot.slane %v4071_v53, 4  ;;  %4766 = vmatprep.subr.bf16.mxu1 %v11306_v40  ;;  %4866 = vmatprep.subr.bf16.mxu0 %v7778_v38  ;;  %v3920_v39 = vpop.permute.xlu1 %3919  ;;  %v4016_v33 = vsel %vm4012_vm2, %v10165_v52, %v4015_v63 }
 0x6cd   : > { %v3935_v29 = vrot.slane %v3920_v39, 4 }
 0x6ce   : > { %v4090_v25 = vsel %vm240_vm0, %v4078_v57, %v4079_v19  ;;  %v4092_v24 = vsel %vm4081_vm13, %v4071_v53, %v4079_v19  ;;  %v4318_v6 = vld [vmem:[#allocation3 + $0x1f8] sm:$0xff]  ;;  %v4013_v53 = vsel %vm4012_vm2, %v10136_v48, %v4011_v2  ;;  %v3941_v57 = vrot.slane %v10213_v4, 4 }
 0x6cf   : > { %v4091_v31 = vsel %vm4081_vm13, %v10065_v23, %v4090_v25  ;;  %4108 = vst.msk [vmem:[#allocation3 + $0x1b8] sm:$0xff] %vm8515_vm1, %v4092_v24  ;;  %v3930_v8 = vpop.permute.xlu0 %3929  ;;  %4767 = vmatpush2.bf16.msra.mxu1 %v11308_v41  ;;  %4867 = vmatpush1.bf16.msra.mxu0 %v7313_v61  ;;  %v7309_v23 = vcombine.low %v4256_v26, %v4258_v17  ;;  %v7782_v28 = vld [vmem:[#allocation3 + $0x1ec] ss:$16 sps:$4 sm:$0xff]   ;;  %v7792_v26 = vld [vmem:[#allocation3 + $0x188] ss:$16 sps:$4 sm:$0xff]  }
 0x6d0   : > { %v3940_v36 = vrot.slane %v3930_v8, 4  ;;  %4868 = vmatprep.subr.bf16.mxu0 %v7780_v30  ;;  %v7360_v7 = vcombine.high %v4088_v9, %v4091_v31  ;;  %v7359_v55 = vcombine.low %v4088_v9, %v4091_v31  ;;  %v7369_v59 = vcombine.low %v4316_v20, %v4318_v6  ;;  %v3924_v40 = vpop.permute.xlu1 %3923  ;;  %v7790_v24 = vld [vmem:[#allocation3 + $0x18c] ss:$16 sps:$4 sm:$0xff]  }
 0x6d1   : > { %v7347_v15 = vcombine.low %v4013_v53, %v4016_v33  ;;  %v3937_v30 = vrot.slane %v3924_v40, 4  ;;  %v7798_v6 = vld [vmem:[#allocation3 + $0x22c] ss:$16 sps:$4 sm:$0xff]  }
 0x6d2   : > { %v3951_v51 = vsel %vm1004_vm11, %v3930_v8, %v3940_v36  ;;  %4768 = vmatprep.subr.bf16.mxu1 %v7360_v7  ;;  %v3949_v19 = vsel %vm240_vm0, %v3939_v13, %v3940_v36 }
 0x6d3   : > { %3968 = vst.msk [vmem:[#allocation3 + $0x128] sm:$0xff] %vm8515_vm1, %v3951_v51  ;;  %v4002_v18 = vpop.permute.xlu0 %4001  ;;  %4769 = vmatpush2.bf16.msra.mxu1 %v7359_v55  ;;  %4869 = vmatpush1.bf16.msra.mxu0 %v7309_v23  ;;  %v3950_v17 = vsel %vm1004_vm11, %v10180_v35, %v3949_v19  ;;  %v7800_v51 = vld [vmem:[#allocation4 + $0x60] ss:$12 sps:$4 sm:$0xff]  }
 0x6d4   : > { %v4010_v46 = vrot.slane %v4002_v18, 4  ;;  %4770 = vmatprep.subr.bf16.mxu1 %v7356_v22  ;;  %4870 = vmatprep.subr.bf16.mxu0 %v7782_v28  ;;  %v7796_v22 = vld [vmem:[#allocation3 + $0x14c] ss:$16 sps:$4 sm:$0xff]   ;;  %v7804_v28 = vld [vmem:[#allocation3 + $0x148] ss:$16 sps:$4 sm:$0xff]   ;;  %v11309_v19 = vld [vmem:[#allocation10_spill] sm:$0xff] }
 0x6d6   : > { %v4021_v62 = vsel %vm240_vm0, %v4009_v47, %v4010_v46  ;;  %v4023_v21 = vsel %vm4012_vm2, %v4002_v18, %v4010_v46  ;;  %v7787_v1 = vld [vmem:[#allocation3 + $0x1ac] ss:$16 sps:$4 sm:$0xff]   ;;  %v7789_v61 = vld [vmem:[#allocation3 + $0x1a8] ss:$16 sps:$4 sm:$0xff]  }
 0x6d7   : > { %v4022_v60 = vsel %vm4012_vm2, %v10108_v34, %v4021_v62  ;;  %4039 = vst.msk [vmem:[#allocation3 + $0x178] sm:$0xff] %vm8515_vm1, %v4023_v21  ;;  %v3922_v32 = vpop.permute.xlu0 %3921  ;;  %4771 = vmatpush2.bf16.msra.mxu1 %v7355_v54  ;;  %4871 = vmatpush2.bf16.msra.mxu0 %v7369_v59  ;;  %v7348_v34 = vcombine.high %v4013_v53, %v4016_v33  ;;  %v7805_v47 = vld [vmem:[#allocation3 + $0x228] ss:$16 sps:$4 sm:$0xff]  }
 0x6d8   : > { %v3936_v56 = vrot.slane %v3922_v32, 4  ;;  %4872 = vmatprep.subr.bf16.mxu0 %v7784_v10  ;;  %v7352_v38 = vcombine.high %v4019_v43, %v4022_v60  ;;  %v7351_v44 = vcombine.low %v4019_v43, %v4022_v60  ;;  %v7814_v18 = vld [vmem:[#allocation4 + $0x7c] ss:$12 sps:$4 sm:$0xff]   ;;  %v7816_v54 = vld [vmem:[#allocation4 + $0x78] ss:$12 sps:$4 sm:$0xff]  }
 0x6d9   : > { %v7811_v46 = vld [vmem:[#allocation3 + $0x208] ss:$16 sps:$4 sm:$0xff]  }
 0x6da   : > { %v3945_v52 = vsel %vm1004_vm11, %v3922_v32, %v3936_v56  ;;  %4772 = vmatprep.subr.bf16.mxu1 %v7352_v38  ;;  %v3943_v31 = vsel %vm240_vm0, %v3935_v29, %v3936_v56 }
 0x6db   : > { %3964 = vst.msk [vmem:[#allocation3 + $0x108] sm:$0xff] %vm8515_vm1, %v3945_v52  ;;  %v3934_v11 = vpop.permute.xlu0 %3933  ;;  %4773 = vmatpush2.bf16.msra.mxu1 %v7351_v44  ;;  %4873 = vmatpush2.bf16.msra.mxu0 %v7786_v42 }
 0x6dc   : > { %v3942_v48 = vrot.slane %v3934_v11, 4  ;;  %4774 = vmatprep.subr.bf16.mxu1 %v7348_v34  ;;  %4874 = vmatprep.subr.bf16.mxu0 %v7787_v1 }
 0x6dd   : > { %v10271_v21 = vpop.permute.xlu1 %4344 }
 0x6de   : > { %v3952_v27 = vsel %vm240_vm0, %v3941_v57, %v3942_v48  ;;  %v3954_v25 = vsel %vm1004_vm11, %v3934_v11, %v3942_v48  ;;  %v7793_v55 = vld [vmem:[#allocation3 + $0x16c] ss:$16 sps:$4 sm:$0xff]   ;;  %v7795_v37 = vld [vmem:[#allocation3 + $0x168] ss:$16 sps:$4 sm:$0xff]  }
 0x6df   : > { %v3953_v9 = vsel %vm1004_vm11, %v10213_v4, %v3952_v27  ;;  %3970 = vst.msk [vmem:[#allocation3 + $0x138] sm:$0xff] %vm8515_vm1, %v3954_v25  ;;  %v3926_v3 = vpop.permute.xlu0 %3925  ;;  %4775 = vmatpush2.bf16.msra.mxu1 %v7347_v15  ;;  %4875 = vmatpush2.bf16.msra.mxu0 %v7789_v61  ;;  %v3944_v4 = vsel %vm1004_vm11, %v3920_v39, %v3943_v31 }
 0x6e0   : > { %v3938_v8 = vrot.slane %v3926_v3, 4  ;;  %4876 = vmatprep.subr.bf16.mxu0 %v7790_v24  ;;  %v7344_v41 = vcombine.high %v3950_v17, %v3953_v9  ;;  %v7343_v36 = vcombine.low %v3950_v17, %v3953_v9 }
 0x6e1   : > { %v4335_v33 = vpop.permute.xlu1 %4334 }
 0x6e2   : > { %v3946_v7 = vsel %vm240_vm0, %v3937_v30, %v3938_v8  ;;  %v3948_v35 = vsel %vm1004_vm11, %v3926_v3, %v3938_v8  ;;  %4776 = vmatprep.subr.bf16.mxu1 %v7344_v41 }
 0x6e3   : > { %v3947_v58 = vsel %vm1004_vm11, %v3924_v40, %v3946_v7  ;;  %3966 = vst.msk [vmem:[#allocation3 + $0x118] sm:$0xff] %vm8515_vm1, %v3948_v35  ;;  %4777 = vmatpush2.bf16.msra.mxu1 %v7343_v36  ;;  %4877 = vmatpush2.bf16.msra.mxu0 %v7792_v26 }
 0x6e4   : > { %4878 = vmatprep.subr.bf16.mxu0 %v7793_v55  ;;  %v7340_v23 = vcombine.high %v3944_v4, %v3947_v58  ;;  %v7339_v12 = vcombine.low %v3944_v4, %v3947_v58 }
 0x6e6   : > { %4778 = vmatprep.subr.bf16.mxu1 %v7340_v23  ;;  %v7806_v0 = vld [vmem:[#allocation3 + $0x12c] ss:$16 sps:$4 sm:$0xff]   ;;  %v7810_v63 = vld [vmem:[#allocation3 + $0x128] ss:$16 sps:$4 sm:$0xff]  }
 0x6e7   : > { %4779 = vmatpush2.bf16.msra.mxu1 %v7339_v12  ;;  %4879 = vmatpush2.bf16.msra.mxu0 %v7795_v37 }
 0x6e8   : > { %4880 = vmatprep.subr.bf16.mxu0 %v7796_v22  ;;  %4919 = vmatprep.subr.bf16.mxu1 %v7798_v6 }
 0x6ea   : > { %4781 = vmatmul.mubr.bf16.vlgmr.msra.gmra.mxu1 %v7800_v51  ;;  %v7812_v20 = vld [vmem:[#allocation3 + $0x10c] ss:$16 sps:$4 sm:$0xff]   ;;  %v7817_v59 = vld [vmem:[#allocation3 + $0x108] ss:$16 sps:$4 sm:$0xff]  }
 0x6eb   : > { %4881 = vmatpush2.bf16.msra.mxu0 %v7804_v28  ;;  %4920 = vmatpush1.bf16.msra.mxu1 %v7805_v47 }
 0x6ec   : > { %4882 = vmatprep.subr.bf16.mxu0 %v7806_v0  ;;  %4921 = vmatprep.subr.bf16.mxu1 %v7808_v45  ;;  %v10273_v42 = vpop.permute.xlu0 %4349 }
 0x6ed   : > { %4790 = vmatprep.mubr.bf16.mxu1 %v7814_v18 }
 0x6ef   : > { %4883 = vmatpush2.bf16.msra.mxu0 %v7810_v63  ;;  %4922 = vmatpush1.bf16.msra.mxu1 %v7811_v46 }
 0x6f0   : > { %4884 = vmatprep.subr.bf16.mxu0 %v7812_v20  ;;  %v10278_v29 = vpop.permute.xlu0 %4339 }
 0x6f2   : > { %4791 = vmatmul.mubr.bf16.gmra.mxu1 %v7816_v54 }
 0x6f3   : > { %4885 = vmatpush2.bf16.msra.mxu0 %v7817_v59  ;;  %4939 = vmatprep.mubr.bf16.mxu1 %v11279_v16 }
 0x6f6   : > { %4887 = vmatmul.mubr.bf16.vlgmr.msra.gmra.mxu0 %v7800_v51 }
 0x6f7   : > { %4896 = vmatprep.mubr.bf16.mxu0 %v7814_v18 }
 0x6fa   : > { %7381 = vmatmul.mubr.msk.bf16.vlgmr.msra.gmra.mxu1 %vm1802_vm4, %v10070_v14 }
 0x6fb   : > { %4949 = vmatprep.mubr.bf16.mxu1 %v11279_v16 }
 0x6fe   : > { %4897 = vmatmul.mubr.bf16.gmra.mxu0 %v7816_v54 }
 0x6ff   : > { %6235 = vmatprep.mubr.bf16.mxu0 %v11279_v16 }
 0x702   : > { %7382 = vmatmul.mubr.msk.bf16.gmra.mxu1 %vm1802_vm4, %v10113_v5 }
 0x776   : > { %v4835_v2 = vpop.f32.mrf.mxu0 }
 0x778   : > { %v4837_v39 = vpop.f32.mrf.mxu0 }
 0x77a   : > { %v4839_v62 = vpop.f32.mrf.mxu0 }
 0x77c   : > { %v4841_v10 = vpop.f32.mrf.mxu0 }
 0x77e   : > { %v4845_v43 = vpop.f32.mrf.mxu0 }
 0x780   : > { %v4847_v14 = vpop.f32.mrf.mxu0 }
 0x782   : > { %v4849_v5 = vpop.f32.mrf.mxu0 }
 0x784   : > { %v4851_v15 = vpop.f32.mrf.mxu0 }
 0x7aa   : > { %v4782_v60 = vpop.f32.mrf.mxu1 }
 0x7ab   : > { %v4783_v32 = vadd.f32 %v4782_v60, %v4335_v33 }
 0x7ac   : > { %v4784_v56 = vpop.f32.mrf.mxu1 }
 0x7ad   : > { %v4836_v38 = vadd.f32 %v4835_v2, %v4783_v32  ;;  %v4785_v44 = vadd.f32 %v4784_v56, %v4335_v33 }
 0x7ae   : > { %v4786_v53 = vpop.f32.mrf.mxu1 }
 0x7af   : > { %v4960_v13 = vmax.f32 %v4836_v38, 0.0  ;;  %v4838_v52 = vadd.f32 %v4837_v39, %v4785_v44  ;;  %v4787_v31 = vadd.f32 %v4786_v53, %v10278_v29  ;;  %v11310_v44 = vld [vmem:[#allocation11_spill] sm:$0xff] }
 0x7b0   : > { %v4788_v34 = vpop.f32.mrf.mxu1 }
 0x7b1   : > { %v4961_v1 = vmax.f32 %v4838_v52, 0.0  ;;  %v4976_v57 = vmul.f32 %v4960_v13, %v8855_v50  ;;  %v4789_v24 = vadd.f32 %v4788_v34, %v10278_v29  ;;  %v4840_v6 = vadd.f32 %v4839_v62, %v4787_v31  ;;  %v11311_v13 = vld [vmem:[#allocation12_spill] sm:$0xff] }
 0x7b2   : > { %v4792_v11 = vpop.f32.mrf.mxu1 }
 0x7b3   : > { %v4977_v40 = vmul.f32 %v4961_v1, %v11309_v19  ;;  %v4793_v48 = vadd.f32 %v4792_v11, %v10271_v21  ;;  %v4842_v4 = vadd.f32 %v4841_v10, %v4789_v24  ;;  %v4964_v60 = vmax.f32 %v4840_v6, 0.0 }
 0x7b4   : > { %v4794_v61 = vpop.f32.mrf.mxu1 }
 0x7b5   : > { %v7525_v27 = vpack.c.bf16 %v4977_v40, %v4976_v57  ;;  %v4846_v25 = vadd.f32 %v4845_v43, %v4793_v48  ;;  %v4795_v17 = vadd.f32 %v4794_v61, %v10271_v21  ;;  %v4965_v46 = vmax.f32 %v4842_v4, 0.0 }
 0x7b6   : > { %v4796_v30 = vpop.f32.mrf.mxu1  ;;  %v4888_v9 = vpop.f32.mrf.mxu0  ;;  %v4980_v57 = vmul.f32 %v4964_v60, %v8855_v50 }
 0x7b7   : > { %v4797_v3 = vadd.f32 %v4796_v30, %v10273_v42  ;;  %5032 = vrot.lane.b32.xlu1 %v7525_v27, %s8014_s16  ;;  %v4968_v8 = vmax.f32 %v4846_v25, 0.0  ;;  %v4848_v41 = vadd.f32 %v4847_v14, %v4795_v17  ;;  %v4889_v35 = vadd.f32 %v4888_v9, %v4335_v33 }
 0x7b8   : > { %v4798_v36 = vpop.f32.mrf.mxu1  ;;  %v4890_v26 = vpop.f32.mrf.mxu0  ;;  %v4981_v38 = vmul.f32 %v4965_v46, %v11309_v19 }
 0x7b9   : > { %v4850_v7 = vadd.f32 %v4849_v5, %v4797_v3  ;;  %v4799_v55 = vadd.f32 %v4798_v36, %v10273_v42  ;;  %v4969_v58 = vmax.f32 %v4848_v41, 0.0  ;;  %v4984_v28 = vmul.f32 %v4968_v8, %v8855_v50 }
 0x7ba   : > { %v4892_v23 = vpop.f32.mrf.mxu0  ;;  %v4941_v12 = vpop.f32.mrf.mxu1  ;;  %v4891_v18 = vadd.f32 %v4890_v26, %v4335_v33  ;;  %v7527_v17 = vpack.c.bf16 %v4981_v38, %v4980_v57 }
 0x7bb   : > { %v4972_v37 = vmax.f32 %v4850_v7, 0.0  ;;  %v4852_v51 = vadd.f32 %v4851_v15, %v4799_v55  ;;  %v4942_v22 = vadd.f32 %v4941_v12, %v4889_v35  ;;  %v4985_v47 = vmul.f32 %v4969_v58, %v11309_v19 }
 0x7bc   : > { %v4894_v0 = vpop.f32.mrf.mxu0  ;;  %v4943_v45 = vpop.f32.mrf.mxu1  ;;  %v4893_v30 = vadd.f32 %v4892_v23, %v10278_v29 }
 0x7bd   : > { %v4973_v63 = vmax.f32 %v4852_v51, 0.0  ;;  %v7529_v20 = vpack.c.bf16 %v4985_v47, %v4984_v28  ;;  %v4962_v54 = vmax.f32 %v4942_v22, 0.0  ;;  %v4944_v59 = vadd.f32 %v4943_v45, %v4891_v18 }
 0x7be   : > { %v4898_v2 = vpop.f32.mrf.mxu0  ;;  %v4945_v39 = vpop.f32.mrf.mxu1  ;;  %v4988_v10 = vmul.f32 %v4972_v37, %v8855_v50  ;;  %v4895_v61 = vadd.f32 %v4894_v0, %v10278_v29 }
 0x7bf   : > { %v4989_v43 = vmul.f32 %v4973_v63, %v11309_v19  ;;  %v4963_v62 = vmax.f32 %v4944_v59, 0.0  ;;  %5040 = vrot.lane.b32.xlu1 %v7529_v20, %s8014_s16  ;;  %v4899_v14 = vadd.f32 %v4898_v2, %v10271_v21  ;;  %v4978_v53 = vmul.f32 %v4962_v54, %v11310_v44 }
 0x7c0   : > { %v4900_v32 = vpop.f32.mrf.mxu0  ;;  %v4947_v56 = vpop.f32.mrf.mxu1  ;;  %v4946_v41 = vadd.f32 %v4945_v39, %v4893_v30 }
 0x7c1   : > { %v7531_v33 = vpack.c.bf16 %v4989_v43, %v4988_v10  ;;  %v4979_v52 = vmul.f32 %v4963_v62, %v11311_v13  ;;  %v4901_v1 = vadd.f32 %v4900_v32, %v10271_v21  ;;  %v4948_v9 = vadd.f32 %v4947_v56, %v4895_v61  ;;  %v7485_v56 = vld [vmem:[%s11203_s3 + $0x80] sm:$0xff] }
 0x7c2   : > { %v4902_v5 = vpop.f32.mrf.mxu0  ;;  %v4951_v34 = vpop.f32.mrf.mxu1  ;;  %v4966_v23 = vmax.f32 %v4946_v41, 0.0 }
 0x7c3   : > { %v4952_v11 = vadd.f32 %v4951_v34, %v4899_v14  ;;  %v7526_v40 = vpack.c.bf16 %v4979_v52, %v4978_v53  ;;  %5044 = vrot.lane.b32.xlu1 %v7531_v33, %s8014_s16  ;;  %v4903_v27 = vadd.f32 %v4902_v5, %v10273_v42  ;;  %v4967_v4 = vmax.f32 %v4948_v9, 0.0 }
 0x7c4   : > { %v4904_v48 = vpop.f32.mrf.mxu0  ;;  %v4953_v15 = vpop.f32.mrf.mxu1  ;;  %v4982_v22 = vmul.f32 %v4966_v23, %v11310_v44 }
 0x7c5   : > { %v4970_v25 = vmax.f32 %v4952_v11, 0.0  ;;  %v4954_v24 = vadd.f32 %v4953_v15, %v4901_v1  ;;  %5034 = vrot.lane.b32.xlu0 %v7526_v40, %s8014_s16  ;;  %v4905_v3 = vadd.f32 %v4904_v48, %v10273_v42  ;;  %v4983_v37 = vmul.f32 %v4967_v4, %v11311_v13 }
 0x7c6   : > { %v4955_v21 = vpop.f32.mrf.mxu1 }
 0x7c7   : > { %v4971_v31 = vmax.f32 %v4954_v24, 0.0  ;;  %v4956_v8 = vadd.f32 %v4955_v21, %v4903_v27  ;;  %5036 = vrot.lane.b32.xlu1 %v7527_v17, %s8014_s16  ;;  %v4986_v26 = vmul.f32 %v4970_v25, %v11310_v44  ;;  %v7528_v6 = vpack.c.bf16 %v4983_v37, %v4982_v22 }
 0x7c8   : > { %v4957_v36 = vpop.f32.mrf.mxu1 }
 0x7c9   : > { %v4987_v7 = vmul.f32 %v4971_v31, %v11311_v13  ;;  %v4974_v35 = vmax.f32 %v4956_v8, 0.0  ;;  %v4958_v55 = vadd.f32 %v4957_v36, %v4905_v3  ;;  %v7393_v36 = vld [vmem:[%s11203_s3 + $0x70] sm:$0xff] }
 0x7cb   : > { %v7530_v29 = vpack.c.bf16 %v4987_v7, %v4986_v26  ;;  %v4975_v58 = vmax.f32 %v4958_v55, 0.0  ;;  %v4990_v12 = vmul.f32 %v4974_v35, %v11310_v44  ;;  %v7391_v7 = vld [vmem:[%s11203_s3 + $0x60] sm:$0xff] }
 0x7cd   : > { %v4991_v42 = vmul.f32 %v4975_v58, %v11311_v13  ;;  %5042 = vrot.lane.b32.xlu0 %v7530_v29, %s8014_s16 }
 0x7cf   : > { %v7532_v51 = vpack.c.bf16 %v4991_v42, %v4990_v12 }
 0x7d1   : > { %5046 = vrot.lane.b32.xlu0 %v7532_v51, %s8014_s16  ;;  %v10485_v51 = vld [vmem:[#allocation4 + $0x94] ss:$12 sps:$4 sm:$0xff]  }
 0x7d2   : > { %6182 = vmatprep.mubr.bf16.mxu1 %v10485_v51 }
 0x7d5   : > { %5038 = vrot.lane.b32.xlu0 %v7528_v6, %s8014_s16 }
 0x829   : > { %v5033_v28 = vpop.permute.xlu1 %5032 }
 0x82a   : > { %v5048_v47 = vrot.slane %v5033_v28, 4 }
 0x82c   : > { %v5056_v18 = vsel %vm2138_vm14, %v5048_v47, %v5033_v28 }
 0x82d   : > { %5076 = vst.msk [vmem:[#allocation2] sm:$0xff] %vm8904_vm15, %v5056_v18 }
 0x831   : > { %v5041_v45 = vpop.permute.xlu1 %5040 }
 0x832   : > { %v5052_v63 = vrot.slane %v5041_v45, 4 }
 0x834   : > { %v10316_v46 = vld [vmem:[#allocation2] sm:$0xff]  ;;  %v5062_v20 = vsel %vm2138_vm14, %v5052_v63, %v5041_v45 }
 0x835   : > { %5253 = vrot.lane.b32.xlu1 %v10316_v46, %s8026_s14  ;;  %5080 = vst.msk [vmem:[#allocation2 + $0x20] sm:$0xff] %vm8904_vm15, %v5062_v20  ;;  %v5045_v54 = vpop.permute.xlu1 %5044 }
 0x836   : > { %v5054_v59 = vrot.slane %v5045_v54, 4 }
 0x837   : > { %v5035_v2 = vpop.permute.xlu0 %5034 }
 0x838   : > { %v5065_v39 = vsel %vm2138_vm14, %v5054_v59, %v5045_v54  ;;  %v5049_v10 = vrot.slane %v5035_v2, 4 }
 0x839   : > { %5596 = vrot.lane.b32.xlu1 %v10316_v46, %s7989_s23  ;;  %5082 = vst.msk [vmem:[#allocation2 + $0x30] sm:$0xff] %vm8904_vm15, %v5065_v39  ;;  %v5037_v43 = vpop.permute.xlu1 %5036  ;;  %v7394_v39 = vld [vmem:[%s11203_s3 + $0x78] sm:$0xff] }
 0x83a   : > { %v5057_v60 = vsel %vm240_vm0, %v5048_v47, %v5049_v10  ;;  %v5050_v62 = vrot.slane %v5037_v43, 4 }
 0x83b   : > { %v5058_v32 = vsel %vm2138_vm14, %v5057_v60, %v5035_v2 }
 0x83c   : > { %5077 = vst.msk [vmem:[#allocation2 + $0x8] sm:$0xff] %vm8927_vm3, %v5058_v32  ;;  %v5059_v33 = vsel %vm2138_vm14, %v5050_v62, %v5037_v43  ;;  %v10335_v14 = vld [vmem:[#allocation2 + $0x20] sm:$0xff] }
 0x83d   : > { %5184 = vrot.lane.b32.xlu1 %v10316_v46, %s8027_s15  ;;  %5078 = vst.msk [vmem:[#allocation2 + $0x10] sm:$0xff] %vm8904_vm15, %v5059_v33 }
 0x83f   : > { %v5043_v38 = vpop.permute.xlu0 %5042 }
 0x840   : > { %v5053_v53 = vrot.slane %v5043_v38, 4  ;;  %v10341_v52 = vld [vmem:[#allocation2 + $0x30] sm:$0xff] }
 0x841   : > { %5116 = vrot.lane.b32.xlu1 %v10316_v46, %s8008_s7 }
 0x842   : > { %v5063_v5 = vsel %vm240_vm0, %v5052_v63, %v5053_v53  ;;  %v7392_v53 = vld [vmem:[%s11203_s3 + $0x68] sm:$0xff] }
 0x843   : > { %v5064_v34 = vsel %vm2138_vm14, %v5063_v5, %v5043_v38  ;;  %v5047_v1 = vpop.permute.xlu0 %5046  ;;  %v10347_v57 = vld [vmem:[#allocation2 + $0x8] sm:$0xff] }
 0x844   : > { %5081 = vst.msk [vmem:[#allocation2 + $0x28] sm:$0xff] %vm8927_vm3, %v5064_v34  ;;  %v5055_v11 = vrot.slane %v5047_v1, 4  ;;  %v5085_v40 = vld [vmem:[#allocation2 + $0x8] sm:$0xff]  ;;  %5255 = vrot.lane.b32.xlu0 %v10347_v57, %s8026_s14  ;;  %v10353_v48 = vld [vmem:[#allocation2 + $0x10] sm:$0xff] }
 0x845   : > { %5528 = vrot.lane.b32.xlu1 %v10316_v46, %s8010_s9  ;;  %5093 = vst.msk [vmem:[#allocation3 + $0x8] sm:$0xff] %vm8515_vm1, %v5085_v40 }
 0x846   : > { %v5066_v15 = vsel %vm240_vm0, %v5054_v59, %v5055_v11 }
 0x847   : > { %v5067_v61 = vsel %vm2138_vm14, %v5066_v15, %v5047_v1  ;;  %v5039_v27 = vpop.permute.xlu0 %5038 }
 0x848   : > { %5083 = vst.msk [vmem:[#allocation2 + $0x38] sm:$0xff] %vm8927_vm3, %v5067_v61  ;;  %v5051_v25 = vrot.slane %v5039_v27, 4  ;;  %5598 = vrot.lane.b32.xlu0 %v10347_v57, %s7989_s23 }
 0x849   : > { %5257 = vrot.lane.b32.xlu1 %v10353_v48, %s8026_s14 }
 0x84a   : > { %v5060_v24 = vsel %vm240_vm0, %v5050_v62, %v5051_v25 }
 0x84b   : > { %v5061_v17 = vsel %vm2138_vm14, %v5060_v24, %v5039_v27  ;;  %v5242_v30 = vld [vmem:[#allocation2 + $0x28] sm:$0xff] }
 0x84c   : > { %5079 = vst.msk [vmem:[#allocation2 + $0x18] sm:$0xff] %vm8927_vm3, %v5061_v17  ;;  %5186 = vrot.lane.b32.xlu0 %v10347_v57, %s8027_s15 }
 0x84d   : > { %5097 = vst.msk [vmem:[#allocation3 + $0x28] sm:$0xff] %vm8515_vm1, %v5242_v30  ;;  %5600 = vrot.lane.b32.xlu1 %v10353_v48, %s7989_s23 }
 0x84f   : > { %v10375_v21 = vld [vmem:[#allocation2 + $0x38] sm:$0xff] }
 0x850   : > { %5099 = vst.msk [vmem:[#allocation3 + $0x38] sm:$0xff] %vm8515_vm1, %v10375_v21  ;;  %5118 = vrot.lane.b32.xlu0 %v10347_v57, %s8008_s7 }
 0x851   : > { %5188 = vrot.lane.b32.xlu1 %v10353_v48, %s8027_s15 }
 0x853   : > { %v5087_v9 = vld [vmem:[#allocation2 + $0x18] sm:$0xff] }
 0x854   : > { %5095 = vst.msk [vmem:[#allocation3 + $0x18] sm:$0xff] %vm8515_vm1, %v5087_v9  ;;  %5530 = vrot.lane.b32.xlu0 %v10347_v57, %s8010_s9  ;;  %v10390_v3 = vld [vmem:[#allocation2 + $0x18] sm:$0xff] }
 0x855   : > { %5120 = vrot.lane.b32.xlu1 %v10353_v48, %s8008_s7 }
 0x858   : > { %5259 = vrot.lane.b32.xlu0 %v10390_v3, %s8026_s14 }
 0x859   : > { %5532 = vrot.lane.b32.xlu1 %v10353_v48, %s8010_s9 }
 0x85c   : > { %5602 = vrot.lane.b32.xlu0 %v10390_v3, %s7989_s23 }
 0x85d   : > { %5261 = vrot.lane.b32.xlu1 %v10335_v14, %s8026_s14 }
 0x860   : > { %5190 = vrot.lane.b32.xlu0 %v10390_v3, %s8027_s15 }
 0x861   : > { %5604 = vrot.lane.b32.xlu1 %v10335_v14, %s7989_s23 }
 0x864   : > { %5122 = vrot.lane.b32.xlu0 %v10390_v3, %s8008_s7 }
 0x865   : > { %5192 = vrot.lane.b32.xlu1 %v10335_v14, %s8027_s15 }
 0x868   : > { %5534 = vrot.lane.b32.xlu0 %v10390_v3, %s8010_s9 }
 0x869   : > { %5124 = vrot.lane.b32.xlu1 %v10335_v14, %s8008_s7 }
 0x86c   : > { %5263 = vrot.lane.b32.xlu0 %v5242_v30, %s8026_s14 }
 0x86d   : > { %5536 = vrot.lane.b32.xlu1 %v10335_v14, %s8010_s9 }
 0x870   : > { %5606 = vrot.lane.b32.xlu0 %v5242_v30, %s7989_s23 }
 0x871   : > { %5467 = vrot.lane.b32.xlu1 %v10335_v14, %s7993_s6 }
 0x874   : > { %5194 = vrot.lane.b32.xlu0 %v5242_v30, %s8027_s15 }
 0x875   : > { %5265 = vrot.lane.b32.xlu1 %v10341_v52, %s8026_s14 }
 0x878   : > { %5126 = vrot.lane.b32.xlu0 %v5242_v30, %s8008_s7 }
 0x879   : > { %5608 = vrot.lane.b32.xlu1 %v10341_v52, %s7989_s23 }
 0x87c   : > { %5538 = vrot.lane.b32.xlu0 %v5242_v30, %s8010_s9 }
 0x87d   : > { %5196 = vrot.lane.b32.xlu1 %v10341_v52, %s8027_s15 }
 0x880   : > { %5469 = vrot.lane.b32.xlu0 %v5242_v30, %s7993_s6 }
 0x881   : > { %5459 = vrot.lane.b32.xlu1 %v10316_v46, %s7993_s6 }
 0x884   : > { %5267 = vrot.lane.b32.xlu0 %v10375_v21, %s8026_s14  ;;  %s8037_s14 = smov 53  }
 0x885   : > { %5128 = vrot.lane.b32.xlu1 %v10341_v52, %s8008_s7 }
 0x888   : > { %5610 = vrot.lane.b32.xlu0 %v10375_v21, %s7989_s23  ;;  %s8030_s23 = smov 111  }
 0x889   : > { %5540 = vrot.lane.b32.xlu1 %v10341_v52, %s8010_s9 }
 0x88c   : > { %5198 = vrot.lane.b32.xlu0 %v10375_v21, %s8027_s15  ;;  %s8038_s15 = smov 43  }
 0x88d   : > { %5471 = vrot.lane.b32.xlu1 %v10341_v52, %s7993_s6 }
 0x890   : > { %5461 = vrot.lane.b32.xlu0 %v10347_v57, %s7993_s6 }
 0x891   : > { %5463 = vrot.lane.b32.xlu1 %v10353_v48, %s7993_s6 }
 0x894   : > { %5130 = vrot.lane.b32.xlu0 %v10375_v21, %s8008_s7 }
 0x895   : > { %5398 = vrot.lane.b32.xlu1 %v10335_v14, %s8028_s25 }
 0x898   : > { %5465 = vrot.lane.b32.xlu0 %v10390_v3, %s7993_s6 }
 0x899   : > { %5402 = vrot.lane.b32.xlu1 %v10341_v52, %s8028_s25 }
 0x89c   : > { %5400 = vrot.lane.b32.xlu0 %v5242_v30, %s8028_s25 }
 0x89d   : > { %5390 = vrot.lane.b32.xlu1 %v10316_v46, %s8028_s25 }
 0x8a0   : > { %5392 = vrot.lane.b32.xlu0 %v10347_v57, %s8028_s25 }
 0x8a1   : > { %5394 = vrot.lane.b32.xlu1 %v10353_v48, %s8028_s25 }
 0x8a4   : > { %5542 = vrot.lane.b32.xlu0 %v10375_v21, %s8010_s9  ;;  %s8031_s9 = smov 13  }
 0x8a5   : > { %5330 = vrot.lane.b32.xlu1 %v10335_v14, %s8013_s13 }
 0x8a7   : > { %v5254_v31 = vpop.permute.xlu1 %5253 }
 0x8a8   : > { %5396 = vrot.lane.b32.xlu0 %v10390_v3, %s8028_s25  ;;  %v5269_v4 = vrot.slane %v5254_v31, 4 }
 0x8a9   : > { %5334 = vrot.lane.b32.xlu1 %v10341_v52, %s8013_s13 }
 0x8ab   : > { %v5597_v8 = vpop.permute.xlu1 %5596 }
 0x8ac   : > { %5473 = vrot.lane.b32.xlu0 %v10375_v21, %s7993_s6  ;;  %v5612_v22 = vrot.slane %v5597_v8, 4  ;;  %s8034_s6 = smov 103  }
 0x8ad   : > { %5322 = vrot.lane.b32.xlu1 %v10316_v46, %s8013_s13 }
 0x8af   : > { %v5185_v41 = vpop.permute.xlu1 %5184 }
 0x8b0   : > { %5332 = vrot.lane.b32.xlu0 %v5242_v30, %s8013_s13  ;;  %v5200_v20 = vrot.slane %v5185_v41, 4 }
 0x8b1   : > { %5326 = vrot.lane.b32.xlu1 %v10353_v48, %s8013_s13 }
 0x8b3   : > { %v5117_v26 = vpop.permute.xlu1 %5116 }
 0x8b4   : > { %5404 = vrot.lane.b32.xlu0 %v10375_v21, %s8028_s25  ;;  %v5132_v62 = vrot.slane %v5117_v26, 4  ;;  %s8029_s25 = smov 23  }
 0x8b5   : > { %5746 = vperm.xlu1 %7649, %v7393_v36  }
 0x8b6   : > { %v5256_v35 = vpop.permute.xlu0 %5255 }
 0x8b7   : > { %v5529_v55 = vpop.permute.xlu1 %5528  ;;  %v5270_v29 = vrot.slane %v5256_v35, 4 }
 0x8b8   : > { %5324 = vrot.lane.b32.xlu0 %v10347_v57, %s8013_s13  ;;  %v5544_v11 = vrot.slane %v5529_v55, 4 }
 0x8b9   : > { %5736 = vperm.xlu1 %7649, %v7391_v7   ;;  %v5277_v58 = vsel %vm240_vm0, %v5269_v4, %v5270_v29  ;;  %v5280_v23 = vsel %vm5278_vm6, %v5256_v35, %v5270_v29 }
 0x8ba   : > { %v10481_v12 = vsel %vm5278_vm6, %v5254_v31, %v5277_v58  ;;  %5299 = vst.msk [vmem:[#allocation3 + $0xc8] sm:$0xff] %vm8515_vm1, %v5280_v23  ;;  %v5599_v42 = vpop.permute.xlu0 %5598 }
 0x8bb   : > { %v5258_v37 = vpop.permute.xlu1 %5257  ;;  %v5613_v6 = vrot.slane %v5599_v42, 4 }
 0x8bc   : > { %5336 = vrot.lane.b32.xlu0 %v10375_v21, %s8013_s13  ;;  %v5271_v24 = vrot.slane %v5258_v37, 4 }
 0x8bd   : > { %v5620_v28 = vsel %vm240_vm0, %v5612_v22, %v5613_v6  ;;  %v5622_v47 = vsel %vm345_vm7, %v5599_v42, %v5613_v6 }
 0x8be   : > { %v10493_v18 = vsel %vm345_vm7, %v5597_v8, %v5620_v28  ;;  %5641 = vst.msk [vmem:[#allocation3 + $0x208] sm:$0xff] %vm8515_vm1, %v5622_v47  ;;  %v5187_v45 = vpop.permute.xlu0 %5186 }
 0x8bf   : > { %v5601_v63 = vpop.permute.xlu1 %5600  ;;  %v5201_v54 = vrot.slane %v5187_v45, 4 }
 0x8c0   : > { %5328 = vrot.lane.b32.xlu0 %v10390_v3, %s8013_s13  ;;  %v5614_v8 = vrot.slane %v5601_v63, 4 }
 0x8c1   : > { %v5208_v59 = vsel %vm240_vm0, %v5200_v20, %v5201_v54  ;;  %v5211_v2 = vsel %vm5209_vm9, %v5187_v45, %v5201_v54 }
 0x8c2   : > { %v10505_v10 = vsel %vm5209_vm9, %v5185_v41, %v5208_v59  ;;  %5230 = vst.msk [vmem:[#allocation3 + $0x88] sm:$0xff] %vm8515_vm1, %v5211_v2  ;;  %v5119_v43 = vpop.permute.xlu0 %5118 }
 0x8c3   : > { %v5189_v60 = vpop.permute.xlu1 %5188  ;;  %v5133_v32 = vrot.slane %v5119_v43, 4 }
 0x8c4   : > { %5751 = vperm.xlu0 %7648, %v7394_v39   ;;  %v5202_v4 = vrot.slane %v5189_v60, 4 }
 0x8c5   : > { %v5140_v33 = vsel %vm240_vm0, %v5132_v62, %v5133_v32  ;;  %v5142_v38 = vsel %vm797_vm5, %v5119_v43, %v5133_v32 }
 0x8c6   : > { %v10515_v5 = vsel %vm797_vm5, %v5117_v26, %v5140_v33  ;;  %5161 = vst.msk [vmem:[#allocation3 + $0x48] sm:$0xff] %vm8515_vm1, %v5142_v38  ;;  %v5531_v34 = vpop.permute.xlu0 %5530 }
 0x8c7   : > { %v5121_v1 = vpop.permute.xlu1 %5120  ;;  %v5545_v57 = vrot.slane %v5531_v34, 4 }
 0x8c8   : > { %5741 = vperm.xlu0 %7648, %v7392_v53   ;;  %v5134_v6 = vrot.slane %v5121_v1, 4 }
 0x8c9   : > { %v5552_v40 = vsel %vm240_vm0, %v5544_v11, %v5545_v57  ;;  %v5554_v15 = vsel %vm1211_vm8, %v5531_v34, %v5545_v57 }
 0x8ca   : > { %v10522_v61 = vsel %vm1211_vm8, %v5529_v55, %v5552_v40  ;;  %5573 = vst.msk [vmem:[#allocation3 + $0x1c8] sm:$0xff] %vm8515_vm1, %v5554_v15  ;;  %v5260_v27 = vpop.permute.xlu0 %5259 }
 0x8cb   : > { %v5533_v25 = vpop.permute.xlu1 %5532  ;;  %v5272_v17 = vrot.slane %v5260_v27, 4 }
 0x8cc   : > { %v5546_v59 = vrot.slane %v5533_v25, 4 }
 0x8cd   : > { %v5281_v30 = vsel %vm240_vm0, %v5271_v24, %v5272_v17  ;;  %v5283_v21 = vsel %vm5278_vm6, %v5260_v27, %v5272_v17 }
 0x8ce   : > { %v10529_v9 = vsel %vm5278_vm6, %v5258_v37, %v5281_v30  ;;  %5301 = vst.msk [vmem:[#allocation3 + $0xd8] sm:$0xff] %vm8515_vm1, %v5283_v21  ;;  %v5603_v3 = vpop.permute.xlu0 %5602 }
 0x8cf   : > { %v5262_v31 = vpop.permute.xlu1 %5261  ;;  %v5615_v41 = vrot.slane %v5603_v3, 4 }
 0x8d0   : > { %v5273_v33 = vrot.slane %v5262_v31, 4 }
 0x8d1   : > { %v5623_v36 = vsel %vm240_vm0, %v5614_v8, %v5615_v41  ;;  %v5625_v26 = vsel %vm345_vm7, %v5603_v3, %v5615_v41 }
 0x8d2   : > { %v10536_v7 = vsel %vm345_vm7, %v5601_v63, %v5623_v36  ;;  %5643 = vst.msk [vmem:[#allocation3 + $0x218] sm:$0xff] %vm8515_vm1, %v5625_v26  ;;  %v5191_v35 = vpop.permute.xlu0 %5190 }
 0x8d3   : > { %v5605_v55 = vpop.permute.xlu1 %5604  ;;  %v5203_v29 = vrot.slane %v5191_v35, 4 }
 0x8d4   : > { %v5616_v15 = vrot.slane %v5605_v55, 4 }
 0x8d5   : > { %v5212_v58 = vsel %vm240_vm0, %v5202_v4, %v5203_v29  ;;  %v5214_v23 = vsel %vm5209_vm9, %v5191_v35, %v5203_v29 }
 0x8d6   : > { %v10543_v42 = vsel %vm5209_vm9, %v5189_v60, %v5212_v58  ;;  %5232 = vst.msk [vmem:[#allocation3 + $0x98] sm:$0xff] %vm8515_vm1, %v5214_v23  ;;  %v5123_v37 = vpop.permute.xlu0 %5122 }
 0x8d7   : > { %v5193_v22 = vpop.permute.xlu1 %5192  ;;  %v5135_v28 = vrot.slane %v5123_v37, 4 }
 0x8d8   : > { %v5204_v3 = vrot.slane %v5193_v22, 4 }
 0x8d9   : > { %v5143_v47 = vsel %vm240_vm0, %v5134_v6, %v5135_v28  ;;  %v5145_v45 = vsel %vm797_vm5, %v5123_v37, %v5135_v28 }
 0x8da   : > { %v10550_v63 = vsel %vm797_vm5, %v5121_v1, %v5143_v47  ;;  %5163 = vst.msk [vmem:[#allocation3 + $0x58] sm:$0xff] %vm8515_vm1, %v5145_v45  ;;  %v5535_v20 = vpop.permute.xlu0 %5534 }
 0x8db   : > { %v5125_v54 = vpop.permute.xlu1 %5124  ;;  %v5547_v2 = vrot.slane %v5535_v20, 4 }
 0x8dd   : > { %v5555_v39 = vsel %vm240_vm0, %v5546_v59, %v5547_v2  ;;  %v5557_v43 = vsel %vm1211_vm8, %v5535_v20, %v5547_v2 }
 0x8de   : > { %v10557_v60 = vsel %vm1211_vm8, %v5533_v25, %v5555_v39  ;;  %5575 = vst.msk [vmem:[#allocation3 + $0x1d8] sm:$0xff] %vm8515_vm1, %v5557_v43  ;;  %v5264_v62 = vpop.permute.xlu0 %5263 }
 0x8df   : > { %v5537_v32 = vpop.permute.xlu1 %5536  ;;  %v5274_v38 = vrot.slane %v5264_v62, 4  ;;  %v7457_v53 = vcombine.low %v10522_v61, %v10557_v60 }
 0x8e0   : > { %v5548_v6 = vrot.slane %v5537_v32, 4 }
 0x8e1   : > { %v5284_v34 = vsel %vm240_vm0, %v5273_v33, %v5274_v38  ;;  %v5286_v1 = vsel %vm5278_vm6, %v5264_v62, %v5274_v38 }
 0x8e2   : > { %v10566_v11 = vsel %vm5278_vm6, %v5262_v31, %v5284_v34  ;;  %5303 = vst.msk [vmem:[#allocation3 + $0xe8] sm:$0xff] %vm8515_vm1, %v5286_v1  ;;  %v5607_v57 = vpop.permute.xlu0 %5606 }
 0x8e3   : > { %v5468_v40 = vpop.permute.xlu1 %5467  ;;  %v5617_v27 = vrot.slane %v5607_v57, 4 }
 0x8e4   : > { %v5479_v2 = vrot.slane %v5468_v40, 4 }
 0x8e5   : > { %v5626_v25 = vsel %vm240_vm0, %v5616_v15, %v5617_v27  ;;  %v5628_v24 = vsel %vm345_vm7, %v5607_v57, %v5617_v27 }
 0x8e6   : > { %v10573_v17 = vsel %vm345_vm7, %v5605_v55, %v5626_v25  ;;  %5645 = vst.msk [vmem:[#allocation3 + $0x228] sm:$0xff] %vm8515_vm1, %v5628_v24  ;;  %v5195_v30 = vpop.permute.xlu0 %5194  ;;  %v5136_v55 = vrot.slane %v5125_v54, 4 }
 0x8e7   : > { %v5266_v21 = vpop.permute.xlu1 %5265  ;;  %v5205_v31 = vrot.slane %v5195_v30, 4 }
 0x8e8   : > { %v5275_v34 = vrot.slane %v5266_v21, 4 }
 0x8e9   : > { %v5215_v8 = vsel %vm240_vm0, %v5204_v3, %v5205_v31  ;;  %v5217_v41 = vsel %vm5209_vm9, %v5195_v30, %v5205_v31 }
 0x8ea   : > { %v10580_v36 = vsel %vm5209_vm9, %v5193_v22, %v5215_v8  ;;  %5234 = vst.msk [vmem:[#allocation3 + $0xa8] sm:$0xff] %vm8515_vm1, %v5217_v41  ;;  %v5127_v26 = vpop.permute.xlu0 %5126 }
 0x8eb   : > { %v5609_v35 = vpop.permute.xlu1 %5608  ;;  %v5137_v4 = vrot.slane %v5127_v26, 4 }
 0x8ec   : > { %v5618_v24 = vrot.slane %v5609_v35, 4 }
 0x8ed   : > { %v5146_v29 = vsel %vm240_vm0, %v5136_v55, %v5137_v4  ;;  %v5148_v58 = vsel %vm797_vm5, %v5127_v26, %v5137_v4 }
 0x8ee   : > { %v10587_v23 = vsel %vm797_vm5, %v5125_v54, %v5146_v29  ;;  %5165 = vst.msk [vmem:[#allocation3 + $0x68] sm:$0xff] %vm8515_vm1, %v5148_v58  ;;  %v5539_v37 = vpop.permute.xlu0 %5538 }
 0x8ef   : > { %v5197_v22 = vpop.permute.xlu1 %5196  ;;  %v5549_v28 = vrot.slane %v5539_v37, 4 }
 0x8f0   : > { %v5206_v29 = vrot.slane %v5197_v22, 4 }
 0x8f1   : > { %v5558_v47 = vsel %vm240_vm0, %v5548_v6, %v5549_v28  ;;  %v5560_v45 = vsel %vm1211_vm8, %v5539_v37, %v5549_v28  ;;  %v7425_v6 = vcombine.low %v10481_v12, %v10529_v9 }
 0x8f2   : > { %v10594_v20 = vsel %vm1211_vm8, %v5537_v32, %v5558_v47  ;;  %5577 = vst.msk [vmem:[#allocation3 + $0x1e8] sm:$0xff] %vm8515_vm1, %v5560_v45  ;;  %v5470_v54 = vpop.permute.xlu0 %5469  ;;  %v7466_v47 = vcombine.high %v10493_v18, %v10536_v7 }
 0x8f3   : > { %v5460_v59 = vpop.permute.xlu1 %5459  ;;  %v5480_v39 = vrot.slane %v5470_v54, 4 }
 0x8f5   : > { %v5490_v43 = vsel %vm240_vm0, %v5479_v2, %v5480_v39  ;;  %v5492_v62 = vsel %vm5484_vm10, %v5470_v54, %v5480_v39 }
 0x8f6   : > { %v10601_v33 = vsel %vm5484_vm10, %v5468_v40, %v5490_v43  ;;  %5509 = vst.msk [vmem:[#allocation3 + $0x1a8] sm:$0xff] %vm8515_vm1, %v5492_v62  ;;  %v5268_v32 = vpop.permute.xlu0 %5267  ;;  %v7465_v43 = vcombine.low %v10493_v18, %v10536_v7 }
 0x8f7   : > { %v10605_v38 = vpop.permute.xlu1 %5128  ;;  %v5276_v1 = vrot.slane %v5268_v32, 4 }
 0x8f8   : > { %v5138_v18 = vrot.slane %v10605_v38, 4 }
 0x8f9   : > { %v5287_v57 = vsel %vm240_vm0, %v5275_v34, %v5276_v1  ;;  %v5289_v15 = vsel %vm5278_vm6, %v5268_v32, %v5276_v1  ;;  %v7418_v32 = vcombine.high %v10505_v10, %v10543_v42  ;;  %v10644_v1 = vld [vmem:[#allocation4 + $0x98] ss:$12 sps:$4 sm:$0xff]  }
 0x8fa   : > { %v5288_v27 = vsel %vm5278_vm6, %v5266_v21, %v5287_v57  ;;  %5305 = vst.msk [vmem:[#allocation3 + $0xf8] sm:$0xff] %vm8515_vm1, %v5289_v15  ;;  %v5611_v25 = vpop.permute.xlu0 %5610  ;;  %v7426_v21 = vcombine.high %v10481_v12, %v10529_v9 }
 0x8fb   : > { %v10612_v40 = vpop.permute.xlu1 %5540  ;;  %v5619_v30 = vrot.slane %v5611_v25, 4  ;;  %v7429_v3 = vcombine.low %v10566_v11, %v5288_v27  ;;  %v7430_v31 = vcombine.high %v10566_v11, %v5288_v27  ;;  %v7417_v27 = vcombine.low %v10505_v10, %v10543_v42 }
 0x8fd   : > { %v5629_v8 = vsel %vm240_vm0, %v5618_v24, %v5619_v30  ;;  %v5631_v41 = vsel %vm345_vm7, %v5611_v25, %v5619_v30  ;;  %6150 = vmatprep.subr.bf16.mxu1 %v7430_v31  ;;  %v7824_v30 = vld [vmem:[#allocation3 + $0xcc] ss:$16 sps:$4 sm:$0xff]  }
 0x8fe   : > { %v5630_v26 = vsel %vm345_vm7, %v5609_v35, %v5629_v8  ;;  %5647 = vst.msk [vmem:[#allocation3 + $0x238] sm:$0xff] %vm8515_vm1, %v5631_v41  ;;  %v5199_v55 = vpop.permute.xlu0 %5198  ;;  %6151 = vmatpush1.bf16.msra.mxu1 %v7429_v3  ;;  %vm5415_vm7 = vcmask 752640  }
 0x8ff   : > { %v10623_v4 = vpop.permute.xlu1 %5471  ;;  %v5207_v58 = vrot.slane %v5199_v55, 4  ;;  %6152 = vmatprep.subr.bf16.mxu1 %v7426_v21  ;;  %v7469_v11 = vcombine.low %v10573_v17, %v5630_v26  ;;  %v7470_v37 = vcombine.high %v10573_v17, %v5630_v26  ;;  %v5475_v17 = vrot.slane %v5460_v59, 4  ;;  %v7822_v26 = vld [vmem:[#allocation3 + $0xc8] ss:$16 sps:$4 sm:$0xff]  }
 0x901   : > { %v5218_v28 = vsel %vm240_vm0, %v5206_v29, %v5207_v58  ;;  %v5220_v35 = vsel %vm5209_vm9, %v5199_v55, %v5207_v58  ;;  %6215 = vmatprep.subr.bf16.mxu0 %v7470_v37  ;;  %v7820_v34 = vld [vmem:[#allocation3 + $0xec] ss:$16 sps:$4 sm:$0xff]   ;;  %v7818_v25 = vld [vmem:[#allocation3 + $0xe8] ss:$16 sps:$4 sm:$0xff]   ;;  %v7410_v29 = vcombine.high %v10515_v5, %v10550_v63 }
 0x902   : > { %v5219_v45 = vsel %vm5209_vm9, %v5197_v22, %v5218_v28  ;;  %5236 = vst.msk [vmem:[#allocation3 + $0xb8] sm:$0xff] %vm8515_vm1, %v5220_v35  ;;  %v5462_v54 = vpop.permute.xlu0 %5461  ;;  %6153 = vmatpush1.bf16.msra.mxu1 %v7425_v6  ;;  %6216 = vmatpush1.bf16.msra.mxu0 %v7469_v11  ;;  %v10671_v11 = vld [vmem:[#allocation4 + $0xb0] ss:$12 sps:$4 sm:$0xff]  }
 0x903   : > { %v5464_v2 = vpop.permute.xlu1 %5463  ;;  %v5476_v39 = vrot.slane %v5462_v54, 4  ;;  %6217 = vmatprep.subr.bf16.mxu0 %v7466_v47  ;;  %v7421_v12 = vcombine.low %v10580_v36, %v5219_v45  ;;  %v7422_v9 = vcombine.high %v10580_v36, %v5219_v45  ;;  %v7409_v47 = vcombine.low %v10515_v5, %v10550_v63 }
 0x904   : > { %v5477_v10 = vrot.slane %v5464_v2, 4 }
 0x905   : > { %v5483_v62 = vsel %vm240_vm0, %v5475_v17, %v5476_v39  ;;  %v5486_v22 = vsel %vm5484_vm10, %v5462_v54, %v5476_v39  ;;  %6154 = vmatprep.subr.bf16.mxu1 %v7422_v9  ;;  %v7406_v17 = vcombine.high %v10335_v14, %v10341_v52  ;;  %v7830_v39 = vld [vmem:[#allocation3 + $0x8c] ss:$16 sps:$4 sm:$0xff]  }
 0x906   : > { %v10647_v57 = vsel %vm5484_vm10, %v5460_v59, %v5483_v62  ;;  %5505 = vst.msk [vmem:[#allocation3 + $0x188] sm:$0xff] %vm8515_vm1, %v5486_v22  ;;  %v5131_v36 = vpop.permute.xlu0 %5130  ;;  %6155 = vmatpush1.bf16.msra.mxu1 %v7421_v12  ;;  %6218 = vmatpush1.bf16.msra.mxu0 %v7465_v43  ;;  %v7405_v43 = vcombine.low %v10335_v14, %v10341_v52  ;;  %v7828_v62 = vld [vmem:[#allocation3 + $0x88] ss:$16 sps:$4 sm:$0xff]   ;;  %v5550_v14 = vrot.slane %v10612_v40, 4 }
 0x907   : > { %v5399_v15 = vpop.permute.xlu1 %5398  ;;  %v5139_v7 = vrot.slane %v5131_v36, 4  ;;  %6156 = vmatprep.subr.bf16.mxu1 %v7418_v32  ;;  %6256 = vmatprep.subr.bf16.mxu0 %v7820_v34  ;;  %v7402_v34 = vcombine.high %v10316_v46, %v10353_v48 }
 0x908   : > { %v5410_v6 = vrot.slane %v5399_v15, 4 }
 0x909   : > { %v5149_v24 = vsel %vm240_vm0, %v5138_v18, %v5139_v7  ;;  %v5151_v59 = vsel %vm797_vm5, %v5131_v36, %v5139_v7  ;;  %7473 = vmatmul.mubr.msk.bf16.vlgmr.msra.gmra.mxu0 %vm1802_vm4, %v10644_v1  ;;  %v7827_v58 = vld [vmem:[#allocation3 + $0xac] ss:$16 sps:$4 sm:$0xff]   ;;  %v7825_v45 = vld [vmem:[#allocation3 + $0xa8] ss:$16 sps:$4 sm:$0xff]  }
 0x90a   : > { %v5150_v3 = vsel %vm797_vm5, %v10605_v38, %v5149_v24  ;;  %5167 = vst.msk [vmem:[#allocation3 + $0x78] sm:$0xff] %vm8515_vm1, %v5151_v59  ;;  %v5466_v31 = vpop.permute.xlu0 %5465  ;;  %6157 = vmatpush1.bf16.msra.mxu1 %v7417_v27  ;;  %6257 = vmatpush1.bf16.msra.mxu0 %v7818_v25  ;;  %v7836_v59 = vld [vmem:[#allocation3 + $0x4c] ss:$16 sps:$4 sm:$0xff]   ;;  %vm6790_vm5 = vcmask 523648  }
 0x90b   : > { %v10662_v8 = vpop.permute.xlu1 %5402  ;;  %v5478_v42 = vrot.slane %v5466_v31, 4  ;;  %6258 = vmatprep.subr.bf16.mxu0 %v7824_v30  ;;  %v7413_v41 = vcombine.low %v10587_v23, %v5150_v3  ;;  %v7414_v21 = vcombine.high %v10587_v23, %v5150_v3  ;;  %6245 = vmatprep.mubr.bf16.mxu0 %v11279_v16 }
 0x90d   : > { %v5487_v38 = vsel %vm240_vm0, %v5477_v10, %v5478_v42  ;;  %v5489_v55 = vsel %vm5484_vm10, %v5466_v31, %v5478_v42  ;;  %6158 = vmatprep.subr.bf16.mxu1 %v7414_v21 }
 0x90e   : > { %v10674_v37 = vsel %vm5484_vm10, %v5464_v2, %v5487_v38  ;;  %5507 = vst.msk [vmem:[#allocation3 + $0x198] sm:$0xff] %vm8515_vm1, %v5489_v55  ;;  %v5401_v23 = vpop.permute.xlu0 %5400  ;;  %6159 = vmatpush1.bf16.msra.mxu1 %v7413_v41  ;;  %6259 = vmatpush1.bf16.msra.mxu0 %v7822_v26  ;;  %v7834_v41 = vld [vmem:[#allocation3 + $0x48] ss:$16 sps:$4 sm:$0xff]   ;;  %v7839_v38 = vld [vmem:[#allocation3 + $0x2c] ss:$16 sps:$4 sm:$0xff]  }
 0x90f   : > { %v5411_v28 = vrot.slane %v5401_v23, 4  ;;  %6160 = vmatprep.subr.bf16.mxu1 %v7410_v29  ;;  %6260 = vmatprep.subr.bf16.mxu0 %v7827_v58  ;;  %v5391_v35 = vpop.permute.xlu1 %5390 }
 0x910   : > { %v5406_v5 = vrot.slane %v5391_v35, 4 }
 0x911   : > { %v5421_v54 = vsel %vm240_vm0, %v5410_v6, %v5411_v28  ;;  %v5423_v2 = vsel %vm5415_vm7, %v5401_v23, %v5411_v28  ;;  %7474 = vmatmul.mubr.msk.bf16.gmra.mxu0 %vm1802_vm4, %v10671_v11  ;;  %v7833_v36 = vld [vmem:[#allocation3 + $0x6c] ss:$16 sps:$4 sm:$0xff]   ;;  %v7831_v27 = vld [vmem:[#allocation3 + $0x68] ss:$16 sps:$4 sm:$0xff]  }
 0x912   : > { %v10687_v12 = vsel %vm5415_vm7, %v5399_v15, %v5421_v54  ;;  %5440 = vst.msk [vmem:[#allocation3 + $0x168] sm:$0xff] %vm8515_vm1, %v5423_v2  ;;  %v5393_v9 = vpop.permute.xlu0 %5392  ;;  %6161 = vmatpush1.bf16.msra.mxu1 %v7409_v47  ;;  %6261 = vmatpush1.bf16.msra.mxu0 %v7825_v45  ;;  %v7837_v23 = vld [vmem:[#allocation3 + $0x28] ss:$16 sps:$4 sm:$0xff]  }
 0x913   : > { %v5407_v63 = vrot.slane %v5393_v9, 4  ;;  %6162 = vmatprep.subr.bf16.mxu1 %v7406_v17  ;;  %6262 = vmatprep.subr.bf16.mxu0 %v7830_v39  ;;  %v5395_v18 = vpop.permute.xlu1 %5394 }
 0x914   : > { %6288 = vmatprep.mubr.bf16.mxu0 %v10485_v51  ;;  %v7401_v51 = vcombine.low %v10316_v46, %v10353_v48  ;;  %v5408_v31 = vrot.slane %v5395_v18, 4 }
 0x915   : > { %v5414_v22 = vsel %vm240_vm0, %v5406_v5, %v5407_v63  ;;  %v5417_v32 = vsel %vm5415_vm7, %v5393_v9, %v5407_v63  ;;  %v7840_v5 = vld [vmem:[#allocation3 + $0x8] ss:$16 sps:$4 sm:$0xff]  }
 0x916   : > { %v10699_v15 = vsel %vm5415_vm7, %v5391_v35, %v5414_v22  ;;  %5436 = vst.msk [vmem:[#allocation3 + $0x148] sm:$0xff] %vm8515_vm1, %v5417_v32  ;;  %v5543_v7 = vpop.permute.xlu0 %5542  ;;  %6163 = vmatpush1.bf16.msra.mxu1 %v7405_v43  ;;  %6263 = vmatpush1.bf16.msra.mxu0 %v7828_v62  ;;  %v7842_v35 = vld [vmem:[#allocation3 + $0xc] ss:$16 sps:$4 sm:$0xff]   ;;  %v7450_v43 = vcombine.high %v10647_v57, %v10674_v37 }
 0x917   : > { %v5551_v52 = vrot.slane %v5543_v7, 4  ;;  %6164 = vmatprep.subr.bf16.mxu1 %v7402_v34  ;;  %6264 = vmatprep.subr.bf16.mxu0 %v7833_v36  ;;  %v5331_v42 = vpop.permute.xlu1 %5330  ;;  %v7449_v32 = vcombine.low %v10647_v57, %v10674_v37 }
 0x918   : > { %v5342_v2 = vrot.slane %v5331_v42, 4 }
 0x919   : > { %v5561_v25 = vsel %vm240_vm0, %v5550_v14, %v5551_v52  ;;  %v5563_v24 = vsel %vm1211_vm8, %v5543_v7, %v5551_v52  ;;  %v7848_v7 = vld [vmem:[#allocation3 + $0x1cc] ss:$16 sps:$4 sm:$0xff]  }
 0x91a   : > { %v5562_v30 = vsel %vm1211_vm8, %v10612_v40, %v5561_v25  ;;  %5579 = vst.msk [vmem:[#allocation3 + $0x1f8] sm:$0xff] %vm8515_vm1, %v5563_v24  ;;  %v5397_v3 = vpop.permute.xlu0 %5396  ;;  %6165 = vmatpush1.bf16.msra.mxu1 %v7401_v51  ;;  %6265 = vmatpush1.bf16.msra.mxu0 %v7831_v27  ;;  %v7458_v40 = vcombine.high %v10522_v61, %v10557_v60  ;;  %v7846_v25 = vld [vmem:[#allocation3 + $0x1c8] ss:$16 sps:$4 sm:$0xff]   ;;  %vm6807_vm8 = vcmask 654848  }
 0x91b   : > { %v5409_v10 = vrot.slane %v5397_v3, 4  ;;  %6266 = vmatprep.subr.bf16.mxu0 %v7836_v59  ;;  %v7461_v46 = vcombine.low %v10594_v20, %v5562_v30  ;;  %v7462_v48 = vcombine.high %v10594_v20, %v5562_v30  ;;  %v5481_v20 = vrot.slane %v10623_v4, 4  ;;  %v10726_v47 = vpop.permute.xlu1 %5334 }
 0x91d   : > { %v5418_v21 = vsel %vm240_vm0, %v5408_v31, %v5409_v10  ;;  %v5420_v26 = vsel %vm5415_vm7, %v5397_v3, %v5409_v10  ;;  %6166 = vmatprep.subr.bf16.mxu1 %v7462_v48 }
 0x91e   : > { %v10719_v55 = vsel %vm5415_vm7, %v5395_v18, %v5418_v21  ;;  %5438 = vst.msk [vmem:[#allocation3 + $0x158] sm:$0xff] %vm8515_vm1, %v5420_v26  ;;  %v5474_v29 = vpop.permute.xlu0 %5473  ;;  %6167 = vmatpush2.bf16.msra.mxu1 %v7461_v46  ;;  %6267 = vmatpush1.bf16.msra.mxu0 %v7834_v41  ;;  %v7854_v26 = vld [vmem:[#allocation3 + $0x18c] ss:$16 sps:$4 sm:$0xff]  }
 0x91f   : > { %v5482_v58 = vrot.slane %v5474_v29, 4  ;;  %6168 = vmatprep.subr.bf16.mxu1 %v7458_v40  ;;  %6268 = vmatprep.subr.bf16.mxu0 %v7839_v38  ;;  %v5323_v22 = vpop.permute.xlu1 %5322  ;;  %v7441_v48 = vcombine.low %v10699_v15, %v10719_v55 }
 0x920   : > { %v5338_v51 = vrot.slane %v5323_v22, 4 }
 0x921   : > { %v5493_v6 = vsel %vm240_vm0, %v5481_v20, %v5482_v58  ;;  %v5495_v28 = vsel %vm5484_vm10, %v5474_v29, %v5482_v58  ;;  %v7845_v62 = vld [vmem:[#allocation3 + $0x1ec] ss:$16 sps:$4 sm:$0xff]   ;;  %v7843_v34 = vld [vmem:[#allocation3 + $0x1e8] ss:$16 sps:$4 sm:$0xff]  }
 0x922   : > { %v5494_v45 = vsel %vm5484_vm10, %v10623_v4, %v5493_v6  ;;  %5511 = vst.msk [vmem:[#allocation3 + $0x1b8] sm:$0xff] %vm8515_vm1, %v5495_v28  ;;  %v5333_v54 = vpop.permute.xlu0 %5332  ;;  %6169 = vmatpush2.bf16.msra.mxu1 %v7457_v53  ;;  %6269 = vmatpush1.bf16.msra.mxu0 %v7837_v23  ;;  %v5412_v53 = vrot.slane %v10662_v8, 4  ;;  %v7852_v58 = vld [vmem:[#allocation3 + $0x188] ss:$16 sps:$4 sm:$0xff]  }
 0x923   : > { %v5343_v17 = vrot.slane %v5333_v54, 4  ;;  %6270 = vmatprep.subr.bf16.mxu0 %v7842_v35  ;;  %v7453_v39 = vcombine.low %v10601_v33, %v5494_v45  ;;  %v7454_v9 = vcombine.high %v10601_v33, %v5494_v45  ;;  %v5327_v46 = vpop.permute.xlu1 %5326 }
 0x924   : > { %v5340_v29 = vrot.slane %v5327_v46, 4 }
 0x925   : > { %v5352_v63 = vsel %vm240_vm0, %v5342_v2, %v5343_v17  ;;  %v5354_v4 = vsel %vm1004_vm11, %v5333_v54, %v5343_v17  ;;  %6170 = vmatprep.subr.bf16.mxu1 %v7454_v9  ;;  %v7864_v2 = vld [vmem:[#allocation4 + $0x90] ss:$12 sps:$4 sm:$0xff]   ;;  %v7858_v9 = vld [vmem:[#allocation3 + $0x148] ss:$16 sps:$4 sm:$0xff]  }
 0x926   : > { %v10742_v61 = vsel %vm1004_vm11, %v5331_v42, %v5352_v63  ;;  %5371 = vst.msk [vmem:[#allocation3 + $0x128] sm:$0xff] %vm8515_vm1, %v5354_v4  ;;  %v5405_v60 = vpop.permute.xlu0 %5404  ;;  %6171 = vmatpush2.bf16.msra.mxu1 %v7453_v39  ;;  %6271 = vmatpush1.bf16.msra.mxu0 %v7840_v5  ;;  %v7860_v17 = vld [vmem:[#allocation3 + $0x14c] ss:$16 sps:$4 sm:$0xff]   ;;  %v7861_v5 = vld [vmem:[#allocation3 + $0x228] ss:$16 sps:$4 sm:$0xff]  }
 0x927   : > { %v5413_v33 = vrot.slane %v5405_v60, 4  ;;  %6172 = vmatprep.subr.bf16.mxu1 %v7450_v43  ;;  %6272 = vmatprep.subr.bf16.mxu0 %v7845_v62  ;;  %v7863_v39 = vld [vmem:[#allocation3 + $0x22c] ss:$16 sps:$4 sm:$0xff]   ;;  %v7871_v62 = vld [vmem:[#allocation3 + $0x208] ss:$16 sps:$4 sm:$0xff]  }
 0x928   : > { %v7877_v63 = vld [vmem:[#allocation4 + $0xac] ss:$12 sps:$4 sm:$0xff]  }
 0x929   : > { %v5424_v36 = vsel %vm240_vm0, %v5412_v53, %v5413_v33  ;;  %v5426_v18 = vsel %vm5415_vm7, %v5405_v60, %v5413_v33  ;;  %v7851_v30 = vld [vmem:[#allocation3 + $0x1ac] ss:$16 sps:$4 sm:$0xff]   ;;  %v7849_v42 = vld [vmem:[#allocation3 + $0x1a8] ss:$16 sps:$4 sm:$0xff]  }
 0x92a   : > { %v5425_v14 = vsel %vm5415_vm7, %v10662_v8, %v5424_v36  ;;  %5442 = vst.msk [vmem:[#allocation3 + $0x178] sm:$0xff] %vm8515_vm1, %v5426_v18  ;;  %v5325_v52 = vpop.permute.xlu0 %5324  ;;  %6173 = vmatpush2.bf16.msra.mxu1 %v7449_v32  ;;  %6273 = vmatpush2.bf16.msra.mxu0 %v7843_v34  ;;  %v7442_v8 = vcombine.high %v10699_v15, %v10719_v55  ;;  %v7873_v4 = vld [vmem:[#allocation3 + $0x20c] ss:$16 sps:$4 sm:$0xff]   ;;  %v7879_v60 = vld [vmem:[#allocation4 + $0xa8] ss:$12 sps:$4 sm:$0xff]  }
 0x92b   : > { %v5339_v27 = vrot.slane %v5325_v52, 4  ;;  %6274 = vmatprep.subr.bf16.mxu0 %v7848_v7  ;;  %v7445_v57 = vcombine.low %v10687_v12, %v5425_v14  ;;  %v7446_v37 = vcombine.high %v10687_v12, %v5425_v14  ;;  %v5344_v12 = vrot.slane %v10726_v47, 4 }
 0x92d   : > { %v5346_v24 = vsel %vm240_vm0, %v5338_v51, %v5339_v27  ;;  %v5348_v59 = vsel %vm1004_vm11, %v5325_v52, %v5339_v27  ;;  %6174 = vmatprep.subr.bf16.mxu1 %v7446_v37 }
 0x92e   : > { %v5347_v3 = vsel %vm1004_vm11, %v5323_v22, %v5346_v24  ;;  %5367 = vst.msk [vmem:[#allocation3 + $0x108] sm:$0xff] %vm8515_vm1, %v5348_v59  ;;  %v5337_v31 = vpop.permute.xlu0 %5336  ;;  %6175 = vmatpush2.bf16.msra.mxu1 %v7445_v57  ;;  %6275 = vmatpush2.bf16.msra.mxu0 %v7846_v25 }
 0x92f   : > { %v5345_v10 = vrot.slane %v5337_v31, 4  ;;  %6176 = vmatprep.subr.bf16.mxu1 %v7442_v8  ;;  %6276 = vmatprep.subr.bf16.mxu0 %v7851_v30 }
 0x930   : > { %v10788_v34 = vpop.permute.xlu1 %5746 }
 0x931   : > { %v5355_v41 = vsel %vm240_vm0, %v5344_v12, %v5345_v10  ;;  %v5357_v21 = vsel %vm1004_vm11, %v5337_v31, %v5345_v10  ;;  %v7857_v28 = vld [vmem:[#allocation3 + $0x16c] ss:$16 sps:$4 sm:$0xff]   ;;  %v7855_v54 = vld [vmem:[#allocation3 + $0x168] ss:$16 sps:$4 sm:$0xff]  }
 0x932   : > { %v5356_v40 = vsel %vm1004_vm11, %v10726_v47, %v5355_v41  ;;  %5373 = vst.msk [vmem:[#allocation3 + $0x138] sm:$0xff] %vm8515_vm1, %v5357_v21  ;;  %v5329_v38 = vpop.permute.xlu0 %5328  ;;  %6177 = vmatpush2.bf16.msra.mxu1 %v7441_v48  ;;  %6277 = vmatpush2.bf16.msra.mxu0 %v7849_v42 }
 0x933   : > { %v5341_v20 = vrot.slane %v5329_v38, 4  ;;  %6278 = vmatprep.subr.bf16.mxu0 %v7854_v26  ;;  %v7437_v15 = vcombine.low %v10742_v61, %v5356_v40  ;;  %v7438_v55 = vcombine.high %v10742_v61, %v5356_v40 }
 0x934   : > { %v5737_v7 = vpop.permute.xlu1 %5736 }
 0x935   : > { %v5349_v23 = vsel %vm240_vm0, %v5340_v29, %v5341_v20  ;;  %v5351_v6 = vsel %vm1004_vm11, %v5329_v38, %v5341_v20  ;;  %6178 = vmatprep.subr.bf16.mxu1 %v7438_v55 }
 0x936   : > { %v5350_v35 = vsel %vm1004_vm11, %v5327_v46, %v5349_v23  ;;  %5369 = vst.msk [vmem:[#allocation3 + $0x118] sm:$0xff] %vm8515_vm1, %v5351_v6  ;;  %6179 = vmatpush2.bf16.msra.mxu1 %v7437_v15  ;;  %6279 = vmatpush2.bf16.msra.mxu0 %v7852_v58  ;;  %vm6756_vm1 = vcmask 261248  }
 0x937   : > { %6280 = vmatprep.subr.bf16.mxu0 %v7857_v28  ;;  %v7433_v47 = vcombine.low %v5347_v3, %v5350_v35  ;;  %v7434_v45 = vcombine.high %v5347_v3, %v5350_v35 }
 0x939   : > { %6180 = vmatprep.subr.bf16.mxu1 %v7434_v45  ;;  %v7870_v49 = vld [vmem:[#allocation3 + $0x12c] ss:$16 sps:$4 sm:$0xff]   ;;  %v7868_v43 = vld [vmem:[#allocation3 + $0x128] ss:$16 sps:$4 sm:$0xff]  }
 0x93a   : > { %6181 = vmatpush2.bf16.msra.mxu1 %v7433_v47  ;;  %6281 = vmatpush2.bf16.msra.mxu0 %v7855_v54 }
 0x93b   : > { %6282 = vmatprep.subr.bf16.mxu0 %v7860_v17  ;;  %6321 = vmatprep.subr.bf16.mxu1 %v7863_v39 }
 0x93d   : > { %6183 = vmatmul.mubr.bf16.vlgmr.msra.gmra.mxu1 %v7864_v2  ;;  %v7876_v61 = vld [vmem:[#allocation3 + $0x10c] ss:$16 sps:$4 sm:$0xff]   ;;  %v7874_v53 = vld [vmem:[#allocation3 + $0x108] ss:$16 sps:$4 sm:$0xff]  }
 0x93e   : > { %6283 = vmatpush2.bf16.msra.mxu0 %v7858_v9  ;;  %6322 = vmatpush1.bf16.msra.mxu1 %v7861_v5 }
 0x93f   : > { %6284 = vmatprep.subr.bf16.mxu0 %v7870_v49  ;;  %6323 = vmatprep.subr.bf16.mxu1 %v7873_v4  ;;  %v10790_v25 = vpop.permute.xlu0 %5751 }
 0x940   : > { %6192 = vmatprep.mubr.bf16.mxu1 %v7877_v63 }
 0x942   : > { %6285 = vmatpush2.bf16.msra.mxu0 %v7868_v43  ;;  %6324 = vmatpush1.bf16.msra.mxu1 %v7871_v62 }
 0x943   : > { %6286 = vmatprep.subr.bf16.mxu0 %v7876_v61  ;;  %v10795_v42 = vpop.permute.xlu0 %5741 }
 0x945   : > { %6193 = vmatmul.mubr.bf16.gmra.mxu1 %v7879_v60 }
 0x946   : > { %6287 = vmatpush2.bf16.msra.mxu0 %v7874_v53  ;;  %6341 = vmatprep.mubr.bf16.mxu1 %v11279_v16 }
 0x949   : > { %6289 = vmatmul.mubr.bf16.vlgmr.msra.gmra.mxu0 %v7864_v2 }
 0x94a   : > { %6298 = vmatprep.mubr.bf16.mxu0 %v7877_v63 }
 0x94d   : > { %7475 = vmatmul.mubr.msk.bf16.vlgmr.msra.gmra.mxu1 %vm1802_vm4, %v10644_v1 }
 0x94e   : > { %6351 = vmatprep.mubr.bf16.mxu1 %v11279_v16 }
 0x951   : > { %6299 = vmatmul.mubr.bf16.gmra.mxu0 %v7879_v60 }
 0x952   : > { %6686 = vmatprep.mubr.bf16.mxu0 %v11279_v16 }
 0x955   : > { %7476 = vmatmul.mubr.msk.bf16.gmra.mxu1 %vm1802_vm4, %v10671_v11 }
 0x956   : > { %6633 = vmatprep.mubr.bf16.mxu1 %v11279_v16 }
 0x9c9   : > { %v6237_v33 = vpop.f32.mrf.mxu0 }
 0x9cb   : > { %v6239_v22 = vpop.f32.mrf.mxu0 }
 0x9cd   : > { %v6241_v32 = vpop.f32.mrf.mxu0 }
 0x9cf   : > { %v6243_v36 = vpop.f32.mrf.mxu0 }
 0x9d1   : > { %v6247_v18 = vpop.f32.mrf.mxu0 }
 0x9d3   : > { %v6249_v51 = vpop.f32.mrf.mxu0 }
 0x9d5   : > { %v6251_v59 = vpop.f32.mrf.mxu0 }
 0x9d7   : > { %v6253_v46 = vpop.f32.mrf.mxu0 }
 0x9fd   : > { %v6184_v14 = vpop.f32.mrf.mxu1 }
 0x9fe   : > { %v6185_v1 = vadd.f32 %v6184_v14, %v5737_v7 }
 0x9ff   : > { %v6186_v52 = vpop.f32.mrf.mxu1 }
 0xa00   : > { %v6238_v27 = vadd.f32 %v6237_v33, %v6185_v1  ;;  %v6187_v57 = vadd.f32 %v6186_v52, %v5737_v7 }
 0xa01   : > { %v6188_v37 = vpop.f32.mrf.mxu1 }
 0xa02   : > { %v6362_v11 = vmax.f32 %v6238_v27, 0.0  ;;  %v6240_v24 = vadd.f32 %v6239_v22, %v6187_v57  ;;  %v6189_v15 = vadd.f32 %v6188_v37, %v10795_v42 }
 0xa03   : > { %v6190_v8 = vpop.f32.mrf.mxu1 }
 0xa04   : > { %v6363_v30 = vmax.f32 %v6240_v24, 0.0  ;;  %v6378_v31 = vmul.f32 %v6362_v11, %v8855_v50  ;;  %v6191_v26 = vadd.f32 %v6190_v8, %v10795_v42  ;;  %v6242_v63 = vadd.f32 %v6241_v32, %v6189_v15 }
 0xa05   : > { %v6194_v3 = vpop.f32.mrf.mxu1 }
 0xa06   : > { %v6379_v12 = vmul.f32 %v6363_v30, %v11309_v19  ;;  %v6195_v10 = vadd.f32 %v6194_v3, %v10788_v34  ;;  %v6244_v45 = vadd.f32 %v6243_v36, %v6191_v26 }
 0xa07   : > { %v6196_v48 = vpop.f32.mrf.mxu1 }
 0xa08   : > { %v7533_v41 = vpack.c.bf16 %v6379_v12, %v6378_v31  ;;  %v6248_v21 = vadd.f32 %v6247_v18, %v6195_v10  ;;  %v6197_v40 = vadd.f32 %v6196_v48, %v10788_v34  ;;  %v6367_v53 = vmax.f32 %v6244_v45, 0.0 }
 0xa09   : > { %v6198_v38 = vpop.f32.mrf.mxu1  ;;  %v6290_v29 = vpop.f32.mrf.mxu0 }
 0xa0a   : > { %v6199_v20 = vadd.f32 %v6198_v38, %v10790_v25  ;;  %6434 = vrot.lane.b32.xlu1 %v7533_v41, %s8014_s16  ;;  %v6370_v55 = vmax.f32 %v6248_v21, 0.0  ;;  %v6250_v58 = vadd.f32 %v6249_v51, %v6197_v40  ;;  %v6291_v35 = vadd.f32 %v6290_v29, %v5737_v7 }
 0xa0b   : > { %v6200_v23 = vpop.f32.mrf.mxu1  ;;  %v6292_v6 = vpop.f32.mrf.mxu0  ;;  %v6366_v51 = vmax.f32 %v6242_v63, 0.0  ;;  %v6383_v11 = vmul.f32 %v6367_v53, %v11309_v19 }
 0xa0c   : > { %v6252_v28 = vadd.f32 %v6251_v59, %v6199_v20  ;;  %v6201_v47 = vadd.f32 %v6200_v23, %v10790_v25  ;;  %v6371_v54 = vmax.f32 %v6250_v58, 0.0  ;;  %v6386_v49 = vmul.f32 %v6370_v55, %v8855_v50 }
 0xa0d   : > { %v6294_v2 = vpop.f32.mrf.mxu0  ;;  %v6343_v17 = vpop.f32.mrf.mxu1  ;;  %v6293_v43 = vadd.f32 %v6292_v6, %v5737_v7  ;;  %v6382_v12 = vmul.f32 %v6366_v51, %v8855_v50 }
 0xa0e   : > { %v6374_v39 = vmax.f32 %v6252_v28, 0.0  ;;  %v6254_v9 = vadd.f32 %v6253_v46, %v6201_v47  ;;  %v6344_v5 = vadd.f32 %v6343_v17, %v6291_v35  ;;  %v6387_v4 = vmul.f32 %v6371_v54, %v11309_v19 }
 0xa0f   : > { %v6296_v62 = vpop.f32.mrf.mxu0  ;;  %v6345_v61 = vpop.f32.mrf.mxu1  ;;  %v7535_v40 = vpack.c.bf16 %v6383_v11, %v6382_v12  ;;  %v6295_v38 = vadd.f32 %v6294_v2, %v10795_v42 }
 0xa10   : > { %v6375_v60 = vmax.f32 %v6254_v9, 0.0  ;;  %v7537_v33 = vpack.c.bf16 %v6387_v4, %v6386_v49  ;;  %v6364_v22 = vmax.f32 %v6344_v5, 0.0  ;;  %v6346_v18 = vadd.f32 %v6345_v61, %v6293_v43 }
 0xa11   : > { %v6300_v36 = vpop.f32.mrf.mxu0  ;;  %v6347_v14 = vpop.f32.mrf.mxu1  ;;  %v6390_v1 = vmul.f32 %v6374_v39, %v8855_v50  ;;  %v6297_v41 = vadd.f32 %v6296_v62, %v10795_v42 }
 0xa12   : > { %v6391_v52 = vmul.f32 %v6375_v60, %v11309_v19  ;;  %v6365_v32 = vmax.f32 %v6346_v18, 0.0  ;;  %6442 = vrot.lane.b32.xlu1 %v7537_v33, %s8014_s16  ;;  %v6301_v37 = vadd.f32 %v6300_v36, %v10788_v34  ;;  %v6380_v24 = vmul.f32 %v6364_v22, %v11310_v44 }
 0xa13   : > { %v6302_v27 = vpop.f32.mrf.mxu0  ;;  %v6349_v57 = vpop.f32.mrf.mxu1  ;;  %v6348_v55 = vadd.f32 %v6347_v14, %v6295_v38  ;;  %v7488_v38 = vld [vmem:[%s11203_s3 + $0x98] sm:$0xff] }
 0xa14   : > { %v7539_v7 = vpack.c.bf16 %v6391_v52, %v6390_v1  ;;  %v6381_v59 = vmul.f32 %v6365_v32, %v11311_v13  ;;  %v6303_v3 = vadd.f32 %v6302_v27, %v10788_v34  ;;  %v6350_v29 = vadd.f32 %v6349_v57, %v6297_v41 }
 0xa15   : > { %v6304_v8 = vpop.f32.mrf.mxu0  ;;  %v6353_v30 = vpop.f32.mrf.mxu1  ;;  %v6368_v54 = vmax.f32 %v6348_v55, 0.0 }
 0xa16   : > { %v6354_v31 = vadd.f32 %v6353_v30, %v6301_v37  ;;  %v7534_v10 = vpack.c.bf16 %v6381_v59, %v6380_v24  ;;  %6446 = vrot.lane.b32.xlu1 %v7539_v7, %s8014_s16  ;;  %v6305_v19 = vadd.f32 %v6304_v8, %v10790_v25  ;;  %v6369_v47 = vmax.f32 %v6350_v29, 0.0 }
 0xa17   : > { %v6306_v46 = vpop.f32.mrf.mxu0  ;;  %v6355_v48 = vpop.f32.mrf.mxu1  ;;  %v6384_v9 = vmul.f32 %v6368_v54, %v11310_v44 }
 0xa18   : > { %v6372_v21 = vmax.f32 %v6354_v31, 0.0  ;;  %v6356_v26 = vadd.f32 %v6355_v48, %v6303_v3  ;;  %6436 = vrot.lane.b32.xlu0 %v7534_v10, %s8014_s16  ;;  %v6307_v50 = vadd.f32 %v6306_v46, %v10790_v25  ;;  %v6385_v17 = vmul.f32 %v6369_v47, %v11311_v13 }
 0xa19   : > { %v6357_v34 = vpop.f32.mrf.mxu1 }
 0xa1a   : > { %v6373_v20 = vmax.f32 %v6356_v26, 0.0  ;;  %v6358_v15 = vadd.f32 %v6357_v34, %v6305_v19  ;;  %6438 = vrot.lane.b32.xlu1 %v7535_v40, %s8014_s16  ;;  %v6388_v23 = vmul.f32 %v6372_v21, %v11310_v44  ;;  %v7536_v5 = vpack.c.bf16 %v6385_v17, %v6384_v9  ;;  %v7487_v26 = vld [vmem:[%s11203_s3 + $0x90] sm:$0xff]  ;;  %v7486_v40 = vld [vmem:[%s11203_s3 + $0x88] sm:$0xff] }
 0xa1b   : > { %v6359_v58 = vpop.f32.mrf.mxu1 }
 0xa1c   : > { %v6389_v6 = vmul.f32 %v6373_v20, %v11311_v13  ;;  %v6376_v28 = vmax.f32 %v6358_v15, 0.0  ;;  %v6360_v35 = vadd.f32 %v6359_v58, %v6307_v50 }
 0xa1e   : > { %v7538_v42 = vpack.c.bf16 %v6389_v6, %v6388_v23  ;;  %v6377_v45 = vmax.f32 %v6360_v35, 0.0  ;;  %v6392_v2 = vmul.f32 %v6376_v28, %v11310_v44 }
 0xa20   : > { %v6393_v25 = vmul.f32 %v6377_v45, %v11311_v13  ;;  %6444 = vrot.lane.b32.xlu0 %v7538_v42, %s8014_s16  ;;  %v7891_v42 = vld [vmem:[%s11202_s2] sm:$0xff]  }
 0xa22   : > { %v7540_v39 = vpack.c.bf16 %v6393_v25, %v6392_v2  ;;  %v7892_v2 = vld [vmem:[%s11202_s2 + $0x8] sm:$0xff]  }
 0xa24   : > { %6448 = vrot.lane.b32.xlu0 %v7540_v39, %s8014_s16 }
 0xa28   : > { %6440 = vrot.lane.b32.xlu0 %v7536_v5, %s8014_s16  ;;  %s8039_s16 = smov 33  }
 0xa7c   : > { %v6435_v63 = vpop.permute.xlu1 %6434 }
 0xa7d   : > { %v6450_v49 = vrot.slane %v6435_v63, 4 }
 0xa7f   : > { %v6458_v4 = vsel %vm2138_vm14, %v6450_v49, %v6435_v63 }
 0xa80   : > { %6478 = vst.msk [vmem:[#allocation2] sm:$0xff] %vm8904_vm15, %v6458_v4 }
 0xa84   : > { %v6443_v43 = vpop.permute.xlu1 %6442 }
 0xa85   : > { %v6454_v62 = vrot.slane %v6443_v43, 4 }
 0xa87   : > { %v6464_v61 = vsel %vm2138_vm14, %v6454_v62, %v6443_v43 }
 0xa88   : > { %6482 = vst.msk [vmem:[#allocation2 + $0x20] sm:$0xff] %vm8904_vm15, %v6464_v61  ;;  %v6447_v44 = vpop.permute.xlu1 %6446 }
 0xa89   : > { %v6456_v13 = vrot.slane %v6447_v44, 4 }
 0xa8a   : > { %v6437_v60 = vpop.permute.xlu0 %6436 }
 0xa8b   : > { %v6467_v53 = vsel %vm2138_vm14, %v6456_v13, %v6447_v44  ;;  %v6451_v33 = vrot.slane %v6437_v60, 4 }
 0xa8c   : > { %6484 = vst.msk [vmem:[#allocation2 + $0x30] sm:$0xff] %vm8904_vm15, %v6467_v53  ;;  %v6439_v22 = vpop.permute.xlu1 %6438 }
 0xa8d   : > { %v6459_v18 = vsel %vm240_vm0, %v6450_v49, %v6451_v33  ;;  %v6452_v36 = vrot.slane %v6439_v22, 4 }
 0xa8e   : > { %v6460_v14 = vsel %vm2138_vm14, %v6459_v18, %v6437_v60 }
 0xa8f   : > { %6479 = vst.msk [vmem:[#allocation2 + $0x8] sm:$0xff] %vm8927_vm3, %v6460_v14  ;;  %v6461_v1 = vsel %vm2138_vm14, %v6452_v36, %v6439_v22  ;;  %v6490_v24 = vld [vmem:[#allocation2 + $0x20] sm:$0xff] }
 0xa90   : > { %6480 = vst.msk [vmem:[#allocation2 + $0x10] sm:$0xff] %vm8904_vm15, %v6461_v1  ;;  %vm6862_vm15 = vcmask 1048448  }
 0xa92   : > { %v6445_v52 = vpop.permute.xlu0 %6444 }
 0xa93   : > { %v6455_v51 = vrot.slane %v6445_v52, 4  ;;  %v7880_v32 = vld [vmem:[#allocation2 + $0x24] ss:$16 sps:$4 sm:$0xff]  }
 0xa94   : > { %v6492_v57 = vld [vmem:[#allocation2 + $0x30] sm:$0xff]  ;;  %6575 = vrot.lane.b32.xlu1 %v7880_v32, %s8013_s13 }
 0xa95   : > { %v6465_v27 = vsel %vm240_vm0, %v6454_v62, %v6455_v51  ;;  %v7495_v59 = vcombine.low %v6490_v24, %v6492_v57 }
 0xa96   : > { %v6466_v7 = vsel %vm2138_vm14, %v6465_v27, %v6445_v52  ;;  %v6449_v37 = vpop.permute.xlu0 %6448 }
 0xa97   : > { %6483 = vst.msk [vmem:[#allocation2 + $0x28] sm:$0xff] %vm8927_vm3, %v6466_v7  ;;  %v6457_v11 = vrot.slane %v6449_v37, 4  ;;  %v7886_v48 = vld [vmem:[#allocation2 + $0x4] ss:$16 sps:$4 sm:$0xff]   ;;  %v7889_v19 = vld [vmem:[#allocation2] ss:$16 sps:$4 sm:$0xff]  }
 0xa98   : > { %6573 = vrot.lane.b32.xlu1 %v7495_v59, %s8013_s13 }
 0xa99   : > { %v6468_v0 = vsel %vm240_vm0, %v6456_v13, %v6457_v11 }
 0xa9a   : > { %v6469_v8 = vsel %vm2138_vm14, %v6468_v0, %v6449_v37  ;;  %v6441_v30 = vpop.permute.xlu0 %6440 }
 0xa9b   : > { %6485 = vst.msk [vmem:[#allocation2 + $0x38] sm:$0xff] %vm8927_vm3, %v6469_v8  ;;  %v6453_v3 = vrot.slane %v6441_v30, 4 }
 0xa9d   : > { %v6462_v31 = vsel %vm240_vm0, %v6452_v36, %v6453_v3  ;;  %vm6739_vm0 = vcmask 130048  }
 0xa9e   : > { %v6463_v12 = vsel %vm2138_vm14, %v6462_v31, %v6441_v30  ;;  %vm6845_vm14 = vcmask 917248  }
 0xa9f   : > { %6481 = vst.msk [vmem:[#allocation2 + $0x18] sm:$0xff] %vm8927_vm3, %v6463_v12  ;;  %vm6987_vm3 = vcmask 908288  }
 0xaa2   : > { %v7882_v10 = vld [vmem:[#allocation2 + $0x28] ss:$16 sps:$4 sm:$0xff]   ;;  %v7888_v41 = vld [vmem:[#allocation2 + $0x2c] ss:$16 sps:$4 sm:$0xff]  }
 0xaa3   : > { %6577 = vrot.lane.b32.xlu0 %v7882_v10, %s8013_s13 }
 0xaa6   : > { %v7884_v46 = vld [vmem:[#allocation2 + $0x8] ss:$16 sps:$4 sm:$0xff]   ;;  %v7890_v21 = vld [vmem:[#allocation2 + $0xc] ss:$16 sps:$4 sm:$0xff]  }
 0xaa7   : > { %6569 = vrot.lane.b32.xlu1 %v7884_v46, %s8013_s13  ;;  %6567 = vrot.lane.b32.xlu0 %v7886_v48, %s8013_s13 }
 0xaab   : > { %6579 = vrot.lane.b32.xlu1 %v7888_v41, %s8013_s13  ;;  %6565 = vrot.lane.b32.xlu0 %v7889_v19, %s8013_s13 }
 0xaaf   : > { %6505 = vperm.xlu1 %7649, %v7485_v56   ;;  %6571 = vrot.lane.b32.xlu0 %v7890_v21, %s8013_s13  ;;  %s8036_s13 = smov 63  }
 0xab3   : > { %6515 = vperm.xlu1 %7649, %v7487_v26   ;;  %6510 = vperm.xlu0 %7648, %v7486_v40  }
 0xab7   : > { %6520 = vperm.xlu0 %7648, %v7488_v38  }
 0xb06   : > { %v6576_v34 = vpop.permute.xlu1 %6575 }
 0xb0a   : > { %v6574_v29 = vpop.permute.xlu1 %6573 }
 0xb0b   : > { %v6584_v15 = vsel %vm1004_vm11, %v6574_v29, %v6576_v34 }
 0xb15   : > { %v6578_v50 = vpop.permute.xlu0 %6577 }
 0xb16   : > { %v6585_v20 = vsel %vm1004_vm11, %v6576_v34, %v6578_v50 }
 0xb17   : > { %6613 = vmatprep.subr.bf16.mxu1 %v6585_v20 }
 0xb18   : > { %6614 = vmatpush1.bf16.msra.mxu1 %v6584_v15 }
 0xb19   : > { %v6568_v55 = vpop.permute.xlu0 %6567  ;;  %v6570_v58 = vpop.permute.xlu1 %6569 }
 0xb1a   : > { %v6582_v23 = vsel %vm1004_vm11, %v6568_v55, %v6570_v58 }
 0xb1b   : > { %6615 = vmatprep.subr.bf16.mxu1 %v6582_v23 }
 0xb1d   : > { %v6566_v6 = vpop.permute.xlu0 %6565  ;;  %v6580_v28 = vpop.permute.xlu1 %6579 }
 0xb1e   : > { %v6581_v35 = vsel %vm1004_vm11, %v6566_v6, %v6568_v55  ;;  %v6586_v47 = vsel %vm1004_vm11, %v6578_v50, %v6580_v28  ;;  %6666 = vmatprep.subr.bf16.mxu0 %v6580_v28 }
 0xb1f   : > { %6616 = vmatpush1.bf16.msra.mxu1 %v6581_v35  ;;  %6667 = vmatpush1.bf16.msra.mxu0 %v6586_v47 }
 0xb21   : > { %v6572_v45 = vpop.permute.xlu0 %6571 }
 0xb22   : > { %v6583_v54 = vsel %vm1004_vm11, %v6570_v58, %v6572_v45  ;;  %7499 = vmatmul.mubr.msk.bf16.vlgmr.msra.gmra.mxu1 %vm1802_vm4, %v7891_v42  ;;  %6668 = vmatprep.subr.bf16.mxu0 %v6572_v45  ;;  %vm6828_vm11 = vcmask 786048  }
 0xb23   : > { %6669 = vmatpush1.bf16.msra.mxu0 %v6583_v54  ;;  %6643 = vmatprep.mubr.bf16.mxu1 %v11279_v16 }
 0xb26   : > { %7501 = vmatmul.mubr.msk.bf16.vlgmr.msra.gmra.mxu0 %vm1802_vm4, %v7891_v42 }
 0xb27   : > { %6696 = vmatprep.mubr.bf16.mxu0 %v11279_v16 }
 0xb2a   : > { %7500 = vmatmul.mubr.msk.bf16.gmra.mxu1 %vm1802_vm4, %v7892_v2  ;;  %v6506_v25 = vpop.permute.xlu1 %6505 }
 0xb2e   : > { %7502 = vmatmul.mubr.msk.bf16.gmra.mxu0 %vm1802_vm4, %v7892_v2  ;;  %v6511_v49 = vpop.permute.xlu0 %6510  ;;  %v6516_v37 = vpop.permute.xlu1 %6515  ;;  %vm6773_vm4 = vcmask 392448  }
 0xb32   : > { %v6521_v0 = vpop.permute.xlu0 %6520 }
 0xbe2   : > { %v6635_v61 = vpop.f32.mrf.mxu1 }
 0xbe3   : > { %v6636_v60 = vadd.f32 %v6635_v61, %v6506_v25 }
 0xbe4   : > { %v6637_v44 = vpop.f32.mrf.mxu1 }
 0xbe5   : > { %v6707_v33 = vmax.f32 %v6636_v60, 0.0  ;;  %v6638_v1 = vadd.f32 %v6637_v44, %v6506_v25 }
 0xbe6   : > { %v6688_v17 = vpop.f32.mrf.mxu0  ;;  %v6639_v13 = vpop.f32.mrf.mxu1 }
 0xbe7   : > { %v6689_v39 = vadd.f32 %v6688_v17, %v6506_v25  ;;  %v6640_v53 = vadd.f32 %v6639_v13, %v6511_v49  ;;  %v6708_v32 = vmax.f32 %v6638_v1, 0.0 }
 0xbe8   : > { %v6690_v9 = vpop.f32.mrf.mxu0  ;;  %v6641_v14 = vpop.f32.mrf.mxu1 }
 0xbe9   : > { %v6709_v5 = vmax.f32 %v6689_v39, 0.0  ;;  %v6691_v63 = vadd.f32 %v6690_v9, %v6506_v25  ;;  %v6711_v22 = vmax.f32 %v6640_v53, 0.0  ;;  %v6642_v52 = vadd.f32 %v6641_v14, %v6511_v49 }
 0xbea   : > { %v6692_v4 = vpop.f32.mrf.mxu0  ;;  %v6645_v12 = vpop.f32.mrf.mxu1 }
 0xbeb   : > { %v6710_v43 = vmax.f32 %v6691_v63, 0.0  ;;  %v6693_v62 = vadd.f32 %v6692_v4, %v6511_v49  ;;  %6903 = vrot.lane.b32.xlu1 %v6709_v5, %s8029_s25  ;;  %v6712_v27 = vmax.f32 %v6642_v52, 0.0  ;;  %v6646_v41 = vadd.f32 %v6645_v12, %v6516_v37 }
 0xbec   : > { %v6694_v18 = vpop.f32.mrf.mxu0  ;;  %v6647_v10 = vpop.f32.mrf.mxu1 }
 0xbed   : > { %6973 = vrot.lane.b32.xlu0 %v6710_v43, %s8030_s23  ;;  %v10898_v16 = vmax.f32 %v6693_v62, 0.0  ;;  %v10920_v36 = vadd.f32 %v6694_v18, %v6511_v49  ;;  %v6715_v56 = vmax.f32 %v6646_v41, 0.0  ;;  %v6648_v38 = vadd.f32 %v6647_v10, %v6516_v37 }
 0xbee   : > { %v6698_v57 = vpop.f32.mrf.mxu0  ;;  %v6649_v46 = vpop.f32.mrf.mxu1 }
 0xbef   : > { %6919 = vrot.lane.b32.xlu1 %v6709_v5, %s8031_s9  ;;  %v6714_v51 = vmax.f32 %v10920_v36, 0.0  ;;  %v6699_v59 = vadd.f32 %v6698_v57, %v6516_v37  ;;  %v6650_v48 = vadd.f32 %v6649_v46, %v6521_v0  ;;  %v6716_v50 = vmax.f32 %v6648_v38, 0.0 }
 0xbf0   : > { %v6700_v7 = vpop.f32.mrf.mxu0  ;;  %v6651_v40 = vpop.f32.mrf.mxu1 }
 0xbf1   : > { %6905 = vrot.lane.b32.xlu0 %v10898_v16, %s8029_s25  ;;  %v10937_v11 = vadd.f32 %v6700_v7, %v6516_v37  ;;  %v6717_v3 = vmax.f32 %v6699_v59, 0.0  ;;  %v6719_v19 = vmax.f32 %v6650_v48, 0.0  ;;  %v6652_v34 = vadd.f32 %v6651_v40, %v6521_v0 }
 0xbf2   : > { %v6702_v24 = vpop.f32.mrf.mxu0 }
 0xbf3   : > { %6935 = vrot.lane.b32.xlu1 %v6709_v5, %s8032_s17  ;;  %v6718_v8 = vmax.f32 %v10937_v11, 0.0  ;;  %v6703_v30 = vadd.f32 %v6702_v24, %v6521_v0  ;;  %v6720_v20 = vmax.f32 %v6652_v34, 0.0 }
 0xbf4   : > { %v6704_v21 = vpop.f32.mrf.mxu0 }
 0xbf5   : > { %6921 = vrot.lane.b32.xlu0 %v10898_v16, %s8031_s9  ;;  %v6721_v31 = vmax.f32 %v6703_v30, 0.0  ;;  %v6705_v26 = vadd.f32 %v6704_v21, %v6521_v0 }
 0xbf7   : > { %6951 = vrot.lane.b32.xlu1 %v6709_v5, %s8007_s30  ;;  %v6722_v29 = vmax.f32 %v6705_v26, 0.0 }
 0xbf9   : > { %6937 = vrot.lane.b32.xlu0 %v10898_v16, %s8032_s17 }
 0xbfb   : > { %6971 = vrot.lane.b32.xlu1 %v6709_v5, %s8030_s23 }
 0xbfd   : > { %6953 = vrot.lane.b32.xlu0 %v10898_v16, %s8007_s30 }
 0xbff   : > { %6727 = vrot.lane.b32.xlu1 %v6707_v33, %s8008_s7 }
 0xc01   : > { %6729 = vrot.lane.b32.xlu0 %v6711_v22, %s8008_s7 }
 0xc03   : > { %6744 = vrot.lane.b32.xlu1 %v6707_v33, %s8033_s8 }
 0xc05   : > { %6746 = vrot.lane.b32.xlu0 %v6711_v22, %s8033_s8 }
 0xc07   : > { %6761 = vrot.lane.b32.xlu1 %v6707_v33, %s8034_s6 }
 0xc09   : > { %6763 = vrot.lane.b32.xlu0 %v6711_v22, %s8034_s6 }
 0xc0b   : > { %6778 = vrot.lane.b32.xlu1 %v6707_v33, %s8025_s26 }
 0xc0d   : > { %6780 = vrot.lane.b32.xlu0 %v6711_v22, %s8025_s26 }
 0xc0f   : > { %6795 = vrot.lane.b32.xlu1 %v6707_v33, %s8035_s12 }
 0xc11   : > { %6797 = vrot.lane.b32.xlu0 %v6711_v22, %s8035_s12 }
 0xc13   : > { %7000 = vrot.lane.b32.xlu1 %v6710_v43, %s8020_s11 }
 0xc15   : > { %6977 = vrot.lane.b32.xlu0 %v6714_v51, %s8030_s23 }
 0xc17   : > { %6816 = vrot.lane.b32.xlu1 %v6708_v32, %s8011_s10 }
 0xc19   : > { %6818 = vrot.lane.b32.xlu0 %v6712_v27, %s8011_s10 }
 0xc1b   : > { %6833 = vrot.lane.b32.xlu1 %v6708_v32, %s8036_s13 }
 0xc1d   : > { %6835 = vrot.lane.b32.xlu0 %v6712_v27, %s8036_s13 }
 0xc1f   : > { %6850 = vrot.lane.b32.xlu1 %v6708_v32, %s8037_s14 }
 0xc21   : > { %6852 = vrot.lane.b32.xlu0 %v6712_v27, %s8037_s14 }
 0xc23   : > { %6867 = vrot.lane.b32.xlu1 %v6708_v32, %s8038_s15 }
 0xc25   : > { %6869 = vrot.lane.b32.xlu0 %v6712_v27, %s8038_s15 }
 0xc27   : > { %6883 = vrot.lane.b32.xlu1 %v6708_v32, %s8039_s16 }
 0xc29   : > { %6885 = vrot.lane.b32.xlu0 %v6712_v27, %s8039_s16 }
 0xc2b   : > { %6975 = vrot.lane.b32.xlu1 %v10898_v16, %s8030_s23 }
 0xc2d   : > { %6981 = vrot.lane.b32.xlu0 %v6718_v8, %s8030_s23 }
 0xc2f   : > { %6907 = vrot.lane.b32.xlu1 %v6717_v3, %s8029_s25 }
 0xc31   : > { %6909 = vrot.lane.b32.xlu0 %v6721_v31, %s8029_s25 }
 0xc33   : > { %6923 = vrot.lane.b32.xlu1 %v6717_v3, %s8031_s9 }
 0xc35   : > { %6925 = vrot.lane.b32.xlu0 %v6721_v31, %s8031_s9 }
 0xc37   : > { %6939 = vrot.lane.b32.xlu1 %v6717_v3, %s8032_s17 }
 0xc39   : > { %6941 = vrot.lane.b32.xlu0 %v6721_v31, %s8032_s17 }
 0xc3b   : > { %6955 = vrot.lane.b32.xlu1 %v6717_v3, %s8007_s30 }
 0xc3d   : > { %6957 = vrot.lane.b32.xlu0 %v6721_v31, %s8007_s30  ;;  %s230_s30 = sand.u32 1, %s7975_s19  }
 0xc3e   : > { %s11160_s9 = scalar_lea.sflag [#allocation6], %s230_s30 }
 0xc3f   : > { %6979 = vrot.lane.b32.xlu1 %v6717_v3, %s8030_s23 }
 0xc41   : > { %6733 = vrot.lane.b32.xlu0 %v6719_v19, %s8008_s7 }
 0xc43   : > { %6731 = vrot.lane.b32.xlu1 %v6715_v56, %s8008_s7  ;;  %s7110_s7 = sshll.u32 %s230_s30, 6 }
 0xc45   : > { %6750 = vrot.lane.b32.xlu0 %v6719_v19, %s8033_s8 }
 0xc47   : > { %6748 = vrot.lane.b32.xlu1 %v6715_v56, %s8033_s8  ;;  %s8040_s8 = smov [#allocation7]  }
 0xc49   : > { %6767 = vrot.lane.b32.xlu0 %v6719_v19, %s8034_s6 }
 0xc4b   : > { %6765 = vrot.lane.b32.xlu1 %v6715_v56, %s8034_s6  ;;  %s7923_s6 = sshll.u32 %s8040_s8, 4  ;;  %s7924_s6 = int_to_ptr.vmem [resolvable:$false] %s7923_s6 }
 0xc4d   : > { %6784 = vrot.lane.b32.xlu0 %v6719_v19, %s8025_s26 }
 0xc4f   : > { %6782 = vrot.lane.b32.xlu1 %v6715_v56, %s8025_s26 }
 0xc51   : > { %6801 = vrot.lane.b32.xlu0 %v6719_v19, %s8035_s12 }
 0xc53   : > { %6799 = vrot.lane.b32.xlu1 %v6715_v56, %s8035_s12  ;;  %s7925_s12 = scalar_lea.vmem %s7924_s6, 2048 }
 0xc55   : > { %6985 = vrot.lane.b32.xlu0 %v6722_v29, %s8030_s23 }
 0xc57   : > { %6820 = vrot.lane.b32.xlu1 %v6716_v50, %s8011_s10 }
 0xc59   : > { %6822 = vrot.lane.b32.xlu0 %v6720_v20, %s8011_s10  ;;  %s11006_s10 = scalar_lea.vmem [#allocation7], %s7110_s7 }
 0xc5a   : > { %s7030_s26 = sshll.u32 %s11006_s10, 4  ;;  %s11152_s26 = int_to_ptr.vmem [resolvable:$true] %s7030_s26 }
 0xc5b   : > { %6837 = vrot.lane.b32.xlu1 %v6716_v50, %s8036_s13  ;;  %s7919_s17 = scalar_lea.vmem %s11152_s26, 1024  ;;  %p7926_p11 = scmp.lt.s32.totalorder %s11152_s26, %s7924_s6 }
 0xc5c   : > { %p7920_p6 = scmp.ne.s32.totalorder %s11152_s26, %s7919_s17  ;;  %p7927_p12 = scmp.lt.s32.totalorder %s7925_s12, %s7919_s17 }
 0xc5d   : > { %6839 = vrot.lane.b32.xlu0 %v6720_v20, %s8036_s13  ;;  %v10971_v15 = vpop.permute.xlu1 %6903 }
 0xc5e   : > { %p7921_p9 = pnand %p7920_p6, %p8111_p5  ;;  %p7928_p13 = por %p7927_p12, %p7926_p11 }
 0xc5f   : > { %v10973_v55 = vpop.permute.xlu0 %6973  ;;  %6854 = vrot.lane.b32.xlu1 %v6716_v50, %s8037_s14 }
 0xc60   : > { %p7922_p10 = pneg %p7921_p9 }
 0xc61   : > { %6856 = vrot.lane.b32.xlu0 %v6720_v20, %s8037_s14  ;;  %v10977_v58 = vpop.permute.xlu1 %6919 }
 0xc62   : > { %p7929_p0 = pnand %p7928_p13, %p7922_p10 }
 0xc63   : > { %v10979_v23 = vpop.permute.xlu0 %6905  ;;  %6871 = vrot.lane.b32.xlu1 %v6716_v50, %s8038_s15 }
 0xc65   : > { %6873 = vrot.lane.b32.xlu0 %v6720_v20, %s8038_s15  ;;  %v10983_v6 = vpop.permute.xlu1 %6935 }
 0xc67   : > { %v10985_v28 = vpop.permute.xlu0 %6921  ;;  %6887 = vrot.lane.b32.xlu1 %v6716_v50, %s8039_s16 }
 0xc69   : > { %6889 = vrot.lane.b32.xlu0 %v6720_v20, %s8039_s16  ;;  %v10989_v35 = vpop.permute.xlu1 %6951 }
 0xc6b   : > { %v10992_v47 = vpop.permute.xlu0 %6937  ;;  %6983 = vrot.lane.b32.xlu1 %v6721_v31, %s8030_s23 }
 0xc6d   : > { %7002 = vrot.lane.b32.xlu0 %v6714_v51, %s8020_s11  ;;  %v6972_v42 = vpop.permute.xlu1 %6971 }
 0xc6e   : > { %v6988_v1 = vsel %vm6987_vm3, %v6972_v42, %v10973_v55 }
 0xc6f   : > { %v11000_v45 = vpop.permute.xlu0 %6953  ;;  %7004 = vrot.lane.b32.xlu1 %v6718_v8, %s8020_s11 }
 0xc71   : > { %7006 = vrot.lane.b32.xlu0 %v6722_v29, %s8020_s11  ;;  %v6728_v54 = vpop.permute.xlu1 %6727  ;;  %s7541_s11 = sshll.u32 %s8094_s22, 10 }
 0xc72   : > { %6740 = vst.msk [vmem:[%s11006_s10] sm:$0xff] %vm6739_vm0, %v6728_v54  ;;  %s11150_s22 = scalar_lea.hbm %s11205_s5, %s7541_s11 }
 0xc73   : > { %v6730_v2 = vpop.permute.xlu0 %6729 }
 0xc74   : > { %6741 = vst.msk [vmem:[%s11006_s10 + $0x10] sm:$0xff] %vm6739_vm0, %v6730_v2 }
 0xc75   : > { %v6745_v25 = vpop.permute.xlu1 %6744 }
 0xc76   : > { %6757 = vst.msk [vmem:[%s11006_s10] sm:$0xff] %vm6756_vm1, %v6745_v25 }
 0xc77   : > { %v6747_v17 = vpop.permute.xlu0 %6746 }
 0xc78   : > { %6758 = vst.msk [vmem:[%s11006_s10 + $0x10] sm:$0xff] %vm6756_vm1, %v6747_v17 }
 0xc79   : > { %v6762_v39 = vpop.permute.xlu1 %6761 }
 0xc7a   : > { %6774 = vst.msk [vmem:[%s11006_s10] sm:$0xff] %vm6773_vm4, %v6762_v39 }
 0xc7b   : > { %v6764_v9 = vpop.permute.xlu0 %6763 }
 0xc7c   : > { %6775 = vst.msk [vmem:[%s11006_s10 + $0x10] sm:$0xff] %vm6773_vm4, %v6764_v9 }
 0xc7d   : > { %v6779_v5 = vpop.permute.xlu1 %6778 }
 0xc7e   : > { %6791 = vst.msk [vmem:[%s11006_s10] sm:$0xff] %vm6790_vm5, %v6779_v5 }
 0xc7f   : > { %v6781_v63 = vpop.permute.xlu0 %6780 }
 0xc80   : > { %6792 = vst.msk [vmem:[%s11006_s10 + $0x10] sm:$0xff] %vm6790_vm5, %v6781_v63 }
 0xc81   : > { %v6796_v49 = vpop.permute.xlu1 %6795 }
 0xc82   : > { %6808 = vst.msk [vmem:[%s11006_s10] sm:$0xff] %vm6807_vm8, %v6796_v49 }
 0xc83   : > { %v6798_v4 = vpop.permute.xlu0 %6797 }
 0xc84   : > { %6809 = vst.msk [vmem:[%s11006_s10 + $0x10] sm:$0xff] %vm6807_vm8, %v6798_v4 }
 0xc85   : > { %v7001_v43 = vpop.permute.xlu1 %7000 }
 0xc87   : > { %v6978_v62 = vpop.permute.xlu0 %6977 }
 0xc89   : > { %v6817_v16 = vpop.permute.xlu1 %6816 }
 0xc8a   : > { %6829 = vst.msk [vmem:[%s11006_s10] sm:$0xff] %vm6828_vm11, %v6817_v16 }
 0xc8b   : > { %v6819_v61 = vpop.permute.xlu0 %6818 }
 0xc8c   : > { %6830 = vst.msk [vmem:[%s11006_s10 + $0x10] sm:$0xff] %vm6828_vm11, %v6819_v61 }
 0xc8d   : > { %v6834_v44 = vpop.permute.xlu1 %6833 }
 0xc8e   : > { %6846 = vst.msk [vmem:[%s11006_s10] sm:$0xff] %vm6845_vm14, %v6834_v44 }
 0xc8f   : > { %v6836_v13 = vpop.permute.xlu0 %6835 }
 0xc90   : > { %6847 = vst.msk [vmem:[%s11006_s10 + $0x10] sm:$0xff] %vm6845_vm14, %v6836_v13 }
 0xc91   : > { %v6851_v60 = vpop.permute.xlu1 %6850 }
 0xc92   : > { %6863 = vst.msk [vmem:[%s11006_s10] sm:$0xff] %vm6862_vm15, %v6851_v60 }
 0xc93   : > { %v6853_v53 = vpop.permute.xlu0 %6852 }
 0xc94   : > { %6864 = vst.msk [vmem:[%s11006_s10 + $0x10] sm:$0xff] %vm6862_vm15, %v6853_v53 }
 0xc95   : > { %v6868_v33 = vpop.permute.xlu1 %6867 }
 0xc96   : > { %6879 = vst.msk [vmem:[%s11006_s10 + $0x8] sm:$0xff] %vm6739_vm0, %v6868_v33 }
 0xc97   : > { %v6870_v22 = vpop.permute.xlu0 %6869 }
 0xc98   : > { %6880 = vst.msk [vmem:[%s11006_s10 + $0x18] sm:$0xff] %vm6739_vm0, %v6870_v22 }
 0xc99   : > { %v6884_v18 = vpop.permute.xlu1 %6883 }
 0xc9a   : > { %6895 = vst.msk [vmem:[%s11006_s10 + $0x8] sm:$0xff] %vm6756_vm1, %v6884_v18 }
 0xc9b   : > { %6915 = vst.msk [vmem:[%s11006_s10 + $0x8] sm:$0xff] %vm6773_vm4, %v10971_v15  ;;  %v6886_v36 = vpop.permute.xlu0 %6885 }
 0xc9c   : > { %6931 = vst.msk [vmem:[%s11006_s10 + $0x8] sm:$0xff] %vm6790_vm5, %v10977_v58 }
 0xc9d   : > { %6896 = vst.msk [vmem:[%s11006_s10 + $0x18] sm:$0xff] %vm6756_vm1, %v6886_v36  ;;  %v6976_v14 = vpop.permute.xlu1 %6975 }
 0xc9e   : > { %6947 = vst.msk [vmem:[%s11006_s10 + $0x8] sm:$0xff] %vm6807_vm8, %v10983_v6  ;;  %v6989_v51 = vsel %vm6987_vm3, %v6976_v14, %v6978_v62 }
 0xc9f   : > { %6916 = vst.msk [vmem:[%s11006_s10 + $0x18] sm:$0xff] %vm6773_vm4, %v10979_v23  ;;  %v6982_v52 = vpop.permute.xlu0 %6981 }
 0xca0   : > { %6963 = vst.msk [vmem:[%s11006_s10 + $0x8] sm:$0xff] %vm6828_vm11, %v10989_v35 }
 0xca1   : > { %6932 = vst.msk [vmem:[%s11006_s10 + $0x18] sm:$0xff] %vm6790_vm5, %v10985_v28  ;;  %v6908_v32 = vpop.permute.xlu1 %6907 }
 0xca2   : > { %6996 = vst.msk [vmem:[%s11006_s10 + $0x8] sm:$0xff] %vm6845_vm14, %v6988_v1 }
 0xca3   : > { %6948 = vst.msk [vmem:[%s11006_s10 + $0x18] sm:$0xff] %vm6807_vm8, %v10992_v47  ;;  %v6910_v27 = vpop.permute.xlu0 %6909 }
 0xca4   : > { %7012 = vst.msk [vmem:[%s11006_s10 + $0x8] sm:$0xff] %vm6862_vm15, %v7001_v43 }
 0xca5   : > { %6964 = vst.msk [vmem:[%s11006_s10 + $0x18] sm:$0xff] %vm6828_vm11, %v11000_v45  ;;  %v6924_v57 = vpop.permute.xlu1 %6923 }
 0xca6   : > { %6997 = vst.msk [vmem:[%s11006_s10 + $0x18] sm:$0xff] %vm6845_vm14, %v6989_v51 }
 0xca7   : > { %v6926_v7 = vpop.permute.xlu0 %6925 }
 0xca9   : > { %v6940_v37 = vpop.permute.xlu1 %6939 }
 0xcab   : > { %v6942_v11 = vpop.permute.xlu0 %6941 }
 0xcad   : > { %v6956_v24 = vpop.permute.xlu1 %6955 }
 0xcaf   : > { %v6958_v59 = vpop.permute.xlu0 %6957 }
 0xcb1   : > { %v6980_v0 = vpop.permute.xlu1 %6979 }
 0xcb2   : > { %v6990_v23 = vsel %vm6987_vm3, %v6980_v0, %v6982_v52 }
 0xcb3   : > { %v6734_v8 = vpop.permute.xlu0 %6733 }
 0xcb4   : > { %6743 = vst.msk [vmem:[%s11006_s10 + $0x30] sm:$0xff] %vm6739_vm0, %v6734_v8 }
 0xcb5   : > { %v6732_v30 = vpop.permute.xlu1 %6731 }
 0xcb6   : > { %6742 = vst.msk [vmem:[%s11006_s10 + $0x20] sm:$0xff] %vm6739_vm0, %v6732_v30 }
 0xcb7   : > { %v6751_v3 = vpop.permute.xlu0 %6750 }
 0xcb8   : > { %6760 = vst.msk [vmem:[%s11006_s10 + $0x30] sm:$0xff] %vm6756_vm1, %v6751_v3 }
 0xcb9   : > { %v6749_v31 = vpop.permute.xlu1 %6748 }
 0xcba   : > { %6759 = vst.msk [vmem:[%s11006_s10 + $0x20] sm:$0xff] %vm6756_vm1, %v6749_v31 }
 0xcbb   : > { %v6768_v12 = vpop.permute.xlu0 %6767 }
 0xcbc   : > { %6777 = vst.msk [vmem:[%s11006_s10 + $0x30] sm:$0xff] %vm6773_vm4, %v6768_v12 }
 0xcbd   : > { %v6766_v10 = vpop.permute.xlu1 %6765 }
 0xcbe   : > { %6776 = vst.msk [vmem:[%s11006_s10 + $0x20] sm:$0xff] %vm6773_vm4, %v6766_v10 }
 0xcbf   : > { %v6785_v46 = vpop.permute.xlu0 %6784 }
 0xcc0   : > { %6794 = vst.msk [vmem:[%s11006_s10 + $0x30] sm:$0xff] %vm6790_vm5, %v6785_v46 }
 0xcc1   : > { %v6783_v48 = vpop.permute.xlu1 %6782 }
 0xcc2   : > { %6793 = vst.msk [vmem:[%s11006_s10 + $0x20] sm:$0xff] %vm6790_vm5, %v6783_v48 }
 0xcc3   : > { %v6802_v41 = vpop.permute.xlu0 %6801 }
 0xcc4   : > { %6811 = vst.msk [vmem:[%s11006_s10 + $0x30] sm:$0xff] %vm6807_vm8, %v6802_v41 }
 0xcc5   : > { %v6800_v19 = vpop.permute.xlu1 %6799 }
 0xcc6   : > { %6810 = vst.msk [vmem:[%s11006_s10 + $0x20] sm:$0xff] %vm6807_vm8, %v6800_v19 }
 0xcc7   : > { %v6986_v56 = vpop.permute.xlu0 %6985 }
 0xcc9   : > { %v6821_v21 = vpop.permute.xlu1 %6820 }
 0xcca   : > { %6831 = vst.msk [vmem:[%s11006_s10 + $0x20] sm:$0xff] %vm6828_vm11, %v6821_v21 }
 0xccb   : > { %v6823_v26 = vpop.permute.xlu0 %6822 }
 0xccc   : > { %6832 = vst.msk [vmem:[%s11006_s10 + $0x30] sm:$0xff] %vm6828_vm11, %v6823_v26 }
 0xccd   : > { %v6838_v40 = vpop.permute.xlu1 %6837 }
 0xcce   : > { %6848 = vst.msk [vmem:[%s11006_s10 + $0x20] sm:$0xff] %vm6845_vm14, %v6838_v40 }
 0xccf   : > { %v6840_v38 = vpop.permute.xlu0 %6839 }
 0xcd0   : > { %6849 = vst.msk [vmem:[%s11006_s10 + $0x30] sm:$0xff] %vm6845_vm14, %v6840_v38 }
 0xcd1   : > { %v6855_v34 = vpop.permute.xlu1 %6854 }
 0xcd2   : > { %6865 = vst.msk [vmem:[%s11006_s10 + $0x20] sm:$0xff] %vm6862_vm15, %v6855_v34 }
 0xcd3   : > { %v6857_v29 = vpop.permute.xlu0 %6856 }
 0xcd4   : > { %6866 = vst.msk [vmem:[%s11006_s10 + $0x30] sm:$0xff] %vm6862_vm15, %v6857_v29 }
 0xcd5   : > { %v6872_v50 = vpop.permute.xlu1 %6871 }
 0xcd6   : > { %6881 = vst.msk [vmem:[%s11006_s10 + $0x28] sm:$0xff] %vm6739_vm0, %v6872_v50 }
 0xcd7   : > { %v6874_v20 = vpop.permute.xlu0 %6873 }
 0xcd8   : > { %6882 = vst.msk [vmem:[%s11006_s10 + $0x38] sm:$0xff] %vm6739_vm0, %v6874_v20 }
 0xcd9   : > { %v6888_v15 = vpop.permute.xlu1 %6887 }
 0xcda   : > { %6897 = vst.msk [vmem:[%s11006_s10 + $0x28] sm:$0xff] %vm6756_vm1, %v6888_v15 }
 0xcdb   : > { %6917 = vst.msk [vmem:[%s11006_s10 + $0x28] sm:$0xff] %vm6773_vm4, %v6908_v32  ;;  %v6890_v55 = vpop.permute.xlu0 %6889 }
 0xcdc   : > { %6933 = vst.msk [vmem:[%s11006_s10 + $0x28] sm:$0xff] %vm6790_vm5, %v6924_v57 }
 0xcdd   : > { %6898 = vst.msk [vmem:[%s11006_s10 + $0x38] sm:$0xff] %vm6756_vm1, %v6890_v55  ;;  %v6984_v58 = vpop.permute.xlu1 %6983 }
 0xcde   : > { %6949 = vst.msk [vmem:[%s11006_s10 + $0x28] sm:$0xff] %vm6807_vm8, %v6940_v37  ;;  %v6991_v28 = vsel %vm6987_vm3, %v6984_v58, %v6986_v56 }
 0xcdf   : > { %6918 = vst.msk [vmem:[%s11006_s10 + $0x38] sm:$0xff] %vm6773_vm4, %v6910_v27  ;;  %v7003_v6 = vpop.permute.xlu0 %7002 }
 0xce0   : > { %6934 = vst.msk [vmem:[%s11006_s10 + $0x38] sm:$0xff] %vm6790_vm5, %v6926_v7 }
 0xce1   : > { %6965 = vst.msk [vmem:[%s11006_s10 + $0x28] sm:$0xff] %vm6828_vm11, %v6956_v24  ;;  %v7005_v35 = vpop.permute.xlu1 %7004 }
 0xce2   : > { %6950 = vst.msk [vmem:[%s11006_s10 + $0x38] sm:$0xff] %vm6807_vm8, %v6942_v11 }
 0xce3   : > { %6998 = vst.msk [vmem:[%s11006_s10 + $0x28] sm:$0xff] %vm6845_vm14, %v6990_v23  ;;  %v7007_v47 = vpop.permute.xlu0 %7006 }
 0xce4   : > { %6966 = vst.msk [vmem:[%s11006_s10 + $0x38] sm:$0xff] %vm6828_vm11, %v6958_v59 }
 0xce5   : > { %7013 = vst.msk [vmem:[%s11006_s10 + $0x18] sm:$0xff] %vm6862_vm15, %v7003_v6  ;;  %7014 = vst.msk [vmem:[%s11006_s10 + $0x28] sm:$0xff] %vm6862_vm15, %v7005_v35 }
 0xce6   : > { %6999 = vst.msk [vmem:[%s11006_s10 + $0x38] sm:$0xff] %vm6845_vm14, %v6991_v28 }
 0xce7   : > { %7015 = vst.msk [vmem:[%s11006_s10 + $0x38] sm:$0xff] %vm6862_vm15, %v7007_v47 }
 0xce8   : > { %7932 = shalt.err (!%p7929_p0)
}
 0xce9   : > { %s7933_s13 = scalar_lea.hbm %s11150_s22, 1024  ;;  %s7937_s16 = scalar_lea.hbm %s11205_s5, 2048 }
 0xcea   : > { %p7934_p1 = scmp.ne.s32.totalorder %s11150_s22, %s7933_s13  ;;  %p7938_p4 = scmp.lt.s32.totalorder %s11150_s22, %s11205_s5 }
 0xceb   : > { %p7939_p7 = scmp.lt.s32.totalorder %s7937_s16, %s7933_s13 }
 0xcec   : > { %p7935_p2 = pnand %p7934_p1, %p8111_p5 }
 0xced   : > { %p7940_p8 = por %p7939_p7, %p7938_p4 }
 0xcee   : > { %p7936_p3 = pneg %p7935_p2 }
 0xcf0   : > { %p7941_p6 = pnand %p7940_p8, %p7936_p3 }
 0xcf2   : > { %7944 = shalt.err (!%p7941_p6)
}
 0xcf3   : > { %s8041_s10 = smov 256   ;;  %s8042_s11 = smov 16  }
 0xcf4   : > { %7546 = dma.vmem_to_hbm [thread:$0]  (%p8111_p5), %s11152_s26, 1024, %s11150_s22, %s11160_s9, %s8041_s10, %s8041_s10, %s8042_s11  }
 0xcf5 PF: > { %p7558_p9 = scmp.ge.s32.totalorder %s7983_s21, 2  ;;  %s7045_s25 = sand.u32 1, %s7971_s18  }
 0xcf6   : > { %p11314_p10 = scmp.ne.s32.totalorder %s11252_s29, 0  ;;  %s7046_s23 = scalar_lea.sflag [#allocation6], %s7045_s25 }
 0xcf8   : > { %p7553_p11 = pnand %p7558_p9, %p11314_p10 }
 0xcfa   : > { %p7554_p12 = pneg %p7553_p11 }
 0xcfc   : > { %7966 = dma.done.wait (%p7554_p12), %s7046_s23, 1024  }
 0xcfd   : > { %7968 = vsyncadd (%p7554_p12), %s7046_s23, 4294966272  ;;  %p16_p13 = scmp.ge.s32.totalorder %s8098_s24, 4   ;;  %s11315_s18 = smov %s7975_s19 }
 0xcfe   : > { %s11316_s19 = smov %s7979_s20  ;;  %s11317_s20 = smov %s8109_s27 }
 0xcff   : > { %s11318_s21 = smov %s8098_s24  ;;  %18 = sbr.rel (!%p16_p13) target bundleno = 4 (0x4), region = 87 }
 0xd04   :  { %7051 = vsyncpa [#allocation5], 1 }
 0xd05   :  { %7053 = vsyncpa [#allocation5 + $0x1], 1 }
 0xd06   :  { %7054 = vsyncpa [#allocation6], 1 }
 0xd07   :  { %7056 = vsyncpa [#allocation6 + $0x1], 1 }

</bundles_post_ra>
